<compile_context>
chip_gen: v7x
topology: tpu7x:2x2x1
jax: 0.10.0
libtpu: 0.0.40
codegen_flags: <defaults>
</compile_context>

<pallas_src>
import jax
import jax.numpy as jnp
from jax import lax
from jax.experimental import pallas as pl
from jax.experimental.pallas import tpu as pltpu

_BN_EPS = 1e-5


def _conv3x3_bn_relu(xpad_ref, w_ref, gamma_ref, beta_ref, N, H, W, Cp):
    """One conv3x3 (halo already in scratch) + training-mode BN + ReLU stage.

    xpad_ref  : (N, H+2, W+2, Cp) f32 VMEM scratch (zero halo, zero padded lanes)
    w_ref     : (9, Cp, Cp)       bf16 per-tap weight matrices, tap = ky*3 + kx
    gamma_ref : (1, Cp) f32 BN weight (zero in padded lanes)
    beta_ref  : (1, Cp) f32 BN bias   (zero in padded lanes)
    returns   : (N*H*W, Cp) f32
    """
    rows = N * H * W

    # 9 unrolled K=Cp MXU matmuls accumulated in f32 (no im2col slab, no concat).
    acc = jnp.zeros((rows, Cp), jnp.float32)
    for ky in range(3):
        for kx in range(3):
            win = xpad_ref[:, ky:ky + H, kx:kx + W, :].astype(jnp.bfloat16)
            acc = acc + jnp.dot(win.reshape(rows, Cp), w_ref[ky * 3 + kx],
                                preferred_element_type=jnp.float32)

    # Training-mode BatchNorm (biased variance, two-pass / mean-centred) + ReLU,
    # fused into a single per-channel scale/shift.
    inv_n = 1.0 / rows
    mean = jnp.sum(acc, axis=0, keepdims=True) * inv_n          # (1, Cp)
    xc = acc - mean
    var = jnp.sum(xc * xc, axis=0, keepdims=True) * inv_n       # (1, Cp)
    scale = gamma_ref[...] * lax.rsqrt(var + _BN_EPS)           # (1, Cp)
    return jnp.maximum(xc * scale + beta_ref[...], 0.0)         # fused BN + ReLU


def double_conv_kernel(x_ref, w1_ref, g1_ref, be1_ref, w2_ref, g2_ref, be2_ref,
                       o_ref, xpad_ref):
    """Fused DoubleConv: (conv3x3 -> BN(train) -> ReLU) x 2, all resident in VMEM."""
    N, H, W, Cp = x_ref.shape

    # Zero ONLY the 1-pixel halo frame, once; it stays zero for both stages.
    zrow = jnp.zeros((N, 1, W + 2, Cp), jnp.float32)
    zcol = jnp.zeros((N, H + 2, 1, Cp), jnp.float32)
    xpad_ref[:, 0:1, :, :] = zrow
    xpad_ref[:, H + 1:H + 2, :, :] = zrow
    xpad_ref[:, :, 0:1, :] = zcol
    xpad_ref[:, :, W + 1:W + 2, :] = zcol

    # ---- stage 1: interior <- x (bf16 in HBM/VMEM, widened once to f32) ----
    xpad_ref[:, 1:H + 1, 1:W + 1, :] = x_ref[...].astype(jnp.float32)
    y1 = _conv3x3_bn_relu(xpad_ref, w1_ref, g1_ref, be1_ref, N, H, W, Cp)

    # ---- stage 2: overwrite the interior with y1; halo untouched -> still zero ----
    xpad_ref[:, 1:H + 1, 1:W + 1, :] = y1.reshape(N, H, W, Cp)
    y2 = _conv3x3_bn_relu(xpad_ref, w2_ref, g2_ref, be2_ref, N, H, W, Cp)

    o_ref[...] = y2.reshape(N, H, W, Cp).astype(o_ref.dtype)    # lane-dense bf16 store


@jax.jit
def double_conv(x_nchw, params):
    """Matches DoubleConv.forward on NCHW input (training-mode BatchNorm)."""
    N, Cin, H, W = x_nchw.shape
    Cout = params["w1"].shape[-1]
    Cp = max(128, -(-Cout // 128) * 128)          # lane-dense channel padding
    assert Cin <= Cp and Cout <= Cp

    # NCHW f32 -> NHWC bf16, channel-padded to full 128-lane vregs (fused by XLA).
    x = jnp.transpose(x_nchw, (0, 2, 3, 1))
    x = jnp.pad(x, ((0, 0), (0, 0), (0, 0), (0, Cp - Cin))).astype(jnp.bfloat16)

    # Weights -> (9, Cp, Cp) per-tap matrices, zero-padded channels, bf16 for the MXU.
    w1 = jnp.pad(params["w1"], ((0, 0), (0, 0), (0, Cp - Cin), (0, Cp - Cout)))
    w1 = w1.reshape(9, Cp, Cp).astype(jnp.bfloat16)
    w2 = jnp.pad(params["w2"], ((0, 0), (0, 0), (0, Cp - Cout), (0, Cp - Cout)))
    w2 = w2.reshape(9, Cp, Cp).astype(jnp.bfloat16)

    def pad_c(v):  # (Cout,) -> (1, Cp); padded lanes kept at exactly 0
        return jnp.pad(v, (0, Cp - Cout)).reshape(1, Cp).astype(jnp.float32)

    g1, be1 = pad_c(params["g1"]), pad_c(params["be1"])
    g2, be2 = pad_c(params["g2"]), pad_c(params["be2"])
    # NOTE: conv biases b1/b2 are intentionally NOT passed: with training-mode BatchNorm
    # a per-channel bias is exactly cancelled by the batch-mean subtraction.

    vmem = pl.BlockSpec(memory_space=pltpu.MemorySpace.VMEM)
    y_pad = pl.pallas_call(
        double_conv_kernel,
        out_shape=jax.ShapeDtypeStruct((N, H, W, Cp), jnp.bfloat16),
        in_specs=[vmem] * 7,
        out_specs=vmem,
        scratch_shapes=[
            pltpu.VMEM((N, H + 2, W + 2, Cp), jnp.float32),   # single shared padded slab
        ],
        compiler_params=pltpu.CompilerParams(
            vmem_limit_bytes=32 * 1024 * 1024),               # portable across v5e/v6e/v7x
    )(x, w1, g1, be1, w2, g2, be2)

    y = y_pad[..., :Cout].astype(jnp.float32)     # drop padded lanes, restore f32
    return jnp.transpose(y, (0, 3, 1, 2))         # NHWC -> NCHW


# -------- pure-JAX reference (PyTorch semantics, f32, with conv bias) --------
def _ref_conv_bn_relu(x_nhwc, w, b, gamma, beta):
    y = lax.conv_general_dilated(
        x_nhwc, w, window_strides=(1, 1), padding="SAME",
        dimension_numbers=("NHWC", "HWIO", "NHWC"))
    y = y + b.reshape(1, 1, 1, -1)
    mean = jnp.mean(y, axis=(0, 1, 2), keepdims=True)
    var = jnp.mean((y - mean) ** 2, axis=(0, 1, 2), keepdims=True)
    y = (y - mean) * lax.rsqrt(var + _BN_EPS)
    y = y * gamma.reshape(1, 1, 1, -1) + beta.reshape(1, 1, 1, -1)
    return jnp.maximum(y, 0.0)


def _ref_double_conv(x_nchw, params):
    x = jnp.transpose(x_nchw, (0, 2, 3, 1))
    y = _ref_conv_bn_relu(x, params["w1"], params["b1"], params["g1"], params["be1"])
    y = _ref_conv_bn_relu(y, params["w2"], params["b2"], params["g2"], params["be2"])
    return jnp.transpose(y, (0, 3, 1, 2))


if __name__ == "__main__":
    in_ch, out_ch = 4, 8
    N, H, W = 2, 16, 16

    key = jax.random.PRNGKey(0)
    k_x, k_w1, k_b1, k_g1, k_be1, k_w2, k_b2, k_g2, k_be2 = jax.random.split(key, 9)

    x = jax.random.normal(k_x, (N, in_ch, H, W), dtype=jnp.float32)

    # Deterministic synthetic parameters (conv weights stored HWIO for the kernel).
    params = {
        "w1": 0.1 * jax.random.normal(k_w1, (3, 3, in_ch, out_ch), jnp.float32),
        "b1": 0.1 * jax.random.normal(k_b1, (out_ch,), jnp.float32),
        "g1": 1.0 + 0.1 * jax.random.normal(k_g1, (out_ch,), jnp.float32),
        "be1": 0.1 * jax.random.normal(k_be1, (out_ch,), jnp.float32),
        "w2": 0.1 * jax.random.normal(k_w2, (3, 3, out_ch, out_ch), jnp.float32),
        "b2": 0.1 * jax.random.normal(k_b2, (out_ch,), jnp.float32),
        "g2": 1.0 + 0.1 * jax.random.normal(k_g2, (out_ch,), jnp.float32),
        "be2": 0.1 * jax.random.normal(k_be2, (out_ch,), jnp.float32),
    }

    out = double_conv(x, params)
    out = jax.block_until_ready(out)

    ref = _ref_double_conv(x, params)
    assert out.shape == (N, out_ch, H, W), out.shape
    # Tolerance loosened vs. the f32 reference because the MXU path uses bf16 inputs
    # (f32 accumulation) and the kernel output is bf16; observed error ~1e-3..1e-2
    # after two BN-normalized stages.
    assert jnp.allclose(out, ref, rtol=2e-2, atol=2e-2), "mismatch vs reference"

    print("KERNEL_OK")
</pallas_src>

<mosaic_0001>
module attributes {stable_mosaic.version = 11 : i64} {
  func.func @double_conv_kernel(%arg0: memref<2x16x16x128xbf16, #tpu.memory_space<vmem>>, %arg1: memref<9x128x128xbf16, #tpu.memory_space<vmem>>, %arg2: memref<1x128xf32, #tpu.memory_space<vmem>>, %arg3: memref<1x128xf32, #tpu.memory_space<vmem>>, %arg4: memref<9x128x128xbf16, #tpu.memory_space<vmem>>, %arg5: memref<1x128xf32, #tpu.memory_space<vmem>>, %arg6: memref<1x128xf32, #tpu.memory_space<vmem>>, %arg7: memref<2x16x16x128xbf16, #tpu.memory_space<vmem>>, %arg8: memref<2x18x18x128xf32, #tpu.memory_space<vmem>>) attributes {dimension_semantics = [], scalar_prefetch = 0 : i64, scratch_operands = 1 : i64, tpu.core_type = #tpu.core_type<tc>} {
    %cst = arith.constant 0.000000e+00 : f32
    %0 = vector.broadcast %cst : f32 to vector<2x1x18x128xf32>
    %cst_0 = arith.constant 0.000000e+00 : f32
    %1 = vector.broadcast %cst_0 : f32 to vector<2x18x1x128xf32>
    %c0 = arith.constant 0 : index
    %c0_1 = arith.constant 0 : index
    %c0_2 = arith.constant 0 : index
    %c0_3 = arith.constant 0 : index
    %2 = vector.load %arg8[%c0, %c0_1, %c0_2, %c0_3] : memref<2x18x18x128xf32, #tpu.memory_space<vmem>>, vector<2x1x18x128xf32>
    tpu.vector_store %arg8[%c0, %c0_1, %c0_2, %c0_3], %0 {strides = array<i32>} : memref<2x18x18x128xf32, #tpu.memory_space<vmem>>, vector<2x1x18x128xf32>,
    %c0_4 = arith.constant 0 : index
    %c17 = arith.constant 17 : index
    %c0_5 = arith.constant 0 : index
    %c0_6 = arith.constant 0 : index
    %3 = vector.load %arg8[%c0_4, %c17, %c0_5, %c0_6] : memref<2x18x18x128xf32, #tpu.memory_space<vmem>>, vector<2x1x18x128xf32>
    tpu.vector_store %arg8[%c0_4, %c17, %c0_5, %c0_6], %0 {strides = array<i32>} : memref<2x18x18x128xf32, #tpu.memory_space<vmem>>, vector<2x1x18x128xf32>,
    %c0_7 = arith.constant 0 : index
    %c0_8 = arith.constant 0 : index
    %c0_9 = arith.constant 0 : index
    %c0_10 = arith.constant 0 : index
    %4 = vector.load %arg8[%c0_7, %c0_8, %c0_9, %c0_10] : memref<2x18x18x128xf32, #tpu.memory_space<vmem>>, vector<2x18x1x128xf32>
    tpu.vector_store %arg8[%c0_7, %c0_8, %c0_9, %c0_10], %1 {strides = array<i32>} : memref<2x18x18x128xf32, #tpu.memory_space<vmem>>, vector<2x18x1x128xf32>,
    %c0_11 = arith.constant 0 : index
    %c0_12 = arith.constant 0 : index
    %c17_13 = arith.constant 17 : index
    %c0_14 = arith.constant 0 : index
    %5 = vector.load %arg8[%c0_11, %c0_12, %c17_13, %c0_14] : memref<2x18x18x128xf32, #tpu.memory_space<vmem>>, vector<2x18x1x128xf32>
    tpu.vector_store %arg8[%c0_11, %c0_12, %c17_13, %c0_14], %1 {strides = array<i32>} : memref<2x18x18x128xf32, #tpu.memory_space<vmem>>, vector<2x18x1x128xf32>,
    %c0_15 = arith.constant 0 : index
    %c0_16 = arith.constant 0 : index
    %c0_17 = arith.constant 0 : index
    %c0_18 = arith.constant 0 : index
    %6 = vector.load %arg0[%c0_15, %c0_16, %c0_17, %c0_18] : memref<2x16x16x128xbf16, #tpu.memory_space<vmem>>, vector<2x16x16x128xbf16>
    %7 = arith.extf %6 : vector<2x16x16x128xbf16> to vector<2x16x16x128xf32>
    %c0_19 = arith.constant 0 : index
    %c1 = arith.constant 1 : index
    %c1_20 = arith.constant 1 : index
    %c0_21 = arith.constant 0 : index
    %8 = vector.load %arg8[%c0_19, %c1, %c1_20, %c0_21] : memref<2x18x18x128xf32, #tpu.memory_space<vmem>>, vector<2x16x16x128xf32>
    tpu.vector_store %arg8[%c0_19, %c1, %c1_20, %c0_21], %7 {strides = array<i32>} : memref<2x18x18x128xf32, #tpu.memory_space<vmem>>, vector<2x16x16x128xf32>,
    %cst_22 = arith.constant 0.000000e+00 : f32
    %9 = vector.broadcast %cst_22 : f32 to vector<512x128xf32>
    %c0_23 = arith.constant 0 : index
    %c0_24 = arith.constant 0 : index
    %c0_25 = arith.constant 0 : index
    %c0_26 = arith.constant 0 : index
    %10 = vector.load %arg8[%c0_23, %c0_24, %c0_25, %c0_26] : memref<2x18x18x128xf32, #tpu.memory_space<vmem>>, vector<2x16x16x128xf32>
    %11 = arith.truncf %10 : vector<2x16x16x128xf32> to vector<2x16x16x128xbf16>
    %12 = vector.shape_cast %11 : vector<2x16x16x128xbf16> to vector<512x128xbf16>
    %c0_27 = arith.constant 0 : index
    %c0_28 = arith.constant 0 : index
    %c0_29 = arith.constant 0 : index
    %13 = vector.load %arg1[%c0_27, %c0_28, %c0_29] : memref<9x128x128xbf16, #tpu.memory_space<vmem>>, vector<1x128x128xbf16>
    %14 = vector.shape_cast %13 : vector<1x128x128xbf16> to vector<128x128xbf16>
    %cst_30 = arith.constant dense<0.000000e+00> : vector<512x128xf32>
    %15 = tpu.matmul %12, %14, %cst_30 {dimension_numbers = #tpu.dot_dimension_numbers<[1], [0], [0], [1], [0, 0, 1, 1], [], []>} : vector<512x128xbf16>, vector<128x128xbf16>, vector<512x128xf32> -> vector<512x128xf32>
    %16 = arith.addf %9, %15 : vector<512x128xf32>
    %c0_31 = arith.constant 0 : index
    %c0_32 = arith.constant 0 : index
    %c1_33 = arith.constant 1 : index
    %c0_34 = arith.constant 0 : index
    %17 = vector.load %arg8[%c0_31, %c0_32, %c1_33, %c0_34] : memref<2x18x18x128xf32, #tpu.memory_space<vmem>>, vector<2x16x16x128xf32>
    %18 = arith.truncf %17 : vector<2x16x16x128xf32> to vector<2x16x16x128xbf16>
    %19 = vector.shape_cast %18 : vector<2x16x16x128xbf16> to vector<512x128xbf16>
    %c1_35 = arith.constant 1 : index
    %c0_36 = arith.constant 0 : index
    %c0_37 = arith.constant 0 : index
    %20 = vector.load %arg1[%c1_35, %c0_36, %c0_37] : memref<9x128x128xbf16, #tpu.memory_space<vmem>>, vector<1x128x128xbf16>
    %21 = vector.shape_cast %20 : vector<1x128x128xbf16> to vector<128x128xbf16>
    %cst_38 = arith.constant dense<0.000000e+00> : vector<512x128xf32>
    %22 = tpu.matmul %19, %21, %cst_38 {dimension_numbers = #tpu.dot_dimension_numbers<[1], [0], [0], [1], [0, 0, 1, 1], [], []>} : vector<512x128xbf16>, vector<128x128xbf16>, vector<512x128xf32> -> vector<512x128xf32>
    %23 = arith.addf %16, %22 : vector<512x128xf32>
    %c0_39 = arith.constant 0 : index
    %c0_40 = arith.constant 0 : index
    %c2 = arith.constant 2 : index
    %c0_41 = arith.constant 0 : index
    %24 = vector.load %arg8[%c0_39, %c0_40, %c2, %c0_41] : memref<2x18x18x128xf32, #tpu.memory_space<vmem>>, vector<2x16x16x128xf32>
    %25 = arith.truncf %24 : vector<2x16x16x128xf32> to vector<2x16x16x128xbf16>
    %26 = vector.shape_cast %25 : vector<2x16x16x128xbf16> to vector<512x128xbf16>
    %c2_42 = arith.constant 2 : index
    %c0_43 = arith.constant 0 : index
    %c0_44 = arith.constant 0 : index
    %27 = vector.load %arg1[%c2_42, %c0_43, %c0_44] : memref<9x128x128xbf16, #tpu.memory_space<vmem>>, vector<1x128x128xbf16>
    %28 = vector.shape_cast %27 : vector<1x128x128xbf16> to vector<128x128xbf16>
    %cst_45 = arith.constant dense<0.000000e+00> : vector<512x128xf32>
    %29 = tpu.matmul %26, %28, %cst_45 {dimension_numbers = #tpu.dot_dimension_numbers<[1], [0], [0], [1], [0, 0, 1, 1], [], []>} : vector<512x128xbf16>, vector<128x128xbf16>, vector<512x128xf32> -> vector<512x128xf32>
    %30 = arith.addf %23, %29 : vector<512x128xf32>
    %c0_46 = arith.constant 0 : index
    %c1_47 = arith.constant 1 : index
    %c0_48 = arith.constant 0 : index
    %c0_49 = arith.constant 0 : index
    %31 = vector.load %arg8[%c0_46, %c1_47, %c0_48, %c0_49] : memref<2x18x18x128xf32, #tpu.memory_space<vmem>>, vector<2x16x16x128xf32>
    %32 = arith.truncf %31 : vector<2x16x16x128xf32> to vector<2x16x16x128xbf16>
    %33 = vector.shape_cast %32 : vector<2x16x16x128xbf16> to vector<512x128xbf16>
    %c3 = arith.constant 3 : index
    %c0_50 = arith.constant 0 : index
    %c0_51 = arith.constant 0 : index
    %34 = vector.load %arg1[%c3, %c0_50, %c0_51] : memref<9x128x128xbf16, #tpu.memory_space<vmem>>, vector<1x128x128xbf16>
    %35 = vector.shape_cast %34 : vector<1x128x128xbf16> to vector<128x128xbf16>
    %cst_52 = arith.constant dense<0.000000e+00> : vector<512x128xf32>
    %36 = tpu.matmul %33, %35, %cst_52 {dimension_numbers = #tpu.dot_dimension_numbers<[1], [0], [0], [1], [0, 0, 1, 1], [], []>} : vector<512x128xbf16>, vector<128x128xbf16>, vector<512x128xf32> -> vector<512x128xf32>
    %37 = arith.addf %30, %36 : vector<512x128xf32>
    %c0_53 = arith.constant 0 : index
    %c1_54 = arith.constant 1 : index
    %c1_55 = arith.constant 1 : index
    %c0_56 = arith.constant 0 : index
    %38 = vector.load %arg8[%c0_53, %c1_54, %c1_55, %c0_56] : memref<2x18x18x128xf32, #tpu.memory_space<vmem>>, vector<2x16x16x128xf32>
    %39 = arith.truncf %38 : vector<2x16x16x128xf32> to vector<2x16x16x128xbf16>
    %40 = vector.shape_cast %39 : vector<2x16x16x128xbf16> to vector<512x128xbf16>
    %c4 = arith.constant 4 : index
    %c0_57 = arith.constant 0 : index
    %c0_58 = arith.constant 0 : index
    %41 = vector.load %arg1[%c4, %c0_57, %c0_58] : memref<9x128x128xbf16, #tpu.memory_space<vmem>>, vector<1x128x128xbf16>
    %42 = vector.shape_cast %41 : vector<1x128x128xbf16> to vector<128x128xbf16>
    %cst_59 = arith.constant dense<0.000000e+00> : vector<512x128xf32>
    %43 = tpu.matmul %40, %42, %cst_59 {dimension_numbers = #tpu.dot_dimension_numbers<[1], [0], [0], [1], [0, 0, 1, 1], [], []>} : vector<512x128xbf16>, vector<128x128xbf16>, vector<512x128xf32> -> vector<512x128xf32>
    %44 = arith.addf %37, %43 : vector<512x128xf32>
    %c0_60 = arith.constant 0 : index
    %c1_61 = arith.constant 1 : index
    %c2_62 = arith.constant 2 : index
    %c0_63 = arith.constant 0 : index
    %45 = vector.load %arg8[%c0_60, %c1_61, %c2_62, %c0_63] : memref<2x18x18x128xf32, #tpu.memory_space<vmem>>, vector<2x16x16x128xf32>
    %46 = arith.truncf %45 : vector<2x16x16x128xf32> to vector<2x16x16x128xbf16>
    %47 = vector.shape_cast %46 : vector<2x16x16x128xbf16> to vector<512x128xbf16>
    %c5 = arith.constant 5 : index
    %c0_64 = arith.constant 0 : index
    %c0_65 = arith.constant 0 : index
    %48 = vector.load %arg1[%c5, %c0_64, %c0_65] : memref<9x128x128xbf16, #tpu.memory_space<vmem>>, vector<1x128x128xbf16>
    %49 = vector.shape_cast %48 : vector<1x128x128xbf16> to vector<128x128xbf16>
    %cst_66 = arith.constant dense<0.000000e+00> : vector<512x128xf32>
    %50 = tpu.matmul %47, %49, %cst_66 {dimension_numbers = #tpu.dot_dimension_numbers<[1], [0], [0], [1], [0, 0, 1, 1], [], []>} : vector<512x128xbf16>, vector<128x128xbf16>, vector<512x128xf32> -> vector<512x128xf32>
    %51 = arith.addf %44, %50 : vector<512x128xf32>
    %c0_67 = arith.constant 0 : index
    %c2_68 = arith.constant 2 : index
    %c0_69 = arith.constant 0 : index
    %c0_70 = arith.constant 0 : index
    %52 = vector.load %arg8[%c0_67, %c2_68, %c0_69, %c0_70] : memref<2x18x18x128xf32, #tpu.memory_space<vmem>>, vector<2x16x16x128xf32>
    %53 = arith.truncf %52 : vector<2x16x16x128xf32> to vector<2x16x16x128xbf16>
    %54 = vector.shape_cast %53 : vector<2x16x16x128xbf16> to vector<512x128xbf16>
    %c6 = arith.constant 6 : index
    %c0_71 = arith.constant 0 : index
    %c0_72 = arith.constant 0 : index
    %55 = vector.load %arg1[%c6, %c0_71, %c0_72] : memref<9x128x128xbf16, #tpu.memory_space<vmem>>, vector<1x128x128xbf16>
    %56 = vector.shape_cast %55 : vector<1x128x128xbf16> to vector<128x128xbf16>
    %cst_73 = arith.constant dense<0.000000e+00> : vector<512x128xf32>
    %57 = tpu.matmul %54, %56, %cst_73 {dimension_numbers = #tpu.dot_dimension_numbers<[1], [0], [0], [1], [0, 0, 1, 1], [], []>} : vector<512x128xbf16>, vector<128x128xbf16>, vector<512x128xf32> -> vector<512x128xf32>
    %58 = arith.addf %51, %57 : vector<512x128xf32>
    %c0_74 = arith.constant 0 : index
    %c2_75 = arith.constant 2 : index
    %c1_76 = arith.constant 1 : index
    %c0_77 = arith.constant 0 : index
    %59 = vector.load %arg8[%c0_74, %c2_75, %c1_76, %c0_77] : memref<2x18x18x128xf32, #tpu.memory_space<vmem>>, vector<2x16x16x128xf32>
    %60 = arith.truncf %59 : vector<2x16x16x128xf32> to vector<2x16x16x128xbf16>
    %61 = vector.shape_cast %60 : vector<2x16x16x128xbf16> to vector<512x128xbf16>
    %c7 = arith.constant 7 : index
    %c0_78 = arith.constant 0 : index
    %c0_79 = arith.constant 0 : index
    %62 = vector.load %arg1[%c7, %c0_78, %c0_79] : memref<9x128x128xbf16, #tpu.memory_space<vmem>>, vector<1x128x128xbf16>
    %63 = vector.shape_cast %62 : vector<1x128x128xbf16> to vector<128x128xbf16>
    %cst_80 = arith.constant dense<0.000000e+00> : vector<512x128xf32>
    %64 = tpu.matmul %61, %63, %cst_80 {dimension_numbers = #tpu.dot_dimension_numbers<[1], [0], [0], [1], [0, 0, 1, 1], [], []>} : vector<512x128xbf16>, vector<128x128xbf16>, vector<512x128xf32> -> vector<512x128xf32>
    %65 = arith.addf %58, %64 : vector<512x128xf32>
    %c0_81 = arith.constant 0 : index
    %c2_82 = arith.constant 2 : index
    %c2_83 = arith.constant 2 : index
    %c0_84 = arith.constant 0 : index
    %66 = vector.load %arg8[%c0_81, %c2_82, %c2_83, %c0_84] : memref<2x18x18x128xf32, #tpu.memory_space<vmem>>, vector<2x16x16x128xf32>
    %67 = arith.truncf %66 : vector<2x16x16x128xf32> to vector<2x16x16x128xbf16>
    %68 = vector.shape_cast %67 : vector<2x16x16x128xbf16> to vector<512x128xbf16>
    %c8 = arith.constant 8 : index
    %c0_85 = arith.constant 0 : index
    %c0_86 = arith.constant 0 : index
    %69 = vector.load %arg1[%c8, %c0_85, %c0_86] : memref<9x128x128xbf16, #tpu.memory_space<vmem>>, vector<1x128x128xbf16>
    %70 = vector.shape_cast %69 : vector<1x128x128xbf16> to vector<128x128xbf16>
    %cst_87 = arith.constant dense<0.000000e+00> : vector<512x128xf32>
    %71 = tpu.matmul %68, %70, %cst_87 {dimension_numbers = #tpu.dot_dimension_numbers<[1], [0], [0], [1], [0, 0, 1, 1], [], []>} : vector<512x128xbf16>, vector<128x128xbf16>, vector<512x128xf32> -> vector<512x128xf32>
    %72 = arith.addf %65, %71 : vector<512x128xf32>
    %cst_88 = arith.constant dense<0.000000e+00> : vector<128xf32>
    %73 = vector.multi_reduction <add>, %72, %cst_88 [0] : vector<512x128xf32> to vector<128xf32>
    %74 = vector.shape_cast %73 : vector<128xf32> to vector<1x128xf32>
    %cst_89 = arith.constant 0.001953125 : f32
    %75 = vector.broadcast %cst_89 : f32 to vector<1x128xf32>
    %76 = arith.mulf %74, %75 : vector<1x128xf32>
    %77 = vector.broadcast %76 : vector<1x128xf32> to vector<512x128xf32>
    %78 = arith.subf %72, %77 : vector<512x128xf32>
    %79 = arith.mulf %78, %78 : vector<512x128xf32>
    %cst_90 = arith.constant dense<0.000000e+00> : vector<128xf32>
    %80 = vector.multi_reduction <add>, %79, %cst_90 [0] : vector<512x128xf32> to vector<128xf32>
    %81 = vector.shape_cast %80 : vector<128xf32> to vector<1x128xf32>
    %cst_91 = arith.constant 0.001953125 : f32
    %82 = vector.broadcast %cst_91 : f32 to vector<1x128xf32>
    %83 = arith.mulf %81, %82 : vector<1x128xf32>
    %c0_92 = arith.constant 0 : index
    %c0_93 = arith.constant 0 : index
    %84 = vector.load %arg2[%c0_92, %c0_93] : memref<1x128xf32, #tpu.memory_space<vmem>>, vector<1x128xf32>
    %cst_94 = arith.constant 9.99999974E-6 : f32
    %85 = vector.broadcast %cst_94 : f32 to vector<1x128xf32>
    %86 = arith.addf %83, %85 : vector<1x128xf32>
    %87 = math.rsqrt %86 : vector<1x128xf32>
    %88 = arith.mulf %84, %87 : vector<1x128xf32>
    %89 = vector.broadcast %88 : vector<1x128xf32> to vector<512x128xf32>
    %90 = arith.mulf %78, %89 : vector<512x128xf32>
    %c0_95 = arith.constant 0 : index
    %c0_96 = arith.constant 0 : index
    %91 = vector.load %arg3[%c0_95, %c0_96] : memref<1x128xf32, #tpu.memory_space<vmem>>, vector<1x128xf32>
    %92 = vector.broadcast %91 : vector<1x128xf32> to vector<512x128xf32>
    %93 = arith.addf %90, %92 : vector<512x128xf32>
    %cst_97 = arith.constant 0.000000e+00 : f32
    %94 = vector.broadcast %cst_97 : f32 to vector<512x128xf32>
    %95 = arith.maximumf %93, %94 : vector<512x128xf32>
    %96 = vector.shape_cast %95 : vector<512x128xf32> to vector<2x16x16x128xf32>
    %c0_98 = arith.constant 0 : index
    %c1_99 = arith.constant 1 : index
    %c1_100 = arith.constant 1 : index
    %c0_101 = arith.constant 0 : index
    %97 = vector.load %arg8[%c0_98, %c1_99, %c1_100, %c0_101] : memref<2x18x18x128xf32, #tpu.memory_space<vmem>>, vector<2x16x16x128xf32>
    tpu.vector_store %arg8[%c0_98, %c1_99, %c1_100, %c0_101], %96 {strides = array<i32>} : memref<2x18x18x128xf32, #tpu.memory_space<vmem>>, vector<2x16x16x128xf32>,
    %cst_102 = arith.constant 0.000000e+00 : f32
    %98 = vector.broadcast %cst_102 : f32 to vector<512x128xf32>
    %c0_103 = arith.constant 0 : index
    %c0_104 = arith.constant 0 : index
    %c0_105 = arith.constant 0 : index
    %c0_106 = arith.constant 0 : index
    %99 = vector.load %arg8[%c0_103, %c0_104, %c0_105, %c0_106] : memref<2x18x18x128xf32, #tpu.memory_space<vmem>>, vector<2x16x16x128xf32>
    %100 = arith.truncf %99 : vector<2x16x16x128xf32> to vector<2x16x16x128xbf16>
    %101 = vector.shape_cast %100 : vector<2x16x16x128xbf16> to vector<512x128xbf16>
    %c0_107 = arith.constant 0 : index
    %c0_108 = arith.constant 0 : index
    %c0_109 = arith.constant 0 : index
    %102 = vector.load %arg4[%c0_107, %c0_108, %c0_109] : memref<9x128x128xbf16, #tpu.memory_space<vmem>>, vector<1x128x128xbf16>
    %103 = vector.shape_cast %102 : vector<1x128x128xbf16> to vector<128x128xbf16>
    %cst_110 = arith.constant dense<0.000000e+00> : vector<512x128xf32>
    %104 = tpu.matmul %101, %103, %cst_110 {dimension_numbers = #tpu.dot_dimension_numbers<[1], [0], [0], [1], [0, 0, 1, 1], [], []>} : vector<512x128xbf16>, vector<128x128xbf16>, vector<512x128xf32> -> vector<512x128xf32>
    %105 = arith.addf %98, %104 : vector<512x128xf32>
    %c0_111 = arith.constant 0 : index
    %c0_112 = arith.constant 0 : index
    %c1_113 = arith.constant 1 : index
    %c0_114 = arith.constant 0 : index
    %106 = vector.load %arg8[%c0_111, %c0_112, %c1_113, %c0_114] : memref<2x18x18x128xf32, #tpu.memory_space<vmem>>, vector<2x16x16x128xf32>
    %107 = arith.truncf %106 : vector<2x16x16x128xf32> to vector<2x16x16x128xbf16>
    %108 = vector.shape_cast %107 : vector<2x16x16x128xbf16> to vector<512x128xbf16>
    %c1_115 = arith.constant 1 : index
    %c0_116 = arith.constant 0 : index
    %c0_117 = arith.constant 0 : index
    %109 = vector.load %arg4[%c1_115, %c0_116, %c0_117] : memref<9x128x128xbf16, #tpu.memory_space<vmem>>, vector<1x128x128xbf16>
    %110 = vector.shape_cast %109 : vector<1x128x128xbf16> to vector<128x128xbf16>
    %cst_118 = arith.constant dense<0.000000e+00> : vector<512x128xf32>
    %111 = tpu.matmul %108, %110, %cst_118 {dimension_numbers = #tpu.dot_dimension_numbers<[1], [0], [0], [1], [0, 0, 1, 1], [], []>} : vector<512x128xbf16>, vector<128x128xbf16>, vector<512x128xf32> -> vector<512x128xf32>
    %112 = arith.addf %105, %111 : vector<512x128xf32>
    %c0_119 = arith.constant 0 : index
    %c0_120 = arith.constant 0 : index
    %c2_121 = arith.constant 2 : index
    %c0_122 = arith.constant 0 : index
    %113 = vector.load %arg8[%c0_119, %c0_120, %c2_121, %c0_122] : memref<2x18x18x128xf32, #tpu.memory_space<vmem>>, vector<2x16x16x128xf32>
    %114 = arith.truncf %113 : vector<2x16x16x128xf32> to vector<2x16x16x128xbf16>
    %115 = vector.shape_cast %114 : vector<2x16x16x128xbf16> to vector<512x128xbf16>
    %c2_123 = arith.constant 2 : index
    %c0_124 = arith.constant 0 : index
    %c0_125 = arith.constant 0 : index
    %116 = vector.load %arg4[%c2_123, %c0_124, %c0_125] : memref<9x128x128xbf16, #tpu.memory_space<vmem>>, vector<1x128x128xbf16>
    %117 = vector.shape_cast %116 : vector<1x128x128xbf16> to vector<128x128xbf16>
    %cst_126 = arith.constant dense<0.000000e+00> : vector<512x128xf32>
    %118 = tpu.matmul %115, %117, %cst_126 {dimension_numbers = #tpu.dot_dimension_numbers<[1], [0], [0], [1], [0, 0, 1, 1], [], []>} : vector<512x128xbf16>, vector<128x128xbf16>, vector<512x128xf32> -> vector<512x128xf32>
    %119 = arith.addf %112, %118 : vector<512x128xf32>
    %c0_127 = arith.constant 0 : index
    %c1_128 = arith.constant 1 : index
    %c0_129 = arith.constant 0 : index
    %c0_130 = arith.constant 0 : index
    %120 = vector.load %arg8[%c0_127, %c1_128, %c0_129, %c0_130] : memref<2x18x18x128xf32, #tpu.memory_space<vmem>>, vector<2x16x16x128xf32>
    %121 = arith.truncf %120 : vector<2x16x16x128xf32> to vector<2x16x16x128xbf16>
    %122 = vector.shape_cast %121 : vector<2x16x16x128xbf16> to vector<512x128xbf16>
    %c3_131 = arith.constant 3 : index
    %c0_132 = arith.constant 0 : index
    %c0_133 = arith.constant 0 : index
    %123 = vector.load %arg4[%c3_131, %c0_132, %c0_133] : memref<9x128x128xbf16, #tpu.memory_space<vmem>>, vector<1x128x128xbf16>
    %124 = vector.shape_cast %123 : vector<1x128x128xbf16> to vector<128x128xbf16>
    %cst_134 = arith.constant dense<0.000000e+00> : vector<512x128xf32>
    %125 = tpu.matmul %122, %124, %cst_134 {dimension_numbers = #tpu.dot_dimension_numbers<[1], [0], [0], [1], [0, 0, 1, 1], [], []>} : vector<512x128xbf16>, vector<128x128xbf16>, vector<512x128xf32> -> vector<512x128xf32>
    %126 = arith.addf %119, %125 : vector<512x128xf32>
    %c0_135 = arith.constant 0 : index
    %c1_136 = arith.constant 1 : index
    %c1_137 = arith.constant 1 : index
    %c0_138 = arith.constant 0 : index
    %127 = vector.load %arg8[%c0_135, %c1_136, %c1_137, %c0_138] : memref<2x18x18x128xf32, #tpu.memory_space<vmem>>, vector<2x16x16x128xf32>
    %128 = arith.truncf %127 : vector<2x16x16x128xf32> to vector<2x16x16x128xbf16>
    %129 = vector.shape_cast %128 : vector<2x16x16x128xbf16> to vector<512x128xbf16>
    %c4_139 = arith.constant 4 : index
    %c0_140 = arith.constant 0 : index
    %c0_141 = arith.constant 0 : index
    %130 = vector.load %arg4[%c4_139, %c0_140, %c0_141] : memref<9x128x128xbf16, #tpu.memory_space<vmem>>, vector<1x128x128xbf16>
    %131 = vector.shape_cast %130 : vector<1x128x128xbf16> to vector<128x128xbf16>
    %cst_142 = arith.constant dense<0.000000e+00> : vector<512x128xf32>
    %132 = tpu.matmul %129, %131, %cst_142 {dimension_numbers = #tpu.dot_dimension_numbers<[1], [0], [0], [1], [0, 0, 1, 1], [], []>} : vector<512x128xbf16>, vector<128x128xbf16>, vector<512x128xf32> -> vector<512x128xf32>
    %133 = arith.addf %126, %132 : vector<512x128xf32>
    %c0_143 = arith.constant 0 : index
    %c1_144 = arith.constant 1 : index
    %c2_145 = arith.constant 2 : index
    %c0_146 = arith.constant 0 : index
    %134 = vector.load %arg8[%c0_143, %c1_144, %c2_145, %c0_146] : memref<2x18x18x128xf32, #tpu.memory_space<vmem>>, vector<2x16x16x128xf32>
    %135 = arith.truncf %134 : vector<2x16x16x128xf32> to vector<2x16x16x128xbf16>
    %136 = vector.shape_cast %135 : vector<2x16x16x128xbf16> to vector<512x128xbf16>
    %c5_147 = arith.constant 5 : index
    %c0_148 = arith.constant 0 : index
    %c0_149 = arith.constant 0 : index
    %137 = vector.load %arg4[%c5_147, %c0_148, %c0_149] : memref<9x128x128xbf16, #tpu.memory_space<vmem>>, vector<1x128x128xbf16>
    %138 = vector.shape_cast %137 : vector<1x128x128xbf16> to vector<128x128xbf16>
    %cst_150 = arith.constant dense<0.000000e+00> : vector<512x128xf32>
    %139 = tpu.matmul %136, %138, %cst_150 {dimension_numbers = #tpu.dot_dimension_numbers<[1], [0], [0], [1], [0, 0, 1, 1], [], []>} : vector<512x128xbf16>, vector<128x128xbf16>, vector<512x128xf32> -> vector<512x128xf32>
    %140 = arith.addf %133, %139 : vector<512x128xf32>
    %c0_151 = arith.constant 0 : index
    %c2_152 = arith.constant 2 : index
    %c0_153 = arith.constant 0 : index
    %c0_154 = arith.constant 0 : index
    %141 = vector.load %arg8[%c0_151, %c2_152, %c0_153, %c0_154] : memref<2x18x18x128xf32, #tpu.memory_space<vmem>>, vector<2x16x16x128xf32>
    %142 = arith.truncf %141 : vector<2x16x16x128xf32> to vector<2x16x16x128xbf16>
    %143 = vector.shape_cast %142 : vector<2x16x16x128xbf16> to vector<512x128xbf16>
    %c6_155 = arith.constant 6 : index
    %c0_156 = arith.constant 0 : index
    %c0_157 = arith.constant 0 : index
    %144 = vector.load %arg4[%c6_155, %c0_156, %c0_157] : memref<9x128x128xbf16, #tpu.memory_space<vmem>>, vector<1x128x128xbf16>
    %145 = vector.shape_cast %144 : vector<1x128x128xbf16> to vector<128x128xbf16>
    %cst_158 = arith.constant dense<0.000000e+00> : vector<512x128xf32>
    %146 = tpu.matmul %143, %145, %cst_158 {dimension_numbers = #tpu.dot_dimension_numbers<[1], [0], [0], [1], [0, 0, 1, 1], [], []>} : vector<512x128xbf16>, vector<128x128xbf16>, vector<512x128xf32> -> vector<512x128xf32>
    %147 = arith.addf %140, %146 : vector<512x128xf32>
    %c0_159 = arith.constant 0 : index
    %c2_160 = arith.constant 2 : index
    %c1_161 = arith.constant 1 : index
    %c0_162 = arith.constant 0 : index
    %148 = vector.load %arg8[%c0_159, %c2_160, %c1_161, %c0_162] : memref<2x18x18x128xf32, #tpu.memory_space<vmem>>, vector<2x16x16x128xf32>
    %149 = arith.truncf %148 : vector<2x16x16x128xf32> to vector<2x16x16x128xbf16>
    %150 = vector.shape_cast %149 : vector<2x16x16x128xbf16> to vector<512x128xbf16>
    %c7_163 = arith.constant 7 : index
    %c0_164 = arith.constant 0 : index
    %c0_165 = arith.constant 0 : index
    %151 = vector.load %arg4[%c7_163, %c0_164, %c0_165] : memref<9x128x128xbf16, #tpu.memory_space<vmem>>, vector<1x128x128xbf16>
    %152 = vector.shape_cast %151 : vector<1x128x128xbf16> to vector<128x128xbf16>
    %cst_166 = arith.constant dense<0.000000e+00> : vector<512x128xf32>
    %153 = tpu.matmul %150, %152, %cst_166 {dimension_numbers = #tpu.dot_dimension_numbers<[1], [0], [0], [1], [0, 0, 1, 1], [], []>} : vector<512x128xbf16>, vector<128x128xbf16>, vector<512x128xf32> -> vector<512x128xf32>
    %154 = arith.addf %147, %153 : vector<512x128xf32>
    %c0_167 = arith.constant 0 : index
    %c2_168 = arith.constant 2 : index
    %c2_169 = arith.constant 2 : index
    %c0_170 = arith.constant 0 : index
    %155 = vector.load %arg8[%c0_167, %c2_168, %c2_169, %c0_170] : memref<2x18x18x128xf32, #tpu.memory_space<vmem>>, vector<2x16x16x128xf32>
    %156 = arith.truncf %155 : vector<2x16x16x128xf32> to vector<2x16x16x128xbf16>
    %157 = vector.shape_cast %156 : vector<2x16x16x128xbf16> to vector<512x128xbf16>
    %c8_171 = arith.constant 8 : index
    %c0_172 = arith.constant 0 : index
    %c0_173 = arith.constant 0 : index
    %158 = vector.load %arg4[%c8_171, %c0_172, %c0_173] : memref<9x128x128xbf16, #tpu.memory_space<vmem>>, vector<1x128x128xbf16>
    %159 = vector.shape_cast %158 : vector<1x128x128xbf16> to vector<128x128xbf16>
    %cst_174 = arith.constant dense<0.000000e+00> : vector<512x128xf32>
    %160 = tpu.matmul %157, %159, %cst_174 {dimension_numbers = #tpu.dot_dimension_numbers<[1], [0], [0], [1], [0, 0, 1, 1], [], []>} : vector<512x128xbf16>, vector<128x128xbf16>, vector<512x128xf32> -> vector<512x128xf32>
    %161 = arith.addf %154, %160 : vector<512x128xf32>
    %cst_175 = arith.constant dense<0.000000e+00> : vector<128xf32>
    %162 = vector.multi_reduction <add>, %161, %cst_175 [0] : vector<512x128xf32> to vector<128xf32>
    %163 = vector.shape_cast %162 : vector<128xf32> to vector<1x128xf32>
    %cst_176 = arith.constant 0.001953125 : f32
    %164 = vector.broadcast %cst_176 : f32 to vector<1x128xf32>
    %165 = arith.mulf %163, %164 : vector<1x128xf32>
    %166 = vector.broadcast %165 : vector<1x128xf32> to vector<512x128xf32>
    %167 = arith.subf %161, %166 : vector<512x128xf32>
    %168 = arith.mulf %167, %167 : vector<512x128xf32>
    %cst_177 = arith.constant dense<0.000000e+00> : vector<128xf32>
    %169 = vector.multi_reduction <add>, %168, %cst_177 [0] : vector<512x128xf32> to vector<128xf32>
    %170 = vector.shape_cast %169 : vector<128xf32> to vector<1x128xf32>
    %cst_178 = arith.constant 0.001953125 : f32
    %171 = vector.broadcast %cst_178 : f32 to vector<1x128xf32>
    %172 = arith.mulf %170, %171 : vector<1x128xf32>
    %c0_179 = arith.constant 0 : index
    %c0_180 = arith.constant 0 : index
    %173 = vector.load %arg5[%c0_179, %c0_180] : memref<1x128xf32, #tpu.memory_space<vmem>>, vector<1x128xf32>
    %cst_181 = arith.constant 9.99999974E-6 : f32
    %174 = vector.broadcast %cst_181 : f32 to vector<1x128xf32>
    %175 = arith.addf %172, %174 : vector<1x128xf32>
    %176 = math.rsqrt %175 : vector<1x128xf32>
    %177 = arith.mulf %173, %176 : vector<1x128xf32>
    %178 = vector.broadcast %177 : vector<1x128xf32> to vector<512x128xf32>
    %179 = arith.mulf %167, %178 : vector<512x128xf32>
    %c0_182 = arith.constant 0 : index
    %c0_183 = arith.constant 0 : index
    %180 = vector.load %arg6[%c0_182, %c0_183] : memref<1x128xf32, #tpu.memory_space<vmem>>, vector<1x128xf32>
    %181 = vector.broadcast %180 : vector<1x128xf32> to vector<512x128xf32>
    %182 = arith.addf %179, %181 : vector<512x128xf32>
    %cst_184 = arith.constant 0.000000e+00 : f32
    %183 = vector.broadcast %cst_184 : f32 to vector<512x128xf32>
    %184 = arith.maximumf %182, %183 : vector<512x128xf32>
    %185 = vector.shape_cast %184 : vector<512x128xf32> to vector<2x16x16x128xf32>
    %186 = arith.truncf %185 : vector<2x16x16x128xf32> to vector<2x16x16x128xbf16>
    %c0_185 = arith.constant 0 : index
    %c0_186 = arith.constant 0 : index
    %c0_187 = arith.constant 0 : index
    %c0_188 = arith.constant 0 : index
    %187 = vector.load %arg7[%c0_185, %c0_186, %c0_187, %c0_188] : memref<2x16x16x128xbf16, #tpu.memory_space<vmem>>, vector<2x16x16x128xbf16>
    tpu.vector_store %arg7[%c0_185, %c0_186, %c0_187, %c0_188], %186 {strides = array<i32>} : memref<2x16x16x128xbf16, #tpu.memory_space<vmem>>, vector<2x16x16x128xbf16>,
    return
  }
}

</mosaic_0001>

<bundles_post_ra>
// kernel: double_conv.1
= control target key start
LH: loop header
LB: loop body
LE: loop exit
PB: predicated region body
PF: predicated region fallthrough
CT: control target
= control target key end

     0   :  { %v14891_v1 = vmov 0.0   ;;  %s19077_s1 = inlined_call_operand.vmem [shape: bf16[9,128,128], index: 1, kind: input, shape index: {}]   ;;  %s19078_s0 = inlined_call_operand.vmem [shape: bf16[2,16,16,128], index: 0, kind: input, shape index: {}]   ;;  %s19079_s4 = inlined_call_operand.vmem [shape: bf16[9,128,128], index: 4, kind: input, shape index: {}]   ;;  %s19080_s2 = inlined_call_operand.vmem [shape: f32[1,128], index: 2, kind: input, shape index: {}]   ;;  %s19081_s3 = inlined_call_operand.vmem [shape: f32[1,128], index: 3, kind: input, shape index: {}]   ;;  %s19082_s5 = inlined_call_operand.vmem [shape: f32[1,128], index: 5, kind: input, shape index: {}]   ;;  %s19083_s6 = inlined_call_operand.vmem [shape: f32[1,128], index: 6, kind: input, shape index: {}]   ;;  %s19084_s7 = inlined_call_operand.vmem [shape: bf16[2,16,16,128], index: 7, kind: output, shape index: {}]  }
   0x1   :  { %v14935_v0 = vld [vmem:[%s19077_s1 + $0x40] sm:$0xff]   ;;  %27 = vst [vmem:[#allocation2] sm:$0xff] %v14891_v1  ;;  %28 = vst [vmem:[#allocation2 + $0x8] sm:$0xff] %v14891_v1  ;;  %v14708_v2 = vld [vmem:[%s19077_s1 + $0x48] sm:$0xff]  }
   0x2   :  { %29 = vst [vmem:[#allocation2 + $0x10] sm:$0x3] %v14891_v1  ;;  %30 = vst [vmem:[#allocation2 + $0x1b0] sm:$0xff] %v14891_v1  ;;  %12242 = vmatprep.subr.bf16.mxu0 %v14935_v0  ;;  %v14709_v3 = vld [vmem:[%s19077_s1 + $0x50] sm:$0xff]   ;;  %v14710_v4 = vld [vmem:[%s19077_s1 + $0x58] sm:$0xff]  }
   0x3   :  { %31 = vst [vmem:[#allocation2 + $0x1b8] sm:$0xff] %v14891_v1  ;;  %32 = vst [vmem:[#allocation2 + $0x1c0] sm:$0x3] %v14891_v1  ;;  %12243 = vmatpush3.bf16.msra.mxu0 %v14935_v0  ;;  %v11173_v7 = vld [vmem:[%s19078_s0] sm:$0xff]   ;;  %v11460_v11 = vld [vmem:[%s19078_s0 + $0x8] sm:$0xff]  }
   0x4   :  { %34 = vst [vmem:[#allocation2 + $0x198] sm:$0xff] %v14891_v1  ;;  %35 = vst [vmem:[#allocation2 + $0x1a0] sm:$0xff] %v14891_v1  ;;  %12244 = vmatprep.subr.bf16.mxu0 %v14708_v2  ;;  %v11174_v9 = vunpack.c.l.bf16 %v11173_v7  ;;  %v11175_v10 = vunpack.c.h.bf16 %v11173_v7  ;;  %v11178_v12 = vunpack.c.l.bf16 %v11460_v11  ;;  %v11179_v13 = vunpack.c.h.bf16 %v11460_v11  ;;  %v11461_v14 = vld [vmem:[%s19078_s0 + $0x10] sm:$0xff]   ;;  %v11462_v15 = vld [vmem:[%s19078_s0 + $0x18] sm:$0xff]  }
   0x5   :  { %36 = vst [vmem:[#allocation2 + $0x1a8] sm:$0x3] %v14891_v1  ;;  %37 = vst [vmem:[#allocation2 + $0x348] sm:$0xff] %v14891_v1  ;;  %v14711_v16 = vld [vmem:[%s19077_s1 + $0x60] sm:$0xff]   ;;  %v11182_v17 = vunpack.c.l.bf16 %v11461_v14  ;;  %v11183_v18 = vunpack.c.h.bf16 %v11461_v14  ;;  %v11186_v19 = vunpack.c.l.bf16 %v11462_v15  ;;  %v11187_v20 = vunpack.c.h.bf16 %v11462_v15  ;;  %v11464_v24 = vld [vmem:[%s19078_s0 + $0x28] sm:$0xff]  }
   0x6   :  { %38 = vst [vmem:[#allocation2 + $0x350] sm:$0xff] %v14891_v1  ;;  %39 = vst [vmem:[#allocation2 + $0x358] sm:$0x3] %v14891_v1  ;;  %v11463_v21 = vld [vmem:[%s19078_s0 + $0x20] sm:$0xff]   ;;  %v11465_v25 = vld [vmem:[%s19078_s0 + $0x30] sm:$0xff]   ;;  %v11194_v26 = vunpack.c.l.bf16 %v11464_v24  ;;  %v11195_v27 = vunpack.c.h.bf16 %v11464_v24 }
   0x7   :  { %41 = vst [vmem:[#allocation2 + $0x18] sm:$0x1] %v14891_v1  ;;  %42 = vst [vmem:[#allocation2 + $0x30] sm:$0x1] %v14891_v1  ;;  %12245 = vmatpush3.bf16.msra.mxu0 %v14708_v2  ;;  %v11190_v22 = vunpack.c.l.bf16 %v11463_v21  ;;  %v11191_v23 = vunpack.c.h.bf16 %v11463_v21  ;;  %v11198_v28 = vunpack.c.l.bf16 %v11465_v25  ;;  %v11199_v29 = vunpack.c.h.bf16 %v11465_v25  ;;  %v11466_v30 = vld [vmem:[%s19078_s0 + $0x38] sm:$0xff]   ;;  %v14712_v31 = vld [vmem:[%s19077_s1 + $0x68] sm:$0xff]  }
   0x8   :  { %43 = vst [vmem:[#allocation2 + $0x48] sm:$0x1] %v14891_v1  ;;  %44 = vst [vmem:[#allocation2 + $0x60] sm:$0x1] %v14891_v1  ;;  %12246 = vmatprep.subr.bf16.mxu0 %v14709_v3  ;;  %v417_v5 = vld [vmem:[#allocation2 + $0x1] sm:$0xff]  ;;  %v11202_v32 = vunpack.c.l.bf16 %v11466_v30  ;;  %v11203_v33 = vunpack.c.h.bf16 %v11466_v30  ;;  %v11469_v40 = vld [vmem:[%s19078_s0 + $0x50] sm:$0xff]  }
   0x9   :  { %45 = vst [vmem:[#allocation2 + $0x78] sm:$0x1] %v14891_v1  ;;  %46 = vst [vmem:[#allocation2 + $0x90] sm:$0x1] %v14891_v1  ;;  %v418_v6 = vld [vmem:[#allocation2 + $0x9] sm:$0xff]  ;;  %v11467_v34 = vld [vmem:[%s19078_s0 + $0x40] sm:$0xff]   ;;  %v11214_v41 = vunpack.c.l.bf16 %v11469_v40  ;;  %v11215_v42 = vunpack.c.h.bf16 %v11469_v40 }
   0xa   :  { %47 = vst [vmem:[#allocation2 + $0xa8] sm:$0x1] %v14891_v1  ;;  %48 = vst [vmem:[#allocation2 + $0xc0] sm:$0x1] %v14891_v1  ;;  %v481_v8 = vpack.c.bf16 %v418_v6, %v417_v5  ;;  %v11206_v35 = vunpack.c.l.bf16 %v11467_v34  ;;  %v11207_v36 = vunpack.c.h.bf16 %v11467_v34  ;;  %v11468_v37 = vld [vmem:[%s19078_s0 + $0x48] sm:$0xff]   ;;  %v11470_v43 = vld [vmem:[%s19078_s0 + $0x58] sm:$0xff]  }
   0xb   :  { %49 = vst [vmem:[#allocation2 + $0xd8] sm:$0x1] %v14891_v1  ;;  %50 = vst [vmem:[#allocation2 + $0xf0] sm:$0x1] %v14891_v1  ;;  %12247 = vmatpush3.bf16.msra.mxu0 %v14709_v3  ;;  %v11210_v38 = vunpack.c.l.bf16 %v11468_v37  ;;  %v11211_v39 = vunpack.c.h.bf16 %v11468_v37  ;;  %v11471_v44 = vld [vmem:[%s19078_s0 + $0x60] sm:$0xff]   ;;  %v14713_v45 = vld [vmem:[%s19077_s1 + $0x70] sm:$0xff]   ;;  %v11218_v46 = vunpack.c.l.bf16 %v11470_v43  ;;  %v11219_v47 = vunpack.c.h.bf16 %v11470_v43 }
   0xc   :  { %51 = vst [vmem:[#allocation2 + $0x108] sm:$0x1] %v14891_v1  ;;  %52 = vst [vmem:[#allocation2 + $0x120] sm:$0x1] %v14891_v1  ;;  %12258 = vmatprep.mubr.bf16.mxu0 %v481_v8  ;;  %12248 = vmatprep.subr.bf16.mxu0 %v14710_v4  ;;  %v11222_v48 = vunpack.c.l.bf16 %v11471_v44  ;;  %v11223_v49 = vunpack.c.h.bf16 %v11471_v44  ;;  %v11472_v50 = vld [vmem:[%s19078_s0 + $0x68] sm:$0xff]   ;;  %v11473_v53 = vld [vmem:[%s19078_s0 + $0x70] sm:$0xff]  }
   0xd   :  { %53 = vst [vmem:[#allocation2 + $0x138] sm:$0x1] %v14891_v1  ;;  %54 = vst [vmem:[#allocation2 + $0x150] sm:$0x1] %v14891_v1  ;;  %v11226_v51 = vunpack.c.l.bf16 %v11472_v50  ;;  %v11227_v52 = vunpack.c.h.bf16 %v11472_v50  ;;  %v11230_v54 = vunpack.c.l.bf16 %v11473_v53  ;;  %v11231_v55 = vunpack.c.h.bf16 %v11473_v53  ;;  %v11475_v56 = vld [vmem:[%s19078_s0 + $0x80] sm:$0xff]   ;;  %v14714_v57 = vld [vmem:[%s19077_s1 + $0x78] sm:$0xff]  }
   0xe   :  { %55 = vst [vmem:[#allocation2 + $0x168] sm:$0x1] %v14891_v1  ;;  %56 = vst [vmem:[#allocation2 + $0x180] sm:$0x1] %v14891_v1  ;;  %v11238_v58 = vunpack.c.l.bf16 %v11475_v56  ;;  %v11239_v59 = vunpack.c.h.bf16 %v11475_v56  ;;  %v11476_v60 = vld [vmem:[%s19078_s0 + $0x88] sm:$0xff]   ;;  %v11477_v61 = vld [vmem:[%s19078_s0 + $0x90] sm:$0xff]  }
   0xf   :  { %59 = vst [vmem:[#allocation2 + $0x1c8] sm:$0x1] %v14891_v1  ;;  %60 = vst [vmem:[#allocation2 + $0x1e0] sm:$0x1] %v14891_v1  ;;  %12249 = vmatpush3.bf16.msra.mxu0 %v14710_v4  ;;  %v11242_v62 = vunpack.c.l.bf16 %v11476_v60  ;;  %v11243_v63 = vunpack.c.h.bf16 %v11476_v60  ;;  %v11246_v0 = vunpack.c.l.bf16 %v11477_v61  ;;  %v11247_v2 = vunpack.c.h.bf16 %v11477_v61  ;;  %v11478_v3 = vld [vmem:[%s19078_s0 + $0x98] sm:$0xff]   ;;  %v11479_v6 = vld [vmem:[%s19078_s0 + $0xa0] sm:$0xff]  }
  0x10   :  { %61 = vst [vmem:[#allocation2 + $0x1f8] sm:$0x1] %v14891_v1  ;;  %62 = vst [vmem:[#allocation2 + $0x210] sm:$0x1] %v14891_v1  ;;  %12250 = vmatprep.subr.bf16.mxu0 %v14711_v16  ;;  %v11250_v4 = vunpack.c.l.bf16 %v11478_v3  ;;  %v11251_v5 = vunpack.c.h.bf16 %v11478_v3  ;;  %v14716_v7 = vld [vmem:[%s19077_s1] sm:$0xff]   ;;  %v11254_v8 = vunpack.c.l.bf16 %v11479_v6  ;;  %v14721_v24 = vld [vmem:[%s19077_s1 + $0x8] sm:$0xff]  }
  0x11   :  { %63 = vst [vmem:[#allocation2 + $0x228] sm:$0x1] %v14891_v1  ;;  %64 = vst [vmem:[#allocation2 + $0x240] sm:$0x1] %v14891_v1  ;;  %v14715_v14 = vld [vmem:[%s19078_s0] sm:$0xff]  ;;  %v11484_v25 = vld [vmem:[%s19078_s0 + $0xc8] sm:$0xff]  }
  0x12   :  { %65 = vst [vmem:[#allocation2 + $0x258] sm:$0x1] %v14891_v1  ;;  %66 = vst [vmem:[#allocation2 + $0x270] sm:$0x1] %v14891_v1  ;;  %v11487_v34 = vld [vmem:[%s19078_s0 + $0xe0] sm:$0xff]   ;;  %v14726_v37 = vld [vmem:[%s19077_s1 + $0x10] sm:$0xff]  }
  0x13   :  { %67 = vst [vmem:[#allocation2 + $0x288] sm:$0x1] %v14891_v1  ;;  %68 = vst [vmem:[#allocation2 + $0x2a0] sm:$0x1] %v14891_v1  ;;  %12251 = vmatpush3.bf16.msra.mxu0 %v14711_v16  ;;  %v14718_v44 = vld [vmem:[%s19078_s0 + $0x10] sm:$0xff]  ;;  %v14740_v50 = vld [vmem:[%s19077_s1 + $0x28] sm:$0xff]  }
  0x14   :  { %69 = vst [vmem:[#allocation2 + $0x2b8] sm:$0x1] %v14891_v1  ;;  %70 = vst [vmem:[#allocation2 + $0x2d0] sm:$0x1] %v14891_v1  ;;  %12252 = vmatprep.subr.bf16.mxu0 %v14712_v31  ;;  %v14724_v53 = vld [vmem:[%s19078_s0 + $0x38] sm:$0xff]  ;;  %v14725_v56 = vld [vmem:[%s19078_s0 + $0x40] sm:$0xff] }
  0x15   :  { %71 = vst [vmem:[#allocation2 + $0x2e8] sm:$0x1] %v14891_v1  ;;  %72 = vst [vmem:[#allocation2 + $0x300] sm:$0x1] %v14891_v1  ;;  %v14730_v60 = vld [vmem:[%s19078_s0 + $0x60] sm:$0xff]  ;;  %v14732_v61 = vld [vmem:[%s19078_s0 + $0x68] sm:$0xff] }
  0x16   :  { %73 = vst [vmem:[#allocation2 + $0x318] sm:$0x1] %v14891_v1  ;;  %74 = vst [vmem:[#allocation2 + $0x330] sm:$0x1] %v14891_v1  ;;  %v14734_v3 = vld [vmem:[%s19078_s0 + $0x80] sm:$0xff] }
  0x17   :  { %77 = vst [vmem:[#allocation2 + $0x29] sm:$0x1] %v14891_v1  ;;  %78 = vst [vmem:[#allocation2 + $0x41] sm:$0x1] %v14891_v1  ;;  %12253 = vmatpush3.bf16.msra.mxu0 %v14712_v31 }
  0x18   :  { %79 = vst [vmem:[#allocation2 + $0x59] sm:$0x1] %v14891_v1  ;;  %80 = vst [vmem:[#allocation2 + $0x71] sm:$0x1] %v14891_v1  ;;  %12254 = vmatprep.subr.bf16.mxu0 %v14713_v45 }
  0x19   :  { %81 = vst [vmem:[#allocation2 + $0x89] sm:$0x1] %v14891_v1  ;;  %82 = vst [vmem:[#allocation2 + $0xa1] sm:$0x1] %v14891_v1 }
  0x1a   :  { %83 = vst [vmem:[#allocation2 + $0xb9] sm:$0x1] %v14891_v1  ;;  %84 = vst [vmem:[#allocation2 + $0xd1] sm:$0x1] %v14891_v1 }
  0x1b   :  { %85 = vst [vmem:[#allocation2 + $0xe9] sm:$0x1] %v14891_v1  ;;  %86 = vst [vmem:[#allocation2 + $0x101] sm:$0x1] %v14891_v1  ;;  %12255 = vmatpush3.bf16.msra.mxu0 %v14713_v45  ;;  %v14719_v45 = vld [vmem:[%s19078_s0 + $0x18] sm:$0xff] }
  0x1c   :  { %87 = vst [vmem:[#allocation2 + $0x119] sm:$0x1] %v14891_v1  ;;  %88 = vst [vmem:[#allocation2 + $0x131] sm:$0x1] %v14891_v1  ;;  %12256 = vmatprep.subr.bf16.mxu0 %v14714_v57 }
  0x1d   :  { %89 = vst [vmem:[#allocation2 + $0x149] sm:$0x1] %v14891_v1  ;;  %90 = vst [vmem:[#allocation2 + $0x161] sm:$0x1] %v14891_v1 }
  0x1e   :  { %91 = vst [vmem:[#allocation2 + $0x179] sm:$0x1] %v14891_v1  ;;  %92 = vst [vmem:[#allocation2 + $0x191] sm:$0x1] %v14891_v1 }
  0x1f   :  { %95 = vst [vmem:[#allocation2 + $0x1d9] sm:$0x1] %v14891_v1  ;;  %96 = vst [vmem:[#allocation2 + $0x1f1] sm:$0x1] %v14891_v1  ;;  %12257 = vmatpush3.bf16.msra.mxu0 %v14714_v57  ;;  %v14727_v57 = vld [vmem:[%s19078_s0 + $0x48] sm:$0xff] }
  0x20   :  { %97 = vst [vmem:[#allocation2 + $0x209] sm:$0x1] %v14891_v1  ;;  %98 = vst [vmem:[#allocation2 + $0x221] sm:$0x1] %v14891_v1  ;;  %12322 = vmatprep.subr.bf16.mxu0 %v14716_v7 }
  0x21   :  { %99 = vst [vmem:[#allocation2 + $0x239] sm:$0x1] %v14891_v1  ;;  %100 = vst [vmem:[#allocation2 + $0x251] sm:$0x1] %v14891_v1 }
  0x22   :  { %101 = vst [vmem:[#allocation2 + $0x269] sm:$0x1] %v14891_v1  ;;  %102 = vst [vmem:[#allocation2 + $0x281] sm:$0x1] %v14891_v1  ;;  %12259 = vmatmul.mubr.bf16.vlgmr.msra.gmra.mrb[0].mxu0 %v14715_v14  ;;  %v14748_v14 = vld [vmem:[%s19078_s0 + $0xd8] sm:$0xff] }
  0x23   :  { %103 = vst [vmem:[#allocation2 + $0x299] sm:$0x1] %v14891_v1  ;;  %104 = vst [vmem:[#allocation2 + $0x2b1] sm:$0x1] %v14891_v1  ;;  %12323 = vmatpush3.bf16.msra.mxu0 %v14716_v7  ;;  %v14739_v7 = vld [vmem:[%s19078_s0 + $0xa0] sm:$0xff] }
  0x24   :  { %105 = vst [vmem:[#allocation2 + $0x2c9] sm:$0x1] %v14891_v1  ;;  %106 = vst [vmem:[#allocation2 + $0x2e1] sm:$0x1] %v14891_v1  ;;  %12324 = vmatprep.subr.bf16.mxu0 %v14721_v24 }
  0x25   :  { %107 = vst [vmem:[#allocation2 + $0x2f9] sm:$0x1] %v14891_v1  ;;  %108 = vst [vmem:[#allocation2 + $0x311] sm:$0x1] %v14891_v1 }
  0x26   :  { %109 = vst [vmem:[#allocation2 + $0x329] sm:$0x1] %v14891_v1  ;;  %110 = vst [vmem:[#allocation2 + $0x341] sm:$0x1] %v14891_v1 }
  0x27   :  { %40 = vst [vmem:[#allocation2] sm:$0x1] %v14891_v1  ;;  %76 = vst [vmem:[#allocation2 + $0x11] sm:$0x1] %v14891_v1  ;;  %12325 = vmatpush3.bf16.msra.mxu0 %v14721_v24 }
  0x28   :  { %57 = vst [vmem:[#allocation2 + $0x198] sm:$0x1] %v14891_v1  ;;  %58 = vst [vmem:[#allocation2 + $0x1b0] sm:$0x1] %v14891_v1  ;;  %12326 = vmatprep.subr.bf16.mxu0 %v14726_v37 }
  0x29   :  { %75 = vst [vmem:[#allocation2 + $0x348] sm:$0x1] %v14891_v1  ;;  %93 = vst [vmem:[#allocation2 + $0x1a9] sm:$0x1] %v14891_v1 }
  0x2a   :  { %94 = vst [vmem:[#allocation2 + $0x1c1] sm:$0x1] %v14891_v1  ;;  %111 = vst [vmem:[#allocation2 + $0x359] sm:$0x1] %v14891_v1 }
  0x2b   :  { %241 = vst [vmem:[#allocation2 + $0x19] sm:$0xff] %v11174_v9  ;;  %242 = vst [vmem:[#allocation2 + $0x21] sm:$0xff] %v11175_v10  ;;  %v11255_v9 = vunpack.c.h.bf16 %v11479_v6  ;;  %v11480_v10 = vld [vmem:[%s19078_s0 + $0xa8] sm:$0xff]   ;;  %12327 = vmatpush3.bf16.msra.mxu0 %v14726_v37  ;;  %v14738_v6 = vld [vmem:[%s19078_s0 + $0x98] sm:$0xff] }
  0x2c   :  { %243 = vst [vmem:[#allocation2 + $0x31] sm:$0xff] %v11178_v12  ;;  %244 = vst [vmem:[#allocation2 + $0x39] sm:$0xff] %v11179_v13  ;;  %v11258_v11 = vunpack.c.l.bf16 %v11480_v10  ;;  %v11259_v12 = vunpack.c.h.bf16 %v11480_v10  ;;  %v11481_v13 = vld [vmem:[%s19078_s0 + $0xb0] sm:$0xff]   ;;  %v14743_v10 = vld [vmem:[%s19078_s0 + $0xb8] sm:$0xff] }
  0x2d   :  { %245 = vst [vmem:[#allocation2 + $0x49] sm:$0xff] %v11182_v17  ;;  %246 = vst [vmem:[#allocation2 + $0x51] sm:$0xff] %v11183_v18  ;;  %v11262_v15 = vunpack.c.l.bf16 %v11481_v13  ;;  %v11263_v16 = vunpack.c.h.bf16 %v11481_v13  ;;  %v11482_v17 = vld [vmem:[%s19078_s0 + $0xb8] sm:$0xff]   ;;  %v11483_v18 = vld [vmem:[%s19078_s0 + $0xc0] sm:$0xff]  }
  0x2e   :  { %247 = vst [vmem:[#allocation2 + $0x61] sm:$0xff] %v11186_v19  ;;  %248 = vst [vmem:[#allocation2 + $0x69] sm:$0xff] %v11187_v20  ;;  %v14717_v19 = vld [vmem:[%s19078_s0 + $0x8] sm:$0xff]  ;;  %v11266_v20 = vunpack.c.l.bf16 %v11482_v17  ;;  %v11267_v21 = vunpack.c.h.bf16 %v11482_v17  ;;  %v14747_v13 = vld [vmem:[%s19078_s0 + $0xd0] sm:$0xff] }
  0x2f   :  { %249 = vst [vmem:[#allocation2 + $0x79] sm:$0xff] %v11190_v22  ;;  %250 = vst [vmem:[#allocation2 + $0x81] sm:$0xff] %v11191_v23  ;;  %v11270_v22 = vunpack.c.l.bf16 %v11483_v18  ;;  %v11271_v23 = vunpack.c.h.bf16 %v11483_v18  ;;  %12262 = vmatprep.mubr.bf16.mxu0 %v14717_v19  ;;  %v305_v17 = vld [vmem:[#allocation2] sm:$0xff]  ;;  %v14752_v18 = vld [vmem:[%s19078_s0 + $0xf0] sm:$0xff] }
  0x30   :  { %251 = vst [vmem:[#allocation2 + $0x91] sm:$0xff] %v11194_v26  ;;  %252 = vst [vmem:[#allocation2 + $0x99] sm:$0xff] %v11195_v27  ;;  %v11274_v26 = vunpack.c.l.bf16 %v11484_v25  ;;  %v11275_v27 = vunpack.c.h.bf16 %v11484_v25  ;;  %12263 = vmatmul.mubr.bf16.gmra.mrb[4].mxu0 %v14718_v44  ;;  %v369_v19 = vpack.c.bf16 %v14891_v1, %v305_v17 }
  0x31   :  { %253 = vst [vmem:[#allocation2 + $0xa9] sm:$0xff] %v11198_v28  ;;  %254 = vst [vmem:[#allocation2 + $0xb1] sm:$0xff] %v11199_v29  ;;  %v11485_v28 = vld [vmem:[%s19078_s0 + $0xd0] sm:$0xff]   ;;  %v11486_v29 = vld [vmem:[%s19078_s0 + $0xd8] sm:$0xff]   ;;  %12266 = vmatprep.mubr.bf16.mxu0 %v14719_v45 }
  0x32   :  { %255 = vst [vmem:[#allocation2 + $0xc1] sm:$0xff] %v11202_v32  ;;  %256 = vst [vmem:[#allocation2 + $0xc9] sm:$0xff] %v11203_v33  ;;  %v11278_v30 = vunpack.c.l.bf16 %v11485_v28  ;;  %v11279_v31 = vunpack.c.h.bf16 %v11485_v28  ;;  %v11282_v32 = vunpack.c.l.bf16 %v11486_v29  ;;  %v11283_v33 = vunpack.c.h.bf16 %v11486_v29 }
  0x33   :  { %257 = vst [vmem:[#allocation2 + $0xd9] sm:$0xff] %v11206_v35  ;;  %258 = vst [vmem:[#allocation2 + $0xe1] sm:$0xff] %v11207_v36  ;;  %v11286_v35 = vunpack.c.l.bf16 %v11487_v34  ;;  %v11287_v36 = vunpack.c.h.bf16 %v11487_v34 }
  0x34   :  { %259 = vst [vmem:[#allocation2 + $0xf1] sm:$0xff] %v11210_v38  ;;  %260 = vst [vmem:[#allocation2 + $0xf9] sm:$0xff] %v11211_v39  ;;  %v11488_v38 = vld [vmem:[%s19078_s0 + $0xe8] sm:$0xff]   ;;  %v11489_v39 = vld [vmem:[%s19078_s0 + $0xf0] sm:$0xff]  }
  0x35   :  { %261 = vst [vmem:[#allocation2 + $0x109] sm:$0xff] %v11214_v41  ;;  %262 = vst [vmem:[#allocation2 + $0x111] sm:$0xff] %v11215_v42  ;;  %v11290_v40 = vunpack.c.l.bf16 %v11488_v38  ;;  %v11291_v41 = vunpack.c.h.bf16 %v11488_v38  ;;  %v11294_v42 = vunpack.c.l.bf16 %v11489_v39  ;;  %v11295_v43 = vunpack.c.h.bf16 %v11489_v39  ;;  %v311_v1 = vld [vmem:[#allocation2 + $0x48] sm:$0xff]  ;;  %v313_v28 = vld [vmem:[#allocation2 + $0x60] sm:$0xff] }
  0x36   :  { %263 = vst [vmem:[#allocation2 + $0x121] sm:$0xff] %v11218_v46  ;;  %264 = vst [vmem:[#allocation2 + $0x129] sm:$0xff] %v11219_v47  ;;  %v14731_v46 = vld [vmem:[%s19077_s1 + $0x18] sm:$0xff]   ;;  %v14735_v47 = vld [vmem:[%s19077_s1 + $0x20] sm:$0xff]  }
  0x37   :  { %265 = vst [vmem:[#allocation2 + $0x139] sm:$0xff] %v11222_v48  ;;  %266 = vst [vmem:[#allocation2 + $0x141] sm:$0xff] %v11223_v49  ;;  %v14720_v48 = vld [vmem:[%s19078_s0 + $0x20] sm:$0xff]  ;;  %12328 = vmatprep.subr.bf16.mxu0 %v14731_v46  ;;  %v14722_v49 = vld [vmem:[%s19078_s0 + $0x28] sm:$0xff] }
  0x38   :  { %267 = vst [vmem:[#allocation2 + $0x151] sm:$0xff] %v11226_v51  ;;  %268 = vst [vmem:[#allocation2 + $0x159] sm:$0xff] %v11227_v52  ;;  %12329 = vmatpush3.bf16.msra.mxu0 %v14731_v46  ;;  %v14745_v51 = vld [vmem:[%s19077_s1 + $0x30] sm:$0xff]   ;;  %v314_v29 = vld [vmem:[#allocation2 + $0x68] sm:$0xff] }
  0x39   :  { %269 = vst [vmem:[#allocation2 + $0x169] sm:$0xff] %v11230_v54  ;;  %270 = vst [vmem:[#allocation2 + $0x171] sm:$0xff] %v11231_v55  ;;  %12330 = vmatprep.subr.bf16.mxu0 %v14735_v47  ;;  %12267 = vmatmul.mubr.bf16.gmra.mrb[8].mxu0 %v14720_v48  ;;  %v14723_v52 = vld [vmem:[%s19078_s0 + $0x30] sm:$0xff]  ;;  %v14750_v54 = vld [vmem:[%s19077_s1 + $0x38] sm:$0xff]  }
  0x3a   :  { %273 = vst [vmem:[#allocation2 + $0x1c9] sm:$0xff] %v11238_v58  ;;  %274 = vst [vmem:[#allocation2 + $0x1d1] sm:$0xff] %v11239_v59  ;;  %12270 = vmatprep.mubr.bf16.mxu0 %v14722_v49  ;;  %v14753_v55 = vld [vmem:[%s19077_s1 + $0x80] sm:$0xff]   ;;  %v14728_v58 = vld [vmem:[%s19078_s0 + $0x50] sm:$0xff] }
  0x3b   :  { %275 = vst [vmem:[#allocation2 + $0x1e1] sm:$0xff] %v11242_v62  ;;  %276 = vst [vmem:[#allocation2 + $0x1e9] sm:$0xff] %v11243_v63  ;;  %v14729_v59 = vld [vmem:[%s19078_s0 + $0x58] sm:$0xff]  ;;  %v14757_v38 = vld [vmem:[%s19077_s1 + $0xa0] sm:$0xff]  }
  0x3c   :  { %277 = vst [vmem:[#allocation2 + $0x1f9] sm:$0xff] %v11246_v0  ;;  %278 = vst [vmem:[#allocation2 + $0x201] sm:$0xff] %v11247_v2  ;;  %12331 = vmatpush3.bf16.msra.mxu0 %v14735_v47  ;;  %v449_v62 = vld [vmem:[#allocation2 + $0x1b1] sm:$0xff]  ;;  %v450_v63 = vld [vmem:[#allocation2 + $0x1b9] sm:$0xff] }
  0x3d   :  { %279 = vst [vmem:[#allocation2 + $0x211] sm:$0xff] %v11250_v4  ;;  %280 = vst [vmem:[#allocation2 + $0x219] sm:$0xff] %v11251_v5  ;;  %12332 = vmatprep.subr.bf16.mxu0 %v14740_v50  ;;  %v14733_v0 = vld [vmem:[%s19078_s0 + $0x70] sm:$0xff]  ;;  %v497_v2 = vpack.c.bf16 %v450_v63, %v449_v62  ;;  %v14736_v4 = vld [vmem:[%s19078_s0 + $0x88] sm:$0xff] }
  0x3e   :  { %281 = vst [vmem:[#allocation2 + $0x229] sm:$0xff] %v11254_v8  ;;  %282 = vst [vmem:[#allocation2 + $0x231] sm:$0xff] %v11255_v9  ;;  %v14737_v5 = vld [vmem:[%s19078_s0 + $0x90] sm:$0xff]  ;;  %v14741_v8 = vld [vmem:[%s19078_s0 + $0xa8] sm:$0xff] }
  0x3f   :  { %283 = vst [vmem:[#allocation2 + $0x241] sm:$0xff] %v11258_v11  ;;  %284 = vst [vmem:[#allocation2 + $0x249] sm:$0xff] %v11259_v12  ;;  %v14742_v9 = vld [vmem:[%s19078_s0 + $0xb0] sm:$0xff]  ;;  %v14744_v11 = vld [vmem:[%s19078_s0 + $0xc0] sm:$0xff] }
  0x40   :  { %285 = vst [vmem:[#allocation2 + $0x259] sm:$0xff] %v11262_v15  ;;  %286 = vst [vmem:[#allocation2 + $0x261] sm:$0xff] %v11263_v16  ;;  %12333 = vmatpush3.bf16.msra.mxu0 %v14740_v50  ;;  %v14746_v12 = vld [vmem:[%s19078_s0 + $0xc8] sm:$0xff]  ;;  %v14749_v15 = vld [vmem:[%s19078_s0 + $0xe0] sm:$0xff] }
  0x41   :  { %287 = vst [vmem:[#allocation2 + $0x271] sm:$0xff] %v11266_v20  ;;  %288 = vst [vmem:[#allocation2 + $0x279] sm:$0xff] %v11267_v21  ;;  %12334 = vmatprep.subr.bf16.mxu0 %v14745_v51  ;;  %12271 = vmatmul.mubr.bf16.gmra.mrb[12].mxu0 %v14723_v52  ;;  %v14751_v16 = vld [vmem:[%s19078_s0 + $0xe8] sm:$0xff]  ;;  %v307_v20 = vld [vmem:[#allocation2 + $0x18] sm:$0xff] }
  0x42   :  { %289 = vst [vmem:[#allocation2 + $0x289] sm:$0xff] %v11270_v22  ;;  %290 = vst [vmem:[#allocation2 + $0x291] sm:$0xff] %v11271_v23  ;;  %12274 = vmatprep.mubr.bf16.mxu0 %v14724_v53  ;;  %v308_v21 = vld [vmem:[#allocation2 + $0x20] sm:$0xff]  ;;  %v309_v22 = vld [vmem:[#allocation2 + $0x30] sm:$0xff] }
  0x43   :  { %291 = vst [vmem:[#allocation2 + $0x2a1] sm:$0xff] %v11274_v26  ;;  %292 = vst [vmem:[#allocation2 + $0x2a9] sm:$0xff] %v11275_v27  ;;  %v310_v23 = vld [vmem:[#allocation2 + $0x38] sm:$0xff]  ;;  %v15252_v24 = vpack.c.bf16 %v308_v21, %v307_v20  ;;  %v14754_v26 = vld [vmem:[%s19077_s1 + $0x88] sm:$0xff]  }
  0x44   :  { %293 = vst [vmem:[#allocation2 + $0x2b9] sm:$0xff] %v11278_v30  ;;  %294 = vst [vmem:[#allocation2 + $0x2c1] sm:$0xff] %v11279_v31  ;;  %12335 = vmatpush3.bf16.msra.mxu0 %v14745_v51  ;;  %v15254_v25 = vpack.c.bf16 %v310_v23, %v309_v22  ;;  %v312_v27 = vld [vmem:[#allocation2 + $0x50] sm:$0xff]  ;;  %v315_v34 = vld [vmem:[#allocation2 + $0x78] sm:$0xff] }
  0x45   :  { %295 = vst [vmem:[#allocation2 + $0x2d1] sm:$0xff] %v11282_v32  ;;  %296 = vst [vmem:[#allocation2 + $0x2d9] sm:$0xff] %v11283_v33  ;;  %12336 = vmatprep.subr.bf16.mxu0 %v14750_v54  ;;  %v14755_v30 = vld [vmem:[%s19077_s1 + $0x90] sm:$0xff]   ;;  %v15264_v31 = vpack.c.bf16 %v312_v27, %v311_v1  ;;  %v15266_v32 = vpack.c.bf16 %v314_v29, %v313_v28  ;;  %v14756_v33 = vld [vmem:[%s19077_s1 + $0x98] sm:$0xff]  }
  0x46   :  { %297 = vst [vmem:[#allocation2 + $0x2e9] sm:$0xff] %v11286_v35  ;;  %298 = vst [vmem:[#allocation2 + $0x2f1] sm:$0xff] %v11287_v36  ;;  %v316_v35 = vld [vmem:[#allocation2 + $0x80] sm:$0xff]  ;;  %v317_v36 = vld [vmem:[#allocation2 + $0x90] sm:$0xff] }
  0x47   :  { %299 = vst [vmem:[#allocation2 + $0x301] sm:$0xff] %v11290_v40  ;;  %300 = vst [vmem:[#allocation2 + $0x309] sm:$0xff] %v11291_v41  ;;  %v318_v37 = vld [vmem:[#allocation2 + $0x98] sm:$0xff]  ;;  %v15276_v39 = vpack.c.bf16 %v316_v35, %v315_v34  ;;  %v14758_v41 = vld [vmem:[%s19077_s1 + $0xa8] sm:$0xff]  }
  0x48   :  { %301 = vst [vmem:[#allocation2 + $0x319] sm:$0xff] %v11294_v42  ;;  %302 = vst [vmem:[#allocation2 + $0x321] sm:$0xff] %v11295_v43  ;;  %12337 = vmatpush3.bf16.msra.mxu0 %v14750_v54  ;;  %v15278_v40 = vpack.c.bf16 %v318_v37, %v317_v36  ;;  %v319_v42 = vld [vmem:[#allocation2 + $0xa8] sm:$0xff]  ;;  %v320_v43 = vld [vmem:[#allocation2 + $0xb0] sm:$0xff] }
  0x49   :  { %12402 = vmatprep.subr.bf16.mxu0 %v14753_v55  ;;  %12275 = vmatmul.mubr.bf16.gmra.mrb[16].mxu0 %v14725_v56  ;;  %v321_v44 = vld [vmem:[#allocation2 + $0xc0] sm:$0xff]  ;;  %v322_v45 = vld [vmem:[#allocation2 + $0xc8] sm:$0xff]  ;;  %v14759_v46 = vld [vmem:[%s19077_s1 + $0xb0] sm:$0xff]   ;;  %v15288_v47 = vpack.c.bf16 %v320_v43, %v319_v42 }
  0x4a   :  { %12278 = vmatprep.mubr.bf16.mxu0 %v14727_v57  ;;  %v15290_v48 = vpack.c.bf16 %v322_v45, %v321_v44  ;;  %v14760_v49 = vld [vmem:[%s19077_s1 + $0xb8] sm:$0xff]   ;;  %v324_v51 = vld [vmem:[#allocation2 + $0xe0] sm:$0xff]  ;;  %v325_v52 = vld [vmem:[#allocation2 + $0xf0] sm:$0xff] }
  0x4b   :  { %v323_v50 = vld [vmem:[#allocation2 + $0xd8] sm:$0xff]  ;;  %v15300_v54 = vld [vmem:[%s19077_s1 + $0xc0] sm:$0xff]   ;;  %v327_v57 = vld [vmem:[#allocation2 + $0x108] sm:$0xff] }
  0x4c   :  { %v326_v53 = vld [vmem:[#allocation2 + $0xf8] sm:$0xff]  ;;  %v345_v20 = vld [vmem:[#allocation2 + $0x210] sm:$0xff]  ;;  %v349_v27 = vld [vmem:[#allocation2 + $0x240] sm:$0xff] }
  0x4d   :  { %v15304_v56 = vpack.c.bf16 %v326_v53, %v325_v52  ;;  %v331_v63 = vld [vmem:[#allocation2 + $0x138] sm:$0xff]  ;;  %v348_v1 = vld [vmem:[#allocation2 + $0x230] sm:$0xff]  ;;  %v350_v28 = vld [vmem:[#allocation2 + $0x248] sm:$0xff] }
  0x4e   :  { %v346_v21 = vld [vmem:[#allocation2 + $0x218] sm:$0xff]  ;;  %v352_v34 = vld [vmem:[#allocation2 + $0x260] sm:$0xff]  ;;  %v353_v35 = vld [vmem:[#allocation2 + $0x270] sm:$0xff] }
  0x4f   :  { %v15332_v23 = vpack.c.bf16 %v346_v21, %v345_v20  ;;  %v354_v36 = vld [vmem:[#allocation2 + $0x278] sm:$0xff]  ;;  %v356_v42 = vld [vmem:[#allocation2 + $0x290] sm:$0xff]  ;;  %v357_v43 = vld [vmem:[#allocation2 + $0x2a0] sm:$0xff] }
  0x50   :  { %v358_v44 = vld [vmem:[#allocation2 + $0x2a8] sm:$0xff]  ;;  %v362_v52 = vld [vmem:[#allocation2 + $0x2d8] sm:$0xff] }
  0x51   :  { %12279 = vmatmul.mubr.bf16.gmra.mrb[20].mxu0 %v14728_v58  ;;  %v328_v58 = vld [vmem:[#allocation2 + $0x110] sm:$0xff]  ;;  %v14762_v20 = vld [vmem:[%s19077_s1 + $0xc8] sm:$0xff]  }
  0x52   :  { %12282 = vmatprep.mubr.bf16.mxu0 %v14729_v59  ;;  %v329_v59 = vld [vmem:[#allocation2 + $0x120] sm:$0xff]  ;;  %v1210_v21 = vld [vmem:[#allocation2 + $0x4a] sm:$0xff] }
  0x59   :  { %12283 = vmatmul.mubr.bf16.gmra.mrb[24].mxu0 %v14730_v60  ;;  %v330_v60 = vld [vmem:[#allocation2 + $0x128] sm:$0xff] }
  0x5a   :  { %12286 = vmatprep.mubr.bf16.mxu0 %v14732_v61  ;;  %v15309_v61 = vpack.c.bf16 %v328_v58, %v327_v57  ;;  %v15311_v62 = vpack.c.bf16 %v330_v60, %v329_v59  ;;  %v363_v58 = vld [vmem:[#allocation2 + $0x2e8] sm:$0xff]  ;;  %v364_v59 = vld [vmem:[#allocation2 + $0x2f0] sm:$0xff]  ;;  %v365_v60 = vld [vmem:[#allocation2 + $0x300] sm:$0xff] }
  0x61   :  { %12287 = vmatmul.mubr.bf16.gmra.mrb[28].mxu0 %v14733_v0  ;;  %v332_v0 = vld [vmem:[#allocation2 + $0x140] sm:$0xff] }
  0x62   :  { %12290 = vmatprep.mubr.bf16.mxu0 %v497_v2  ;;  %v333_v2 = vld [vmem:[#allocation2 + $0x150] sm:$0xff] }
  0x69   :  { %12291 = vmatmul.mubr.bf16.gmra.mrb[32].mxu0 %v14734_v3  ;;  %v334_v3 = vld [vmem:[#allocation2 + $0x158] sm:$0xff] }
  0x6a   :  { %12294 = vmatprep.mubr.bf16.mxu0 %v14736_v4  ;;  %v15315_v4 = vpack.c.bf16 %v332_v0, %v331_v63  ;;  %v366_v63 = vld [vmem:[#allocation2 + $0x308] sm:$0xff]  ;;  %v15360_v0 = vpack.c.bf16 %v364_v59, %v363_v58 }
  0x6b   :  { %v1220_v58 = vld [vmem:[#allocation2 + $0xc2] sm:$0xff]  ;;  %v1221_v59 = vld [vmem:[#allocation2 + $0xca] sm:$0xff] }
  0x71   :  { %12295 = vmatmul.mubr.bf16.gmra.mrb[36].mxu0 %v14737_v5  ;;  %v15317_v5 = vpack.c.bf16 %v334_v3, %v333_v2  ;;  %v15362_v2 = vpack.c.bf16 %v366_v63, %v365_v60  ;;  %v367_v3 = vld [vmem:[#allocation2 + $0x318] sm:$0xff]  ;;  %v14767_v60 = vld [vmem:[%s19077_s1 + $0xf0] sm:$0xff]  }
  0x72   :  { %12298 = vmatprep.mubr.bf16.mxu0 %v14738_v6  ;;  %v335_v6 = vld [vmem:[#allocation2 + $0x168] sm:$0xff] }
  0x79   :  { %12299 = vmatmul.mubr.bf16.gmra.mrb[40].mxu0 %v14739_v7  ;;  %v336_v7 = vld [vmem:[#allocation2 + $0x170] sm:$0xff] }
  0x7a   :  { %12302 = vmatprep.mubr.bf16.mxu0 %v14741_v8  ;;  %v337_v8 = vld [vmem:[#allocation2 + $0x1b0] sm:$0xff] }
  0x81   :  { %12303 = vmatmul.mubr.bf16.gmra.mrb[44].mxu0 %v14742_v9  ;;  %v15321_v9 = vpack.c.bf16 %v336_v7, %v335_v6  ;;  %v368_v6 = vld [vmem:[#allocation2 + $0x320] sm:$0xff] }
  0x82   :  { %12306 = vmatprep.mubr.bf16.mxu0 %v14743_v10  ;;  %v14887_v10 = vld [vmem:[#allocation2 + $0x8] sm:$0xff] }
  0x83   :  { %v1204_v7 = vld [vmem:[#allocation2 + $0x2] sm:$0xff] }
  0x89   :  { %12307 = vmatmul.mubr.bf16.gmra.mrb[48].mxu0 %v14744_v11  ;;  %v385_v11 = vpack.c.bf16 %v14887_v10, %v337_v8  ;;  %v1205_v8 = vld [vmem:[#allocation2 + $0xa] sm:$0xff]  ;;  %v15366_v10 = vpack.c.bf16 %v368_v6, %v367_v3  ;;  %v15408_v3 = vpack.c.bf16 %v1221_v59, %v1220_v58  ;;  %v14768_v6 = vld [vmem:[%s19077_s1 + $0xf8] sm:$0xff]  }
  0x8a   :  { %12310 = vmatprep.mubr.bf16.mxu0 %v14746_v12  ;;  %v339_v12 = vld [vmem:[#allocation2 + $0x1c8] sm:$0xff]  ;;  %v1235_v59 = vld [vmem:[#allocation2 + $0x172] sm:$0xff] }
  0x8b   :  { %v1234_v58 = vld [vmem:[#allocation2 + $0x16a] sm:$0xff] }
  0x91   :  { %12311 = vmatmul.mubr.bf16.gmra.mrb[52].mxu0 %v14747_v13  ;;  %v340_v13 = vld [vmem:[#allocation2 + $0x1d0] sm:$0xff] }
  0x92   :  { %12314 = vmatprep.mubr.bf16.mxu0 %v14748_v14  ;;  %v341_v14 = vld [vmem:[#allocation2 + $0x1e0] sm:$0xff] }
  0x99   :  { %12315 = vmatmul.mubr.bf16.gmra.mrb[56].mxu0 %v14749_v15  ;;  %v342_v15 = vld [vmem:[#allocation2 + $0x1e8] sm:$0xff] }
  0x9a   :  { %12318 = vmatprep.mubr.bf16.mxu0 %v14751_v16  ;;  %v15324_v16 = vpack.c.bf16 %v340_v13, %v339_v12  ;;  %v15326_v17 = vpack.c.bf16 %v342_v15, %v341_v14  ;;  %v1206_v12 = vld [vmem:[#allocation2 + $0x1a] sm:$0xff]  ;;  %v1207_v13 = vld [vmem:[#allocation2 + $0x22] sm:$0xff]  ;;  %v1208_v14 = vld [vmem:[#allocation2 + $0x32] sm:$0xff] }
  0x9b   :  { %v1209_v15 = vld [vmem:[#allocation2 + $0x3a] sm:$0xff] }
  0xa1   :  { %12319 = vmatmul.mubr.bf16.gmra.mrb[60].mxu0 %v14752_v18  ;;  %v343_v18 = vld [vmem:[#allocation2 + $0x1f8] sm:$0xff] }
  0xa2   :  { %12338 = vmatprep.mubr.bf16.mxu0 %v369_v19  ;;  %v344_v19 = vld [vmem:[#allocation2 + $0x200] sm:$0xff] }
  0xa3   :  { %v15330_v22 = vpack.c.bf16 %v344_v19, %v343_v18  ;;  %v15369_v18 = vpack.c.bf16 %v1207_v13, %v1206_v12  ;;  %v15371_v19 = vpack.c.bf16 %v1209_v15, %v1208_v14  ;;  %v1225_v12 = vld [vmem:[#allocation2 + $0xfa] sm:$0xff] }
  0xa4   :  { %v15418_v13 = vld [vmem:[%s19077_s1 + $0x100] sm:$0xff]  }
  0xa9   :  { %12339 = vmatmul.mubr.bf16.vlgmr.msra.gmra.mrb[0].mxu0 %v15252_v24 }
  0xaa   :  { %12403 = vmatpush3.bf16.msra.mxu0 %v14753_v55  ;;  %12342 = vmatprep.mubr.bf16.mxu0 %v15254_v25  ;;  %v15302_v55 = vpack.c.bf16 %v324_v51, %v323_v50  ;;  %v360_v50 = vld [vmem:[#allocation2 + $0x2c0] sm:$0xff]  ;;  %v361_v51 = vld [vmem:[#allocation2 + $0x2d0] sm:$0xff] }
  0xab   :  { %12404 = vmatprep.subr.bf16.mxu0 %v14754_v26  ;;  %v15356_v57 = vpack.c.bf16 %v362_v52, %v361_v51  ;;  %v1218_v51 = vld [vmem:[#allocation2 + $0xaa] sm:$0xff]  ;;  %v1219_v52 = vld [vmem:[#allocation2 + $0xb2] sm:$0xff] }
  0xac   :  { %v15406_v63 = vpack.c.bf16 %v1219_v52, %v1218_v51 }
  0xae   :  { %12405 = vmatpush3.bf16.msra.mxu0 %v14754_v26  ;;  %v347_v26 = vld [vmem:[#allocation2 + $0x228] sm:$0xff] }
  0xaf   :  { %12406 = vmatprep.subr.bf16.mxu0 %v14755_v30  ;;  %v15336_v29 = vpack.c.bf16 %v348_v1, %v347_v26  ;;  %v1211_v26 = vld [vmem:[#allocation2 + $0x52] sm:$0xff]  ;;  %v1212_v1 = vld [vmem:[#allocation2 + $0x62] sm:$0xff] }
  0xb1   :  { %12343 = vmatmul.mubr.bf16.gmra.mrb[4].mxu0 %v15264_v31 }
  0xb2   :  { %12346 = vmatprep.mubr.bf16.mxu0 %v15266_v32  ;;  %12407 = vmatpush3.bf16.msra.mxu0 %v14755_v30  ;;  %v15338_v30 = vpack.c.bf16 %v350_v28, %v349_v27  ;;  %v1213_v27 = vld [vmem:[#allocation2 + $0x6a] sm:$0xff] }
  0xb3   :  { %12408 = vmatprep.subr.bf16.mxu0 %v14756_v33  ;;  %v14763_v28 = vld [vmem:[%s19077_s1 + $0xd0] sm:$0xff]  }
  0xb6   :  { %12409 = vmatpush3.bf16.msra.mxu0 %v14756_v33  ;;  %v351_v33 = vld [vmem:[#allocation2 + $0x258] sm:$0xff] }
  0xb7   :  { %12410 = vmatprep.subr.bf16.mxu0 %v14757_v38  ;;  %v15342_v37 = vpack.c.bf16 %v352_v34, %v351_v33  ;;  %v15382_v33 = vpack.c.bf16 %v1211_v26, %v1210_v21  ;;  %v15384_v34 = vpack.c.bf16 %v1213_v27, %v1212_v1  ;;  %v1227_v21 = vld [vmem:[#allocation2 + $0x112] sm:$0xff]  ;;  %v1228_v26 = vld [vmem:[#allocation2 + $0x122] sm:$0xff]  ;;  %v1229_v1 = vld [vmem:[#allocation2 + $0x12a] sm:$0xff] }
  0xb9   :  { %12347 = vmatmul.mubr.bf16.gmra.mrb[8].mxu0 %v15276_v39 }
  0xba   :  { %12350 = vmatprep.mubr.bf16.mxu0 %v15278_v40  ;;  %12411 = vmatpush3.bf16.msra.mxu0 %v14757_v38  ;;  %v15344_v38 = vpack.c.bf16 %v354_v36, %v353_v35  ;;  %v1214_v35 = vld [vmem:[#allocation2 + $0x7a] sm:$0xff]  ;;  %v1215_v36 = vld [vmem:[#allocation2 + $0x82] sm:$0xff] }
  0xbb   :  { %12412 = vmatprep.subr.bf16.mxu0 %v14758_v41 }
  0xbe   :  { %12413 = vmatpush3.bf16.msra.mxu0 %v14758_v41  ;;  %v355_v41 = vld [vmem:[#allocation2 + $0x288] sm:$0xff] }
  0xbf   :  { %12414 = vmatprep.subr.bf16.mxu0 %v14759_v46  ;;  %v15348_v45 = vpack.c.bf16 %v356_v42, %v355_v41  ;;  %v1216_v41 = vld [vmem:[#allocation2 + $0x92] sm:$0xff]  ;;  %v1217_v42 = vld [vmem:[#allocation2 + $0x9a] sm:$0xff] }
  0xc1   :  { %12351 = vmatmul.mubr.bf16.gmra.mrb[12].mxu0 %v15288_v47 }
  0xc2   :  { %12354 = vmatprep.mubr.bf16.mxu0 %v15290_v48  ;;  %12415 = vmatpush3.bf16.msra.mxu0 %v14759_v46  ;;  %v15350_v46 = vpack.c.bf16 %v358_v44, %v357_v43  ;;  %v14765_v43 = vld [vmem:[%s19077_s1 + $0xe0] sm:$0xff]   ;;  %v15394_v44 = vpack.c.bf16 %v1215_v36, %v1214_v35  ;;  %v1232_v36 = vld [vmem:[#allocation2 + $0x152] sm:$0xff] }
  0xc3   :  { %12416 = vmatprep.subr.bf16.mxu0 %v14760_v49  ;;  %v1231_v35 = vld [vmem:[#allocation2 + $0x142] sm:$0xff] }
  0xc6   :  { %12417 = vmatpush3.bf16.msra.mxu0 %v14760_v49  ;;  %v359_v49 = vld [vmem:[#allocation2 + $0x2b8] sm:$0xff] }
  0xc7   :  { %12482 = vmatprep.subr.bf16.mxu0 %v15300_v54  ;;  %v15354_v53 = vpack.c.bf16 %v360_v50, %v359_v49  ;;  %v15396_v49 = vpack.c.bf16 %v1217_v42, %v1216_v41  ;;  %v14766_v50 = vld [vmem:[%s19077_s1 + $0xe8] sm:$0xff]   ;;  %v1233_v41 = vld [vmem:[#allocation2 + $0x15a] sm:$0xff] }
  0xc8   :  { %v11474_v42 = vld [vmem:[%s19078_s0 + $0x78] sm:$0xff]   ;;  %v15438_v52 = vpack.c.bf16 %v1233_v41, %v1232_v36 }
  0xc9   :  { %12355 = vmatmul.mubr.bf16.gmra.mrb[16].mxu0 %v15302_v55  ;;  %v11235_v51 = vunpack.c.h.bf16 %v11474_v42  ;;  %v1244_v36 = vld [vmem:[#allocation2 + $0x212] sm:$0xff]  ;;  %v1245_v41 = vld [vmem:[#allocation2 + $0x21a] sm:$0xff] }
  0xca   :  { %12358 = vmatprep.mubr.bf16.mxu0 %v15304_v56 }
  0xcb   :  { %272 = vst [vmem:[#allocation2 + $0x189] sm:$0xff] %v11235_v51  ;;  %v1246_v51 = vld [vmem:[#allocation2 + $0x22a] sm:$0xff] }
  0xd1   :  { %12359 = vmatmul.mubr.bf16.gmra.mrb[20].mxu0 %v15309_v61 }
  0xd2   :  { %12362 = vmatprep.mubr.bf16.mxu0 %v15311_v62 }
  0xd9   :  { %12363 = vmatmul.mubr.bf16.gmra.mrb[24].mxu0 %v15315_v4 }
  0xda   :  { %12366 = vmatprep.mubr.bf16.mxu0 %v15317_v5 }
  0xe1   :  { %12367 = vmatmul.mubr.bf16.gmra.mrb[28].mxu0 %v15321_v9 }
  0xe2   :  { %12370 = vmatprep.mubr.bf16.mxu0 %v385_v11  ;;  %v1268_v11 = vpack.c.bf16 %v1205_v8, %v1204_v7  ;;  %v1222_v7 = vld [vmem:[#allocation2 + $0xda] sm:$0xff]  ;;  %v1223_v8 = vld [vmem:[#allocation2 + $0xe2] sm:$0xff] }
  0xe3   :  { %v15420_v14 = vpack.c.bf16 %v1223_v8, %v1222_v7  ;;  %v15442_v7 = vpack.c.bf16 %v1235_v59, %v1234_v58  ;;  %v1247_v58 = vld [vmem:[#allocation2 + $0x232] sm:$0xff]  ;;  %v1248_v59 = vld [vmem:[#allocation2 + $0x242] sm:$0xff] }
  0xe9   :  { %12371 = vmatmul.mubr.bf16.gmra.mrb[32].mxu0 %v15324_v16 }
  0xea   :  { %12374 = vmatprep.mubr.bf16.mxu0 %v15326_v17 }
  0xf1   :  { %12375 = vmatmul.mubr.bf16.gmra.mrb[36].mxu0 %v15330_v22 }
  0xf2   :  { %12378 = vmatprep.mubr.bf16.mxu0 %v15332_v23 }
  0xf9   :  { %12379 = vmatmul.mubr.bf16.gmra.mrb[40].mxu0 %v15336_v29 }
  0xfa   :  { %12382 = vmatprep.mubr.bf16.mxu0 %v15338_v30 }
 0x101   :  { %12383 = vmatmul.mubr.bf16.gmra.mrb[44].mxu0 %v15342_v37 }
 0x102   :  { %12386 = vmatprep.mubr.bf16.mxu0 %v15344_v38 }
 0x109   :  { %12387 = vmatmul.mubr.bf16.gmra.mrb[48].mxu0 %v15348_v45 }
 0x10a   :  { %12390 = vmatprep.mubr.bf16.mxu0 %v15350_v46 }
 0x111   :  { %12391 = vmatmul.mubr.bf16.gmra.mrb[52].mxu0 %v15354_v53 }
 0x112   :  { %12394 = vmatprep.mubr.bf16.mxu0 %v15356_v57 }
 0x119   :  { %12395 = vmatmul.mubr.bf16.gmra.mrb[56].mxu0 %v15360_v0 }
 0x11a   :  { %12398 = vmatprep.mubr.bf16.mxu0 %v15362_v2 }
 0x121   :  { %12399 = vmatmul.mubr.bf16.gmra.mrb[60].mxu0 %v15366_v10 }
 0x122   :  { %12418 = vmatprep.mubr.bf16.mxu0 %v1268_v11  ;;  %v1224_v11 = vld [vmem:[#allocation2 + $0xf2] sm:$0xff] }
 0x123   :  { %v15422_v15 = vpack.c.bf16 %v1225_v12, %v1224_v11  ;;  %v1238_v11 = vld [vmem:[#allocation2 + $0x1ca] sm:$0xff]  ;;  %v1239_v12 = vld [vmem:[#allocation2 + $0x1d2] sm:$0xff] }
 0x129   :  { %12419 = vmatmul.mubr.bf16.vlgmr.msra.gmra.mrb[0].mxu0 %v15369_v18 }
 0x12a   :  { %12483 = vmatpush3.bf16.msra.mxu0 %v15300_v54  ;;  %12422 = vmatprep.mubr.bf16.mxu0 %v15371_v19  ;;  %v14764_v54 = vld [vmem:[%s19077_s1 + $0xd8] sm:$0xff]  }
 0x12b   :  { %12484 = vmatprep.subr.bf16.mxu0 %v14762_v20 }
 0x12e   :  { %12485 = vmatpush3.bf16.msra.mxu0 %v14762_v20  ;;  %v1226_v20 = vld [vmem:[#allocation2 + $0x10a] sm:$0xff] }
 0x12f   :  { %12486 = vmatprep.subr.bf16.mxu0 %v14763_v28  ;;  %v15427_v27 = vpack.c.bf16 %v1227_v21, %v1226_v20  ;;  %v1240_v20 = vld [vmem:[#allocation2 + $0x1e2] sm:$0xff]  ;;  %v1241_v21 = vld [vmem:[#allocation2 + $0x1ea] sm:$0xff] }
 0x131   :  { %12423 = vmatmul.mubr.bf16.gmra.mrb[4].mxu0 %v15382_v33 }
 0x132   :  { %12426 = vmatprep.mubr.bf16.mxu0 %v15384_v34  ;;  %12487 = vmatpush3.bf16.msra.mxu0 %v14763_v28  ;;  %v15429_v28 = vpack.c.bf16 %v1229_v1, %v1228_v26  ;;  %v15445_v26 = vpack.c.bf16 %v1239_v12, %v1238_v11  ;;  %v15447_v1 = vpack.c.bf16 %v1241_v21, %v1240_v20  ;;  %v1250_v11 = vld [vmem:[#allocation2 + $0x25a] sm:$0xff]  ;;  %v1251_v12 = vld [vmem:[#allocation2 + $0x262] sm:$0xff]  ;;  %v1252_v20 = vld [vmem:[#allocation2 + $0x272] sm:$0xff] }
 0x133   :  { %12488 = vmatprep.subr.bf16.mxu0 %v14764_v54  ;;  %v1253_v21 = vld [vmem:[#allocation2 + $0x27a] sm:$0xff] }
 0x136   :  { %12489 = vmatpush3.bf16.msra.mxu0 %v14764_v54  ;;  %v1230_v54 = vld [vmem:[#allocation2 + $0x13a] sm:$0xff] }
 0x137   :  { %12490 = vmatprep.subr.bf16.mxu0 %v14765_v43 }
 0x139   :  { %12427 = vmatmul.mubr.bf16.gmra.mrb[8].mxu0 %v15394_v44 }
 0x13a   :  { %12430 = vmatprep.mubr.bf16.mxu0 %v15396_v49  ;;  %12491 = vmatpush3.bf16.msra.mxu0 %v14765_v43  ;;  %v15436_v43 = vpack.c.bf16 %v1231_v35, %v1230_v54  ;;  %v1242_v54 = vld [vmem:[#allocation2 + $0x1fa] sm:$0xff]  ;;  %v1243_v35 = vld [vmem:[#allocation2 + $0x202] sm:$0xff] }
 0x13b   :  { %12492 = vmatprep.subr.bf16.mxu0 %v14766_v50 }
 0x13e   :  { %12493 = vmatpush3.bf16.msra.mxu0 %v14766_v50  ;;  %v11234_v50 = vunpack.c.l.bf16 %v11474_v42  ;;  %v15451_v42 = vpack.c.bf16 %v1243_v35, %v1242_v54  ;;  %v15463_v54 = vpack.c.bf16 %v1251_v12, %v1250_v11  ;;  %v15465_v35 = vpack.c.bf16 %v1253_v21, %v1252_v20  ;;  %v1258_v11 = vld [vmem:[#allocation2 + $0x2ba] sm:$0xff]  ;;  %v1259_v12 = vld [vmem:[#allocation2 + $0x2c2] sm:$0xff]  ;;  %v1260_v20 = vld [vmem:[#allocation2 + $0x2d2] sm:$0xff] }
 0x13f   :  { %12494 = vmatprep.subr.bf16.mxu0 %v14767_v60  ;;  %v1261_v21 = vld [vmem:[#allocation2 + $0x2da] sm:$0xff] }
 0x140   :  { %271 = vst [vmem:[#allocation2 + $0x181] sm:$0xff] %v11234_v50  ;;  %v15453_v50 = vpack.c.bf16 %v1245_v41, %v1244_v36  ;;  %19201 = vst [vmem:[#allocation5_spill] sm:$0xff] %v15463_v54  ;;  %v1254_v36 = vld [vmem:[#allocation2 + $0x28a] sm:$0xff]  ;;  %v1255_v41 = vld [vmem:[#allocation2 + $0x292] sm:$0xff] }
 0x141   :  { %12431 = vmatmul.mubr.bf16.gmra.mrb[12].mxu0 %v15406_v63  ;;  %19202 = vst [vmem:[#allocation6_spill] sm:$0xff] %v15465_v35 }
 0x142   :  { %12434 = vmatprep.mubr.bf16.mxu0 %v15408_v3  ;;  %12495 = vmatpush3.bf16.msra.mxu0 %v14767_v60  ;;  %v1236_v60 = vld [vmem:[#allocation2 + $0x1b2] sm:$0xff] }
 0x143   :  { %12496 = vmatprep.subr.bf16.mxu0 %v14768_v6 }
 0x146   :  { %12497 = vmatpush3.bf16.msra.mxu0 %v14768_v6  ;;  %v1237_v6 = vld [vmem:[#allocation2 + $0x1ba] sm:$0xff] }
 0x147   :  { %12562 = vmatprep.subr.bf16.mxu0 %v15418_v13  ;;  %v1284_v8 = vpack.c.bf16 %v1237_v6, %v1236_v60  ;;  %v1249_v60 = vld [vmem:[#allocation2 + $0x24a] sm:$0xff]  ;;  %v15457_v6 = vpack.c.bf16 %v1247_v58, %v1246_v51  ;;  %v1256_v51 = vld [vmem:[#allocation2 + $0x2a2] sm:$0xff] }
 0x148   :  { %v1257_v58 = vld [vmem:[#allocation2 + $0x2aa] sm:$0xff] }
 0x149   :  { %12435 = vmatmul.mubr.bf16.gmra.mrb[16].mxu0 %v15420_v14  ;;  %19199 = vst [vmem:[#allocation3_spill] sm:$0xff] %v15457_v6 }
 0x14a   :  { %12438 = vmatprep.mubr.bf16.mxu0 %v15422_v15 }
 0x151   :  { %12439 = vmatmul.mubr.bf16.gmra.mrb[20].mxu0 %v15427_v27 }
 0x152   :  { %12442 = vmatprep.mubr.bf16.mxu0 %v15429_v28 }
 0x159   :  { %12443 = vmatmul.mubr.bf16.gmra.mrb[24].mxu0 %v15436_v43 }
 0x15a   :  { %12446 = vmatprep.mubr.bf16.mxu0 %v15438_v52 }
 0x161   :  { %12447 = vmatmul.mubr.bf16.gmra.mrb[28].mxu0 %v15442_v7 }
 0x162   :  { %12450 = vmatprep.mubr.bf16.mxu0 %v1284_v8  ;;  %v15459_v8 = vpack.c.bf16 %v1249_v60, %v1248_v59  ;;  %v15469_v59 = vpack.c.bf16 %v1255_v41, %v1254_v36  ;;  %v15471_v60 = vpack.c.bf16 %v1257_v58, %v1256_v51  ;;  %v1262_v36 = vld [vmem:[#allocation2 + $0x2ea] sm:$0xff]  ;;  %v1263_v41 = vld [vmem:[#allocation2 + $0x2f2] sm:$0xff]  ;;  %v1264_v51 = vld [vmem:[#allocation2 + $0x302] sm:$0xff] }
 0x163   :  { %v1265_v58 = vld [vmem:[#allocation2 + $0x30a] sm:$0xff] }
 0x164   :  { %19200 = vst [vmem:[#allocation4_spill] sm:$0xff] %v15459_v8  ;;  %19203 = vst [vmem:[#allocation7_spill] sm:$0xff] %v15469_v59 }
 0x165   :  { %19204 = vst [vmem:[#allocation8_spill] sm:$0xff] %v15471_v60 }
 0x169   :  { %12451 = vmatmul.mubr.bf16.gmra.mrb[32].mxu0 %v15445_v26 }
 0x16a   :  { %12454 = vmatprep.mubr.bf16.mxu0 %v15447_v1 }
 0x171   :  { %12455 = vmatmul.mubr.bf16.gmra.mrb[36].mxu0 %v15451_v42 }
 0x172   :  { %12458 = vmatprep.mubr.bf16.mxu0 %v15453_v50 }
 0x179   :  { %12459 = vmatmul.mubr.bf16.gmra.mrb[40].mxu0 %v15457_v6 }
 0x17a   :  { %12462 = vmatprep.mubr.bf16.mxu0 %v15459_v8  ;;  %v15475_v8 = vpack.c.bf16 %v1259_v12, %v1258_v11  ;;  %v15486_v11 = vpack.c.bf16 %v1265_v58, %v1264_v51  ;;  %v1266_v12 = vld [vmem:[#allocation2 + $0x31a] sm:$0xff] }
 0x17b   :  { %v14782_v51 = vld [vmem:[%s19077_s1 + $0x160] sm:$0xff]  }
 0x181   :  { %12463 = vmatmul.mubr.bf16.gmra.mrb[44].mxu0 %v15463_v54  ;;  %v15477_v54 = vpack.c.bf16 %v1261_v21, %v1260_v20  ;;  %v1267_v20 = vld [vmem:[#allocation2 + $0x322] sm:$0xff] }
 0x182   :  { %12466 = vmatprep.mubr.bf16.mxu0 %v15465_v35  ;;  %v15490_v21 = vpack.c.bf16 %v1267_v20, %v1266_v12  ;;  %v14783_v20 = vld [vmem:[%s19077_s1 + $0x168] sm:$0xff]  }
 0x189   :  { %12467 = vmatmul.mubr.bf16.gmra.mrb[48].mxu0 %v15469_v59  ;;  %v15484_v59 = vpack.c.bf16 %v1263_v41, %v1262_v36  ;;  %v2244_v36 = vld [vmem:[#allocation2 + $0xa9] sm:$0xff]  ;;  %v2245_v41 = vld [vmem:[#allocation2 + $0xb1] sm:$0xff] }
 0x18a   :  { %12470 = vmatprep.mubr.bf16.mxu0 %v15471_v60  ;;  %v11490_v60 = vld [vmem:[%s19078_s0 + $0xf8] sm:$0xff]   ;;  %v15580_v12 = vpack.c.bf16 %v2245_v41, %v2244_v36 }
 0x18b   :  { %v11298_v35 = vunpack.c.l.bf16 %v11490_v60  ;;  %v11299_v6 = vunpack.c.h.bf16 %v11490_v60  ;;  %v14770_v60 = vld [vmem:[%s19077_s1 + $0x108] sm:$0xff]   ;;  %v2265_v36 = vld [vmem:[#allocation2 + $0x1d1] sm:$0xff] }
 0x18c   :  { %v14781_v41 = vld [vmem:[%s19078_s0 + $0x78] sm:$0xff] }
 0x18d   :  { %303 = vst [vmem:[#allocation2 + $0x331] sm:$0xff] %v11298_v35  ;;  %304 = vst [vmem:[#allocation2 + $0x339] sm:$0xff] %v11299_v6  ;;  %v14771_v6 = vld [vmem:[%s19077_s1 + $0x110] sm:$0xff]   ;;  %v2243_v35 = vld [vmem:[#allocation2 + $0x99] sm:$0xff] }
 0x191   :  { %12471 = vmatmul.mubr.bf16.gmra.mrb[52].mxu0 %v15475_v8 }
 0x192   :  { %12474 = vmatprep.mubr.bf16.mxu0 %v15477_v54 }
 0x199   :  { %12475 = vmatmul.mubr.bf16.gmra.mrb[56].mxu0 %v15484_v59 }
 0x19a   :  { %12478 = vmatprep.mubr.bf16.mxu0 %v15486_v11 }
 0x1a1   :  { %12479 = vmatmul.mubr.bf16.gmra.mrb[60].mxu0 %v15490_v21 }
 0x1a2   :  { %12498 = vmatprep.mubr.bf16.mxu0 %v15252_v24  ;;  %v14772_v24 = vld [vmem:[%s19077_s1 + $0x118] sm:$0xff]  }
 0x1a9   :  { %12499 = vmatmul.mubr.bf16.vlgmr.msra.gmra.mrb[0].mxu0 %v15254_v25  ;;  %v14773_v25 = vld [vmem:[%s19077_s1 + $0x120] sm:$0xff]  }
 0x1aa   :  { %12563 = vmatpush3.bf16.msra.mxu0 %v15418_v13  ;;  %12502 = vmatprep.mubr.bf16.mxu0 %v15264_v31  ;;  %v14774_v31 = vld [vmem:[%s19077_s1 + $0x128] sm:$0xff]   ;;  %v2242_v13 = vld [vmem:[#allocation2 + $0x91] sm:$0xff] }
 0x1ab   :  { %12564 = vmatprep.subr.bf16.mxu0 %v14770_v60  ;;  %v15578_v58 = vpack.c.bf16 %v2243_v35, %v2242_v13  ;;  %v2264_v35 = vld [vmem:[#allocation2 + $0x1c9] sm:$0xff] }
 0x1ae   :  { %12565 = vmatpush3.bf16.msra.mxu0 %v14770_v60  ;;  %v2246_v60 = vld [vmem:[#allocation2 + $0xc1] sm:$0xff] }
 0x1af   :  { %12566 = vmatprep.subr.bf16.mxu0 %v14771_v6 }
 0x1b1   :  { %12503 = vmatmul.mubr.bf16.gmra.mrb[4].mxu0 %v15266_v32  ;;  %v14775_v32 = vld [vmem:[%s19077_s1 + $0x130] sm:$0xff]  }
 0x1b2   :  { %12506 = vmatprep.mubr.bf16.mxu0 %v15276_v39  ;;  %12567 = vmatpush3.bf16.msra.mxu0 %v14771_v6  ;;  %v14776_v39 = vld [vmem:[%s19077_s1 + $0x138] sm:$0xff]   ;;  %v2247_v6 = vld [vmem:[#allocation2 + $0xc9] sm:$0xff] }
 0x1b3   :  { %12568 = vmatprep.subr.bf16.mxu0 %v14772_v24 }
 0x1b6   :  { %12569 = vmatpush3.bf16.msra.mxu0 %v14772_v24  ;;  %v2248_v24 = vld [vmem:[#allocation2 + $0xd9] sm:$0xff] }
 0x1b7   :  { %12570 = vmatprep.subr.bf16.mxu0 %v14773_v25 }
 0x1b9   :  { %12507 = vmatmul.mubr.bf16.gmra.mrb[8].mxu0 %v15278_v40  ;;  %v14777_v40 = vld [vmem:[%s19077_s1 + $0x140] sm:$0xff]  }
 0x1ba   :  { %12510 = vmatprep.mubr.bf16.mxu0 %v15288_v47  ;;  %12571 = vmatpush3.bf16.msra.mxu0 %v14773_v25  ;;  %v1748_v47 = vld [vmem:[#allocation2 + $0x180] sm:$0xff] }
 0x1bb   :  { %12572 = vmatprep.subr.bf16.mxu0 %v14774_v31  ;;  %v2249_v25 = vld [vmem:[#allocation2 + $0xe1] sm:$0xff] }
 0x1be   :  { %12573 = vmatpush3.bf16.msra.mxu0 %v14774_v31  ;;  %v14784_v31 = vld [vmem:[%s19077_s1 + $0x170] sm:$0xff]  }
 0x1bf   :  { %12574 = vmatprep.subr.bf16.mxu0 %v14775_v32 }
 0x1c1   :  { %12511 = vmatmul.mubr.bf16.gmra.mrb[12].mxu0 %v15290_v48  ;;  %v1749_v48 = vld [vmem:[#allocation2 + $0x188] sm:$0xff] }
 0x1c2   :  { %12514 = vmatprep.mubr.bf16.mxu0 %v15302_v55  ;;  %12575 = vmatpush3.bf16.msra.mxu0 %v14775_v32  ;;  %v15533_v55 = vpack.c.bf16 %v1749_v48, %v1748_v47  ;;  %v15590_v32 = vpack.c.bf16 %v2247_v6, %v2246_v60  ;;  %v2250_v47 = vld [vmem:[#allocation2 + $0xf1] sm:$0xff]  ;;  %v2251_v48 = vld [vmem:[#allocation2 + $0xf9] sm:$0xff]  ;;  %v2267_v60 = vld [vmem:[#allocation2 + $0x1e9] sm:$0xff] }
 0x1c3   :  { %12576 = vmatprep.subr.bf16.mxu0 %v14776_v39  ;;  %v2268_v6 = vld [vmem:[#allocation2 + $0x1f9] sm:$0xff] }
 0x1c6   :  { %12577 = vmatpush3.bf16.msra.mxu0 %v14776_v39  ;;  %v15592_v39 = vpack.c.bf16 %v2249_v25, %v2248_v24  ;;  %v2269_v24 = vld [vmem:[#allocation2 + $0x201] sm:$0xff] }
 0x1c7   :  { %12642 = vmatprep.subr.bf16.mxu0 %v14777_v40 }
 0x1c9   :  { %12515 = vmatmul.mubr.bf16.gmra.mrb[16].mxu0 %v15304_v56  ;;  %v1780_v56 = vld [vmem:[#allocation2 + $0x330] sm:$0xff] }
 0x1ca   :  { %12518 = vmatprep.mubr.bf16.mxu0 %v15309_v61  ;;  %v1781_v61 = vld [vmem:[#allocation2 + $0x338] sm:$0xff] }
 0x1d1   :  { %12519 = vmatmul.mubr.bf16.gmra.mrb[20].mxu0 %v15311_v62  ;;  %v2232_v62 = vld [vmem:[#allocation2 + $0x19] sm:$0xff] }
 0x1d2   :  { %12522 = vmatprep.mubr.bf16.mxu0 %v15315_v4  ;;  %v2233_v4 = vld [vmem:[#allocation2 + $0x21] sm:$0xff] }
 0x1d9   :  { %12523 = vmatmul.mubr.bf16.gmra.mrb[24].mxu0 %v15317_v5  ;;  %v15551_v5 = vpack.c.bf16 %v1781_v61, %v1780_v56  ;;  %v2252_v56 = vld [vmem:[#allocation2 + $0x109] sm:$0xff]  ;;  %v2253_v61 = vld [vmem:[#allocation2 + $0x111] sm:$0xff] }
 0x1da   :  { %12526 = vmatprep.mubr.bf16.mxu0 %v15321_v9  ;;  %v2296_v9 = vpack.c.bf16 %v2233_v4, %v2232_v62  ;;  %v15602_v62 = vld [vmem:[%s19077_s1 + $0x180] sm:$0xff]   ;;  %v15604_v4 = vpack.c.bf16 %v2251_v48, %v2250_v47  ;;  %v2272_v48 = vld [vmem:[#allocation2 + $0x229] sm:$0xff] }
 0x1db   :  { %v2271_v47 = vld [vmem:[#allocation2 + $0x219] sm:$0xff] }
 0x1e1   :  { %12527 = vmatmul.mubr.bf16.gmra.mrb[28].mxu0 %v15533_v55 }
 0x1e2   :  { %12530 = vmatprep.mubr.bf16.mxu0 %v15324_v16  ;;  %v2234_v16 = vld [vmem:[#allocation2 + $0x31] sm:$0xff] }
 0x1e9   :  { %12531 = vmatmul.mubr.bf16.gmra.mrb[32].mxu0 %v15326_v17  ;;  %v2235_v17 = vld [vmem:[#allocation2 + $0x39] sm:$0xff] }
 0x1ea   :  { %12534 = vmatprep.mubr.bf16.mxu0 %v15330_v22  ;;  %v2236_v22 = vld [vmem:[#allocation2 + $0x49] sm:$0xff] }
 0x1f1   :  { %12535 = vmatmul.mubr.bf16.gmra.mrb[36].mxu0 %v15332_v23  ;;  %v2237_v23 = vld [vmem:[#allocation2 + $0x51] sm:$0xff] }
 0x1f2   :  { %12538 = vmatprep.mubr.bf16.mxu0 %v15336_v29  ;;  %v15554_v29 = vpack.c.bf16 %v2235_v17, %v2234_v16  ;;  %v2254_v16 = vld [vmem:[#allocation2 + $0x121] sm:$0xff]  ;;  %v2255_v17 = vld [vmem:[#allocation2 + $0x129] sm:$0xff] }
 0x1f9   :  { %12539 = vmatmul.mubr.bf16.gmra.mrb[40].mxu0 %v15338_v30  ;;  %v15556_v30 = vpack.c.bf16 %v2237_v23, %v2236_v22  ;;  %v2256_v22 = vld [vmem:[#allocation2 + $0x139] sm:$0xff]  ;;  %v2257_v23 = vld [vmem:[#allocation2 + $0x141] sm:$0xff] }
 0x1fa   :  { %12542 = vmatprep.mubr.bf16.mxu0 %v15342_v37  ;;  %v14778_v37 = vld [vmem:[%s19077_s1 + $0x148] sm:$0xff]  }
 0x201   :  { %12543 = vmatmul.mubr.bf16.gmra.mrb[44].mxu0 %v15344_v38  ;;  %v2238_v38 = vld [vmem:[#allocation2 + $0x61] sm:$0xff] }
 0x202   :  { %12546 = vmatprep.mubr.bf16.mxu0 %v15348_v45  ;;  %v2239_v45 = vld [vmem:[#allocation2 + $0x69] sm:$0xff] }
 0x209   :  { %12547 = vmatmul.mubr.bf16.gmra.mrb[48].mxu0 %v15350_v46  ;;  %v2240_v46 = vld [vmem:[#allocation2 + $0x79] sm:$0xff] }
 0x20a   :  { %12550 = vmatprep.mubr.bf16.mxu0 %v15354_v53  ;;  %v2241_v53 = vld [vmem:[#allocation2 + $0x81] sm:$0xff] }
 0x211   :  { %12551 = vmatmul.mubr.bf16.gmra.mrb[52].mxu0 %v15356_v57  ;;  %v14779_v57 = vld [vmem:[%s19077_s1 + $0x150] sm:$0xff]  }
 0x212   :  { %12554 = vmatprep.mubr.bf16.mxu0 %v15360_v0  ;;  %v15566_v0 = vpack.c.bf16 %v2239_v45, %v2238_v38  ;;  %v15613_v38 = vpack.c.bf16 %v2257_v23, %v2256_v22  ;;  %v2258_v45 = vld [vmem:[#allocation2 + $0x151] sm:$0xff]  ;;  %v2275_v22 = vld [vmem:[#allocation2 + $0x249] sm:$0xff]  ;;  %v2276_v23 = vld [vmem:[#allocation2 + $0x259] sm:$0xff] }
 0x219   :  { %12555 = vmatmul.mubr.bf16.gmra.mrb[56].mxu0 %v15362_v2  ;;  %v15568_v2 = vpack.c.bf16 %v2241_v53, %v2240_v46  ;;  %v2259_v46 = vld [vmem:[#allocation2 + $0x159] sm:$0xff]  ;;  %v2260_v53 = vld [vmem:[#allocation2 + $0x169] sm:$0xff] }
 0x21a   :  { %12558 = vmatprep.mubr.bf16.mxu0 %v15366_v10  ;;  %v14780_v10 = vld [vmem:[%s19077_s1 + $0x158] sm:$0xff]  }
 0x221   :  { %12559 = vmatmul.mubr.bf16.gmra.mrb[60].mxu0 %v15551_v5 }
 0x222   :  { %12578 = vmatprep.mubr.bf16.mxu0 %v2296_v9  ;;  %v15606_v9 = vpack.c.bf16 %v2253_v61, %v2252_v56  ;;  %v2273_v56 = vld [vmem:[#allocation2 + $0x231] sm:$0xff] }
 0x229   :  { %12579 = vmatmul.mubr.bf16.vlgmr.msra.gmra.mrb[0].mxu0 %v15554_v29 }
 0x22a   :  { %12643 = vmatpush3.bf16.msra.mxu0 %v14777_v40  ;;  %12582 = vmatprep.mubr.bf16.mxu0 %v15556_v30  ;;  %v14785_v40 = vld [vmem:[%s19077_s1 + $0x178] sm:$0xff]  }
 0x22b   :  { %12644 = vmatprep.subr.bf16.mxu0 %v14778_v37 }
 0x22e   :  { %12645 = vmatpush3.bf16.msra.mxu0 %v14778_v37  ;;  %v15611_v37 = vpack.c.bf16 %v2255_v17, %v2254_v16  ;;  %v15634_v16 = vpack.c.bf16 %v2273_v56, %v2272_v48  ;;  %v2274_v17 = vld [vmem:[#allocation2 + $0x241] sm:$0xff]  ;;  %v2286_v56 = vld [vmem:[#allocation2 + $0x2d1] sm:$0xff] }
 0x22f   :  { %12646 = vmatprep.subr.bf16.mxu0 %v14779_v57 }
 0x231   :  { %12583 = vmatmul.mubr.bf16.gmra.mrb[4].mxu0 %v15566_v0 }
 0x232   :  { %12586 = vmatprep.mubr.bf16.mxu0 %v15568_v2  ;;  %12647 = vmatpush3.bf16.msra.mxu0 %v14779_v57  ;;  %v2261_v57 = vld [vmem:[#allocation2 + $0x171] sm:$0xff] }
 0x233   :  { %12648 = vmatprep.subr.bf16.mxu0 %v14780_v10  ;;  %v15619_v13 = vpack.c.bf16 %v2261_v57, %v2260_v53  ;;  %v2278_v57 = vld [vmem:[#allocation2 + $0x271] sm:$0xff] }
 0x236   :  { %12649 = vmatpush3.bf16.msra.mxu0 %v14780_v10  ;;  %v15617_v10 = vpack.c.bf16 %v2259_v46, %v2258_v45  ;;  %v2277_v45 = vld [vmem:[#allocation2 + $0x261] sm:$0xff]  ;;  %v15638_v46 = vpack.c.bf16 %v2275_v22, %v2274_v17  ;;  %v2287_v17 = vld [vmem:[#allocation2 + $0x2d9] sm:$0xff]  ;;  %v2288_v22 = vld [vmem:[#allocation2 + $0x2e9] sm:$0xff] }
 0x237   :  { %12650 = vmatprep.subr.bf16.mxu0 %v14782_v51  ;;  %v15640_v53 = vpack.c.bf16 %v2277_v45, %v2276_v23  ;;  %v2289_v23 = vld [vmem:[#allocation2 + $0x2f1] sm:$0xff]  ;;  %v15656_v45 = vpack.c.bf16 %v2287_v17, %v2286_v56  ;;  %v14788_v56 = vld [vmem:[%s19077_s1 + $0x188] sm:$0xff]  }
 0x238   :  { %v14789_v17 = vld [vmem:[%s19077_s1 + $0x190] sm:$0xff]  }
 0x239   :  { %12587 = vmatmul.mubr.bf16.gmra.mrb[8].mxu0 %v15578_v58 }
 0x23a   :  { %12590 = vmatprep.mubr.bf16.mxu0 %v15580_v12  ;;  %12651 = vmatpush3.bf16.msra.mxu0 %v14782_v51  ;;  %v2312_v51 = vpack.c.bf16 %v2265_v36, %v2264_v35  ;;  %v2279_v35 = vld [vmem:[#allocation2 + $0x279] sm:$0xff]  ;;  %v2280_v36 = vld [vmem:[#allocation2 + $0x289] sm:$0xff] }
 0x23b   :  { %12652 = vmatprep.subr.bf16.mxu0 %v14783_v20 }
 0x23e   :  { %12653 = vmatpush3.bf16.msra.mxu0 %v14783_v20  ;;  %v2266_v20 = vld [vmem:[#allocation2 + $0x1e1] sm:$0xff] }
 0x23f   :  { %12654 = vmatprep.subr.bf16.mxu0 %v14784_v31  ;;  %v15626_v25 = vpack.c.bf16 %v2267_v60, %v2266_v20  ;;  %v2282_v60 = vld [vmem:[#allocation2 + $0x2a1] sm:$0xff] }
 0x241   :  { %12591 = vmatmul.mubr.bf16.gmra.mrb[12].mxu0 %v15590_v32 }
 0x242   :  { %12594 = vmatprep.mubr.bf16.mxu0 %v15592_v39  ;;  %12655 = vmatpush3.bf16.msra.mxu0 %v14784_v31  ;;  %v15628_v31 = vpack.c.bf16 %v2269_v24, %v2268_v6  ;;  %v2283_v6 = vld [vmem:[#allocation2 + $0x2a9] sm:$0xff]  ;;  %v2284_v24 = vld [vmem:[#allocation2 + $0x2b9] sm:$0xff] }
 0x243   :  { %12656 = vmatprep.subr.bf16.mxu0 %v14785_v40 }
 0x246   :  { %12657 = vmatpush3.bf16.msra.mxu0 %v14785_v40  ;;  %v2270_v40 = vld [vmem:[#allocation2 + $0x211] sm:$0xff] }
 0x247   :  { %12722 = vmatprep.subr.bf16.mxu0 %v15602_v62  ;;  %v15632_v61 = vpack.c.bf16 %v2271_v47, %v2270_v40  ;;  %v2285_v40 = vld [vmem:[#allocation2 + $0x2c1] sm:$0xff]  ;;  %v15650_v47 = vpack.c.bf16 %v2283_v6, %v2282_v60 }
 0x248   :  { %v15652_v48 = vpack.c.bf16 %v2285_v40, %v2284_v24  ;;  %v2293_v60 = vld [vmem:[#allocation2 + $0x321] sm:$0xff]  ;;  %v14786_v40 = vld [vmem:[%s19078_s0 + $0xf8] sm:$0xff] }
 0x249   :  { %12595 = vmatmul.mubr.bf16.gmra.mrb[16].mxu0 %v15604_v4 }
 0x24a   :  { %12598 = vmatprep.mubr.bf16.mxu0 %v15606_v9 }
 0x251   :  { %12599 = vmatmul.mubr.bf16.gmra.mrb[20].mxu0 %v15611_v37 }
 0x252   :  { %12602 = vmatprep.mubr.bf16.mxu0 %v15613_v38 }
 0x259   :  { %12603 = vmatmul.mubr.bf16.gmra.mrb[24].mxu0 %v15617_v10 }
 0x25a   :  { %12606 = vmatprep.mubr.bf16.mxu0 %v15619_v13 }
 0x261   :  { %12607 = vmatmul.mubr.bf16.gmra.mrb[28].mxu0 %v14781_v41  ;;  %v2281_v41 = vld [vmem:[#allocation2 + $0x291] sm:$0xff] }
 0x262   :  { %12610 = vmatprep.mubr.bf16.mxu0 %v2312_v51  ;;  %v15644_v51 = vpack.c.bf16 %v2279_v35, %v2278_v57  ;;  %v15646_v20 = vpack.c.bf16 %v2281_v41, %v2280_v36  ;;  %v15658_v57 = vpack.c.bf16 %v2289_v23, %v2288_v22  ;;  %v2290_v35 = vld [vmem:[#allocation2 + $0x301] sm:$0xff]  ;;  %v2291_v36 = vld [vmem:[#allocation2 + $0x309] sm:$0xff]  ;;  %v2292_v41 = vld [vmem:[#allocation2 + $0x319] sm:$0xff] }
 0x263   :  { %v15662_v6 = vpack.c.bf16 %v2291_v36, %v2290_v35  ;;  %v15664_v24 = vpack.c.bf16 %v2293_v60, %v2292_v41  ;;  %v3263_v23 = vld [vmem:[#allocation2 + $0x48] sm:$0xff]  ;;  %v3265_v35 = vld [vmem:[#allocation2 + $0x60] sm:$0xff]  ;;  %v3269_v60 = vld [vmem:[#allocation2 + $0x90] sm:$0xff] }
 0x264   :  { %v3268_v41 = vld [vmem:[#allocation2 + $0x80] sm:$0xff] }
 0x269   :  { %12611 = vmatmul.mubr.bf16.gmra.mrb[32].mxu0 %v15626_v25 }
 0x26a   :  { %12614 = vmatprep.mubr.bf16.mxu0 %v15628_v31 }
 0x271   :  { %12615 = vmatmul.mubr.bf16.gmra.mrb[36].mxu0 %v15632_v61 }
 0x272   :  { %12618 = vmatprep.mubr.bf16.mxu0 %v15634_v16 }
 0x279   :  { %12619 = vmatmul.mubr.bf16.gmra.mrb[40].mxu0 %v15638_v46 }
 0x27a   :  { %12622 = vmatprep.mubr.bf16.mxu0 %v15640_v53 }
 0x281   :  { %12623 = vmatmul.mubr.bf16.gmra.mrb[44].mxu0 %v15644_v51 }
 0x282   :  { %12626 = vmatprep.mubr.bf16.mxu0 %v15646_v20 }
 0x289   :  { %12627 = vmatmul.mubr.bf16.gmra.mrb[48].mxu0 %v15650_v47 }
 0x28a   :  { %12630 = vmatprep.mubr.bf16.mxu0 %v15652_v48 }
 0x291   :  { %12631 = vmatmul.mubr.bf16.gmra.mrb[52].mxu0 %v15656_v45 }
 0x292   :  { %12634 = vmatprep.mubr.bf16.mxu0 %v15658_v57 }
 0x299   :  { %12635 = vmatmul.mubr.bf16.gmra.mrb[56].mxu0 %v15662_v6 }
 0x29a   :  { %12638 = vmatprep.mubr.bf16.mxu0 %v15664_v24 }
 0x2a1   :  { %12639 = vmatmul.mubr.bf16.gmra.mrb[60].mxu0 %v14786_v40  ;;  %v3270_v40 = vld [vmem:[#allocation2 + $0x98] sm:$0xff] }
 0x2a2   :  { %12658 = vmatprep.mubr.bf16.mxu0 %v15369_v18  ;;  %v14790_v18 = vld [vmem:[%s19077_s1 + $0x198] sm:$0xff]  }
 0x2a9   :  { %12659 = vmatmul.mubr.bf16.vlgmr.msra.gmra.mrb[0].mxu0 %v15371_v19  ;;  %v14791_v19 = vld [vmem:[%s19077_s1 + $0x1a0] sm:$0xff]  }
 0x2aa   :  { %12723 = vmatpush3.bf16.msra.mxu0 %v15602_v62  ;;  %12662 = vmatprep.mubr.bf16.mxu0 %v15382_v33  ;;  %v14792_v33 = vld [vmem:[%s19077_s1 + $0x1a8] sm:$0xff]  }
 0x2ab   :  { %12724 = vmatprep.subr.bf16.mxu0 %v14788_v56 }
 0x2ae   :  { %12725 = vmatpush3.bf16.msra.mxu0 %v14788_v56  ;;  %v14797_v56 = vld [vmem:[%s19077_s1 + $0x1d0] sm:$0xff]  }
 0x2af   :  { %12726 = vmatprep.subr.bf16.mxu0 %v14789_v17 }
 0x2b1   :  { %12663 = vmatmul.mubr.bf16.gmra.mrb[4].mxu0 %v15384_v34  ;;  %v14793_v34 = vld [vmem:[%s19077_s1 + $0x1b0] sm:$0xff]  }
 0x2b2   :  { %12666 = vmatprep.mubr.bf16.mxu0 %v15394_v44  ;;  %12727 = vmatpush3.bf16.msra.mxu0 %v14789_v17  ;;  %v14794_v44 = vld [vmem:[%s19077_s1 + $0x1b8] sm:$0xff]  }
 0x2b3   :  { %12728 = vmatprep.subr.bf16.mxu0 %v14790_v18 }
 0x2b6   :  { %12729 = vmatpush3.bf16.msra.mxu0 %v14790_v18  ;;  %v3329_v18 = vpack.c.bf16 %v3270_v40, %v3269_v60  ;;  %v3286_v60 = vld [vmem:[#allocation2 + $0x158] sm:$0xff] }
 0x2b7   :  { %12730 = vmatprep.subr.bf16.mxu0 %v14791_v19 }
 0x2b9   :  { %12667 = vmatmul.mubr.bf16.gmra.mrb[8].mxu0 %v15396_v49  ;;  %v14795_v49 = vld [vmem:[%s19077_s1 + $0x1c0] sm:$0xff]  }
 0x2ba   :  { %12670 = vmatprep.mubr.bf16.mxu0 %v15406_v63  ;;  %12731 = vmatpush3.bf16.msra.mxu0 %v14791_v19  ;;  %v2776_v63 = vld [vmem:[#allocation2 + $0x182] sm:$0xff]  ;;  %v14798_v19 = vld [vmem:[%s19077_s1 + $0x1d8] sm:$0xff]  }
 0x2bb   :  { %12732 = vmatprep.subr.bf16.mxu0 %v14792_v33 }
 0x2be   :  { %12733 = vmatpush3.bf16.msra.mxu0 %v14792_v33  ;;  %v3271_v33 = vld [vmem:[#allocation2 + $0xa8] sm:$0xff] }
 0x2bf   :  { %12734 = vmatprep.subr.bf16.mxu0 %v14793_v34 }
 0x2c1   :  { %12671 = vmatmul.mubr.bf16.gmra.mrb[12].mxu0 %v15408_v3  ;;  %v2777_v3 = vld [vmem:[#allocation2 + $0x18a] sm:$0xff] }
 0x2c2   :  { %12674 = vmatprep.mubr.bf16.mxu0 %v15420_v14  ;;  %12735 = vmatpush3.bf16.msra.mxu0 %v14793_v34  ;;  %v15711_v14 = vpack.c.bf16 %v2777_v3, %v2776_v63  ;;  %v3272_v34 = vld [vmem:[#allocation2 + $0xb0] sm:$0xff]  ;;  %v14799_v63 = vld [vmem:[%s19077_s1 + $0x1e0] sm:$0xff]  }
 0x2c3   :  { %12736 = vmatprep.subr.bf16.mxu0 %v14794_v44  ;;  %v3330_v3 = vpack.c.bf16 %v3272_v34, %v3271_v33  ;;  %v3291_v33 = vld [vmem:[#allocation2 + $0x198] sm:$0xff]  ;;  %v3293_v34 = vld [vmem:[#allocation2 + $0x1e0] sm:$0xff] }
 0x2c6   :  { %12737 = vmatpush3.bf16.msra.mxu0 %v14794_v44  ;;  %v3273_v44 = vld [vmem:[#allocation2 + $0xc0] sm:$0xff] }
 0x2c7   :  { %12802 = vmatprep.subr.bf16.mxu0 %v14795_v49 }
 0x2c9   :  { %12675 = vmatmul.mubr.bf16.gmra.mrb[16].mxu0 %v15422_v15  ;;  %v19205_v15 = vld [vmem:[#allocation3_spill] sm:$0xff] }
 0x2ca   :  { %12678 = vmatprep.mubr.bf16.mxu0 %v15427_v27  ;;  %v19206_v27 = vld [vmem:[#allocation4_spill] sm:$0xff] }
 0x2d1   :  { %12679 = vmatmul.mubr.bf16.gmra.mrb[20].mxu0 %v15429_v28  ;;  %v19207_v28 = vld [vmem:[#allocation5_spill] sm:$0xff] }
 0x2d2   :  { %12682 = vmatprep.mubr.bf16.mxu0 %v15436_v43  ;;  %v19208_v43 = vld [vmem:[#allocation6_spill] sm:$0xff] }
 0x2d9   :  { %12683 = vmatmul.mubr.bf16.gmra.mrb[24].mxu0 %v15438_v52  ;;  %v19209_v52 = vld [vmem:[#allocation7_spill] sm:$0xff] }
 0x2da   :  { %12686 = vmatprep.mubr.bf16.mxu0 %v15442_v7  ;;  %v19210_v7 = vld [vmem:[#allocation8_spill] sm:$0xff] }
 0x2e1   :  { %12687 = vmatmul.mubr.bf16.gmra.mrb[28].mxu0 %v15711_v14 }
 0x2e2   :  { %12690 = vmatprep.mubr.bf16.mxu0 %v15445_v26  ;;  %v2808_v26 = vld [vmem:[#allocation2 + $0x332] sm:$0xff] }
 0x2e9   :  { %12691 = vmatmul.mubr.bf16.gmra.mrb[32].mxu0 %v15447_v1  ;;  %v2809_v1 = vld [vmem:[#allocation2 + $0x33a] sm:$0xff] }
 0x2ea   :  { %12694 = vmatprep.mubr.bf16.mxu0 %v15451_v42  ;;  %v3261_v42 = vld [vmem:[#allocation2 + $0x30] sm:$0xff]  ;;  %v15729_v62 = vpack.c.bf16 %v2809_v1, %v2808_v26 }
 0x2eb   :  { %v14801_v26 = vld [vmem:[%s19077_s1 + $0x1f0] sm:$0xff]  }
 0x2f1   :  { %12695 = vmatmul.mubr.bf16.gmra.mrb[36].mxu0 %v15453_v50  ;;  %v3262_v50 = vld [vmem:[#allocation2 + $0x38] sm:$0xff] }
 0x2f2   :  { %12698 = vmatprep.mubr.bf16.mxu0 %v19205_v15  ;;  %v3325_v22 = vpack.c.bf16 %v3262_v50, %v3261_v42  ;;  %v14802_v50 = vld [vmem:[%s19077_s1 + $0x1f8] sm:$0xff]  }
 0x2f9   :  { %12699 = vmatmul.mubr.bf16.gmra.mrb[40].mxu0 %v19206_v27  ;;  %v14800_v27 = vld [vmem:[%s19077_s1 + $0x1e8] sm:$0xff]  }
 0x2fa   :  { %12702 = vmatprep.mubr.bf16.mxu0 %v19207_v28  ;;  %v3275_v28 = vld [vmem:[#allocation2 + $0xd8] sm:$0xff] }
 0x301   :  { %12703 = vmatmul.mubr.bf16.gmra.mrb[44].mxu0 %v19208_v43  ;;  %v3276_v43 = vld [vmem:[#allocation2 + $0xe0] sm:$0xff] }
 0x302   :  { %12706 = vmatprep.mubr.bf16.mxu0 %v19209_v52  ;;  %v3277_v52 = vld [vmem:[#allocation2 + $0xf0] sm:$0xff]  ;;  %v3332_v1 = vpack.c.bf16 %v3276_v43, %v3275_v28  ;;  %v3298_v43 = vld [vmem:[#allocation2 + $0x218] sm:$0xff] }
 0x303   :  { %v3297_v28 = vld [vmem:[#allocation2 + $0x210] sm:$0xff] }
 0x309   :  { %12707 = vmatmul.mubr.bf16.gmra.mrb[48].mxu0 %v19210_v7  ;;  %v3278_v7 = vld [vmem:[#allocation2 + $0xf8] sm:$0xff] }
 0x30a   :  { %12710 = vmatprep.mubr.bf16.mxu0 %v15475_v8  ;;  %v3264_v8 = vld [vmem:[#allocation2 + $0x50] sm:$0xff]  ;;  %v3333_v42 = vpack.c.bf16 %v3278_v7, %v3277_v52  ;;  %v3343_v7 = vpack.c.bf16 %v3298_v43, %v3297_v28  ;;  %v3318_v28 = vld [vmem:[#allocation2 + $0x308] sm:$0xff] }
 0x30b   :  { %v3326_v36 = vpack.c.bf16 %v3264_v8, %v3263_v23  ;;  %v3280_v23 = vld [vmem:[#allocation2 + $0x110] sm:$0xff]  ;;  %v3281_v8 = vld [vmem:[#allocation2 + $0x120] sm:$0xff] }
 0x311   :  { %12711 = vmatmul.mubr.bf16.gmra.mrb[52].mxu0 %v15477_v54  ;;  %v3266_v54 = vld [vmem:[#allocation2 + $0x68] sm:$0xff] }
 0x312   :  { %12714 = vmatprep.mubr.bf16.mxu0 %v15484_v59  ;;  %v3327_v59 = vpack.c.bf16 %v3266_v54, %v3265_v35  ;;  %v3282_v35 = vld [vmem:[#allocation2 + $0x128] sm:$0xff]  ;;  %v15756_v54 = vld [vmem:[%s19077_s1 + $0x200] sm:$0xff]  }
 0x319   :  { %12715 = vmatmul.mubr.bf16.gmra.mrb[56].mxu0 %v15486_v11  ;;  %v14796_v11 = vld [vmem:[%s19077_s1 + $0x1c8] sm:$0xff]  }
 0x31a   :  { %12718 = vmatprep.mubr.bf16.mxu0 %v15490_v21  ;;  %v3267_v21 = vld [vmem:[#allocation2 + $0x78] sm:$0xff] }
 0x31b   :  { %v3328_v17 = vpack.c.bf16 %v3268_v41, %v3267_v21  ;;  %v3284_v21 = vld [vmem:[#allocation2 + $0x140] sm:$0xff]  ;;  %v3285_v41 = vld [vmem:[#allocation2 + $0x150] sm:$0xff] }
 0x321   :  { %12719 = vmatmul.mubr.bf16.gmra.mrb[60].mxu0 %v15729_v62 }
 0x322   :  { %12738 = vmatprep.mubr.bf16.mxu0 %v3325_v22  ;;  %v3279_v22 = vld [vmem:[#allocation2 + $0x108] sm:$0xff] }
 0x329   :  { %12739 = vmatmul.mubr.bf16.vlgmr.msra.gmra.mrb[0].mxu0 %v3326_v36  ;;  %v3334_v36 = vpack.c.bf16 %v3280_v23, %v3279_v22  ;;  %v3303_v23 = vld [vmem:[#allocation2 + $0x258] sm:$0xff] }
 0x32a   :  { %12803 = vmatpush3.bf16.msra.mxu0 %v14795_v49  ;;  %12742 = vmatprep.mubr.bf16.mxu0 %v3327_v59  ;;  %v3274_v49 = vld [vmem:[#allocation2 + $0xc8] sm:$0xff]  ;;  %v3335_v59 = vpack.c.bf16 %v3282_v35, %v3281_v8  ;;  %v3304_v8 = vld [vmem:[#allocation2 + $0x260] sm:$0xff]  ;;  %v3305_v35 = vld [vmem:[#allocation2 + $0x270] sm:$0xff] }
 0x32b   :  { %12804 = vmatprep.subr.bf16.mxu0 %v14796_v11  ;;  %v3331_v15 = vpack.c.bf16 %v3274_v49, %v3273_v44  ;;  %v3294_v44 = vld [vmem:[#allocation2 + $0x1e8] sm:$0xff] }
 0x32c   :  { %v14888_v49 = vld [vmem:[#allocation2 + $0x8] sm:$0xff] }
 0x32e   :  { %12805 = vmatpush3.bf16.msra.mxu0 %v14796_v11  ;;  %v3283_v11 = vld [vmem:[#allocation2 + $0x138] sm:$0xff] }
 0x32f   :  { %12806 = vmatprep.subr.bf16.mxu0 %v14797_v56  ;;  %v3336_v40 = vpack.c.bf16 %v3284_v21, %v3283_v11  ;;  %v3307_v21 = vld [vmem:[#allocation2 + $0x288] sm:$0xff] }
 0x331   :  { %12743 = vmatmul.mubr.bf16.gmra.mrb[4].mxu0 %v3328_v17  ;;  %v3287_v17 = vld [vmem:[#allocation2 + $0x168] sm:$0xff] }
 0x332   :  { %12746 = vmatprep.mubr.bf16.mxu0 %v3329_v18  ;;  %12807 = vmatpush3.bf16.msra.mxu0 %v14797_v56  ;;  %v3337_v56 = vpack.c.bf16 %v3286_v60, %v3285_v41  ;;  %v3288_v18 = vld [vmem:[#allocation2 + $0x170] sm:$0xff]  ;;  %v3309_v60 = vld [vmem:[#allocation2 + $0x2a0] sm:$0xff] }
 0x333   :  { %12808 = vmatprep.subr.bf16.mxu0 %v14798_v19  ;;  %v3308_v41 = vld [vmem:[#allocation2 + $0x290] sm:$0xff] }
 0x336   :  { %12809 = vmatpush3.bf16.msra.mxu0 %v14798_v19  ;;  %v3338_v19 = vpack.c.bf16 %v3288_v18, %v3287_v17  ;;  %v3311_v18 = vld [vmem:[#allocation2 + $0x2b8] sm:$0xff] }
 0x337   :  { %12810 = vmatprep.subr.bf16.mxu0 %v14799_v63 }
 0x339   :  { %12747 = vmatmul.mubr.bf16.gmra.mrb[8].mxu0 %v3330_v3  ;;  %v3341_v3 = vpack.c.bf16 %v3294_v44, %v3293_v34  ;;  %v3314_v34 = vld [vmem:[#allocation2 + $0x2d8] sm:$0xff] }
 0x33a   :  { %12750 = vmatprep.mubr.bf16.mxu0 %v3331_v15  ;;  %12811 = vmatpush3.bf16.msra.mxu0 %v14799_v63  ;;  %v3340_v63 = vpack.c.bf16 %v14888_v49, %v3291_v33  ;;  %v3295_v15 = vld [vmem:[#allocation2 + $0x1f8] sm:$0xff]  ;;  %v3313_v33 = vld [vmem:[#allocation2 + $0x2d0] sm:$0xff] }
 0x33b   :  { %12812 = vmatprep.subr.bf16.mxu0 %v14800_v27 }
 0x33e   :  { %12813 = vmatpush3.bf16.msra.mxu0 %v14800_v27  ;;  %v3296_v27 = vld [vmem:[#allocation2 + $0x200] sm:$0xff] }
 0x33f   :  { %12814 = vmatprep.subr.bf16.mxu0 %v14801_v26  ;;  %v3342_v52 = vpack.c.bf16 %v3296_v27, %v3295_v15  ;;  %v3316_v15 = vld [vmem:[#allocation2 + $0x2f0] sm:$0xff]  ;;  %v3317_v27 = vld [vmem:[#allocation2 + $0x300] sm:$0xff] }
 0x341   :  { %12751 = vmatmul.mubr.bf16.gmra.mrb[12].mxu0 %v3332_v1  ;;  %v3300_v1 = vld [vmem:[#allocation2 + $0x230] sm:$0xff] }
 0x342   :  { %12754 = vmatprep.mubr.bf16.mxu0 %v3333_v42  ;;  %12815 = vmatpush3.bf16.msra.mxu0 %v14801_v26  ;;  %v3299_v26 = vld [vmem:[#allocation2 + $0x228] sm:$0xff]  ;;  %v3301_v42 = vld [vmem:[#allocation2 + $0x240] sm:$0xff] }
 0x343   :  { %12816 = vmatprep.subr.bf16.mxu0 %v14802_v50 }
 0x346   :  { %12817 = vmatpush3.bf16.msra.mxu0 %v14802_v50  ;;  %v3344_v50 = vpack.c.bf16 %v3300_v1, %v3299_v26  ;;  %v3320_v26 = vld [vmem:[#allocation2 + $0x320] sm:$0xff] }
 0x347   :  { %12882 = vmatprep.subr.bf16.mxu0 %v15756_v54 }
 0x349   :  { %12755 = vmatmul.mubr.bf16.gmra.mrb[16].mxu0 %v3334_v36  ;;  %v3306_v36 = vld [vmem:[#allocation2 + $0x278] sm:$0xff] }
 0x34a   :  { %12758 = vmatprep.mubr.bf16.mxu0 %v3335_v59  ;;  %v3346_v59 = vpack.c.bf16 %v3304_v8, %v3303_v23  ;;  %v3347_v11 = vpack.c.bf16 %v3306_v36, %v3305_v35  ;;  %v4299_v8 = vld [vmem:[#allocation2 + $0xaa] sm:$0xff]  ;;  %v4300_v35 = vld [vmem:[#allocation2 + $0xb2] sm:$0xff]  ;;  %v4301_v36 = vld [vmem:[#allocation2 + $0xc2] sm:$0xff] }
 0x351   :  { %12759 = vmatmul.mubr.bf16.gmra.mrb[20].mxu0 %v3336_v40  ;;  %v3310_v40 = vld [vmem:[#allocation2 + $0x2a8] sm:$0xff] }
 0x352   :  { %12762 = vmatprep.mubr.bf16.mxu0 %v3337_v56  ;;  %v3348_v56 = vpack.c.bf16 %v3308_v41, %v3307_v21  ;;  %v3349_v17 = vpack.c.bf16 %v3310_v40, %v3309_v60  ;;  %v4303_v41 = vld [vmem:[#allocation2 + $0xda] sm:$0xff]  ;;  %v4304_v60 = vld [vmem:[#allocation2 + $0xe2] sm:$0xff]  ;;  %v4305_v40 = vld [vmem:[#allocation2 + $0xf2] sm:$0xff] }
 0x359   :  { %12763 = vmatmul.mubr.bf16.gmra.mrb[24].mxu0 %v3338_v19  ;;  %v3312_v19 = vld [vmem:[#allocation2 + $0x2c0] sm:$0xff] }
 0x35a   :  { %12766 = vmatprep.mubr.bf16.mxu0 %v15533_v55  ;;  %v3302_v55 = vld [vmem:[#allocation2 + $0x248] sm:$0xff]  ;;  %v3350_v44 = vpack.c.bf16 %v3312_v19, %v3311_v18 }
 0x35b   :  { %v3345_v22 = vpack.c.bf16 %v3302_v55, %v3301_v42  ;;  %v3323_v42 = vld [vmem:[#allocation2 + $0x348] sm:$0xff] }
 0x35c   :  { %v3356_v55 = vpack.c.bf16 %v14888_v49, %v3323_v42  ;;  %v3806_v49 = vld [vmem:[#allocation2 + $0x1a1] sm:$0xff]  ;;  %v4307_v19 = vld [vmem:[#allocation2 + $0x10a] sm:$0xff] }
 0x361   :  { %12767 = vmatmul.mubr.bf16.gmra.mrb[28].mxu0 %v3340_v63  ;;  %v3351_v63 = vpack.c.bf16 %v3314_v34, %v3313_v33  ;;  %v4308_v33 = vld [vmem:[#allocation2 + $0x112] sm:$0xff]  ;;  %v4309_v34 = vld [vmem:[#allocation2 + $0x122] sm:$0xff] }
 0x362   :  { %12770 = vmatprep.mubr.bf16.mxu0 %v3341_v3  ;;  %v3315_v3 = vld [vmem:[#allocation2 + $0x2e8] sm:$0xff] }
 0x363   :  { %v3352_v43 = vpack.c.bf16 %v3316_v15, %v3315_v3  ;;  %v4311_v15 = vld [vmem:[#allocation2 + $0x13a] sm:$0xff] }
 0x369   :  { %12771 = vmatmul.mubr.bf16.gmra.mrb[32].mxu0 %v3342_v52  ;;  %v3353_v52 = vpack.c.bf16 %v3318_v28, %v3317_v27  ;;  %v4312_v27 = vld [vmem:[#allocation2 + $0x142] sm:$0xff]  ;;  %v4313_v28 = vld [vmem:[#allocation2 + $0x152] sm:$0xff] }
 0x36a   :  { %12774 = vmatprep.mubr.bf16.mxu0 %v3343_v7  ;;  %v3319_v7 = vld [vmem:[#allocation2 + $0x318] sm:$0xff] }
 0x36b   :  { %v3354_v1 = vpack.c.bf16 %v3320_v26, %v3319_v7  ;;  %v4315_v26 = vld [vmem:[#allocation2 + $0x16a] sm:$0xff] }
 0x371   :  { %12775 = vmatmul.mubr.bf16.gmra.mrb[36].mxu0 %v3344_v50  ;;  %v14804_v50 = vld [vmem:[%s19077_s1 + $0x208] sm:$0xff]  }
 0x372   :  { %12778 = vmatprep.mubr.bf16.mxu0 %v3345_v22 }
 0x379   :  { %12779 = vmatmul.mubr.bf16.gmra.mrb[40].mxu0 %v3346_v59  ;;  %v4302_v59 = vld [vmem:[#allocation2 + $0xca] sm:$0xff] }
 0x37a   :  { %12782 = vmatprep.mubr.bf16.mxu0 %v3347_v11  ;;  %v4358_v11 = vpack.c.bf16 %v4300_v35, %v4299_v8  ;;  %v4359_v21 = vpack.c.bf16 %v4302_v59, %v4301_v36  ;;  %v4343_v8 = vld [vmem:[#allocation2 + $0x2ea] sm:$0xff]  ;;  %v4344_v35 = vld [vmem:[#allocation2 + $0x2f2] sm:$0xff]  ;;  %v4345_v36 = vld [vmem:[#allocation2 + $0x302] sm:$0xff] }
 0x37b   :  { %v4346_v59 = vld [vmem:[#allocation2 + $0x30a] sm:$0xff] }
 0x381   :  { %12783 = vmatmul.mubr.bf16.gmra.mrb[44].mxu0 %v3348_v56  ;;  %v4306_v56 = vld [vmem:[#allocation2 + $0xfa] sm:$0xff] }
 0x382   :  { %12786 = vmatprep.mubr.bf16.mxu0 %v3349_v17  ;;  %v4360_v17 = vpack.c.bf16 %v4304_v60, %v4303_v41  ;;  %v4361_v18 = vpack.c.bf16 %v4306_v56, %v4305_v40  ;;  %v4347_v41 = vld [vmem:[#allocation2 + $0x31a] sm:$0xff]  ;;  %v4348_v60 = vld [vmem:[#allocation2 + $0x322] sm:$0xff]  ;;  %v4351_v56 = vld [vmem:[#allocation2 + $0x34a] sm:$0xff] }
 0x383   :  { %v4382_v40 = vpack.c.bf16 %v4348_v60, %v4347_v41 }
 0x389   :  { %12787 = vmatmul.mubr.bf16.gmra.mrb[48].mxu0 %v3350_v44  ;;  %v4310_v44 = vld [vmem:[#allocation2 + $0x12a] sm:$0xff] }
 0x38a   :  { %12790 = vmatprep.mubr.bf16.mxu0 %v3351_v63  ;;  %v4362_v63 = vpack.c.bf16 %v4308_v33, %v4307_v19  ;;  %v4363_v3 = vpack.c.bf16 %v4310_v44, %v4309_v34 }
 0x391   :  { %12791 = vmatmul.mubr.bf16.gmra.mrb[52].mxu0 %v3352_v43  ;;  %v4314_v43 = vld [vmem:[#allocation2 + $0x15a] sm:$0xff] }
 0x392   :  { %12794 = vmatprep.mubr.bf16.mxu0 %v3353_v52  ;;  %v4364_v52 = vpack.c.bf16 %v4312_v27, %v4311_v15  ;;  %v4365_v7 = vpack.c.bf16 %v4314_v43, %v4313_v28 }
 0x399   :  { %12795 = vmatmul.mubr.bf16.gmra.mrb[56].mxu0 %v3354_v1  ;;  %v4316_v1 = vld [vmem:[#allocation2 + $0x172] sm:$0xff] }
 0x39a   :  { %12798 = vmatprep.mubr.bf16.mxu0 %v15551_v5  ;;  %v14805_v5 = vld [vmem:[%s19077_s1 + $0x210] sm:$0xff]   ;;  %v4366_v42 = vpack.c.bf16 %v4316_v1, %v4315_v26 }
 0x3a1   :  { %12799 = vmatmul.mubr.bf16.gmra.mrb[60].mxu0 %v3356_v55  ;;  %v4319_v55 = vld [vmem:[#allocation2 + $0x19a] sm:$0xff] }
 0x3a2   :  { %12818 = vmatprep.mubr.bf16.mxu0 %v15554_v29  ;;  %v14806_v29 = vld [vmem:[%s19077_s1 + $0x218] sm:$0xff]  }
 0x3a9   :  { %12819 = vmatmul.mubr.bf16.vlgmr.msra.gmra.mrb[0].mxu0 %v15556_v30  ;;  %v14807_v30 = vld [vmem:[%s19077_s1 + $0x220] sm:$0xff]  }
 0x3aa   :  { %12883 = vmatpush3.bf16.msra.mxu0 %v15756_v54  ;;  %12822 = vmatprep.mubr.bf16.mxu0 %v15566_v0  ;;  %v14808_v0 = vld [vmem:[%s19077_s1 + $0x228] sm:$0xff]  }
 0x3ab   :  { %12884 = vmatprep.subr.bf16.mxu0 %v14804_v50 }
 0x3ae   :  { %12885 = vmatpush3.bf16.msra.mxu0 %v14804_v50  ;;  %v4320_v50 = vld [vmem:[#allocation2 + $0x1a2] sm:$0xff] }
 0x3af   :  { %12886 = vmatprep.subr.bf16.mxu0 %v14805_v5 }
 0x3b1   :  { %12823 = vmatmul.mubr.bf16.gmra.mrb[4].mxu0 %v15568_v2  ;;  %v14809_v2 = vld [vmem:[%s19077_s1 + $0x230] sm:$0xff]  }
 0x3b2   :  { %12826 = vmatprep.mubr.bf16.mxu0 %v15578_v58  ;;  %12887 = vmatpush3.bf16.msra.mxu0 %v14805_v5  ;;  %v14810_v58 = vld [vmem:[%s19077_s1 + $0x238] sm:$0xff]   ;;  %v4321_v5 = vld [vmem:[#allocation2 + $0x1e2] sm:$0xff] }
 0x3b3   :  { %12888 = vmatprep.subr.bf16.mxu0 %v14806_v29 }
 0x3b6   :  { %12889 = vmatpush3.bf16.msra.mxu0 %v14806_v29  ;;  %v4322_v29 = vld [vmem:[#allocation2 + $0x1ea] sm:$0xff] }
 0x3b7   :  { %12890 = vmatprep.subr.bf16.mxu0 %v14807_v30 }
 0x3b9   :  { %12827 = vmatmul.mubr.bf16.gmra.mrb[8].mxu0 %v15580_v12  ;;  %v3803_v12 = vld [vmem:[#allocation2 + $0x181] sm:$0xff] }
 0x3ba   :  { %12830 = vmatprep.mubr.bf16.mxu0 %v15590_v32  ;;  %12891 = vmatpush3.bf16.msra.mxu0 %v14807_v30  ;;  %v3804_v32 = vld [vmem:[#allocation2 + $0x189] sm:$0xff]  ;;  %v4368_v30 = vpack.c.bf16 %v4320_v50, %v4319_v55 }
 0x3bb   :  { %12892 = vmatprep.subr.bf16.mxu0 %v14808_v0  ;;  %v3853_v54 = vpack.c.bf16 %v3804_v32, %v3803_v12  ;;  %v4325_v12 = vld [vmem:[#allocation2 + $0x212] sm:$0xff]  ;;  %v4326_v32 = vld [vmem:[#allocation2 + $0x21a] sm:$0xff] }
 0x3be   :  { %12893 = vmatpush3.bf16.msra.mxu0 %v14808_v0  ;;  %v4369_v0 = vpack.c.bf16 %v4322_v29, %v4321_v5 }
 0x3bf   :  { %12894 = vmatprep.subr.bf16.mxu0 %v14809_v2 }
 0x3c1   :  { %12831 = vmatmul.mubr.bf16.gmra.mrb[12].mxu0 %v15592_v39  ;;  %v3805_v39 = vld [vmem:[#allocation2 + $0x199] sm:$0xff] }
 0x3c2   :  { %12834 = vmatprep.mubr.bf16.mxu0 %v15604_v4  ;;  %12895 = vmatpush3.bf16.msra.mxu0 %v14809_v2  ;;  %v3854_v4 = vpack.c.bf16 %v3806_v49, %v3805_v39  ;;  %v4323_v2 = vld [vmem:[#allocation2 + $0x1fa] sm:$0xff]  ;;  %v4371_v39 = vpack.c.bf16 %v4326_v32, %v4325_v12  ;;  %v4327_v49 = vld [vmem:[#allocation2 + $0x22a] sm:$0xff] }
 0x3c3   :  { %12896 = vmatprep.subr.bf16.mxu0 %v14810_v58 }
 0x3c6   :  { %12897 = vmatpush3.bf16.msra.mxu0 %v14810_v58  ;;  %v4324_v58 = vld [vmem:[#allocation2 + $0x202] sm:$0xff] }
 0x3c9   :  { %12835 = vmatmul.mubr.bf16.gmra.mrb[16].mxu0 %v15606_v9  ;;  %v3835_v9 = vld [vmem:[#allocation2 + $0x331] sm:$0xff] }
 0x3ca   :  { %12838 = vmatprep.mubr.bf16.mxu0 %v15611_v37  ;;  %v3836_v37 = vld [vmem:[#allocation2 + $0x339] sm:$0xff] }
 0x3d1   :  { %12839 = vmatmul.mubr.bf16.gmra.mrb[20].mxu0 %v15613_v38  ;;  %v3869_v38 = vpack.c.bf16 %v3836_v37, %v3835_v9  ;;  %v4329_v9 = vld [vmem:[#allocation2 + $0x242] sm:$0xff] }
 0x3d2   :  { %12842 = vmatprep.mubr.bf16.mxu0 %v15617_v10  ;;  %v3837_v10 = vld [vmem:[#allocation2 + $0x349] sm:$0xff] }
 0x3d9   :  { %12843 = vmatmul.mubr.bf16.gmra.mrb[24].mxu0 %v15619_v13  ;;  %v3838_v13 = vld [vmem:[#allocation2 + $0x351] sm:$0xff] }
 0x3da   :  { %12846 = vmatprep.mubr.bf16.mxu0 %v3853_v54  ;;  %v4370_v54 = vpack.c.bf16 %v4324_v58, %v4323_v2 }
 0x3e1   :  { %12847 = vmatmul.mubr.bf16.gmra.mrb[28].mxu0 %v3854_v4  ;;  %v4328_v4 = vld [vmem:[#allocation2 + $0x232] sm:$0xff] }
 0x3e2   :  { %12850 = vmatprep.mubr.bf16.mxu0 %v15626_v25  ;;  %v4289_v25 = vld [vmem:[#allocation2 + $0x32] sm:$0xff]  ;;  %v4372_v37 = vpack.c.bf16 %v4328_v4, %v4327_v49 }
 0x3e9   :  { %12851 = vmatmul.mubr.bf16.gmra.mrb[32].mxu0 %v15628_v31  ;;  %v4290_v31 = vld [vmem:[#allocation2 + $0x3a] sm:$0xff] }
 0x3ea   :  { %12854 = vmatprep.mubr.bf16.mxu0 %v15632_v61  ;;  %v3870_v61 = vpack.c.bf16 %v3838_v13, %v3837_v10  ;;  %v4331_v10 = vld [vmem:[#allocation2 + $0x25a] sm:$0xff]  ;;  %v4332_v13 = vld [vmem:[#allocation2 + $0x262] sm:$0xff] }
 0x3f1   :  { %12855 = vmatmul.mubr.bf16.gmra.mrb[36].mxu0 %v15634_v16  ;;  %v4353_v16 = vpack.c.bf16 %v4290_v31, %v4289_v25  ;;  %v4333_v25 = vld [vmem:[#allocation2 + $0x272] sm:$0xff]  ;;  %v4334_v31 = vld [vmem:[#allocation2 + $0x27a] sm:$0xff] }
 0x3f2   :  { %12858 = vmatprep.mubr.bf16.mxu0 %v15638_v46  ;;  %v4291_v46 = vld [vmem:[#allocation2 + $0x4a] sm:$0xff] }
 0x3f9   :  { %12859 = vmatmul.mubr.bf16.gmra.mrb[40].mxu0 %v15640_v53  ;;  %v4292_v53 = vld [vmem:[#allocation2 + $0x52] sm:$0xff] }
 0x3fa   :  { %12862 = vmatprep.mubr.bf16.mxu0 %v15644_v51  ;;  %v4293_v51 = vld [vmem:[#allocation2 + $0x62] sm:$0xff] }
 0x401   :  { %12863 = vmatmul.mubr.bf16.gmra.mrb[44].mxu0 %v15646_v20  ;;  %v4294_v20 = vld [vmem:[#allocation2 + $0x6a] sm:$0xff] }
 0x402   :  { %12866 = vmatprep.mubr.bf16.mxu0 %v15650_v47  ;;  %v4354_v47 = vpack.c.bf16 %v4292_v53, %v4291_v46  ;;  %v4335_v46 = vld [vmem:[#allocation2 + $0x28a] sm:$0xff]  ;;  %v4336_v53 = vld [vmem:[#allocation2 + $0x292] sm:$0xff] }
 0x409   :  { %12867 = vmatmul.mubr.bf16.gmra.mrb[48].mxu0 %v15652_v48  ;;  %v4355_v48 = vpack.c.bf16 %v4294_v20, %v4293_v51  ;;  %v4337_v51 = vld [vmem:[#allocation2 + $0x2a2] sm:$0xff]  ;;  %v4338_v20 = vld [vmem:[#allocation2 + $0x2aa] sm:$0xff] }
 0x40a   :  { %12870 = vmatprep.mubr.bf16.mxu0 %v15656_v45  ;;  %v4295_v45 = vld [vmem:[#allocation2 + $0x7a] sm:$0xff] }
 0x411   :  { %12871 = vmatmul.mubr.bf16.gmra.mrb[52].mxu0 %v15658_v57  ;;  %v4296_v57 = vld [vmem:[#allocation2 + $0x82] sm:$0xff] }
 0x412   :  { %12874 = vmatprep.mubr.bf16.mxu0 %v15662_v6  ;;  %v4297_v6 = vld [vmem:[#allocation2 + $0x92] sm:$0xff]  ;;  %v4356_v22 = vpack.c.bf16 %v4296_v57, %v4295_v45  ;;  %v4339_v45 = vld [vmem:[#allocation2 + $0x2ba] sm:$0xff]  ;;  %v4340_v57 = vld [vmem:[#allocation2 + $0x2c2] sm:$0xff] }
 0x419   :  { %12875 = vmatmul.mubr.bf16.gmra.mrb[56].mxu0 %v15664_v24  ;;  %v4298_v24 = vld [vmem:[#allocation2 + $0x9a] sm:$0xff] }
 0x41a   :  { %12878 = vmatprep.mubr.bf16.mxu0 %v3869_v38  ;;  %v4357_v23 = vpack.c.bf16 %v4298_v24, %v4297_v6  ;;  %v4341_v6 = vld [vmem:[#allocation2 + $0x2d2] sm:$0xff]  ;;  %v4342_v24 = vld [vmem:[#allocation2 + $0x2da] sm:$0xff] }
 0x421   :  { %12879 = vmatmul.mubr.bf16.gmra.mrb[60].mxu0 %v3870_v61  ;;  %v4374_v61 = vpack.c.bf16 %v4332_v13, %v4331_v10 }
 0x422   :  { %12898 = vmatprep.mubr.bf16.mxu0 %v4353_v16  ;;  %v4375_v16 = vpack.c.bf16 %v4334_v31, %v4333_v25 }
 0x429   :  { %12899 = vmatmul.mubr.bf16.vlgmr.msra.gmra.mrb[0].mxu0 %v4354_v47  ;;  %v4376_v47 = vpack.c.bf16 %v4336_v53, %v4335_v46 }
 0x42a   :  { %12902 = vmatprep.mubr.bf16.mxu0 %v4355_v48  ;;  %v4377_v48 = vpack.c.bf16 %v4338_v20, %v4337_v51 }
 0x431   :  { %12903 = vmatmul.mubr.bf16.gmra.mrb[4].mxu0 %v4356_v22  ;;  %v4378_v22 = vpack.c.bf16 %v4340_v57, %v4339_v45 }
 0x432   :  { %12906 = vmatprep.mubr.bf16.mxu0 %v4357_v23  ;;  %v4379_v23 = vpack.c.bf16 %v4342_v24, %v4341_v6 }
 0x439   :  { %12907 = vmatmul.mubr.bf16.gmra.mrb[8].mxu0 %v4358_v11  ;;  %v4380_v11 = vpack.c.bf16 %v4344_v35, %v4343_v8 }
 0x43a   :  { %12910 = vmatprep.mubr.bf16.mxu0 %v4359_v21  ;;  %v4381_v21 = vpack.c.bf16 %v4346_v59, %v4345_v36 }
 0x441   :  { %12911 = vmatmul.mubr.bf16.gmra.mrb[12].mxu0 %v4360_v17  ;;  %v4352_v17 = vld [vmem:[#allocation2 + $0x352] sm:$0xff] }
 0x442   :  { %12914 = vmatprep.mubr.bf16.mxu0 %v4361_v18  ;;  %v4384_v18 = vpack.c.bf16 %v4352_v17, %v4351_v56 }
 0x449   :  { %12915 = vmatmul.mubr.bf16.gmra.mrb[16].mxu0 %v4362_v63 }
 0x44a   :  { %12918 = vmatprep.mubr.bf16.mxu0 %v4363_v3 }
 0x451   :  { %12919 = vmatmul.mubr.bf16.gmra.mrb[20].mxu0 %v4364_v52 }
 0x452   :  { %12922 = vmatprep.mubr.bf16.mxu0 %v4365_v7 }
 0x459   :  { %12923 = vmatmul.mubr.bf16.gmra.mrb[24].mxu0 %v4366_v42 }
 0x45a   :  { %12926 = vmatprep.mubr.bf16.mxu0 %v15711_v14  ;;  %v4330_v14 = vld [vmem:[#allocation2 + $0x24a] sm:$0xff] }
 0x45b   :  { %v4373_v38 = vpack.c.bf16 %v4330_v14, %v4329_v9 }
 0x461   :  { %12927 = vmatmul.mubr.bf16.gmra.mrb[28].mxu0 %v4368_v30 }
 0x462   :  { %12930 = vmatprep.mubr.bf16.mxu0 %v4369_v0 }
 0x469   :  { %12931 = vmatmul.mubr.bf16.gmra.mrb[32].mxu0 %v4370_v54 }
 0x46a   :  { %12934 = vmatprep.mubr.bf16.mxu0 %v4371_v39 }
 0x471   :  { %12935 = vmatmul.mubr.bf16.gmra.mrb[36].mxu0 %v4372_v37 }
 0x472   :  { %12938 = vmatprep.mubr.bf16.mxu0 %v4373_v38 }
 0x479   :  { %12939 = vmatmul.mubr.bf16.gmra.mrb[40].mxu0 %v4374_v61 }
 0x47a   :  { %12942 = vmatprep.mubr.bf16.mxu0 %v4375_v16 }
 0x481   :  { %12943 = vmatmul.mubr.bf16.gmra.mrb[44].mxu0 %v4376_v47 }
 0x482   :  { %12946 = vmatprep.mubr.bf16.mxu0 %v4377_v48 }
 0x489   :  { %12947 = vmatmul.mubr.bf16.gmra.mrb[48].mxu0 %v4378_v22 }
 0x48a   :  { %12950 = vmatprep.mubr.bf16.mxu0 %v4379_v23 }
 0x491   :  { %12951 = vmatmul.mubr.bf16.gmra.mrb[52].mxu0 %v4380_v11 }
 0x492   :  { %12954 = vmatprep.mubr.bf16.mxu0 %v4381_v21 }
 0x499   :  { %12955 = vmatmul.mubr.bf16.gmra.mrb[56].mxu0 %v4382_v40 }
 0x49a   :  { %12958 = vmatprep.mubr.bf16.mxu0 %v15729_v62 }
 0x4a1   :  { %12959 = vmatmul.mubr.bf16.gmra.mrb[60].mxu0 %v4384_v18 }
 0x4fc   :  { %v15813_v19 = vpop.f32.mrb[0].mxu0 }
 0x4fd   :  { %v15815_v33 = vpop.f32.mrb[1].mxu0 }
 0x4fe   :  { %v15817_v34 = vpop.f32.mrb[2].mxu0 }
 0x4ff   :  { %v15819_v44 = vpop.f32.mrb[3].mxu0 }
 0x500   :  { %v4803_v63 = vadd.f32 %v15819_v44, %v15815_v33 }
 0x502   :  { %v4804_v3 = vadd.f32 %v15813_v19, %v4803_v63 }
 0x504   :  { %v15824_v15 = vpop.f32.mrb[4].mxu0  ;;  %v4805_v62 = vadd.f32 %v15817_v34, %v4804_v3 }
 0x505   :  { %v15827_v27 = vpop.f32.mrb[5].mxu0 }
 0x506   :  { %v4806_v28 = vadd.f32 %v4805_v62, %v15827_v27  ;;  %v15830_v43 = vpop.f32.mrb[6].mxu0 }
 0x507   :  { %v15832_v52 = vpop.f32.mrb[7].mxu0 }
 0x508   :  { %v4807_v7 = vadd.f32 %v4806_v28, %v15832_v52 }
 0x50a   :  { %v4808_v26 = vadd.f32 %v15824_v15, %v4807_v7 }
 0x50c   :  { %v15836_v1 = vpop.f32.mrb[8].mxu0  ;;  %v4809_v42 = vadd.f32 %v15830_v43, %v4808_v26 }
 0x50d   :  { %v15839_v55 = vpop.f32.mrb[9].mxu0 }
 0x50e   :  { %v4810_v50 = vadd.f32 %v4809_v42, %v15839_v55  ;;  %v15842_v5 = vpop.f32.mrb[10].mxu0 }
 0x50f   :  { %v15844_v29 = vpop.f32.mrb[11].mxu0 }
 0x510   :  { %v4811_v30 = vadd.f32 %v4810_v50, %v15844_v29 }
 0x512   :  { %v4812_v0 = vadd.f32 %v15836_v1, %v4811_v30 }
 0x514   :  { %v15848_v2 = vpop.f32.mrb[12].mxu0  ;;  %v4813_v58 = vadd.f32 %v15842_v5, %v4812_v0 }
 0x515   :  { %v15851_v12 = vpop.f32.mrb[13].mxu0 }
 0x516   :  { %v4814_v32 = vadd.f32 %v4813_v58, %v15851_v12  ;;  %v15854_v54 = vpop.f32.mrb[14].mxu0 }
 0x517   :  { %v15856_v39 = vpop.f32.mrb[15].mxu0 }
 0x518   :  { %v4815_v49 = vadd.f32 %v4814_v32, %v15856_v39 }
 0x51a   :  { %v4816_v4 = vadd.f32 %v15848_v2, %v4815_v49 }
 0x51c   :  { %v15860_v9 = vpop.f32.mrb[16].mxu0  ;;  %v4817_v14 = vadd.f32 %v15854_v54, %v4816_v4 }
 0x51d   :  { %v15863_v37 = vpop.f32.mrb[17].mxu0 }
 0x51e   :  { %v4818_v38 = vadd.f32 %v4817_v14, %v15863_v37  ;;  %v15866_v10 = vpop.f32.mrb[18].mxu0 }
 0x51f   :  { %v15868_v13 = vpop.f32.mrb[19].mxu0 }
 0x520   :  { %v4819_v25 = vadd.f32 %v4818_v38, %v15868_v13 }
 0x522   :  { %v4820_v31 = vadd.f32 %v15860_v9, %v4819_v25 }
 0x524   :  { %v15872_v61 = vpop.f32.mrb[20].mxu0  ;;  %v4821_v16 = vadd.f32 %v15866_v10, %v4820_v31 }
 0x525   :  { %v15875_v46 = vpop.f32.mrb[21].mxu0 }
 0x526   :  { %v4822_v53 = vadd.f32 %v4821_v16, %v15875_v46  ;;  %v15878_v51 = vpop.f32.mrb[22].mxu0 }
 0x527   :  { %v15880_v20 = vpop.f32.mrb[23].mxu0 }
 0x528   :  { %v4823_v47 = vadd.f32 %v4822_v53, %v15880_v20 }
 0x52a   :  { %v4824_v48 = vadd.f32 %v15872_v61, %v4823_v47 }
 0x52c   :  { %v15884_v45 = vpop.f32.mrb[24].mxu0  ;;  %v4825_v57 = vadd.f32 %v15878_v51, %v4824_v48 }
 0x52d   :  { %v15887_v6 = vpop.f32.mrb[25].mxu0 }
 0x52e   :  { %v4826_v24 = vadd.f32 %v4825_v57, %v15887_v6  ;;  %v15890_v22 = vpop.f32.mrb[26].mxu0 }
 0x52f   :  { %v15892_v23 = vpop.f32.mrb[27].mxu0 }
 0x530   :  { %v4827_v8 = vadd.f32 %v4826_v24, %v15892_v23 }
 0x532   :  { %v4828_v35 = vadd.f32 %v15884_v45, %v4827_v8 }
 0x534   :  { %v15896_v36 = vpop.f32.mrb[28].mxu0  ;;  %v4829_v59 = vadd.f32 %v15890_v22, %v4828_v35 }
 0x535   :  { %v15899_v11 = vpop.f32.mrb[29].mxu0 }
 0x536   :  { %v4830_v21 = vadd.f32 %v4829_v59, %v15899_v11  ;;  %v15902_v41 = vpop.f32.mrb[30].mxu0 }
 0x537   :  { %v15904_v60 = vpop.f32.mrb[31].mxu0 }
 0x538   :  { %v4831_v40 = vadd.f32 %v4830_v21, %v15904_v60 }
 0x53a   :  { %v4832_v56 = vadd.f32 %v15896_v36, %v4831_v40 }
 0x53c   :  { %v15908_v17 = vpop.f32.mrb[32].mxu0  ;;  %v4833_v18 = vadd.f32 %v15902_v41, %v4832_v56 }
 0x53d   :  { %v15911_v63 = vpop.f32.mrb[33].mxu0 }
 0x53e   :  { %v4834_v3 = vadd.f32 %v4833_v18, %v15911_v63  ;;  %v15914_v62 = vpop.f32.mrb[34].mxu0 }
 0x53f   :  { %v15916_v28 = vpop.f32.mrb[35].mxu0 }
 0x540   :  { %v4835_v7 = vadd.f32 %v4834_v3, %v15916_v28 }
 0x542   :  { %v4836_v26 = vadd.f32 %v15908_v17, %v4835_v7 }
 0x544   :  { %v15920_v42 = vpop.f32.mrb[36].mxu0  ;;  %v4837_v50 = vadd.f32 %v15914_v62, %v4836_v26 }
 0x545   :  { %v15923_v30 = vpop.f32.mrb[37].mxu0 }
 0x546   :  { %v4838_v0 = vadd.f32 %v4837_v50, %v15923_v30  ;;  %v15926_v58 = vpop.f32.mrb[38].mxu0 }
 0x547   :  { %v15928_v32 = vpop.f32.mrb[39].mxu0 }
 0x548   :  { %v4839_v49 = vadd.f32 %v4838_v0, %v15928_v32 }
 0x54a   :  { %v4840_v4 = vadd.f32 %v15920_v42, %v4839_v49 }
 0x54c   :  { %v15932_v14 = vpop.f32.mrb[40].mxu0  ;;  %v4841_v38 = vadd.f32 %v15926_v58, %v4840_v4 }
 0x54d   :  { %v15935_v25 = vpop.f32.mrb[41].mxu0 }
 0x54e   :  { %v4842_v31 = vadd.f32 %v4841_v38, %v15935_v25  ;;  %v15938_v16 = vpop.f32.mrb[42].mxu0 }
 0x54f   :  { %v15940_v53 = vpop.f32.mrb[43].mxu0 }
 0x550   :  { %v4843_v47 = vadd.f32 %v4842_v31, %v15940_v53 }
 0x552   :  { %v4844_v48 = vadd.f32 %v15932_v14, %v4843_v47 }
 0x554   :  { %v15944_v57 = vpop.f32.mrb[44].mxu0  ;;  %v4845_v24 = vadd.f32 %v15938_v16, %v4844_v48 }
 0x555   :  { %v15947_v8 = vpop.f32.mrb[45].mxu0 }
 0x556   :  { %v4846_v35 = vadd.f32 %v4845_v24, %v15947_v8  ;;  %v15950_v59 = vpop.f32.mrb[46].mxu0 }
 0x557   :  { %v15952_v21 = vpop.f32.mrb[47].mxu0 }
 0x558   :  { %v4847_v40 = vadd.f32 %v4846_v35, %v15952_v21 }
 0x55a   :  { %v4848_v56 = vadd.f32 %v15944_v57, %v4847_v40 }
 0x55c   :  { %v15956_v18 = vpop.f32.mrb[48].mxu0  ;;  %v4849_v3 = vadd.f32 %v15950_v59, %v4848_v56 }
 0x55d   :  { %19211 = vst [vmem:[#allocation3_spill] sm:$0xff] %v15956_v18  ;;  %v15959_v7 = vpop.f32.mrb[49].mxu0 }
 0x55e   :  { %19212 = vst [vmem:[#allocation4_spill] sm:$0xff] %v15959_v7  ;;  %v4850_v26 = vadd.f32 %v4849_v3, %v15959_v7  ;;  %v15962_v50 = vpop.f32.mrb[50].mxu0 }
 0x55f   :  { %19213 = vst [vmem:[#allocation5_spill] sm:$0xff] %v15962_v50  ;;  %v15964_v0 = vpop.f32.mrb[51].mxu0 }
 0x560   :  { %19214 = vst [vmem:[#allocation6_spill] sm:$0xff] %v15964_v0  ;;  %v4851_v49 = vadd.f32 %v4850_v26, %v15964_v0 }
 0x562   :  { %v4852_v4 = vadd.f32 %v15956_v18, %v4851_v49 }
 0x564   :  { %v15968_v38 = vpop.f32.mrb[52].mxu0  ;;  %v4853_v31 = vadd.f32 %v15962_v50, %v4852_v4 }
 0x565   :  { %19215 = vst [vmem:[#allocation7_spill] sm:$0xff] %v15968_v38  ;;  %v15971_v47 = vpop.f32.mrb[53].mxu0 }
 0x566   :  { %19216 = vst [vmem:[#allocation8_spill] sm:$0xff] %v15971_v47  ;;  %v4854_v48 = vadd.f32 %v4853_v31, %v15971_v47  ;;  %v15974_v24 = vpop.f32.mrb[54].mxu0 }
 0x567   :  { %19217 = vst [vmem:[#allocation9_spill] sm:$0xff] %v15974_v24  ;;  %v15976_v35 = vpop.f32.mrb[55].mxu0 }
 0x568   :  { %19218 = vst [vmem:[#allocation10_spill] sm:$0xff] %v15976_v35  ;;  %v4855_v40 = vadd.f32 %v4854_v48, %v15976_v35 }
 0x56a   :  { %v4856_v56 = vadd.f32 %v15968_v38, %v4855_v40 }
 0x56c   :  { %v15980_v3 = vpop.f32.mrb[56].mxu0  ;;  %v4857_v26 = vadd.f32 %v15974_v24, %v4856_v56 }
 0x56d   :  { %19219 = vst [vmem:[#allocation11_spill] sm:$0xff] %v15980_v3  ;;  %v15983_v49 = vpop.f32.mrb[57].mxu0 }
 0x56e   :  { %19220 = vst [vmem:[#allocation12_spill] sm:$0xff] %v15983_v49  ;;  %v4858_v4 = vadd.f32 %v4857_v26, %v15983_v49  ;;  %v15986_v50 = vpop.f32.mrb[58].mxu0 }
 0x56f   :  { %19221 = vst [vmem:[#allocation13_spill] sm:$0xff] %v15986_v50  ;;  %v15988_v18 = vpop.f32.mrb[59].mxu0 }
 0x570   :  { %19222 = vst [vmem:[#allocation14_spill] sm:$0xff] %v15988_v18  ;;  %v4859_v31 = vadd.f32 %v4858_v4, %v15988_v18 }
 0x572   :  { %v4860_v47 = vadd.f32 %v15980_v3, %v4859_v31 }
 0x574   :  { %v15992_v0 = vpop.f32.mrb[60].mxu0  ;;  %v4861_v48 = vadd.f32 %v15986_v50, %v4860_v47 }
 0x575   :  { %v15995_v40 = vpop.f32.mrb[61].mxu0 }
 0x576   :  { %19223 = vst [vmem:[#allocation15_spill] sm:$0xff] %v15995_v40  ;;  %v4862_v56 = vadd.f32 %v4861_v48, %v15995_v40  ;;  %v15998_v24 = vpop.f32.mrb[62].mxu0 }
 0x577   :  { %v16000_v38 = vpop.f32.mrb[63].mxu0 }
 0x578   :  { %v4863_v26 = vadd.f32 %v4862_v56, %v16000_v38 }
 0x57a   :  { %v4864_v49 = vadd.f32 %v15992_v0, %v4863_v26  ;;  %v19237_v26 = vld [vmem:[#allocation5_spill] sm:$0xff] }
 0x57c   :  { %v4865_v4 = vadd.f32 %v15998_v24, %v4864_v49  ;;  %v19235_v49 = vld [vmem:[#allocation3_spill] sm:$0xff] }
 0x57e   :  { %v4866_v18 = vrot.slane %v4865_v4, 4 }
 0x580   :  { %v4867_v31 = vadd.f32 %v4866_v18, %v4865_v4  ;;  %v19239_v4 = vld [vmem:[#allocation8_spill] sm:$0xff] }
 0x582   :  { %v4868_v3 = vrot.slane %v4867_v31, 2 }
 0x584   :  { %v4869_v35 = vadd.f32 %v4868_v3, %v4867_v31  ;;  %v19233_v3 = vld [vmem:[#allocation6_spill] sm:$0xff] }
 0x585   :  { %v19241_v31 = vld [vmem:[#allocation10_spill] sm:$0xff] }
 0x586   :  { %v4870_v7 = vrot.slane %v4869_v35, 1 }
 0x588   :  { %v4871_v47 = vadd.f32 %v4870_v7, %v4869_v35  ;;  %v19231_v35 = vld [vmem:[#allocation4_spill] sm:$0xff] }
 0x58a   :  { %v16005_v50 = vmul.f32 0.001953125, %v4871_v47 }
 0x58c   :  { %v16009_v48 = vsub.f32 %v15815_v33, %v16005_v50  ;;  %v16013_v40 = vsub.f32 %v15819_v44, %v16005_v50  ;;  %v16017_v56 = vsub.f32 %v15813_v19, %v16005_v50  ;;  %v16021_v18 = vsub.f32 %v15817_v34, %v16005_v50 }
 0x58d   :  { %v16025_v7 = vsub.f32 %v15827_v27, %v16005_v50  ;;  %v16029_v33 = vsub.f32 %v15832_v52, %v16005_v50  ;;  %v16033_v44 = vsub.f32 %v15824_v15, %v16005_v50  ;;  %v16037_v19 = vsub.f32 %v15830_v43, %v16005_v50 }
 0x58e   :  { %19224 = vst [vmem:[#allocation16_spill] sm:$0xff] %v16009_v48  ;;  %19225 = vst [vmem:[#allocation17_spill] sm:$0xff] %v16013_v40  ;;  %v16041_v34 = vsub.f32 %v15839_v55, %v16005_v50  ;;  %v16045_v27 = vsub.f32 %v15844_v29, %v16005_v50  ;;  %v16049_v52 = vsub.f32 %v15836_v1, %v16005_v50 }
 0x58f   :  { %19226 = vst [vmem:[#allocation18_spill] sm:$0xff] %v16017_v56  ;;  %v16053_v15 = vsub.f32 %v15842_v5, %v16005_v50  ;;  %v16057_v43 = vsub.f32 %v15851_v12, %v16005_v50  ;;  %v16061_v55 = vsub.f32 %v15856_v39, %v16005_v50  ;;  %v16065_v29 = vsub.f32 %v15848_v2, %v16005_v50 }
 0x590   :  { %v16069_v1 = vsub.f32 %v15854_v54, %v16005_v50  ;;  %v16073_v5 = vsub.f32 %v15863_v37, %v16005_v50  ;;  %v16077_v12 = vsub.f32 %v15868_v13, %v16005_v50  ;;  %v16081_v39 = vsub.f32 %v15860_v9, %v16005_v50 }
 0x591   :  { %v16085_v2 = vsub.f32 %v15866_v10, %v16005_v50  ;;  %v16089_v54 = vsub.f32 %v15875_v46, %v16005_v50  ;;  %v16093_v37 = vsub.f32 %v15880_v20, %v16005_v50  ;;  %v16097_v13 = vsub.f32 %v15872_v61, %v16005_v50 }
 0x592   :  { %v16101_v9 = vsub.f32 %v15878_v51, %v16005_v50  ;;  %v16105_v10 = vsub.f32 %v15887_v6, %v16005_v50  ;;  %v16109_v46 = vsub.f32 %v15892_v23, %v16005_v50  ;;  %v16113_v20 = vsub.f32 %v15884_v45, %v16005_v50 }
 0x593   :  { %v16117_v61 = vsub.f32 %v15890_v22, %v16005_v50  ;;  %v16121_v51 = vsub.f32 %v15899_v11, %v16005_v50  ;;  %v16125_v6 = vsub.f32 %v15904_v60, %v16005_v50  ;;  %v16129_v23 = vsub.f32 %v15896_v36, %v16005_v50 }
 0x594   :  { %v16133_v45 = vsub.f32 %v15902_v41, %v16005_v50  ;;  %v16137_v22 = vsub.f32 %v15911_v63, %v16005_v50  ;;  %v16141_v11 = vsub.f32 %v15916_v28, %v16005_v50  ;;  %v16145_v60 = vsub.f32 %v15908_v17, %v16005_v50 }
 0x595   :  { %v16149_v36 = vsub.f32 %v15914_v62, %v16005_v50  ;;  %v16153_v41 = vsub.f32 %v15923_v30, %v16005_v50  ;;  %v16157_v63 = vsub.f32 %v15928_v32, %v16005_v50  ;;  %v16161_v28 = vsub.f32 %v15920_v42, %v16005_v50 }
 0x596   :  { %v16165_v17 = vsub.f32 %v15926_v58, %v16005_v50  ;;  %v16169_v62 = vsub.f32 %v15935_v25, %v16005_v50  ;;  %v16173_v30 = vsub.f32 %v15940_v53, %v16005_v50  ;;  %v16177_v32 = vsub.f32 %v15932_v14, %v16005_v50 }
 0x597   :  { %v16181_v42 = vsub.f32 %v15938_v16, %v16005_v50  ;;  %v16185_v58 = vsub.f32 %v15947_v8, %v16005_v50  ;;  %v16189_v25 = vsub.f32 %v15952_v21, %v16005_v50  ;;  %v16193_v53 = vsub.f32 %v15944_v57, %v16005_v50 }
 0x598   :  { %v16197_v14 = vsub.f32 %v15950_v59, %v16005_v50  ;;  %v16201_v16 = vsub.f32 %v19231_v35, %v16005_v50  ;;  %v16205_v8 = vsub.f32 %v19233_v3, %v16005_v50  ;;  %v16209_v21 = vsub.f32 %v19235_v49, %v16005_v50  ;;  %v19243_v35 = vld [vmem:[#allocation7_spill] sm:$0xff] }
 0x599   :  { %19227 = vst [vmem:[#allocation19_spill] sm:$0xff] %v16185_v58  ;;  %19228 = vst [vmem:[#allocation20_spill] sm:$0xff] %v16189_v25  ;;  %v16213_v57 = vsub.f32 %v19237_v26, %v16005_v50  ;;  %v16217_v59 = vsub.f32 %v19239_v4, %v16005_v50  ;;  %v16221_v47 = vsub.f32 %v19241_v31, %v16005_v50 }
 0x59a   :  { %19229 = vst [vmem:[#allocation21_spill] sm:$0xff] %v16193_v53  ;;  %19230 = vst [vmem:[#allocation22_spill] sm:$0xff] %v16197_v14  ;;  %v16225_v3 = vsub.f32 %v19243_v35, %v16005_v50 }
 0x59b   :  { %19232 = vst [vmem:[#allocation4_spill] sm:$0xff] %v16201_v16  ;;  %19234 = vst [vmem:[#allocation6_spill] sm:$0xff] %v16205_v8  ;;  %v19245_v8 = vld [vmem:[#allocation9_spill] sm:$0xff] }
 0x59c   :  { %19236 = vst [vmem:[#allocation3_spill] sm:$0xff] %v16209_v21  ;;  %19238 = vst [vmem:[#allocation5_spill] sm:$0xff] %v16213_v57  ;;  %v16229_v49 = vsub.f32 %v19245_v8, %v16005_v50  ;;  %v19247_v21 = vld [vmem:[#allocation12_spill] sm:$0xff]  ;;  %v19249_v57 = vld [vmem:[#allocation14_spill] sm:$0xff] }
 0x59d   :  { %19240 = vst [vmem:[#allocation8_spill] sm:$0xff] %v16217_v59  ;;  %19242 = vst [vmem:[#allocation10_spill] sm:$0xff] %v16221_v47  ;;  %v16233_v26 = vsub.f32 %v19247_v21, %v16005_v50  ;;  %v16237_v4 = vsub.f32 %v19249_v57, %v16005_v50  ;;  %v19251_v59 = vld [vmem:[#allocation11_spill] sm:$0xff]  ;;  %v19253_v47 = vld [vmem:[#allocation13_spill] sm:$0xff]  ;;  %v16253_v21 = vsub.f32 %v16000_v38, %v16005_v50 }
 0x59e   :  { %19244 = vst [vmem:[#allocation7_spill] sm:$0xff] %v16225_v3  ;;  %19246 = vst [vmem:[#allocation9_spill] sm:$0xff] %v16229_v49  ;;  %v16241_v31 = vsub.f32 %v19251_v59, %v16005_v50  ;;  %v16245_v35 = vsub.f32 %v19253_v47, %v16005_v50  ;;  %v19255_v3 = vld [vmem:[#allocation15_spill] sm:$0xff]  ;;  %v16257_v57 = vsub.f32 %v15992_v0, %v16005_v50 }
 0x59f   :  { %19248 = vst [vmem:[#allocation12_spill] sm:$0xff] %v16233_v26  ;;  %19250 = vst [vmem:[#allocation14_spill] sm:$0xff] %v16237_v4  ;;  %v16249_v8 = vsub.f32 %v19255_v3, %v16005_v50  ;;  %v16261_v59 = vsub.f32 %v15998_v24, %v16005_v50  ;;  %v4937_v47 = vmul.f32 %v16009_v48, %v16009_v48 }
 0x5a0   :  { %19252 = vst [vmem:[#allocation11_spill] sm:$0xff] %v16241_v31  ;;  %19254 = vst [vmem:[#allocation13_spill] sm:$0xff] %v16245_v35  ;;  %v4938_v35 = vmul.f32 %v16013_v40, %v16013_v40  ;;  %v4939_v3 = vmul.f32 %v16017_v56, %v16017_v56  ;;  %v4940_v38 = vmul.f32 %v16021_v18, %v16021_v18 }
 0x5a1   :  { %19256 = vst [vmem:[#allocation15_spill] sm:$0xff] %v16249_v8  ;;  %19257 = vst [vmem:[#allocation23_spill] sm:$0xff] %v16253_v21  ;;  %v4941_v0 = vmul.f32 %v16025_v7, %v16025_v7  ;;  %v4942_v50 = vmul.f32 %v16029_v33, %v16029_v33  ;;  %v4943_v48 = vmul.f32 %v16033_v44, %v16033_v44 }
 0x5a2   :  { %19258 = vst [vmem:[#allocation24_spill] sm:$0xff] %v16257_v57  ;;  %v5001_v8 = vadd.f32 %v4938_v35, %v4937_v47  ;;  %v4944_v56 = vmul.f32 %v16037_v19, %v16037_v19  ;;  %v4945_v47 = vmul.f32 %v16041_v34, %v16041_v34 }
 0x5a4   :  { %v5002_v21 = vadd.f32 %v5001_v8, %v4939_v3  ;;  %v4946_v3 = vmul.f32 %v16045_v27, %v16045_v27 }
 0x5a6   :  { %v5003_v57 = vadd.f32 %v5002_v21, %v4940_v38  ;;  %v4947_v38 = vmul.f32 %v16049_v52, %v16049_v52 }
 0x5a8   :  { %v5004_v24 = vadd.f32 %v5003_v57, %v4941_v0  ;;  %v4948_v0 = vmul.f32 %v16053_v15, %v16053_v15 }
 0x5aa   :  { %v5005_v40 = vadd.f32 %v5004_v24, %v4942_v50  ;;  %v4949_v24 = vmul.f32 %v16057_v43, %v16057_v43 }
 0x5ac   :  { %v5006_v35 = vadd.f32 %v5005_v40, %v4943_v48  ;;  %v4950_v48 = vmul.f32 %v16061_v55, %v16061_v55 }
 0x5ae   :  { %v5007_v8 = vadd.f32 %v5006_v35, %v4944_v56  ;;  %v4951_v35 = vmul.f32 %v16065_v29, %v16065_v29 }
 0x5b0   :  { %v5008_v21 = vadd.f32 %v5007_v8, %v4945_v47  ;;  %v4952_v8 = vmul.f32 %v16069_v1, %v16069_v1 }
 0x5b2   :  { %v5009_v57 = vadd.f32 %v5008_v21, %v4946_v3  ;;  %v4953_v21 = vmul.f32 %v16073_v5, %v16073_v5 }
 0x5b4   :  { %v5010_v50 = vadd.f32 %v5009_v57, %v4947_v38  ;;  %v4954_v57 = vmul.f32 %v16077_v12, %v16077_v12 }
 0x5b6   :  { %v5011_v40 = vadd.f32 %v5010_v50, %v4948_v0  ;;  %v4955_v50 = vmul.f32 %v16081_v39, %v16081_v39 }
 0x5b8   :  { %v5012_v56 = vadd.f32 %v5011_v40, %v4949_v24  ;;  %v4956_v40 = vmul.f32 %v16085_v2, %v16085_v2 }
 0x5ba   :  { %v5013_v47 = vadd.f32 %v5012_v56, %v4950_v48  ;;  %v4957_v56 = vmul.f32 %v16089_v54, %v16089_v54 }
 0x5bc   :  { %v5014_v3 = vadd.f32 %v5013_v47, %v4951_v35  ;;  %v4958_v47 = vmul.f32 %v16093_v37, %v16093_v37 }
 0x5be   :  { %v5015_v38 = vadd.f32 %v5014_v3, %v4952_v8  ;;  %v4959_v3 = vmul.f32 %v16097_v13, %v16097_v13 }
 0x5c0   :  { %v5016_v0 = vadd.f32 %v5015_v38, %v4953_v21  ;;  %v4960_v38 = vmul.f32 %v16101_v9, %v16101_v9 }
 0x5c2   :  { %v5017_v24 = vadd.f32 %v5016_v0, %v4954_v57  ;;  %v4961_v0 = vmul.f32 %v16105_v10, %v16105_v10 }
 0x5c4   :  { %v5018_v48 = vadd.f32 %v5017_v24, %v4955_v50  ;;  %v4962_v24 = vmul.f32 %v16109_v46, %v16109_v46 }
 0x5c6   :  { %v5019_v35 = vadd.f32 %v5018_v48, %v4956_v40  ;;  %v14811_v48 = vld [vmem:[%s19079_s4 + $0x40] sm:$0xff]  }
 0x5c7   :  { %12962 = vmatprep.subr.bf16.mxu1 %v14811_v48 }
 0x5c8   :  { %v5020_v8 = vadd.f32 %v5019_v35, %v4957_v56  ;;  %v4963_v56 = vmul.f32 %v16113_v20, %v16113_v20  ;;  %12963 = vmatpush3.bf16.msra.mxu1 %v14811_v48  ;;  %v4968_v48 = vmul.f32 %v16133_v45, %v16133_v45 }
 0x5ca   :  { %v5021_v21 = vadd.f32 %v5020_v8, %v4958_v47  ;;  %v4964_v47 = vmul.f32 %v16117_v61, %v16117_v61 }
 0x5cc   :  { %v5022_v57 = vadd.f32 %v5021_v21, %v4959_v3  ;;  %v14812_v3 = vld [vmem:[%s19079_s4 + $0x48] sm:$0xff]   ;;  %v4965_v21 = vmul.f32 %v16121_v51, %v16121_v51 }
 0x5cd   :  { %12964 = vmatprep.subr.bf16.mxu1 %v14812_v3 }
 0x5ce   :  { %v5023_v50 = vadd.f32 %v5022_v57, %v4960_v38  ;;  %12965 = vmatpush3.bf16.msra.mxu1 %v14812_v3  ;;  %v4966_v57 = vmul.f32 %v16125_v6, %v16125_v6  ;;  %v4970_v3 = vmul.f32 %v16141_v11, %v16141_v11 }
 0x5d0   :  { %v5024_v40 = vadd.f32 %v5023_v50, %v4961_v0  ;;  %v14813_v50 = vld [vmem:[%s19079_s4 + $0x50] sm:$0xff]  }
 0x5d1   :  { %12966 = vmatprep.subr.bf16.mxu1 %v14813_v50 }
 0x5d2   :  { %v5025_v35 = vadd.f32 %v5024_v40, %v4962_v24  ;;  %v4967_v24 = vmul.f32 %v16129_v23, %v16129_v23  ;;  %12967 = vmatpush3.bf16.msra.mxu1 %v14813_v50  ;;  %v4972_v50 = vmul.f32 %v16149_v36, %v16149_v36 }
 0x5d4   :  { %v5026_v8 = vadd.f32 %v5025_v35, %v4963_v56  ;;  %v14814_v35 = vld [vmem:[%s19079_s4 + $0x58] sm:$0xff]  }
 0x5d5   :  { %12968 = vmatprep.subr.bf16.mxu1 %v14814_v35 }
 0x5d6   :  { %v5027_v38 = vadd.f32 %v5026_v8, %v4964_v47  ;;  %v4969_v47 = vmul.f32 %v16137_v22, %v16137_v22  ;;  %12969 = vmatpush3.bf16.msra.mxu1 %v14814_v35  ;;  %v4974_v35 = vmul.f32 %v16157_v63, %v16157_v63 }
 0x5d8   :  { %v5028_v0 = vadd.f32 %v5027_v38, %v4965_v21  ;;  %v14815_v38 = vld [vmem:[%s19079_s4 + $0x60] sm:$0xff]  }
 0x5d9   :  { %12970 = vmatprep.subr.bf16.mxu1 %v14815_v38 }
 0x5da   :  { %v5029_v40 = vadd.f32 %v5028_v0, %v4966_v57  ;;  %v4971_v57 = vmul.f32 %v16145_v60, %v16145_v60  ;;  %12971 = vmatpush3.bf16.msra.mxu1 %v14815_v38  ;;  %v4976_v38 = vmul.f32 %v16165_v17, %v16165_v17 }
 0x5dc   :  { %v5030_v56 = vadd.f32 %v5029_v40, %v4967_v24  ;;  %v14816_v40 = vld [vmem:[%s19079_s4 + $0x68] sm:$0xff]  }
 0x5dd   :  { %12972 = vmatprep.subr.bf16.mxu1 %v14816_v40 }
 0x5de   :  { %v5031_v8 = vadd.f32 %v5030_v56, %v4968_v48  ;;  %v4973_v48 = vmul.f32 %v16153_v41, %v16153_v41  ;;  %12973 = vmatpush3.bf16.msra.mxu1 %v14816_v40  ;;  %v5456_v40 = vld [vmem:[#allocation2 + $0x1] sm:$0xff] }
 0x5e0   :  { %v5032_v21 = vadd.f32 %v5031_v8, %v4969_v47  ;;  %v14817_v8 = vld [vmem:[%s19079_s4 + $0x70] sm:$0xff]  }
 0x5e1   :  { %12974 = vmatprep.subr.bf16.mxu1 %v14817_v8 }
 0x5e2   :  { %v5033_v0 = vadd.f32 %v5032_v21, %v4970_v3  ;;  %v4975_v3 = vmul.f32 %v16161_v28, %v16161_v28  ;;  %12975 = vmatpush3.bf16.msra.mxu1 %v14817_v8  ;;  %v16374_v8 = vld [vmem:[%s19079_s4] sm:$0xff]  }
 0x5e3   :  { %19259 = vst [vmem:[#allocation25_spill] sm:$0xff] %v16374_v8 }
 0x5e4   :  { %v5034_v24 = vadd.f32 %v5033_v0, %v4971_v57  ;;  %v14818_v0 = vld [vmem:[%s19079_s4 + $0x78] sm:$0xff]  }
 0x5e5   :  { %12976 = vmatprep.subr.bf16.mxu1 %v14818_v0 }
 0x5e6   :  { %v5035_v56 = vadd.f32 %v5034_v24, %v4972_v50  ;;  %v4977_v50 = vmul.f32 %v16169_v62, %v16169_v62  ;;  %12977 = vmatpush3.bf16.msra.mxu1 %v14818_v0  ;;  %v4981_v0 = vmul.f32 %v16185_v58, %v16185_v58 }
 0x5e7   :  { %13042 = vmatprep.subr.bf16.mxu1 %v16374_v8  ;;  %v4985_v8 = vmul.f32 %v16201_v16, %v16201_v16 }
 0x5e8   :  { %v5036_v47 = vadd.f32 %v5035_v56, %v4973_v48  ;;  %v5457_v48 = vld [vmem:[#allocation2 + $0x9] sm:$0xff] }
 0x5e9   :  { %v5520_v56 = vpack.c.bf16 %v5457_v48, %v5456_v40  ;;  %v4983_v48 = vmul.f32 %v16193_v53, %v16193_v53 }
 0x5ea   :  { %v5037_v21 = vadd.f32 %v5036_v47, %v4974_v35  ;;  %v4978_v35 = vmul.f32 %v16173_v30, %v16173_v30 }
 0x5eb   :  { %12978 = vmatprep.mubr.bf16.mxu1 %v5520_v56 }
 0x5ec   :  { %v5038_v57 = vadd.f32 %v5037_v21, %v4975_v3  ;;  %v4979_v3 = vmul.f32 %v16177_v32, %v16177_v32 }
 0x5ee   :  { %v5039_v24 = vadd.f32 %v5038_v57, %v4976_v38  ;;  %v4980_v38 = vmul.f32 %v16181_v42, %v16181_v42 }
 0x5f0   :  { %v5040_v47 = vadd.f32 %v5039_v24, %v4977_v50  ;;  %v4982_v24 = vmul.f32 %v16189_v25, %v16189_v25 }
 0x5f2   :  { %v5041_v21 = vadd.f32 %v5040_v47, %v4978_v35  ;;  %v4984_v35 = vmul.f32 %v16197_v14, %v16197_v14 }
 0x5f4   :  { %v5042_v57 = vadd.f32 %v5041_v21, %v4979_v3  ;;  %v19260_v21 = vld [vmem:[#allocation6_spill] sm:$0xff] }
 0x5f5   :  { %v4986_v58 = vmul.f32 %v19260_v21, %v19260_v21 }
 0x5f6   :  { %v5043_v50 = vadd.f32 %v5042_v57, %v4980_v38  ;;  %v19261_v57 = vld [vmem:[#allocation3_spill] sm:$0xff] }
 0x5f7   :  { %v4987_v25 = vmul.f32 %v19261_v57, %v19261_v57 }
 0x5f8   :  { %v5044_v40 = vadd.f32 %v5043_v50, %v4981_v0  ;;  %v19262_v50 = vld [vmem:[#allocation5_spill] sm:$0xff] }
 0x5f9   :  { %v4988_v53 = vmul.f32 %v19262_v50, %v19262_v50 }
 0x5fa   :  { %v5045_v56 = vadd.f32 %v5044_v40, %v4982_v24  ;;  %v19263_v40 = vld [vmem:[#allocation8_spill] sm:$0xff] }
 0x5fb   :  { %v4989_v14 = vmul.f32 %v19263_v40, %v19263_v40  ;;  %v5076_v40 = vlaneseq }
 0x5fc   :  { %v5046_v47 = vadd.f32 %v5045_v56, %v4983_v48  ;;  %v19264_v56 = vld [vmem:[#allocation10_spill] sm:$0xff] }
 0x5fd   :  { %v4990_v16 = vmul.f32 %v19264_v56, %v19264_v56 }
 0x5fe   :  { %v5047_v3 = vadd.f32 %v5046_v47, %v4984_v35  ;;  %v19265_v47 = vld [vmem:[#allocation7_spill] sm:$0xff] }
 0x5ff   :  { %v4991_v21 = vmul.f32 %v19265_v47, %v19265_v47 }
 0x600   :  { %v5048_v38 = vadd.f32 %v5047_v3, %v4985_v8  ;;  %v4992_v3 = vmul.f32 %v16229_v49, %v16229_v49 }
 0x602   :  { %v5049_v0 = vadd.f32 %v5048_v38, %v4986_v58  ;;  %v4993_v38 = vmul.f32 %v16233_v26, %v16233_v26 }
 0x604   :  { %v5050_v24 = vadd.f32 %v5049_v0, %v4987_v25  ;;  %v4994_v0 = vmul.f32 %v16237_v4, %v16237_v4 }
 0x606   :  { %v5051_v48 = vadd.f32 %v5050_v24, %v4988_v53  ;;  %v4995_v24 = vmul.f32 %v16241_v31, %v16241_v31 }
 0x608   :  { %v5052_v35 = vadd.f32 %v5051_v48, %v4989_v14  ;;  %v19266_v48 = vld [vmem:[#allocation13_spill] sm:$0xff] }
 0x609   :  { %v4996_v47 = vmul.f32 %v19266_v48, %v19266_v48 }
 0x60a   :  { %v5053_v8 = vadd.f32 %v5052_v35, %v4990_v16  ;;  %v19267_v35 = vld [vmem:[#allocation15_spill] sm:$0xff] }
 0x60b   :  { %v4997_v49 = vmul.f32 %v19267_v35, %v19267_v35 }
 0x60c   :  { %v5054_v58 = vadd.f32 %v5053_v8, %v4991_v21  ;;  %v19268_v8 = vld [vmem:[#allocation23_spill] sm:$0xff] }
 0x60d   :  { %v4998_v26 = vmul.f32 %v19268_v8, %v19268_v8 }
 0x60e   :  { %v5055_v25 = vadd.f32 %v5054_v58, %v4992_v3  ;;  %v19269_v58 = vld [vmem:[#allocation24_spill] sm:$0xff] }
 0x60f   :  { %v4999_v4 = vmul.f32 %v19269_v58, %v19269_v58 }
 0x610   :  { %v5056_v53 = vadd.f32 %v5055_v25, %v4993_v38  ;;  %v5000_v25 = vmul.f32 %v16261_v59, %v16261_v59 }
 0x612   :  { %v5057_v14 = vadd.f32 %v5056_v53, %v4994_v0 }
 0x614   :  { %v5058_v16 = vadd.f32 %v5057_v14, %v4995_v24 }
 0x616   :  { %v5059_v21 = vadd.f32 %v5058_v16, %v4996_v47 }
 0x618   :  { %v5060_v3 = vadd.f32 %v5059_v21, %v4997_v49  ;;  %v16421_v49 = vshrl.u32 %v5076_v40, 7 }
 0x61a   :  { %v5061_v38 = vadd.f32 %v5060_v3, %v4998_v26  ;;  %19270 = vst [vmem:[#allocation3_spill] sm:$0xff] %v16421_v49  ;;  %v5071_v26 = vld [vmem:[%s19080_s2] sm:$0x1]  ;;  %v19127_v21 = vsub.s32 0, %v16421_v49  ;;  %v19286_v49 = vld [vmem:[#allocation10_spill] sm:$0xff] }
 0x61c   :  { %v5062_v0 = vadd.f32 %v5061_v38, %v4999_v4  ;;  %v19272_v38 = vld [vmem:[#allocation17_spill] sm:$0xff] }
 0x61e   :  { %v5063_v53 = vadd.f32 %v5062_v0, %v5000_v25  ;;  %v19273_v0 = vld [vmem:[#allocation18_spill] sm:$0xff] }
 0x620   :  { %v5064_v31 = vrot.slane %v5063_v53, 4 }
 0x622   :  { %v5065_v48 = vadd.f32 %v5064_v31, %v5063_v53 }
 0x624   :  { %v5066_v24 = vrot.slane %v5065_v48, 2 }
 0x626   :  { %v5067_v14 = vadd.f32 %v5066_v24, %v5065_v48  ;;  %v19271_v48 = vld [vmem:[#allocation16_spill] sm:$0xff] }
 0x628   :  { %v5068_v56 = vrot.slane %v5067_v14, 1 }
 0x62a   :  { %v5069_v35 = vadd.f32 %v5068_v56, %v5067_v14  ;;  %v16434_v56 = vld [vmem:[%s19081_s3] ss:$0 sm:$0xff] }
 0x62c   :  { %v5070_v47 = vmul.f32 0.001953125, %v5069_v35 }
 0x62e   :  { %v5072_v16 = vadd.f32 1e-05, %v5070_v47 }
 0x630   :  { %14883 = vrsqrt.f32 %v5072_v16 }
 0x63a   :  { %v14884_v4 = vpop.eup %14883 }
 0x63b   :  { %v5074_v3 = vmul.f32 %v14884_v4, %v5071_v26 }
 0x63d   :  { %v16429_v31 = vrot.slane %v5074_v3, %v19127_v21  ;;  %v19275_v3 = vld [vmem:[#allocation19_spill] sm:$0xff]  ;;  %v19280_v21 = vld [vmem:[#allocation6_spill] sm:$0xff] }
 0x63f   :  { %v5142_v40 = vmul.f32 %v16429_v31, %v19268_v8  ;;  %v16440_v35 = vmul.f32 %v16429_v31, %v19271_v48  ;;  %v16444_v25 = vmul.f32 %v16429_v31, %v19272_v38  ;;  %v16448_v53 = vmul.f32 %v16429_v31, %v19273_v0  ;;  %v19277_v48 = vld [vmem:[#allocation21_spill] sm:$0xff]  ;;  %v19278_v38 = vld [vmem:[#allocation22_spill] sm:$0xff]  ;;  %v19279_v0 = vld [vmem:[#allocation4_spill] sm:$0xff] }
 0x640   :  { %v16452_v24 = vmul.f32 %v16429_v31, %v16021_v18  ;;  %v16456_v14 = vmul.f32 %v16429_v31, %v16025_v7  ;;  %v16460_v8 = vmul.f32 %v16429_v31, %v16029_v33  ;;  %v16464_v47 = vmul.f32 %v16429_v31, %v16033_v44 }
 0x641   :  { %v16467_v16 = vadd.f32 %v16434_v56, %v5142_v40  ;;  %v16471_v26 = vmul.f32 %v16429_v31, %v16037_v19  ;;  %v16475_v18 = vmul.f32 %v16429_v31, %v16041_v34  ;;  %v16479_v7 = vmul.f32 %v16429_v31, %v16045_v27  ;;  %v19276_v40 = vld [vmem:[#allocation20_spill] sm:$0xff] }
 0x642   :  { %v16483_v33 = vmul.f32 %v16429_v31, %v16049_v52  ;;  %v16487_v44 = vmul.f32 %v16429_v31, %v16053_v15  ;;  %v16491_v19 = vmul.f32 %v16429_v31, %v16057_v43  ;;  %v16495_v34 = vmul.f32 %v16429_v31, %v16061_v55 }
 0x643   :  { %19274 = vst [vmem:[#allocation5_spill] sm:$0xff] %v16467_v16  ;;  %v19128_v4 = vmax.f32 %v16467_v16, 0.0  ;;  %v16500_v27 = vmul.f32 %v16429_v31, %v16065_v29  ;;  %v16504_v52 = vmul.f32 %v16429_v31, %v16069_v1  ;;  %v16508_v15 = vmul.f32 %v16429_v31, %v16073_v5  ;;  %v19288_v16 = vld [vmem:[#allocation7_spill] sm:$0xff] }
 0x644   :  { %v16512_v43 = vmul.f32 %v16429_v31, %v16077_v12  ;;  %v16516_v55 = vmul.f32 %v16429_v31, %v16081_v39  ;;  %v16520_v29 = vmul.f32 %v16429_v31, %v16085_v2  ;;  %v16524_v1 = vmul.f32 %v16429_v31, %v16089_v54 }
 0x645   :  { %v16528_v5 = vmul.f32 %v16429_v31, %v16093_v37  ;;  %v16532_v12 = vmul.f32 %v16429_v31, %v16097_v13  ;;  %v16536_v39 = vmul.f32 %v16429_v31, %v16101_v9  ;;  %v16540_v2 = vmul.f32 %v16429_v31, %v16105_v10  ;;  %5341 = vst [vmem:[#allocation2 + $0x321] sm:$0xff] %v19128_v4  ;;  %v19284_v4 = vld [vmem:[#allocation8_spill] sm:$0xff] }
 0x646   :  { %v16546_v54 = vmul.f32 %v16429_v31, %v16109_v46  ;;  %v16550_v37 = vmul.f32 %v16429_v31, %v16113_v20  ;;  %v16554_v13 = vmul.f32 %v16429_v31, %v16117_v61  ;;  %v16558_v9 = vmul.f32 %v16429_v31, %v16121_v51 }
 0x647   :  { %v16562_v10 = vmul.f32 %v16429_v31, %v16125_v6  ;;  %v16566_v46 = vmul.f32 %v16429_v31, %v16129_v23  ;;  %v16570_v20 = vmul.f32 %v16429_v31, %v16133_v45  ;;  %v16574_v61 = vmul.f32 %v16429_v31, %v16137_v22 }
 0x648   :  { %v16578_v51 = vmul.f32 %v16429_v31, %v16141_v11  ;;  %v16582_v6 = vmul.f32 %v16429_v31, %v16145_v60  ;;  %v16586_v23 = vmul.f32 %v16429_v31, %v16149_v36  ;;  %v16590_v45 = vmul.f32 %v16429_v31, %v16153_v41 }
 0x649   :  { %v16594_v22 = vmul.f32 %v16429_v31, %v16157_v63  ;;  %v16598_v11 = vmul.f32 %v16429_v31, %v16161_v28  ;;  %v16602_v60 = vmul.f32 %v16429_v31, %v16165_v17  ;;  %v16606_v36 = vmul.f32 %v16429_v31, %v16169_v62 }
 0x64a   :  { %v16610_v41 = vmul.f32 %v16429_v31, %v16173_v30  ;;  %v16614_v63 = vmul.f32 %v16429_v31, %v16177_v32  ;;  %v16618_v28 = vmul.f32 %v16429_v31, %v16181_v42  ;;  %v16622_v17 = vmul.f32 %v16429_v31, %v19275_v3 }
 0x64b   :  { %v16626_v62 = vmul.f32 %v16429_v31, %v19276_v40  ;;  %v16630_v30 = vmul.f32 %v16429_v31, %v19277_v48  ;;  %v16634_v32 = vmul.f32 %v16429_v31, %v19278_v38  ;;  %v16638_v42 = vmul.f32 %v16429_v31, %v19279_v0 }
 0x64c   :  { %v16642_v3 = vmul.f32 %v16429_v31, %v19280_v21  ;;  %v16646_v40 = vmul.f32 %v16429_v31, %v19261_v57  ;;  %v16650_v48 = vmul.f32 %v16429_v31, %v19262_v50  ;;  %v16654_v38 = vmul.f32 %v16429_v31, %v19284_v4 }
 0x64d   :  { %v16658_v0 = vmul.f32 %v16429_v31, %v19286_v49  ;;  %v16662_v21 = vmul.f32 %v16429_v31, %v19288_v16 }
 0x64e   :  { %19281 = vst [vmem:[#allocation23_spill] sm:$0xff] %v16642_v3  ;;  %19282 = vst [vmem:[#allocation24_spill] sm:$0xff] %v16646_v40  ;;  %v19290_v3 = vld [vmem:[#allocation9_spill] sm:$0xff]  ;;  %v19291_v40 = vld [vmem:[#allocation12_spill] sm:$0xff] }
 0x64f   :  { %19283 = vst [vmem:[#allocation16_spill] sm:$0xff] %v16650_v48  ;;  %19285 = vst [vmem:[#allocation17_spill] sm:$0xff] %v16654_v38  ;;  %v16666_v57 = vmul.f32 %v16429_v31, %v19290_v3  ;;  %v16670_v50 = vmul.f32 %v16429_v31, %v19291_v40  ;;  %v19292_v48 = vld [vmem:[#allocation14_spill] sm:$0xff]  ;;  %v19293_v38 = vld [vmem:[#allocation11_spill] sm:$0xff]  ;;  %v16690_v40 = vmul.f32 %v16429_v31, %v19269_v58 }
 0x650   :  { %19287 = vst [vmem:[#allocation18_spill] sm:$0xff] %v16658_v0  ;;  %19289 = vst [vmem:[#allocation19_spill] sm:$0xff] %v16662_v21  ;;  %v16674_v4 = vmul.f32 %v16429_v31, %v19292_v48  ;;  %v16678_v49 = vmul.f32 %v16429_v31, %v19293_v38  ;;  %v19294_v0 = vld [vmem:[#allocation13_spill] sm:$0xff]  ;;  %v19295_v21 = vld [vmem:[#allocation15_spill] sm:$0xff]  ;;  %v16694_v48 = vmul.f32 %v16429_v31, %v16261_v59 }
 0x651   :  { %v16682_v16 = vmul.f32 %v16429_v31, %v19294_v0  ;;  %v16686_v3 = vmul.f32 %v16429_v31, %v19295_v21  ;;  %v16698_v38 = vadd.f32 %v16434_v56, %v16440_v35  ;;  %v16702_v0 = vadd.f32 %v16434_v56, %v16444_v25 }
 0x652   :  { %v16706_v21 = vadd.f32 %v16434_v56, %v16448_v53  ;;  %v16710_v58 = vadd.f32 %v16434_v56, %v16452_v24  ;;  %v16714_v59 = vadd.f32 %v16434_v56, %v16456_v14  ;;  %v16718_v31 = vadd.f32 %v16434_v56, %v16460_v8 }
 0x653   :  { %v16722_v35 = vadd.f32 %v16434_v56, %v16464_v47  ;;  %v16726_v25 = vadd.f32 %v16434_v56, %v16471_v26  ;;  %v16730_v53 = vadd.f32 %v16434_v56, %v16475_v18  ;;  %v16734_v24 = vadd.f32 %v16434_v56, %v16479_v7 }
 0x654   :  { %v16738_v14 = vadd.f32 %v16434_v56, %v16483_v33  ;;  %v16742_v8 = vadd.f32 %v16434_v56, %v16487_v44  ;;  %v16746_v47 = vadd.f32 %v16434_v56, %v16491_v19  ;;  %v16750_v26 = vadd.f32 %v16434_v56, %v16495_v34 }
 0x655   :  { %v16754_v18 = vadd.f32 %v16434_v56, %v16500_v27  ;;  %v16758_v7 = vadd.f32 %v16434_v56, %v16504_v52  ;;  %v16762_v33 = vadd.f32 %v16434_v56, %v16508_v15  ;;  %v16766_v44 = vadd.f32 %v16434_v56, %v16512_v43 }
 0x656   :  { %v16770_v19 = vadd.f32 %v16434_v56, %v16516_v55  ;;  %v16774_v34 = vadd.f32 %v16434_v56, %v16520_v29  ;;  %v16778_v27 = vadd.f32 %v16434_v56, %v16524_v1  ;;  %v16782_v52 = vadd.f32 %v16434_v56, %v16528_v5 }
 0x657   :  { %v16786_v15 = vadd.f32 %v16434_v56, %v16532_v12  ;;  %v16790_v43 = vadd.f32 %v16434_v56, %v16536_v39  ;;  %v16794_v55 = vadd.f32 %v16434_v56, %v16540_v2  ;;  %v16798_v29 = vadd.f32 %v16434_v56, %v16546_v54 }
 0x658   :  { %v16802_v1 = vadd.f32 %v16434_v56, %v16550_v37  ;;  %v16806_v5 = vadd.f32 %v16434_v56, %v16554_v13  ;;  %v16810_v12 = vadd.f32 %v16434_v56, %v16558_v9  ;;  %v16814_v39 = vadd.f32 %v16434_v56, %v16562_v10 }
 0x659   :  { %19296 = vst [vmem:[#allocation20_spill] sm:$0xff] %v16790_v43  ;;  %19297 = vst [vmem:[#allocation21_spill] sm:$0xff] %v16794_v55  ;;  %v16818_v2 = vadd.f32 %v16434_v56, %v16566_v46  ;;  %v16822_v54 = vadd.f32 %v16434_v56, %v16570_v20  ;;  %v16826_v37 = vadd.f32 %v16434_v56, %v16574_v61 }
 0x65a   :  { %19298 = vst [vmem:[#allocation22_spill] sm:$0xff] %v16798_v29  ;;  %19299 = vst [vmem:[#allocation4_spill] sm:$0xff] %v16802_v1  ;;  %v16830_v13 = vadd.f32 %v16434_v56, %v16578_v51  ;;  %v16834_v9 = vadd.f32 %v16434_v56, %v16582_v6  ;;  %v16838_v10 = vadd.f32 %v16434_v56, %v16586_v23 }
 0x65b   :  { %19300 = vst [vmem:[#allocation6_spill] sm:$0xff] %v16806_v5  ;;  %v16842_v46 = vadd.f32 %v16434_v56, %v16590_v45  ;;  %v16846_v20 = vadd.f32 %v16434_v56, %v16594_v22  ;;  %v16850_v61 = vadd.f32 %v16434_v56, %v16598_v11  ;;  %v16854_v51 = vadd.f32 %v16434_v56, %v16602_v60 }
 0x65c   :  { %v16858_v6 = vadd.f32 %v16434_v56, %v16606_v36  ;;  %v16862_v23 = vadd.f32 %v16434_v56, %v16610_v41  ;;  %v16866_v45 = vadd.f32 %v16434_v56, %v16614_v63  ;;  %v16870_v22 = vadd.f32 %v16434_v56, %v16618_v28  ;;  %v19306_v28 = vld [vmem:[#allocation23_spill] sm:$0xff] }
 0x65d   :  { %v16874_v11 = vadd.f32 %v16434_v56, %v16622_v17  ;;  %v16878_v60 = vadd.f32 %v16434_v56, %v16626_v62  ;;  %v16882_v36 = vadd.f32 %v16434_v56, %v16630_v30  ;;  %v16886_v41 = vadd.f32 %v16434_v56, %v16634_v32 }
 0x65e   :  { %v16890_v63 = vadd.f32 %v16434_v56, %v16638_v42  ;;  %v16894_v17 = vadd.f32 %v16434_v56, %v19306_v28 }
 0x65f   :  { %19301 = vst [vmem:[#allocation8_spill] sm:$0xff] %v16874_v11  ;;  %19302 = vst [vmem:[#allocation10_spill] sm:$0xff] %v16878_v60  ;;  %v19307_v11 = vld [vmem:[#allocation24_spill] sm:$0xff] }
 0x660   :  { %19303 = vst [vmem:[#allocation7_spill] sm:$0xff] %v16882_v36  ;;  %19304 = vst [vmem:[#allocation9_spill] sm:$0xff] %v16886_v41  ;;  %v16898_v62 = vadd.f32 %v16434_v56, %v19307_v11  ;;  %v19308_v60 = vld [vmem:[#allocation16_spill] sm:$0xff]  ;;  %v19309_v36 = vld [vmem:[#allocation17_spill] sm:$0xff]  ;;  %v16918_v11 = vadd.f32 %v16434_v56, %v16666_v57  ;;  %v16938_v57 = vadd.f32 %v16434_v56, %v16686_v3  ;;  %v19319_v3 = vmax.f32 %v16726_v25, 0.0 }
 0x661   :  { %19305 = vst [vmem:[#allocation12_spill] sm:$0xff] %v16890_v63  ;;  %v16902_v30 = vadd.f32 %v16434_v56, %v19308_v60  ;;  %v16906_v32 = vadd.f32 %v16434_v56, %v19309_v36  ;;  %v19310_v41 = vld [vmem:[#allocation18_spill] sm:$0xff]  ;;  %v19311_v63 = vld [vmem:[#allocation19_spill] sm:$0xff]  ;;  %v16922_v60 = vadd.f32 %v16434_v56, %v16670_v50  ;;  %v16926_v36 = vadd.f32 %v16434_v56, %v16674_v4 }
 0x662   :  { %v16910_v42 = vadd.f32 %v16434_v56, %v19310_v41  ;;  %v16914_v28 = vadd.f32 %v16434_v56, %v19311_v63  ;;  %v16930_v41 = vadd.f32 %v16434_v56, %v16678_v49  ;;  %v16934_v63 = vadd.f32 %v16434_v56, %v16682_v16  ;;  %19315 = vst [vmem:[#allocation15_spill] sm:$0xff] %v16938_v57 }
 0x663   :  { %19312 = vst [vmem:[#allocation14_spill] sm:$0xff] %v16926_v36  ;;  %v16942_v50 = vadd.f32 %v16434_v56, %v16690_v40  ;;  %v16946_v4 = vadd.f32 %v16434_v56, %v16694_v48  ;;  %v19131_v36 = vmax.f32 %v16698_v38, 0.0  ;;  %v19132_v49 = vmax.f32 %v16702_v0, 0.0  ;;  %5287 = vst [vmem:[#allocation2 + $0x69] sm:$0xff] %v19319_v3 }
 0x664   :  { %19313 = vst [vmem:[#allocation11_spill] sm:$0xff] %v16930_v41  ;;  %19314 = vst [vmem:[#allocation13_spill] sm:$0xff] %v16934_v63  ;;  %v19133_v41 = vmax.f32 %v16706_v21, 0.0  ;;  %v19134_v16 = vmax.f32 %v16710_v58, 0.0  ;;  %v19135_v63 = vmax.f32 %v16714_v59, 0.0  ;;  %v19136_v56 = vmax.f32 %v16734_v24, 0.0 }
 0x665   :  { %19316 = vst [vmem:[#allocation23_spill] sm:$0xff] %v16942_v50  ;;  %v19137_v48 = vmax.f32 %v16738_v14, 0.0  ;;  %5280 = vst [vmem:[#allocation2 + $0x19] sm:$0xff] %v19131_v36  ;;  %v19317_v36 = vmax.f32 %v16718_v31, 0.0  ;;  %v19139_v57 = vmax.f32 %v16762_v33, 0.0  ;;  %v19321_v40 = vmax.f32 %v16742_v8, 0.0 }
 0x666   :  { %5281 = vst [vmem:[#allocation2 + $0x21] sm:$0xff] %v19132_v49  ;;  %5282 = vst [vmem:[#allocation2 + $0x31] sm:$0xff] %v19133_v41  ;;  %v19318_v49 = vmax.f32 %v16722_v35, 0.0  ;;  %v19138_v41 = vmax.f32 %v16758_v7, 0.0  ;;  %v19322_v3 = vmax.f32 %v16746_v47, 0.0  ;;  %v5246_v50 = vmax.f32 %v16818_v2, 0.0 }
 0x667   :  { %5283 = vst [vmem:[#allocation2 + $0x39] sm:$0xff] %v19134_v16  ;;  %5284 = vst [vmem:[#allocation2 + $0x49] sm:$0xff] %v19135_v63  ;;  %v19320_v16 = vmax.f32 %v16730_v53, 0.0  ;;  %v19145_v63 = vmax.f32 %v16830_v13, 0.0  ;;  %v19337_v2 = vld [vmem:[#allocation7_spill] sm:$0xff] }
 0x668   :  { %5285 = vst [vmem:[#allocation2 + $0x51] sm:$0xff] %v19317_v36  ;;  %5286 = vst [vmem:[#allocation2 + $0x61] sm:$0xff] %v19318_v49  ;;  %v19140_v36 = vmax.f32 %v16774_v34, 0.0  ;;  %v19142_v49 = vmax.f32 %v16794_v55, 0.0 }
 0x669   :  { %5288 = vst [vmem:[#allocation2 + $0x79] sm:$0xff] %v19320_v16  ;;  %5289 = vst [vmem:[#allocation2 + $0x81] sm:$0xff] %v19136_v56  ;;  %v19323_v16 = vmax.f32 %v16750_v26, 0.0  ;;  %v19324_v56 = vmax.f32 %v16754_v18, 0.0 }
 0x66a   :  { %5290 = vst [vmem:[#allocation2 + $0x91] sm:$0xff] %v19137_v48  ;;  %5291 = vst [vmem:[#allocation2 + $0x99] sm:$0xff] %v19321_v40  ;;  %v19141_v48 = vmax.f32 %v16790_v43, 0.0  ;;  %v19325_v40 = vmax.f32 %v16766_v44, 0.0  ;;  %v5279_v43 = vmax.f32 %v16946_v4, 0.0  ;;  %v14820_v4 = vld [vmem:[%s19079_s4 + $0x8] sm:$0xff]  }
 0x66b   :  { %5292 = vst [vmem:[#allocation2 + $0xa9] sm:$0xff] %v19322_v3  ;;  %5293 = vst [vmem:[#allocation2 + $0xb1] sm:$0xff] %v19323_v16  ;;  %v19326_v3 = vmax.f32 %v16770_v19, 0.0  ;;  %v19144_v16 = vmax.f32 %v16826_v37, 0.0 }
 0x66c   :  { %5294 = vst [vmem:[#allocation2 + $0xc1] sm:$0xff] %v19324_v56  ;;  %5295 = vst [vmem:[#allocation2 + $0xc9] sm:$0xff] %v19138_v41  ;;  %v19143_v56 = vmax.f32 %v16806_v5, 0.0  ;;  %v19327_v41 = vmax.f32 %v16778_v27, 0.0  ;;  %v19343_v5 = vmax.f32 %v16854_v51, 0.0 }
 0x66d   :  { %5296 = vst [vmem:[#allocation2 + $0xd9] sm:$0xff] %v19139_v57  ;;  %5297 = vst [vmem:[#allocation2 + $0xe1] sm:$0xff] %v19325_v40  ;;  %v19328_v57 = vmax.f32 %v16782_v52, 0.0  ;;  %v19329_v40 = vmax.f32 %v16786_v15, 0.0 }
 0x66e   :  { %5298 = vst [vmem:[#allocation2 + $0xf1] sm:$0xff] %v19326_v3  ;;  %5299 = vst [vmem:[#allocation2 + $0xf9] sm:$0xff] %v19140_v36  ;;  %v5247_v3 = vmax.f32 %v16822_v54, 0.0  ;;  %v19147_v54 = vmax.f32 %v16838_v10, 0.0  ;;  %v19342_v36 = vld [vmem:[#allocation12_spill] sm:$0xff] }
 0x66f   :  { %5300 = vst [vmem:[#allocation2 + $0x109] sm:$0xff] %v19327_v41  ;;  %5301 = vst [vmem:[#allocation2 + $0x111] sm:$0xff] %v19328_v57  ;;  %v19330_v41 = vmax.f32 %v16798_v29, 0.0  ;;  %v19331_v57 = vmax.f32 %v16802_v1, 0.0  ;;  %v19348_v1 = vld [vmem:[#allocation11_spill] sm:$0xff] }
 0x670   :  { %5302 = vst [vmem:[#allocation2 + $0x121] sm:$0xff] %v19329_v40  ;;  %5303 = vst [vmem:[#allocation2 + $0x129] sm:$0xff] %v19141_v48  ;;  %v19332_v48 = vmax.f32 %v16810_v12, 0.0  ;;  %v5262_v40 = vmax.f32 %v19337_v2, 0.0  ;;  %v5266_v2 = vmax.f32 %v16898_v62, 0.0  ;;  %v5270_v62 = vmax.f32 %v16914_v28, 0.0 }
 0x671   :  { %5304 = vst [vmem:[#allocation2 + $0x139] sm:$0xff] %v19142_v49  ;;  %5305 = vst [vmem:[#allocation2 + $0x141] sm:$0xff] %v19330_v41  ;;  %v19333_v49 = vmax.f32 %v16814_v39, 0.0  ;;  %v19336_v41 = vld [vmem:[#allocation10_spill] sm:$0xff]  ;;  %v19351_v29 = vld [vmem:[#allocation23_spill] sm:$0xff] }
 0x672   :  { %5306 = vst [vmem:[#allocation2 + $0x151] sm:$0xff] %v19331_v57  ;;  %5307 = vst [vmem:[#allocation2 + $0x159] sm:$0xff] %v19143_v56  ;;  %v5261_v57 = vmax.f32 %v19336_v41, 0.0  ;;  %v5265_v41 = vmax.f32 %v16894_v17, 0.0  ;;  %v5269_v17 = vmax.f32 %v16910_v42, 0.0  ;;  %v19350_v42 = vld [vmem:[#allocation15_spill] sm:$0xff] }
 0x673   :  { %5308 = vst [vmem:[#allocation2 + $0x169] sm:$0xff] %v19332_v48  ;;  %5309 = vst [vmem:[#allocation2 + $0x171] sm:$0xff] %v19333_v49  ;;  %v19334_v48 = vmax.f32 %v16834_v9, 0.0  ;;  %v19335_v49 = vld [vmem:[#allocation8_spill] sm:$0xff]  ;;  %v5276_v28 = vmax.f32 %v19350_v42, 0.0  ;;  %v5278_v55 = vmax.f32 %v19351_v29, 0.0 }
 0x674   :  { %5310 = vst [vmem:[#allocation2 + $0x181] sm:$0xff] %v5246_v50  ;;  %5311 = vst [vmem:[#allocation2 + $0x189] sm:$0xff] %v5247_v3  ;;  %v5259_v50 = vmax.f32 %v16870_v22, 0.0  ;;  %v5260_v56 = vmax.f32 %v19335_v49, 0.0  ;;  %v19338_v3 = vmax.f32 %v16842_v46, 0.0  ;;  %v5264_v49 = vmax.f32 %v19342_v36, 0.0 }
 0x675   :  { %5312 = vst [vmem:[#allocation2 + $0x1c9] sm:$0xff] %v19144_v16  ;;  %5313 = vst [vmem:[#allocation2 + $0x1d1] sm:$0xff] %v19145_v63  ;;  %v19339_v16 = vmax.f32 %v16846_v20, 0.0  ;;  %v19340_v63 = vmax.f32 %v16850_v61, 0.0  ;;  %v5268_v36 = vmax.f32 %v16906_v32, 0.0  ;;  %v19356_v42 = vld [vmem:[#allocation25_spill] sm:$0xff] }
 0x676   :  { %5314 = vst [vmem:[#allocation2 + $0x1e1] sm:$0xff] %v19334_v48  ;;  %5315 = vst [vmem:[#allocation2 + $0x1e9] sm:$0xff] %v19147_v54  ;;  %v19341_v48 = vld [vmem:[#allocation9_spill] sm:$0xff]  ;;  %v19344_v54 = vmax.f32 %v16858_v6, 0.0 }
 0x677   :  { %5316 = vst [vmem:[#allocation2 + $0x1f9] sm:$0xff] %v19338_v3  ;;  %5317 = vst [vmem:[#allocation2 + $0x201] sm:$0xff] %v19339_v16  ;;  %v5263_v22 = vmax.f32 %v19341_v48, 0.0  ;;  %v19345_v3 = vmax.f32 %v16862_v23, 0.0  ;;  %v19346_v16 = vmax.f32 %v16866_v45, 0.0  ;;  %v19347_v48 = vld [vmem:[#allocation14_spill] sm:$0xff] }
 0x678   :  { %5318 = vst [vmem:[#allocation2 + $0x211] sm:$0xff] %v19340_v63  ;;  %5319 = vst [vmem:[#allocation2 + $0x219] sm:$0xff] %v19343_v5  ;;  %v5267_v63 = vmax.f32 %v16902_v30, 0.0  ;;  %v5271_v5 = vmax.f32 %v16918_v11, 0.0  ;;  %v19349_v30 = vld [vmem:[#allocation13_spill] sm:$0xff]  ;;  %v19353_v11 = vmax.f32 %v16702_v0, 0.0 }
 0x679   :  { %5320 = vst [vmem:[#allocation2 + $0x229] sm:$0xff] %v19344_v54  ;;  %5321 = vst [vmem:[#allocation2 + $0x231] sm:$0xff] %v19345_v3  ;;  %v5272_v54 = vmax.f32 %v16922_v60, 0.0  ;;  %v5273_v3 = vmax.f32 %v19347_v48, 0.0  ;;  %v5275_v32 = vmax.f32 %v19349_v30, 0.0  ;;  %v19354_v48 = vmax.f32 %v16706_v21, 0.0 }
 0x67a   :  { %5322 = vst [vmem:[#allocation2 + $0x241] sm:$0xff] %v19346_v16  ;;  %5323 = vst [vmem:[#allocation2 + $0x249] sm:$0xff] %v5259_v50  ;;  %v5274_v16 = vmax.f32 %v19348_v1, 0.0  ;;  %v19352_v1 = vmax.f32 %v16698_v38, 0.0  ;;  %v19355_v30 = vmax.f32 %v16710_v58, 0.0  ;;  %v19357_v38 = vmax.f32 %v16810_v12, 0.0 }
 0x67b   :  { %5324 = vst [vmem:[#allocation2 + $0x259] sm:$0xff] %v5260_v56  ;;  %5325 = vst [vmem:[#allocation2 + $0x261] sm:$0xff] %v5261_v57  ;;  %v19358_v0 = vmax.f32 %v16814_v39, 0.0  ;;  %v14821_v58 = vld [vmem:[%s19079_s4 + $0x10] sm:$0xff]   ;;  %v19363_v39 = vmax.f32 %v16842_v46, 0.0  ;;  %v17148_v46 = vpack.c.bf16 %v5261_v57, %v5260_v56  ;;  %v19372_v56 = vmax.f32 %v16714_v59, 0.0 }
 0x67c   :  { %5326 = vst [vmem:[#allocation2 + $0x271] sm:$0xff] %v5262_v40  ;;  %5327 = vst [vmem:[#allocation2 + $0x279] sm:$0xff] %v5263_v22  ;;  %v5521_v60 = vpack.c.bf16 %v19353_v11, %v19352_v1  ;;  %v5522_v29 = vpack.c.bf16 %v19355_v30, %v19354_v48  ;;  %v19359_v1 = vmax.f32 %v16826_v37, 0.0  ;;  %v19361_v11 = vmax.f32 %v16834_v9, 0.0  ;;  %v14823_v59 = vld [vmem:[%s19079_s4 + $0x20] sm:$0xff]  }
 0x67d   :  { %5328 = vst [vmem:[#allocation2 + $0x289] sm:$0xff] %v5264_v49  ;;  %5329 = vst [vmem:[#allocation2 + $0x291] sm:$0xff] %v5265_v41  ;;  %v17109_v21 = vpack.c.bf16 %v19358_v0, %v19357_v38  ;;  %v19364_v48 = vmax.f32 %v16846_v20, 0.0  ;;  %v19366_v37 = vmax.f32 %v16854_v51, 0.0  ;;  %v19368_v9 = vmax.f32 %v16862_v23, 0.0 }
 0x67e   :  { %5330 = vst [vmem:[#allocation2 + $0x2a1] sm:$0xff] %v5266_v2  ;;  %5331 = vst [vmem:[#allocation2 + $0x2a9] sm:$0xff] %v5267_v63  ;;  %12979 = vmatmul.mubr.bf16.vlgmr.msra.gmra.mrb[0].mxu1 %v5521_v60  ;;  %v19362_v60 = vmax.f32 %v16838_v10, 0.0  ;;  %v19369_v10 = vmax.f32 %v16866_v45, 0.0  ;;  %v17150_v20 = vpack.c.bf16 %v5263_v22, %v5262_v40  ;;  %v17156_v51 = vpack.c.bf16 %v5269_v17, %v5268_v36 }
 0x67f   :  { %5332 = vst [vmem:[#allocation2 + $0x2b9] sm:$0xff] %v5268_v36  ;;  %5333 = vst [vmem:[#allocation2 + $0x2c1] sm:$0xff] %v5269_v17  ;;  %12982 = vmatprep.mubr.bf16.mxu1 %v5522_v29  ;;  %13043 = vmatpush3.bf16.msra.mxu1 %v19356_v42  ;;  %v17130_v30 = vpack.c.bf16 %v19364_v48, %v19363_v39  ;;  %v19365_v29 = vmax.f32 %v16850_v61, 0.0  ;;  %v17154_v61 = vpack.c.bf16 %v5267_v63, %v5266_v2 }
 0x680   :  { %5334 = vst [vmem:[#allocation2 + $0x2d1] sm:$0xff] %v5270_v62  ;;  %5335 = vst [vmem:[#allocation2 + $0x2d9] sm:$0xff] %v5271_v5  ;;  %13044 = vmatprep.subr.bf16.mxu1 %v14820_v4  ;;  %v17124_v12 = vpack.c.bf16 %v19362_v60, %v19361_v11  ;;  %v17146_v0 = vpack.c.bf16 %v5259_v50, %v19369_v10  ;;  %v5550_v23 = vpack.c.bf16 %v5275_v32, %v5274_v16  ;;  %v19370_v11 = vld [vmem:[#allocation5_spill] sm:$0xff]  ;;  %v14822_v50 = vld [vmem:[%s19079_s4 + $0x18] sm:$0xff]  }
 0x681   :  { %5336 = vst [vmem:[#allocation2 + $0x2e9] sm:$0xff] %v5272_v54  ;;  %5337 = vst [vmem:[#allocation2 + $0x2f1] sm:$0xff] %v5273_v3  ;;  %v17136_v42 = vpack.c.bf16 %v19366_v37, %v19365_v29  ;;  %v19371_v60 = vmax.f32 %v19370_v11, 0.0  ;;  %v19373_v40 = vmax.f32 %v16718_v31, 0.0  ;;  %v19374_v22 = vmax.f32 %v16722_v35, 0.0  ;;  %v14824_v35 = vld [vmem:[%s19079_s4 + $0x28] sm:$0xff]  }
 0x682   :  { %5338 = vst [vmem:[#allocation2 + $0x301] sm:$0xff] %v5274_v16  ;;  %5339 = vst [vmem:[#allocation2 + $0x309] sm:$0xff] %v5275_v32  ;;  %v19376_v31 = vmax.f32 %v16730_v53, 0.0  ;;  %v19377_v2 = vmax.f32 %v16734_v24, 0.0  ;;  %v19379_v36 = vmax.f32 %v16742_v8, 0.0  ;;  %v14825_v53 = vld [vmem:[%s19079_s4 + $0x30] sm:$0xff]  }
 0x683   :  { %5340 = vst [vmem:[#allocation2 + $0x319] sm:$0xff] %v5276_v28  ;;  %5342 = vst [vmem:[#allocation2 + $0x331] sm:$0xff] %v5278_v55  ;;  %v19360_v55 = vmax.f32 %v16830_v13, 0.0  ;;  %v19367_v13 = vmax.f32 %v16858_v6, 0.0  ;;  %13045 = vmatpush3.bf16.msra.mxu1 %v14820_v4  ;;  %v5549_v6 = vpack.c.bf16 %v5273_v3, %v5272_v54  ;;  %v17162_v45 = vpack.c.bf16 %v19371_v60, %v5276_v28  ;;  %v19391_v29 = vld [vmem:[#allocation20_spill] sm:$0xff]  ;;  %v19399_v60 = vld [vmem:[#allocation6_spill] sm:$0xff] }
 0x684   :  { %5343 = vst [vmem:[#allocation2 + $0x339] sm:$0xff] %v5279_v43  ;;  %v5523_v57 = vpack.c.bf16 %v19373_v40, %v19372_v56  ;;  %13046 = vmatprep.subr.bf16.mxu1 %v14821_v58  ;;  %v5525_v63 = vpack.c.bf16 %v19377_v2, %v19376_v31  ;;  %v19380_v24 = vmax.f32 %v16746_v47, 0.0  ;;  %v19382_v8 = vmax.f32 %v16754_v18, 0.0  ;;  %v14827_v47 = vld [vmem:[%s19079_s4 + $0x80] sm:$0xff]   ;;  %v19397_v10 = vld [vmem:[#allocation4_spill] sm:$0xff]  ;;  %v5357_v31 = vld [vmem:[#allocation2 + $0x98] sm:$0xff] }
 0x685   :  { %v17118_v43 = vpack.c.bf16 %v19360_v55, %v19359_v1  ;;  %v17142_v38 = vpack.c.bf16 %v19368_v9, %v19367_v13  ;;  %v17152_v1 = vpack.c.bf16 %v5265_v41, %v5264_v49  ;;  %v17158_v55 = vpack.c.bf16 %v5271_v5, %v5270_v62  ;;  %v5489_v40 = vld [vmem:[#allocation2 + $0x1b9] sm:$0xff] }
 0x686   :  { %v19375_v49 = vmax.f32 %v16726_v25, 0.0  ;;  %12983 = vmatmul.mubr.bf16.gmra.mrb[4].mxu1 %v5523_v57  ;;  %v19378_v25 = vmax.f32 %v16738_v14, 0.0  ;;  %v19381_v62 = vmax.f32 %v16750_v26, 0.0  ;;  %v14826_v14 = vld [vmem:[%s19079_s4 + $0x38] sm:$0xff]   ;;  %v19383_v54 = vmax.f32 %v16758_v7, 0.0 }
 0x687   :  { %13047 = vmatpush3.bf16.msra.mxu1 %v14821_v58  ;;  %v19384_v26 = vmax.f32 %v16762_v33, 0.0  ;;  %v19385_v16 = vmax.f32 %v16766_v44, 0.0  ;;  %v19386_v18 = vmax.f32 %v16770_v19, 0.0  ;;  %v19387_v7 = vmax.f32 %v16774_v34, 0.0  ;;  %v19393_v44 = vld [vmem:[#allocation21_spill] sm:$0xff]  ;;  %v19395_v19 = vld [vmem:[#allocation22_spill] sm:$0xff] }
 0x688   :  { %v5524_v41 = vpack.c.bf16 %v19375_v49, %v19374_v22  ;;  %13048 = vmatprep.subr.bf16.mxu1 %v14822_v50  ;;  %v5526_v17 = vpack.c.bf16 %v19379_v36, %v19378_v25  ;;  %v5527_v5 = vpack.c.bf16 %v19381_v62, %v19380_v24  ;;  %v5528_v3 = vpack.c.bf16 %v19383_v54, %v19382_v8  ;;  %v14830_v57 = vld [vmem:[%s19079_s4 + $0x98] sm:$0xff]   ;;  %v14831_v22 = vld [vmem:[%s19079_s4 + $0xa0] sm:$0xff]   ;;  %v14833_v25 = vld [vmem:[%s19079_s4 + $0xb0] sm:$0xff]  }
 0x689   :  { %v5529_v32 = vpack.c.bf16 %v19385_v16, %v19384_v26  ;;  %v5530_v28 = vpack.c.bf16 %v19387_v7, %v19386_v18  ;;  %v19388_v4 = vmax.f32 %v16778_v27, 0.0  ;;  %v19389_v58 = vmax.f32 %v16782_v52, 0.0  ;;  %v5488_v52 = vld [vmem:[#allocation2 + $0x1b1] sm:$0xff]  ;;  %v5358_v36 = vld [vmem:[#allocation2 + $0xa8] sm:$0xff]  ;;  %v17295_v8 = vld [vmem:[%s19079_s4 + $0xc0] sm:$0xff]  }
 0x68a   :  { %12986 = vmatprep.mubr.bf16.mxu1 %v5524_v41  ;;  %v19390_v48 = vmax.f32 %v16786_v15, 0.0  ;;  %v19392_v33 = vmax.f32 %v19391_v29, 0.0  ;;  %v19394_v13 = vmax.f32 %v19393_v44, 0.0  ;;  %v19396_v9 = vmax.f32 %v19395_v19, 0.0  ;;  %v5354_v49 = vld [vmem:[#allocation2 + $0x78] sm:$0xff]  ;;  %v5355_v41 = vld [vmem:[#allocation2 + $0x80] sm:$0xff] }
 0x68b   :  { %13049 = vmatpush3.bf16.msra.mxu1 %v14822_v50  ;;  %v5531_v39 = vpack.c.bf16 %v19389_v58, %v19388_v4  ;;  %v19398_v11 = vmax.f32 %v19397_v10, 0.0  ;;  %v19400_v56 = vmax.f32 %v19399_v60, 0.0  ;;  %v5536_v15 = vpack.c.bf16 %v5489_v40, %v5488_v52  ;;  %v5361_v24 = vld [vmem:[#allocation2 + $0xc8] sm:$0xff]  ;;  %v5362_v54 = vld [vmem:[#allocation2 + $0xd8] sm:$0xff]  ;;  %v5367_v7 = vld [vmem:[#allocation2 + $0x110] sm:$0xff] }
 0x68c   :  { %13050 = vmatprep.subr.bf16.mxu1 %v14823_v59  ;;  %v5532_v37 = vpack.c.bf16 %v19392_v33, %v19390_v48  ;;  %v5533_v34 = vpack.c.bf16 %v19396_v9, %v19394_v13  ;;  %v17271_v2 = vpack.c.bf16 %v5355_v41, %v5354_v49  ;;  %v5365_v26 = vld [vmem:[#allocation2 + $0xf8] sm:$0xff]  ;;  %v5366_v18 = vld [vmem:[#allocation2 + $0x108] sm:$0xff]  ;;  %v5371_v29 = vld [vmem:[#allocation2 + $0x140] sm:$0xff] }
 0x68d   :  { %v5534_v27 = vpack.c.bf16 %v19400_v56, %v19398_v11  ;;  %v5369_v4 = vld [vmem:[#allocation2 + $0x128] sm:$0xff]  ;;  %v17304_v58 = vpack.c.bf16 %v5367_v7, %v5366_v18  ;;  %v5370_v48 = vld [vmem:[#allocation2 + $0x138] sm:$0xff]  ;;  %v5372_v33 = vld [vmem:[#allocation2 + $0x150] sm:$0xff] }
 0x68e   :  { %12987 = vmatmul.mubr.bf16.gmra.mrb[8].mxu1 %v5525_v63  ;;  %v14832_v63 = vld [vmem:[%s19079_s4 + $0xa8] sm:$0xff]   ;;  %v17310_v44 = vpack.c.bf16 %v5371_v29, %v5370_v48  ;;  %v5376_v19 = vld [vmem:[#allocation2 + $0x1b0] sm:$0xff]  ;;  %v5393_v49 = vld [vmem:[#allocation2 + $0x278] sm:$0xff] }
 0x68f   :  { %12990 = vmatprep.mubr.bf16.mxu1 %v5526_v17  ;;  %13051 = vmatpush3.bf16.msra.mxu1 %v14823_v59  ;;  %v5356_v59 = vld [vmem:[#allocation2 + $0x90] sm:$0xff]  ;;  %v5374_v9 = vld [vmem:[#allocation2 + $0x168] sm:$0xff] }
 0x690   :  { %13052 = vmatprep.subr.bf16.mxu1 %v14824_v35  ;;  %v5359_v17 = vld [vmem:[#allocation2 + $0xb0] sm:$0xff]  ;;  %v5378_v60 = vld [vmem:[#allocation2 + $0x1c8] sm:$0xff] }
 0x691   :  { %v17283_v62 = vpack.c.bf16 %v5359_v17, %v5358_v36  ;;  %v5379_v56 = vld [vmem:[#allocation2 + $0x1d0] sm:$0xff]  ;;  %v5381_v52 = vld [vmem:[#allocation2 + $0x1e8] sm:$0xff] }
 0x692   :  { %v17320_v40 = vpack.c.bf16 %v5379_v56, %v5378_v60  ;;  %v5397_v36 = vld [vmem:[#allocation2 + $0x2a8] sm:$0xff]  ;;  %v5403_v7 = vld [vmem:[#allocation2 + $0x2f0] sm:$0xff]  ;;  %v6245_v60 = vld [vmem:[#allocation2 + $0x1a] sm:$0xff] }
 0x693   :  { %13053 = vmatpush3.bf16.msra.mxu1 %v14824_v35  ;;  %v17276_v35 = vpack.c.bf16 %v5357_v31, %v5356_v59  ;;  %v5394_v31 = vld [vmem:[#allocation2 + $0x288] sm:$0xff] }
 0x694   :  { %13054 = vmatprep.subr.bf16.mxu1 %v14825_v53  ;;  %v5402_v18 = vld [vmem:[#allocation2 + $0x2e8] sm:$0xff] }
 0x695   :  { %v17356_v48 = vpack.c.bf16 %v5403_v7, %v5402_v18  ;;  %v6246_v56 = vld [vmem:[#allocation2 + $0x22] sm:$0xff]  ;;  %v6258_v18 = vld [vmem:[#allocation2 + $0xb2] sm:$0xff] }
 0x696   :  { %12991 = vmatmul.mubr.bf16.gmra.mrb[12].mxu1 %v5527_v5  ;;  %v14834_v5 = vld [vmem:[%s19079_s4 + $0xb8] sm:$0xff]   ;;  %v6259_v7 = vld [vmem:[#allocation2 + $0xc2] sm:$0xff] }
 0x697   :  { %12994 = vmatprep.mubr.bf16.mxu1 %v5528_v3  ;;  %13055 = vmatpush3.bf16.msra.mxu1 %v14825_v53  ;;  %v5360_v53 = vld [vmem:[#allocation2 + $0xc0] sm:$0xff] }
 0x698   :  { %13056 = vmatprep.subr.bf16.mxu1 %v14826_v14  ;;  %v5363_v3 = vld [vmem:[#allocation2 + $0xe0] sm:$0xff] }
 0x699   :  { %v17297_v16 = vpack.c.bf16 %v5363_v3, %v5362_v54  ;;  %v5400_v54 = vld [vmem:[#allocation2 + $0x2d0] sm:$0xff]  ;;  %v5401_v3 = vld [vmem:[#allocation2 + $0x2d8] sm:$0xff] }
 0x69b   :  { %13057 = vmatpush3.bf16.msra.mxu1 %v14826_v14  ;;  %v17288_v14 = vpack.c.bf16 %v5361_v24, %v5360_v53  ;;  %v5398_v24 = vld [vmem:[#allocation2 + $0x2b8] sm:$0xff] }
 0x69c   :  { %13122 = vmatprep.subr.bf16.mxu1 %v14827_v47 }
 0x69e   :  { %12995 = vmatmul.mubr.bf16.gmra.mrb[16].mxu1 %v5529_v32 }
 0x69f   :  { %12998 = vmatprep.mubr.bf16.mxu1 %v5530_v28  ;;  %v5368_v28 = vld [vmem:[#allocation2 + $0x120] sm:$0xff] }
 0x6a6   :  { %12999 = vmatmul.mubr.bf16.gmra.mrb[20].mxu1 %v5531_v39  ;;  %v17306_v39 = vpack.c.bf16 %v5369_v4, %v5368_v28  ;;  %v5404_v28 = vld [vmem:[#allocation2 + $0x300] sm:$0xff]  ;;  %v5405_v4 = vld [vmem:[#allocation2 + $0x308] sm:$0xff] }
 0x6a7   :  { %13002 = vmatprep.mubr.bf16.mxu1 %v5532_v37  ;;  %v5373_v37 = vld [vmem:[#allocation2 + $0x158] sm:$0xff]  ;;  %v17358_v29 = vpack.c.bf16 %v5405_v4, %v5404_v28  ;;  %v6260_v28 = vld [vmem:[#allocation2 + $0xca] sm:$0xff] }
 0x6a8   :  { %v17312_v13 = vpack.c.bf16 %v5373_v37, %v5372_v33  ;;  %v6243_v33 = vld [vmem:[#allocation2 + $0x2] sm:$0xff]  ;;  %v6244_v37 = vld [vmem:[#allocation2 + $0xa] sm:$0xff] }
 0x6ae   :  { %13003 = vmatmul.mubr.bf16.gmra.mrb[24].mxu1 %v5533_v34  ;;  %v5375_v34 = vld [vmem:[#allocation2 + $0x170] sm:$0xff] }
 0x6af   :  { %13006 = vmatprep.mubr.bf16.mxu1 %v5534_v27  ;;  %v17317_v11 = vpack.c.bf16 %v5375_v34, %v5374_v9  ;;  %v5380_v27 = vld [vmem:[#allocation2 + $0x1e0] sm:$0xff]  ;;  %v6307_v34 = vpack.c.bf16 %v6244_v37, %v6243_v33  ;;  %v14842_v33 = vld [vmem:[%s19079_s4 + $0xf8] sm:$0xff]   ;;  %v17407_v37 = vpack.c.bf16 %v6260_v28, %v6259_v7 }
 0x6b0   :  { %v5407_v9 = vld [vmem:[#allocation2 + $0x320] sm:$0xff] }
 0x6b6   :  { %13007 = vmatmul.mubr.bf16.gmra.mrb[28].mxu1 %v17109_v21  ;;  %v5344_v21 = vld [vmem:[#allocation2] sm:$0xff] }
 0x6b7   :  { %13010 = vmatprep.mubr.bf16.mxu1 %v5536_v15  ;;  %v17322_v15 = vpack.c.bf16 %v5381_v52, %v5380_v27  ;;  %v6247_v27 = vld [vmem:[#allocation2 + $0x32] sm:$0xff]  ;;  %v6248_v52 = vld [vmem:[#allocation2 + $0x3a] sm:$0xff] }
 0x6be   :  { %13011 = vmatmul.mubr.bf16.gmra.mrb[32].mxu1 %v17118_v43  ;;  %v17243_v43 = vld [vmem:[#allocation2 + $0x8] sm:$0xff] }
 0x6bf   :  { %13014 = vmatprep.mubr.bf16.mxu1 %v17124_v12  ;;  %v5408_v12 = vpack.c.bf16 %v17243_v43, %v5344_v21  ;;  %v5424_v10 = vpack.c.bf16 %v17243_v43, %v5376_v19  ;;  %v5382_v21 = vld [vmem:[#allocation2 + $0x1f8] sm:$0xff]  ;;  %v5384_v43 = vld [vmem:[#allocation2 + $0x210] sm:$0xff] }
 0x6c0   :  { %v5406_v19 = vld [vmem:[#allocation2 + $0x318] sm:$0xff] }
 0x6c6   :  { %13015 = vmatmul.mubr.bf16.gmra.mrb[36].mxu1 %v17130_v30  ;;  %v5346_v30 = vld [vmem:[#allocation2 + $0x18] sm:$0xff] }
 0x6c7   :  { %13018 = vmatprep.mubr.bf16.mxu1 %v17136_v42  ;;  %v5347_v42 = vld [vmem:[#allocation2 + $0x20] sm:$0xff] }
 0x6ce   :  { %13019 = vmatmul.mubr.bf16.gmra.mrb[40].mxu1 %v17142_v38  ;;  %v5348_v38 = vld [vmem:[#allocation2 + $0x30] sm:$0xff] }
 0x6cf   :  { %13022 = vmatprep.mubr.bf16.mxu1 %v17146_v0  ;;  %v5349_v0 = vld [vmem:[#allocation2 + $0x38] sm:$0xff] }
 0x6d6   :  { %13023 = vmatmul.mubr.bf16.gmra.mrb[44].mxu1 %v17148_v46  ;;  %v17247_v46 = vpack.c.bf16 %v5347_v42, %v5346_v30  ;;  %v5385_v30 = vld [vmem:[#allocation2 + $0x218] sm:$0xff] }
 0x6d7   :  { %13026 = vmatprep.mubr.bf16.mxu1 %v17150_v20  ;;  %v14828_v20 = vld [vmem:[%s19079_s4 + $0x88] sm:$0xff]  }
 0x6de   :  { %13027 = vmatmul.mubr.bf16.gmra.mrb[48].mxu1 %v17152_v1  ;;  %v17252_v1 = vpack.c.bf16 %v5349_v0, %v5348_v38  ;;  %v17328_v38 = vpack.c.bf16 %v5385_v30, %v5384_v43  ;;  %v5386_v0 = vld [vmem:[#allocation2 + $0x228] sm:$0xff]  ;;  %v17370_v43 = vpack.c.bf16 %v6248_v52, %v6247_v27  ;;  %v14837_v30 = vld [vmem:[%s19079_s4 + $0xd0] sm:$0xff]  }
 0x6df   :  { %13030 = vmatprep.mubr.bf16.mxu1 %v17154_v61  ;;  %v14829_v61 = vld [vmem:[%s19079_s4 + $0x90] sm:$0xff]  }
 0x6e6   :  { %13031 = vmatmul.mubr.bf16.gmra.mrb[52].mxu1 %v17156_v51  ;;  %v5350_v51 = vld [vmem:[#allocation2 + $0x48] sm:$0xff] }
 0x6e7   :  { %13034 = vmatprep.mubr.bf16.mxu1 %v17158_v55  ;;  %v5351_v55 = vld [vmem:[#allocation2 + $0x50] sm:$0xff] }
 0x6ee   :  { %13035 = vmatmul.mubr.bf16.gmra.mrb[56].mxu1 %v5549_v6  ;;  %v5352_v6 = vld [vmem:[#allocation2 + $0x60] sm:$0xff] }
 0x6ef   :  { %13038 = vmatprep.mubr.bf16.mxu1 %v5550_v23  ;;  %v5353_v23 = vld [vmem:[#allocation2 + $0x68] sm:$0xff] }
 0x6f0   :  { %v17264_v50 = vpack.c.bf16 %v5353_v23, %v5352_v6  ;;  %v5390_v23 = vld [vmem:[#allocation2 + $0x258] sm:$0xff] }
 0x6f6   :  { %13039 = vmatmul.mubr.bf16.gmra.mrb[60].mxu1 %v17162_v45  ;;  %v17259_v45 = vpack.c.bf16 %v5351_v55, %v5350_v51  ;;  %v5389_v51 = vld [vmem:[#allocation2 + $0x248] sm:$0xff] }
 0x6f7   :  { %13058 = vmatprep.mubr.bf16.mxu1 %v5408_v12  ;;  %v5383_v12 = vld [vmem:[#allocation2 + $0x200] sm:$0xff] }
 0x6f8   :  { %v17326_v42 = vpack.c.bf16 %v5383_v12, %v5382_v21  ;;  %v17365_v21 = vpack.c.bf16 %v6246_v56, %v6245_v60  ;;  %v14836_v12 = vld [vmem:[%s19079_s4 + $0xc8] sm:$0xff]   ;;  %v6263_v60 = vld [vmem:[#allocation2 + $0xf2] sm:$0xff]  ;;  %v6264_v56 = vld [vmem:[#allocation2 + $0xfa] sm:$0xff] }
 0x6f9   :  { %v17419_v52 = vpack.c.bf16 %v6264_v56, %v6263_v60  ;;  %v6280_v60 = vld [vmem:[#allocation2 + $0x1ea] sm:$0xff] }
 0x6fe   :  { %13059 = vmatmul.mubr.bf16.vlgmr.msra.gmra.mrb[0].mxu1 %v17247_v46 }
 0x6ff   :  { %13062 = vmatprep.mubr.bf16.mxu1 %v17252_v1  ;;  %13123 = vmatpush3.bf16.msra.mxu1 %v14827_v47  ;;  %v5364_v47 = vld [vmem:[#allocation2 + $0xf0] sm:$0xff] }
 0x700   :  { %13124 = vmatprep.subr.bf16.mxu1 %v14828_v20  ;;  %v17300_v32 = vpack.c.bf16 %v5365_v26, %v5364_v47  ;;  %v17352_v26 = vpack.c.bf16 %v5401_v3, %v5400_v54  ;;  %v14841_v54 = vld [vmem:[%s19079_s4 + $0xf0] sm:$0xff]  }
 0x701   :  { %v6257_v3 = vld [vmem:[#allocation2 + $0xaa] sm:$0xff] }
 0x702   :  { %v17402_v4 = vpack.c.bf16 %v6258_v18, %v6257_v3  ;;  %v6273_v3 = vld [vmem:[#allocation2 + $0x16a] sm:$0xff]  ;;  %v6274_v18 = vld [vmem:[#allocation2 + $0x172] sm:$0xff] }
 0x703   :  { %13125 = vmatpush3.bf16.msra.mxu1 %v14828_v20  ;;  %v5387_v20 = vld [vmem:[#allocation2 + $0x230] sm:$0xff]  ;;  %v17435_v28 = vpack.c.bf16 %v6274_v18, %v6273_v3 }
 0x704   :  { %13126 = vmatprep.subr.bf16.mxu1 %v14829_v61  ;;  %v17332_v55 = vpack.c.bf16 %v5387_v20, %v5386_v0  ;;  %v6249_v0 = vld [vmem:[#allocation2 + $0x4a] sm:$0xff]  ;;  %v6250_v20 = vld [vmem:[#allocation2 + $0x52] sm:$0xff] }
 0x705   :  { %v6288_v3 = vld [vmem:[#allocation2 + $0x24a] sm:$0xff] }
 0x706   :  { %13063 = vmatmul.mubr.bf16.gmra.mrb[4].mxu1 %v17259_v45 }
 0x707   :  { %13066 = vmatprep.mubr.bf16.mxu1 %v17264_v50  ;;  %13127 = vmatpush3.bf16.msra.mxu1 %v14829_v61  ;;  %v5388_v61 = vld [vmem:[#allocation2 + $0x240] sm:$0xff] }
 0x708   :  { %13128 = vmatprep.subr.bf16.mxu1 %v14830_v57  ;;  %v17334_v6 = vpack.c.bf16 %v5389_v51, %v5388_v61  ;;  %v6251_v61 = vld [vmem:[#allocation2 + $0x62] sm:$0xff]  ;;  %v6252_v51 = vld [vmem:[#allocation2 + $0x6a] sm:$0xff] }
 0x70b   :  { %13129 = vmatpush3.bf16.msra.mxu1 %v14830_v57  ;;  %v5391_v57 = vld [vmem:[#allocation2 + $0x260] sm:$0xff] }
 0x70c   :  { %13130 = vmatprep.subr.bf16.mxu1 %v14831_v22  ;;  %v17338_v41 = vpack.c.bf16 %v5391_v57, %v5390_v23  ;;  %v17378_v23 = vpack.c.bf16 %v6250_v20, %v6249_v0  ;;  %v14838_v57 = vld [vmem:[%s19079_s4 + $0xd8] sm:$0xff]   ;;  %v6267_v0 = vld [vmem:[#allocation2 + $0x122] sm:$0xff]  ;;  %v6268_v20 = vld [vmem:[#allocation2 + $0x12a] sm:$0xff] }
 0x70e   :  { %13067 = vmatmul.mubr.bf16.gmra.mrb[8].mxu1 %v17271_v2 }
 0x70f   :  { %13070 = vmatprep.mubr.bf16.mxu1 %v17276_v35  ;;  %13131 = vmatpush3.bf16.msra.mxu1 %v14831_v22  ;;  %v5392_v22 = vld [vmem:[#allocation2 + $0x270] sm:$0xff] }
 0x710   :  { %13132 = vmatprep.subr.bf16.mxu1 %v14832_v63  ;;  %v17340_v59 = vpack.c.bf16 %v5393_v49, %v5392_v22  ;;  %v17383_v22 = vpack.c.bf16 %v6252_v51, %v6251_v61  ;;  %v6253_v49 = vld [vmem:[#allocation2 + $0x7a] sm:$0xff]  ;;  %v17425_v51 = vpack.c.bf16 %v6268_v20, %v6267_v0  ;;  %v6282_v0 = vld [vmem:[#allocation2 + $0x202] sm:$0xff]  ;;  %v6283_v20 = vld [vmem:[#allocation2 + $0x212] sm:$0xff] }
 0x713   :  { %13133 = vmatpush3.bf16.msra.mxu1 %v14832_v63  ;;  %v5395_v63 = vld [vmem:[#allocation2 + $0x290] sm:$0xff] }
 0x714   :  { %13134 = vmatprep.subr.bf16.mxu1 %v14833_v25  ;;  %v17344_v17 = vpack.c.bf16 %v5395_v63, %v5394_v31  ;;  %v6254_v31 = vld [vmem:[#allocation2 + $0x82] sm:$0xff]  ;;  %v6255_v63 = vld [vmem:[#allocation2 + $0x92] sm:$0xff] }
 0x716   :  { %13071 = vmatmul.mubr.bf16.gmra.mrb[12].mxu1 %v17283_v62 }
 0x717   :  { %13074 = vmatprep.mubr.bf16.mxu1 %v17288_v14  ;;  %13135 = vmatpush3.bf16.msra.mxu1 %v14833_v25  ;;  %v5396_v25 = vld [vmem:[#allocation2 + $0x2a0] sm:$0xff] }
 0x718   :  { %13136 = vmatprep.subr.bf16.mxu1 %v14834_v5  ;;  %v17346_v53 = vpack.c.bf16 %v5397_v36, %v5396_v25  ;;  %v6256_v25 = vld [vmem:[#allocation2 + $0x9a] sm:$0xff]  ;;  %v17390_v36 = vpack.c.bf16 %v6254_v31, %v6253_v49  ;;  %v6271_v49 = vld [vmem:[#allocation2 + $0x152] sm:$0xff] }
 0x719   :  { %v6272_v31 = vld [vmem:[#allocation2 + $0x15a] sm:$0xff] }
 0x71b   :  { %13137 = vmatpush3.bf16.msra.mxu1 %v14834_v5  ;;  %v5399_v5 = vld [vmem:[#allocation2 + $0x2c0] sm:$0xff] }
 0x71c   :  { %13202 = vmatprep.subr.bf16.mxu1 %v17295_v8  ;;  %v17350_v47 = vpack.c.bf16 %v5399_v5, %v5398_v24  ;;  %v14840_v24 = vld [vmem:[%s19079_s4 + $0xe8] sm:$0xff]   ;;  %v17395_v5 = vpack.c.bf16 %v6256_v25, %v6255_v63  ;;  %v17431_v25 = vpack.c.bf16 %v6272_v31, %v6271_v49 }
 0x71d   :  { %v6285_v31 = vld [vmem:[#allocation2 + $0x22a] sm:$0xff] }
 0x71e   :  { %13075 = vmatmul.mubr.bf16.gmra.mrb[16].mxu1 %v17297_v16 }
 0x71f   :  { %13078 = vmatprep.mubr.bf16.mxu1 %v17300_v32 }
 0x726   :  { %13079 = vmatmul.mubr.bf16.gmra.mrb[20].mxu1 %v17304_v58 }
 0x727   :  { %13082 = vmatprep.mubr.bf16.mxu1 %v17306_v39 }
 0x72e   :  { %13083 = vmatmul.mubr.bf16.gmra.mrb[24].mxu1 %v17310_v44 }
 0x72f   :  { %13086 = vmatprep.mubr.bf16.mxu1 %v17312_v13 }
 0x736   :  { %13087 = vmatmul.mubr.bf16.gmra.mrb[28].mxu1 %v17317_v11 }
 0x737   :  { %13090 = vmatprep.mubr.bf16.mxu1 %v5424_v10  ;;  %v17362_v10 = vpack.c.bf16 %v5407_v9, %v5406_v19  ;;  %v17414_v19 = vld [vmem:[%s19079_s4 + $0x100] sm:$0xff]  }
 0x738   :  { %v6261_v9 = vld [vmem:[#allocation2 + $0xda] sm:$0xff] }
 0x73e   :  { %13091 = vmatmul.mubr.bf16.gmra.mrb[32].mxu1 %v17320_v40 }
 0x73f   :  { %13094 = vmatprep.mubr.bf16.mxu1 %v17322_v15 }
 0x746   :  { %13095 = vmatmul.mubr.bf16.gmra.mrb[36].mxu1 %v17326_v42 }
 0x747   :  { %13098 = vmatprep.mubr.bf16.mxu1 %v17328_v38 }
 0x74e   :  { %13099 = vmatmul.mubr.bf16.gmra.mrb[40].mxu1 %v17332_v55 }
 0x74f   :  { %13102 = vmatprep.mubr.bf16.mxu1 %v17334_v6 }
 0x756   :  { %13103 = vmatmul.mubr.bf16.gmra.mrb[44].mxu1 %v17338_v41 }
 0x757   :  { %13106 = vmatprep.mubr.bf16.mxu1 %v17340_v59 }
 0x75e   :  { %13107 = vmatmul.mubr.bf16.gmra.mrb[48].mxu1 %v17344_v17 }
 0x75f   :  { %13110 = vmatprep.mubr.bf16.mxu1 %v17346_v53 }
 0x766   :  { %13111 = vmatmul.mubr.bf16.gmra.mrb[52].mxu1 %v17350_v47 }
 0x767   :  { %13114 = vmatprep.mubr.bf16.mxu1 %v17352_v26 }
 0x76e   :  { %13115 = vmatmul.mubr.bf16.gmra.mrb[56].mxu1 %v17356_v48 }
 0x76f   :  { %13118 = vmatprep.mubr.bf16.mxu1 %v17358_v29 }
 0x776   :  { %13119 = vmatmul.mubr.bf16.gmra.mrb[60].mxu1 %v17362_v10 }
 0x777   :  { %13138 = vmatprep.mubr.bf16.mxu1 %v6307_v34  ;;  %v6262_v34 = vld [vmem:[#allocation2 + $0xe2] sm:$0xff] }
 0x778   :  { %v17416_v27 = vpack.c.bf16 %v6262_v34, %v6261_v9  ;;  %v6278_v9 = vld [vmem:[#allocation2 + $0x1d2] sm:$0xff]  ;;  %v6279_v34 = vld [vmem:[#allocation2 + $0x1e2] sm:$0xff] }
 0x77e   :  { %13139 = vmatmul.mubr.bf16.vlgmr.msra.gmra.mrb[0].mxu1 %v17365_v21 }
 0x77f   :  { %13142 = vmatprep.mubr.bf16.mxu1 %v17370_v43  ;;  %13203 = vmatpush3.bf16.msra.mxu1 %v17295_v8  ;;  %v14839_v8 = vld [vmem:[%s19079_s4 + $0xe0] sm:$0xff]  }
 0x780   :  { %13204 = vmatprep.subr.bf16.mxu1 %v14836_v12 }
 0x783   :  { %13205 = vmatpush3.bf16.msra.mxu1 %v14836_v12  ;;  %v6265_v12 = vld [vmem:[#allocation2 + $0x10a] sm:$0xff] }
 0x784   :  { %13206 = vmatprep.subr.bf16.mxu1 %v14837_v30 }
 0x786   :  { %13143 = vmatmul.mubr.bf16.gmra.mrb[4].mxu1 %v17378_v23 }
 0x787   :  { %13146 = vmatprep.mubr.bf16.mxu1 %v17383_v22  ;;  %13207 = vmatpush3.bf16.msra.mxu1 %v14837_v30  ;;  %v6266_v30 = vld [vmem:[#allocation2 + $0x112] sm:$0xff] }
 0x788   :  { %13208 = vmatprep.subr.bf16.mxu1 %v14838_v57  ;;  %v17423_v61 = vpack.c.bf16 %v6266_v30, %v6265_v12  ;;  %v17440_v12 = vpack.c.bf16 %v6280_v60, %v6279_v34  ;;  %v6281_v30 = vld [vmem:[#allocation2 + $0x1fa] sm:$0xff]  ;;  %v6291_v34 = vld [vmem:[#allocation2 + $0x272] sm:$0xff] }
 0x789   :  { %v6292_v60 = vld [vmem:[#allocation2 + $0x27a] sm:$0xff] }
 0x78b   :  { %13209 = vmatpush3.bf16.msra.mxu1 %v14838_v57  ;;  %v6269_v57 = vld [vmem:[#allocation2 + $0x13a] sm:$0xff] }
 0x78c   :  { %13210 = vmatprep.subr.bf16.mxu1 %v14839_v8 }
 0x78e   :  { %13147 = vmatmul.mubr.bf16.gmra.mrb[8].mxu1 %v17390_v36 }
 0x78f   :  { %13150 = vmatprep.mubr.bf16.mxu1 %v17395_v5  ;;  %13211 = vmatpush3.bf16.msra.mxu1 %v14839_v8  ;;  %v6270_v8 = vld [vmem:[#allocation2 + $0x142] sm:$0xff] }
 0x790   :  { %13212 = vmatprep.subr.bf16.mxu1 %v14840_v24  ;;  %v17429_v63 = vpack.c.bf16 %v6270_v8, %v6269_v57  ;;  %v6284_v57 = vld [vmem:[#allocation2 + $0x21a] sm:$0xff]  ;;  %v17444_v8 = vpack.c.bf16 %v6282_v0, %v6281_v30  ;;  %v17458_v0 = vpack.c.bf16 %v6292_v60, %v6291_v34  ;;  %v6299_v34 = vld [vmem:[#allocation2 + $0x2d2] sm:$0xff] }
 0x791   :  { %v17446_v49 = vpack.c.bf16 %v6284_v57, %v6283_v20  ;;  %v6293_v20 = vld [vmem:[#allocation2 + $0x28a] sm:$0xff]  ;;  %v6294_v57 = vld [vmem:[#allocation2 + $0x292] sm:$0xff]  ;;  %v6300_v60 = vld [vmem:[#allocation2 + $0x2da] sm:$0xff] }
 0x792   :  { %19403 = vst [vmem:[#allocation17_spill] sm:$0xff] %v17458_v0 }
 0x793   :  { %13213 = vmatpush3.bf16.msra.mxu1 %v14840_v24  ;;  %v6275_v24 = vld [vmem:[#allocation2 + $0x1b2] sm:$0xff] }
 0x794   :  { %13214 = vmatprep.subr.bf16.mxu1 %v14841_v54 }
 0x796   :  { %13151 = vmatmul.mubr.bf16.gmra.mrb[12].mxu1 %v17402_v4 }
 0x797   :  { %13154 = vmatprep.mubr.bf16.mxu1 %v17407_v37  ;;  %13215 = vmatpush3.bf16.msra.mxu1 %v14841_v54  ;;  %v6276_v54 = vld [vmem:[#allocation2 + $0x1ba] sm:$0xff] }
 0x798   :  { %13216 = vmatprep.subr.bf16.mxu1 %v14842_v33  ;;  %v6323_v7 = vpack.c.bf16 %v6276_v54, %v6275_v24  ;;  %v6286_v24 = vld [vmem:[#allocation2 + $0x232] sm:$0xff]  ;;  %v6287_v54 = vld [vmem:[#allocation2 + $0x242] sm:$0xff] }
 0x799   :  { %v17450_v18 = vpack.c.bf16 %v6286_v24, %v6285_v31  ;;  %v6295_v31 = vld [vmem:[#allocation2 + $0x2a2] sm:$0xff]  ;;  %v6296_v24 = vld [vmem:[#allocation2 + $0x2aa] sm:$0xff] }
 0x79b   :  { %13217 = vmatpush3.bf16.msra.mxu1 %v14842_v33  ;;  %v6277_v33 = vld [vmem:[#allocation2 + $0x1ca] sm:$0xff] }
 0x79c   :  { %13282 = vmatprep.subr.bf16.mxu1 %v17414_v19  ;;  %v17438_v56 = vpack.c.bf16 %v6278_v9, %v6277_v33  ;;  %v6289_v33 = vld [vmem:[#allocation2 + $0x25a] sm:$0xff]  ;;  %v6290_v9 = vld [vmem:[#allocation2 + $0x262] sm:$0xff] }
 0x79d   :  { %v17456_v30 = vpack.c.bf16 %v6290_v9, %v6289_v33  ;;  %v6297_v33 = vld [vmem:[#allocation2 + $0x2ba] sm:$0xff]  ;;  %v6298_v9 = vld [vmem:[#allocation2 + $0x2c2] sm:$0xff] }
 0x79e   :  { %13155 = vmatmul.mubr.bf16.gmra.mrb[16].mxu1 %v17416_v27 }
 0x79f   :  { %13158 = vmatprep.mubr.bf16.mxu1 %v17419_v52  ;;  %19402 = vst [vmem:[#allocation16_spill] sm:$0xff] %v17456_v30 }
 0x7a6   :  { %13159 = vmatmul.mubr.bf16.gmra.mrb[20].mxu1 %v17423_v61 }
 0x7a7   :  { %13162 = vmatprep.mubr.bf16.mxu1 %v17425_v51 }
 0x7ae   :  { %13163 = vmatmul.mubr.bf16.gmra.mrb[24].mxu1 %v17429_v63 }
 0x7af   :  { %13166 = vmatprep.mubr.bf16.mxu1 %v17431_v25 }
 0x7b6   :  { %13167 = vmatmul.mubr.bf16.gmra.mrb[28].mxu1 %v17435_v28 }
 0x7b7   :  { %13170 = vmatprep.mubr.bf16.mxu1 %v6323_v7  ;;  %v17452_v7 = vpack.c.bf16 %v6288_v3, %v6287_v54  ;;  %v17462_v54 = vpack.c.bf16 %v6294_v57, %v6293_v20  ;;  %v17464_v3 = vpack.c.bf16 %v6296_v24, %v6295_v31  ;;  %v6301_v20 = vld [vmem:[#allocation2 + $0x2ea] sm:$0xff]  ;;  %v6302_v57 = vld [vmem:[#allocation2 + $0x2f2] sm:$0xff]  ;;  %v6303_v31 = vld [vmem:[#allocation2 + $0x302] sm:$0xff] }
 0x7b8   :  { %v6304_v24 = vld [vmem:[#allocation2 + $0x30a] sm:$0xff] }
 0x7b9   :  { %19401 = vst [vmem:[#allocation24_spill] sm:$0xff] %v17452_v7  ;;  %19404 = vst [vmem:[#allocation18_spill] sm:$0xff] %v17462_v54 }
 0x7be   :  { %13171 = vmatmul.mubr.bf16.gmra.mrb[32].mxu1 %v17438_v56 }
 0x7bf   :  { %13174 = vmatprep.mubr.bf16.mxu1 %v17440_v12 }
 0x7c6   :  { %13175 = vmatmul.mubr.bf16.gmra.mrb[36].mxu1 %v17444_v8 }
 0x7c7   :  { %13178 = vmatprep.mubr.bf16.mxu1 %v17446_v49 }
 0x7ce   :  { %13179 = vmatmul.mubr.bf16.gmra.mrb[40].mxu1 %v17450_v18 }
 0x7cf   :  { %13182 = vmatprep.mubr.bf16.mxu1 %v17452_v7  ;;  %v17468_v7 = vpack.c.bf16 %v6298_v9, %v6297_v33  ;;  %v6305_v33 = vld [vmem:[#allocation2 + $0x31a] sm:$0xff]  ;;  %v6306_v9 = vld [vmem:[#allocation2 + $0x322] sm:$0xff] }
 0x7d6   :  { %13183 = vmatmul.mubr.bf16.gmra.mrb[44].mxu1 %v17456_v30  ;;  %v17470_v30 = vpack.c.bf16 %v6300_v60, %v6299_v34  ;;  %v17480_v34 = vpack.c.bf16 %v6306_v9, %v6305_v33  ;;  %v14844_v60 = vld [vmem:[%s19079_s4 + $0x108] sm:$0xff]   ;;  %v7284_v33 = vld [vmem:[#allocation2 + $0xb1] sm:$0xff] }
 0x7d7   :  { %13186 = vmatprep.mubr.bf16.mxu1 %v17458_v0  ;;  %v17474_v0 = vpack.c.bf16 %v6302_v57, %v6301_v20  ;;  %v14845_v20 = vld [vmem:[%s19079_s4 + $0x110] sm:$0xff]  }
 0x7d8   :  { %v7281_v57 = vld [vmem:[#allocation2 + $0x91] sm:$0xff] }
 0x7de   :  { %13187 = vmatmul.mubr.bf16.gmra.mrb[48].mxu1 %v17462_v54  ;;  %v17476_v54 = vpack.c.bf16 %v6304_v24, %v6303_v31  ;;  %v7282_v31 = vld [vmem:[#allocation2 + $0x99] sm:$0xff]  ;;  %v7283_v24 = vld [vmem:[#allocation2 + $0xa9] sm:$0xff] }
 0x7df   :  { %13190 = vmatprep.mubr.bf16.mxu1 %v17464_v3  ;;  %v17568_v9 = vpack.c.bf16 %v7282_v31, %v7281_v57 }
 0x7e6   :  { %13191 = vmatmul.mubr.bf16.gmra.mrb[52].mxu1 %v17468_v7 }
 0x7e7   :  { %13194 = vmatprep.mubr.bf16.mxu1 %v17470_v30 }
 0x7ee   :  { %13195 = vmatmul.mubr.bf16.gmra.mrb[56].mxu1 %v17474_v0 }
 0x7ef   :  { %13198 = vmatprep.mubr.bf16.mxu1 %v17476_v54 }
 0x7f6   :  { %13199 = vmatmul.mubr.bf16.gmra.mrb[60].mxu1 %v17480_v34 }
 0x7f7   :  { %13218 = vmatprep.mubr.bf16.mxu1 %v17247_v46  ;;  %v14846_v46 = vld [vmem:[%s19079_s4 + $0x118] sm:$0xff]  }
 0x7fe   :  { %13219 = vmatmul.mubr.bf16.vlgmr.msra.gmra.mrb[0].mxu1 %v17252_v1  ;;  %v14847_v1 = vld [vmem:[%s19079_s4 + $0x120] sm:$0xff]  }
 0x7ff   :  { %13222 = vmatprep.mubr.bf16.mxu1 %v17259_v45  ;;  %13283 = vmatpush3.bf16.msra.mxu1 %v17414_v19  ;;  %v14848_v45 = vld [vmem:[%s19079_s4 + $0x128] sm:$0xff]   ;;  %v14855_v19 = vld [vmem:[%s19079_s4 + $0x160] sm:$0xff]  }
 0x800   :  { %13284 = vmatprep.subr.bf16.mxu1 %v14844_v60 }
 0x803   :  { %13285 = vmatpush3.bf16.msra.mxu1 %v14844_v60  ;;  %v14856_v60 = vld [vmem:[%s19079_s4 + $0x168] sm:$0xff]  }
 0x804   :  { %13286 = vmatprep.subr.bf16.mxu1 %v14845_v20 }
 0x806   :  { %13223 = vmatmul.mubr.bf16.gmra.mrb[4].mxu1 %v17264_v50  ;;  %v14849_v50 = vld [vmem:[%s19079_s4 + $0x130] sm:$0xff]  }
 0x807   :  { %13226 = vmatprep.mubr.bf16.mxu1 %v17271_v2  ;;  %13287 = vmatpush3.bf16.msra.mxu1 %v14845_v20  ;;  %v14850_v2 = vld [vmem:[%s19079_s4 + $0x138] sm:$0xff]   ;;  %v17573_v20 = vpack.c.bf16 %v7284_v33, %v7283_v24  ;;  %v7301_v24 = vld [vmem:[#allocation2 + $0x181] sm:$0xff]  ;;  %v7302_v33 = vld [vmem:[#allocation2 + $0x189] sm:$0xff] }
 0x808   :  { %13288 = vmatprep.subr.bf16.mxu1 %v14846_v46 }
 0x80b   :  { %13289 = vmatpush3.bf16.msra.mxu1 %v14846_v46  ;;  %v14857_v46 = vld [vmem:[%s19079_s4 + $0x170] sm:$0xff]  }
 0x80c   :  { %13290 = vmatprep.subr.bf16.mxu1 %v14847_v1 }
 0x80e   :  { %13227 = vmatmul.mubr.bf16.gmra.mrb[8].mxu1 %v17276_v35  ;;  %v14851_v35 = vld [vmem:[%s19079_s4 + $0x140] sm:$0xff]  }
 0x80f   :  { %13230 = vmatprep.mubr.bf16.mxu1 %v17283_v62  ;;  %13291 = vmatpush3.bf16.msra.mxu1 %v14847_v1  ;;  %v6787_v62 = vld [vmem:[#allocation2 + $0x180] sm:$0xff] }
 0x810   :  { %13292 = vmatprep.subr.bf16.mxu1 %v14848_v45  ;;  %v7285_v1 = vld [vmem:[#allocation2 + $0xc1] sm:$0xff] }
 0x813   :  { %13293 = vmatpush3.bf16.msra.mxu1 %v14848_v45  ;;  %v7286_v45 = vld [vmem:[#allocation2 + $0xc9] sm:$0xff] }
 0x814   :  { %13294 = vmatprep.subr.bf16.mxu1 %v14849_v50 }
 0x816   :  { %13231 = vmatmul.mubr.bf16.gmra.mrb[12].mxu1 %v17288_v14  ;;  %v6788_v14 = vld [vmem:[#allocation2 + $0x188] sm:$0xff] }
 0x817   :  { %13234 = vmatprep.mubr.bf16.mxu1 %v17297_v16  ;;  %13295 = vmatpush3.bf16.msra.mxu1 %v14849_v50  ;;  %v17523_v16 = vpack.c.bf16 %v6788_v14, %v6787_v62  ;;  %v7287_v50 = vld [vmem:[#allocation2 + $0xd9] sm:$0xff] }
 0x818   :  { %13296 = vmatprep.subr.bf16.mxu1 %v14850_v2  ;;  %v14858_v62 = vld [vmem:[%s19079_s4 + $0x178] sm:$0xff]  }
 0x81b   :  { %13297 = vmatpush3.bf16.msra.mxu1 %v14850_v2  ;;  %v7288_v2 = vld [vmem:[#allocation2 + $0xe1] sm:$0xff] }
 0x81c   :  { %13362 = vmatprep.subr.bf16.mxu1 %v14851_v35  ;;  %v17585_v14 = vpack.c.bf16 %v7288_v2, %v7287_v50  ;;  %v7305_v50 = vld [vmem:[#allocation2 + $0x1e1] sm:$0xff]  ;;  %v7306_v2 = vld [vmem:[#allocation2 + $0x1e9] sm:$0xff] }
 0x81e   :  { %13235 = vmatmul.mubr.bf16.gmra.mrb[16].mxu1 %v17300_v32  ;;  %v6819_v32 = vld [vmem:[#allocation2 + $0x330] sm:$0xff] }
 0x81f   :  { %13238 = vmatprep.mubr.bf16.mxu1 %v17304_v58  ;;  %v6820_v58 = vld [vmem:[#allocation2 + $0x338] sm:$0xff] }
 0x826   :  { %13239 = vmatmul.mubr.bf16.gmra.mrb[20].mxu1 %v17306_v39  ;;  %v7271_v39 = vld [vmem:[#allocation2 + $0x19] sm:$0xff] }
 0x827   :  { %13242 = vmatprep.mubr.bf16.mxu1 %v17310_v44  ;;  %v7272_v44 = vld [vmem:[#allocation2 + $0x21] sm:$0xff] }
 0x82e   :  { %13243 = vmatmul.mubr.bf16.gmra.mrb[24].mxu1 %v17312_v13  ;;  %v17541_v13 = vpack.c.bf16 %v6820_v58, %v6819_v32  ;;  %v17592_v32 = vld [vmem:[%s19079_s4 + $0x180] sm:$0xff]   ;;  %v7289_v58 = vld [vmem:[#allocation2 + $0xf1] sm:$0xff] }
 0x82f   :  { %13246 = vmatprep.mubr.bf16.mxu1 %v17317_v11  ;;  %v7335_v11 = vpack.c.bf16 %v7272_v44, %v7271_v39  ;;  %v7290_v39 = vld [vmem:[#allocation2 + $0xf9] sm:$0xff]  ;;  %v7291_v44 = vld [vmem:[#allocation2 + $0x109] sm:$0xff] }
 0x836   :  { %13247 = vmatmul.mubr.bf16.gmra.mrb[28].mxu1 %v17523_v16 }
 0x837   :  { %13250 = vmatprep.mubr.bf16.mxu1 %v17320_v40  ;;  %v7273_v40 = vld [vmem:[#allocation2 + $0x31] sm:$0xff] }
 0x83e   :  { %13251 = vmatmul.mubr.bf16.gmra.mrb[32].mxu1 %v17322_v15  ;;  %v7274_v15 = vld [vmem:[#allocation2 + $0x39] sm:$0xff] }
 0x83f   :  { %13254 = vmatprep.mubr.bf16.mxu1 %v17326_v42  ;;  %v7275_v42 = vld [vmem:[#allocation2 + $0x49] sm:$0xff] }
 0x846   :  { %13255 = vmatmul.mubr.bf16.gmra.mrb[36].mxu1 %v17328_v38  ;;  %v7276_v38 = vld [vmem:[#allocation2 + $0x51] sm:$0xff] }
 0x847   :  { %13258 = vmatprep.mubr.bf16.mxu1 %v17332_v55  ;;  %v17544_v55 = vpack.c.bf16 %v7274_v15, %v7273_v40  ;;  %v17594_v40 = vpack.c.bf16 %v7290_v39, %v7289_v58  ;;  %v7308_v58 = vld [vmem:[#allocation2 + $0x201] sm:$0xff]  ;;  %v17616_v39 = vpack.c.bf16 %v7306_v2, %v7305_v50  ;;  %v7319_v50 = vld [vmem:[#allocation2 + $0x289] sm:$0xff]  ;;  %v7320_v2 = vld [vmem:[#allocation2 + $0x291] sm:$0xff] }
 0x84e   :  { %13259 = vmatmul.mubr.bf16.gmra.mrb[40].mxu1 %v17334_v6  ;;  %v14852_v6 = vld [vmem:[%s19079_s4 + $0x148] sm:$0xff]  }
 0x84f   :  { %13262 = vmatprep.mubr.bf16.mxu1 %v17338_v41  ;;  %v17549_v41 = vpack.c.bf16 %v7276_v38, %v7275_v42  ;;  %v7293_v42 = vld [vmem:[#allocation2 + $0x121] sm:$0xff]  ;;  %v7294_v38 = vld [vmem:[#allocation2 + $0x129] sm:$0xff] }
 0x856   :  { %13263 = vmatmul.mubr.bf16.gmra.mrb[44].mxu1 %v17340_v59  ;;  %v14853_v59 = vld [vmem:[%s19079_s4 + $0x150] sm:$0xff]  }
 0x857   :  { %13266 = vmatprep.mubr.bf16.mxu1 %v17344_v17  ;;  %v7277_v17 = vld [vmem:[#allocation2 + $0x61] sm:$0xff] }
 0x85e   :  { %13267 = vmatmul.mubr.bf16.gmra.mrb[48].mxu1 %v17346_v53  ;;  %v7278_v53 = vld [vmem:[#allocation2 + $0x69] sm:$0xff] }
 0x85f   :  { %13270 = vmatprep.mubr.bf16.mxu1 %v17350_v47  ;;  %v7279_v47 = vld [vmem:[#allocation2 + $0x79] sm:$0xff] }
 0x866   :  { %13271 = vmatmul.mubr.bf16.gmra.mrb[52].mxu1 %v17352_v26  ;;  %v7280_v26 = vld [vmem:[#allocation2 + $0x81] sm:$0xff] }
 0x867   :  { %13274 = vmatprep.mubr.bf16.mxu1 %v17356_v48  ;;  %v17556_v48 = vpack.c.bf16 %v7278_v53, %v7277_v17  ;;  %v17601_v17 = vpack.c.bf16 %v7294_v38, %v7293_v42  ;;  %v7310_v42 = vld [vmem:[#allocation2 + $0x219] sm:$0xff]  ;;  %v7311_v38 = vld [vmem:[#allocation2 + $0x229] sm:$0xff] }
 0x86e   :  { %13275 = vmatmul.mubr.bf16.gmra.mrb[56].mxu1 %v17358_v29  ;;  %v14854_v29 = vld [vmem:[%s19079_s4 + $0x158] sm:$0xff]  }
 0x86f   :  { %13278 = vmatprep.mubr.bf16.mxu1 %v17362_v10  ;;  %v17561_v10 = vpack.c.bf16 %v7280_v26, %v7279_v47  ;;  %v7297_v47 = vld [vmem:[#allocation2 + $0x151] sm:$0xff]  ;;  %v7298_v26 = vld [vmem:[#allocation2 + $0x159] sm:$0xff] }
 0x870   :  { %v17607_v57 = vpack.c.bf16 %v7298_v26, %v7297_v47  ;;  %v7313_v26 = vld [vmem:[#allocation2 + $0x241] sm:$0xff] }
 0x876   :  { %13279 = vmatmul.mubr.bf16.gmra.mrb[60].mxu1 %v17541_v13 }
 0x877   :  { %13298 = vmatprep.mubr.bf16.mxu1 %v7335_v11  ;;  %v7292_v11 = vld [vmem:[#allocation2 + $0x111] sm:$0xff] }
 0x878   :  { %v17597_v15 = vpack.c.bf16 %v7292_v11, %v7291_v44  ;;  %v7309_v11 = vld [vmem:[#allocation2 + $0x211] sm:$0xff] }
 0x87e   :  { %13299 = vmatmul.mubr.bf16.vlgmr.msra.gmra.mrb[0].mxu1 %v17544_v55 }
 0x87f   :  { %13302 = vmatprep.mubr.bf16.mxu1 %v17549_v41  ;;  %13363 = vmatpush3.bf16.msra.mxu1 %v14851_v35  ;;  %v17580_v35 = vpack.c.bf16 %v7286_v45, %v7285_v1  ;;  %v17613_v1 = vpack.c.bf16 %v7302_v33, %v7301_v24  ;;  %v7316_v24 = vld [vmem:[#allocation2 + $0x261] sm:$0xff] }
 0x880   :  { %13364 = vmatprep.subr.bf16.mxu1 %v14852_v6 }
 0x883   :  { %13365 = vmatpush3.bf16.msra.mxu1 %v14852_v6  ;;  %v7295_v6 = vld [vmem:[#allocation2 + $0x139] sm:$0xff] }
 0x884   :  { %13366 = vmatprep.subr.bf16.mxu1 %v14853_v59 }
 0x886   :  { %13303 = vmatmul.mubr.bf16.gmra.mrb[4].mxu1 %v17556_v48 }
 0x887   :  { %13306 = vmatprep.mubr.bf16.mxu1 %v17561_v10  ;;  %13367 = vmatpush3.bf16.msra.mxu1 %v14853_v59  ;;  %v7296_v59 = vld [vmem:[#allocation2 + $0x141] sm:$0xff] }
 0x888   :  { %13368 = vmatprep.subr.bf16.mxu1 %v14854_v29  ;;  %v17603_v53 = vpack.c.bf16 %v7296_v59, %v7295_v6  ;;  %v7312_v6 = vld [vmem:[#allocation2 + $0x231] sm:$0xff]  ;;  %v17622_v59 = vpack.c.bf16 %v7310_v42, %v7309_v11  ;;  %v7321_v11 = vld [vmem:[#allocation2 + $0x2a1] sm:$0xff]  ;;  %v7322_v42 = vld [vmem:[#allocation2 + $0x2a9] sm:$0xff] }
 0x889   :  { %v17624_v47 = vpack.c.bf16 %v7312_v6, %v7311_v38  ;;  %v7323_v38 = vld [vmem:[#allocation2 + $0x2b9] sm:$0xff]  ;;  %v7324_v6 = vld [vmem:[#allocation2 + $0x2c1] sm:$0xff] }
 0x88b   :  { %13369 = vmatpush3.bf16.msra.mxu1 %v14854_v29  ;;  %v7299_v29 = vld [vmem:[#allocation2 + $0x169] sm:$0xff] }
 0x88c   :  { %13370 = vmatprep.subr.bf16.mxu1 %v14855_v19 }
 0x88e   :  { %13307 = vmatmul.mubr.bf16.gmra.mrb[8].mxu1 %v17568_v9 }
 0x88f   :  { %13310 = vmatprep.mubr.bf16.mxu1 %v17573_v20  ;;  %13371 = vmatpush3.bf16.msra.mxu1 %v14855_v19  ;;  %v7300_v19 = vld [vmem:[#allocation2 + $0x171] sm:$0xff] }
 0x890   :  { %13372 = vmatprep.subr.bf16.mxu1 %v14856_v60  ;;  %v17609_v31 = vpack.c.bf16 %v7300_v19, %v7299_v29  ;;  %v7314_v29 = vld [vmem:[#allocation2 + $0x249] sm:$0xff]  ;;  %v7315_v19 = vld [vmem:[#allocation2 + $0x259] sm:$0xff] }
 0x891   :  { %v17628_v33 = vpack.c.bf16 %v7314_v29, %v7313_v26  ;;  %v17640_v26 = vpack.c.bf16 %v7322_v42, %v7321_v11  ;;  %v17642_v29 = vpack.c.bf16 %v7324_v6, %v7323_v38  ;;  %v7329_v11 = vld [vmem:[#allocation2 + $0x301] sm:$0xff]  ;;  %v7330_v42 = vld [vmem:[#allocation2 + $0x309] sm:$0xff]  ;;  %v7331_v38 = vld [vmem:[#allocation2 + $0x319] sm:$0xff] }
 0x892   :  { %v7332_v6 = vld [vmem:[#allocation2 + $0x321] sm:$0xff] }
 0x893   :  { %13373 = vmatpush3.bf16.msra.mxu1 %v14856_v60  ;;  %v7303_v60 = vld [vmem:[#allocation2 + $0x1c9] sm:$0xff]  ;;  %19406 = vst [vmem:[#allocation8_spill] sm:$0xff] %v17640_v26 }
 0x894   :  { %13374 = vmatprep.subr.bf16.mxu1 %v14857_v46 }
 0x896   :  { %13311 = vmatmul.mubr.bf16.gmra.mrb[12].mxu1 %v17580_v35 }
 0x897   :  { %13314 = vmatprep.mubr.bf16.mxu1 %v17585_v14  ;;  %13375 = vmatpush3.bf16.msra.mxu1 %v14857_v46  ;;  %v7304_v46 = vld [vmem:[#allocation2 + $0x1d1] sm:$0xff] }
 0x898   :  { %13376 = vmatprep.subr.bf16.mxu1 %v14858_v62  ;;  %v7351_v45 = vpack.c.bf16 %v7304_v46, %v7303_v60  ;;  %v17630_v60 = vpack.c.bf16 %v7316_v24, %v7315_v19  ;;  %v7317_v46 = vld [vmem:[#allocation2 + $0x271] sm:$0xff]  ;;  %v7326_v24 = vld [vmem:[#allocation2 + $0x2d9] sm:$0xff] }
 0x899   :  { %v7325_v19 = vld [vmem:[#allocation2 + $0x2d1] sm:$0xff] }
 0x89b   :  { %13377 = vmatpush3.bf16.msra.mxu1 %v14858_v62  ;;  %v7307_v62 = vld [vmem:[#allocation2 + $0x1f9] sm:$0xff] }
 0x89c   :  { %13442 = vmatprep.subr.bf16.mxu1 %v17592_v32  ;;  %v17618_v44 = vpack.c.bf16 %v7308_v58, %v7307_v62  ;;  %v17636_v58 = vpack.c.bf16 %v7320_v2, %v7319_v50  ;;  %v17646_v50 = vpack.c.bf16 %v7326_v24, %v7325_v19  ;;  %v7333_v19 = vld [vmem:[#allocation2 + $0x331] sm:$0xff]  ;;  %v7334_v24 = vld [vmem:[#allocation2 + $0x339] sm:$0xff] }
 0x89e   :  { %13315 = vmatmul.mubr.bf16.gmra.mrb[16].mxu1 %v17594_v40  ;;  %19405 = vst [vmem:[#allocation19_spill] sm:$0xff] %v17636_v58 }
 0x89f   :  { %13318 = vmatprep.mubr.bf16.mxu1 %v17597_v15 }
 0x8a6   :  { %13319 = vmatmul.mubr.bf16.gmra.mrb[20].mxu1 %v17601_v17 }
 0x8a7   :  { %13322 = vmatprep.mubr.bf16.mxu1 %v17603_v53 }
 0x8ae   :  { %13323 = vmatmul.mubr.bf16.gmra.mrb[24].mxu1 %v17607_v57 }
 0x8af   :  { %13326 = vmatprep.mubr.bf16.mxu1 %v17609_v31 }
 0x8b6   :  { %13327 = vmatmul.mubr.bf16.gmra.mrb[28].mxu1 %v17613_v1 }
 0x8b7   :  { %13330 = vmatprep.mubr.bf16.mxu1 %v7351_v45  ;;  %v7318_v45 = vld [vmem:[#allocation2 + $0x279] sm:$0xff] }
 0x8b8   :  { %v17634_v62 = vpack.c.bf16 %v7318_v45, %v7317_v46  ;;  %v7327_v46 = vld [vmem:[#allocation2 + $0x2e9] sm:$0xff]  ;;  %v7328_v45 = vld [vmem:[#allocation2 + $0x2f1] sm:$0xff] }
 0x8b9   :  { %v17648_v2 = vpack.c.bf16 %v7328_v45, %v7327_v46  ;;  %v17658_v46 = vpack.c.bf16 %v7334_v24, %v7333_v19  ;;  %v14860_v45 = vld [vmem:[%s19079_s4 + $0x188] sm:$0xff]   ;;  %v8308_v19 = vld [vmem:[#allocation2 + $0x98] sm:$0xff] }
 0x8be   :  { %13331 = vmatmul.mubr.bf16.gmra.mrb[32].mxu1 %v17616_v39 }
 0x8bf   :  { %13334 = vmatprep.mubr.bf16.mxu1 %v17618_v44 }
 0x8c6   :  { %13335 = vmatmul.mubr.bf16.gmra.mrb[36].mxu1 %v17622_v59 }
 0x8c7   :  { %13338 = vmatprep.mubr.bf16.mxu1 %v17624_v47 }
 0x8ce   :  { %13339 = vmatmul.mubr.bf16.gmra.mrb[40].mxu1 %v17628_v33 }
 0x8cf   :  { %13342 = vmatprep.mubr.bf16.mxu1 %v17630_v60 }
 0x8d6   :  { %13343 = vmatmul.mubr.bf16.gmra.mrb[44].mxu1 %v17634_v62 }
 0x8d7   :  { %13346 = vmatprep.mubr.bf16.mxu1 %v17636_v58  ;;  %v17652_v58 = vpack.c.bf16 %v7330_v42, %v7329_v11  ;;  %v14861_v11 = vld [vmem:[%s19079_s4 + $0x190] sm:$0xff]   ;;  %v8305_v42 = vld [vmem:[#allocation2 + $0x78] sm:$0xff] }
 0x8de   :  { %13347 = vmatmul.mubr.bf16.gmra.mrb[48].mxu1 %v17640_v26  ;;  %v17654_v26 = vpack.c.bf16 %v7332_v6, %v7331_v38  ;;  %v8306_v38 = vld [vmem:[#allocation2 + $0x80] sm:$0xff]  ;;  %v8307_v6 = vld [vmem:[#allocation2 + $0x90] sm:$0xff] }
 0x8df   :  { %13350 = vmatprep.mubr.bf16.mxu1 %v17642_v29  ;;  %v8366_v24 = vpack.c.bf16 %v8306_v38, %v8305_v42  ;;  %v8323_v42 = vld [vmem:[#allocation2 + $0x150] sm:$0xff]  ;;  %v8324_v38 = vld [vmem:[#allocation2 + $0x158] sm:$0xff] }
 0x8e6   :  { %13351 = vmatmul.mubr.bf16.gmra.mrb[52].mxu1 %v17646_v50 }
 0x8e7   :  { %13354 = vmatprep.mubr.bf16.mxu1 %v17648_v2 }
 0x8ee   :  { %13355 = vmatmul.mubr.bf16.gmra.mrb[56].mxu1 %v17652_v58 }
 0x8ef   :  { %13358 = vmatprep.mubr.bf16.mxu1 %v17654_v26 }
 0x8f6   :  { %13359 = vmatmul.mubr.bf16.gmra.mrb[60].mxu1 %v17658_v46 }
 0x8f7   :  { %13378 = vmatprep.mubr.bf16.mxu1 %v17365_v21  ;;  %v14862_v21 = vld [vmem:[%s19079_s4 + $0x198] sm:$0xff]  }
 0x8fe   :  { %13379 = vmatmul.mubr.bf16.vlgmr.msra.gmra.mrb[0].mxu1 %v17370_v43  ;;  %v14863_v43 = vld [vmem:[%s19079_s4 + $0x1a0] sm:$0xff]  }
 0x8ff   :  { %13382 = vmatprep.mubr.bf16.mxu1 %v17378_v23  ;;  %13443 = vmatpush3.bf16.msra.mxu1 %v17592_v32  ;;  %v14864_v23 = vld [vmem:[%s19079_s4 + $0x1a8] sm:$0xff]  }
 0x900   :  { %13444 = vmatprep.subr.bf16.mxu1 %v14860_v45 }
 0x903   :  { %13445 = vmatpush3.bf16.msra.mxu1 %v14860_v45  ;;  %v14870_v45 = vld [vmem:[%s19079_s4 + $0x1d8] sm:$0xff]  }
 0x904   :  { %13446 = vmatprep.subr.bf16.mxu1 %v14861_v11 }
 0x906   :  { %13383 = vmatmul.mubr.bf16.gmra.mrb[4].mxu1 %v17383_v22  ;;  %v14865_v22 = vld [vmem:[%s19079_s4 + $0x1b0] sm:$0xff]  }
 0x907   :  { %13386 = vmatprep.mubr.bf16.mxu1 %v17390_v36  ;;  %13447 = vmatpush3.bf16.msra.mxu1 %v14861_v11  ;;  %v14866_v36 = vld [vmem:[%s19079_s4 + $0x1b8] sm:$0xff]   ;;  %v8367_v11 = vpack.c.bf16 %v8308_v19, %v8307_v6  ;;  %v8375_v19 = vpack.c.bf16 %v8324_v38, %v8323_v42  ;;  %v8346_v42 = vld [vmem:[#allocation2 + $0x290] sm:$0xff]  ;;  %v8347_v38 = vld [vmem:[#allocation2 + $0x2a0] sm:$0xff] }
 0x908   :  { %13448 = vmatprep.subr.bf16.mxu1 %v14862_v21 }
 0x90b   :  { %13449 = vmatpush3.bf16.msra.mxu1 %v14862_v21  ;;  %v14871_v21 = vld [vmem:[%s19079_s4 + $0x1e0] sm:$0xff]  }
 0x90c   :  { %13450 = vmatprep.subr.bf16.mxu1 %v14863_v43 }
 0x90e   :  { %13387 = vmatmul.mubr.bf16.gmra.mrb[8].mxu1 %v17395_v5  ;;  %v14867_v5 = vld [vmem:[%s19079_s4 + $0x1c0] sm:$0xff]  }
 0x90f   :  { %13390 = vmatprep.mubr.bf16.mxu1 %v17402_v4  ;;  %13451 = vmatpush3.bf16.msra.mxu1 %v14863_v43  ;;  %v7815_v4 = vld [vmem:[#allocation2 + $0x182] sm:$0xff] }
 0x910   :  { %13452 = vmatprep.subr.bf16.mxu1 %v14864_v23  ;;  %v8309_v43 = vld [vmem:[#allocation2 + $0xa8] sm:$0xff] }
 0x913   :  { %13453 = vmatpush3.bf16.msra.mxu1 %v14864_v23  ;;  %v8310_v23 = vld [vmem:[#allocation2 + $0xb0] sm:$0xff] }
 0x914   :  { %13454 = vmatprep.subr.bf16.mxu1 %v14865_v22 }
 0x916   :  { %13391 = vmatmul.mubr.bf16.gmra.mrb[12].mxu1 %v17407_v37  ;;  %v7816_v37 = vld [vmem:[#allocation2 + $0x18a] sm:$0xff] }
 0x917   :  { %13394 = vmatprep.mubr.bf16.mxu1 %v17416_v27  ;;  %13455 = vmatpush3.bf16.msra.mxu1 %v14865_v22  ;;  %v17701_v27 = vpack.c.bf16 %v7816_v37, %v7815_v4  ;;  %v8311_v22 = vld [vmem:[#allocation2 + $0xc0] sm:$0xff]  ;;  %v14872_v4 = vld [vmem:[%s19079_s4 + $0x1e8] sm:$0xff]  }
 0x918   :  { %13456 = vmatprep.subr.bf16.mxu1 %v14866_v36 }
 0x91b   :  { %13457 = vmatpush3.bf16.msra.mxu1 %v14866_v36  ;;  %v8312_v36 = vld [vmem:[#allocation2 + $0xc8] sm:$0xff] }
 0x91c   :  { %13522 = vmatprep.subr.bf16.mxu1 %v14867_v5  ;;  %v8369_v37 = vpack.c.bf16 %v8312_v36, %v8311_v22  ;;  %v8331_v22 = vld [vmem:[#allocation2 + $0x1e0] sm:$0xff]  ;;  %v8332_v36 = vld [vmem:[#allocation2 + $0x1e8] sm:$0xff] }
 0x91e   :  { %13395 = vmatmul.mubr.bf16.gmra.mrb[16].mxu1 %v17419_v52  ;;  %v19407_v52 = vld [vmem:[#allocation24_spill] sm:$0xff] }
 0x91f   :  { %13398 = vmatprep.mubr.bf16.mxu1 %v17423_v61  ;;  %v19408_v61 = vld [vmem:[#allocation16_spill] sm:$0xff] }
 0x926   :  { %13399 = vmatmul.mubr.bf16.gmra.mrb[20].mxu1 %v17425_v51  ;;  %v19409_v51 = vld [vmem:[#allocation17_spill] sm:$0xff] }
 0x927   :  { %13402 = vmatprep.mubr.bf16.mxu1 %v17429_v63  ;;  %v19410_v63 = vld [vmem:[#allocation18_spill] sm:$0xff] }
 0x92e   :  { %13403 = vmatmul.mubr.bf16.gmra.mrb[24].mxu1 %v17431_v25  ;;  %v7847_v25 = vld [vmem:[#allocation2 + $0x332] sm:$0xff] }
 0x92f   :  { %13406 = vmatprep.mubr.bf16.mxu1 %v17435_v28  ;;  %v7848_v28 = vld [vmem:[#allocation2 + $0x33a] sm:$0xff] }
 0x936   :  { %13407 = vmatmul.mubr.bf16.gmra.mrb[28].mxu1 %v17701_v27 }
 0x937   :  { %13410 = vmatprep.mubr.bf16.mxu1 %v17438_v56  ;;  %v8299_v56 = vld [vmem:[#allocation2 + $0x30] sm:$0xff] }
 0x93e   :  { %13411 = vmatmul.mubr.bf16.gmra.mrb[32].mxu1 %v17440_v12  ;;  %v8300_v12 = vld [vmem:[#allocation2 + $0x38] sm:$0xff] }
 0x93f   :  { %13414 = vmatprep.mubr.bf16.mxu1 %v17444_v8  ;;  %v17719_v8 = vpack.c.bf16 %v7848_v28, %v7847_v25  ;;  %v8316_v25 = vld [vmem:[#allocation2 + $0xf8] sm:$0xff] }
 0x946   :  { %13415 = vmatmul.mubr.bf16.gmra.mrb[36].mxu1 %v17446_v49  ;;  %v8363_v49 = vpack.c.bf16 %v8300_v12, %v8299_v56  ;;  %v14874_v56 = vld [vmem:[%s19079_s4 + $0x1f8] sm:$0xff]  }
 0x947   :  { %13418 = vmatprep.mubr.bf16.mxu1 %v17450_v18  ;;  %v8301_v18 = vld [vmem:[#allocation2 + $0x48] sm:$0xff] }
 0x94e   :  { %13419 = vmatmul.mubr.bf16.gmra.mrb[40].mxu1 %v19407_v52  ;;  %v14873_v52 = vld [vmem:[%s19079_s4 + $0x1f0] sm:$0xff]  }
 0x94f   :  { %13422 = vmatprep.mubr.bf16.mxu1 %v19408_v61  ;;  %v8313_v61 = vld [vmem:[#allocation2 + $0xd8] sm:$0xff] }
 0x956   :  { %13423 = vmatmul.mubr.bf16.gmra.mrb[44].mxu1 %v19409_v51  ;;  %v8314_v51 = vld [vmem:[#allocation2 + $0xe0] sm:$0xff] }
 0x957   :  { %13426 = vmatprep.mubr.bf16.mxu1 %v19410_v63  ;;  %v8315_v63 = vld [vmem:[#allocation2 + $0xf0] sm:$0xff]  ;;  %v8370_v28 = vpack.c.bf16 %v8314_v51, %v8313_v61  ;;  %v8336_v61 = vld [vmem:[#allocation2 + $0x218] sm:$0xff] }
 0x958   :  { %v8371_v12 = vpack.c.bf16 %v8316_v25, %v8315_v63  ;;  %v8337_v25 = vld [vmem:[#allocation2 + $0x228] sm:$0xff] }
 0x95e   :  { %13427 = vmatmul.mubr.bf16.gmra.mrb[48].mxu1 %v17464_v3  ;;  %v8303_v3 = vld [vmem:[#allocation2 + $0x60] sm:$0xff] }
 0x95f   :  { %13430 = vmatprep.mubr.bf16.mxu1 %v17468_v7  ;;  %v8302_v7 = vld [vmem:[#allocation2 + $0x50] sm:$0xff] }
 0x960   :  { %v8364_v32 = vpack.c.bf16 %v8302_v7, %v8301_v18  ;;  %v8317_v18 = vld [vmem:[#allocation2 + $0x108] sm:$0xff]  ;;  %v8318_v7 = vld [vmem:[#allocation2 + $0x110] sm:$0xff] }
 0x966   :  { %13431 = vmatmul.mubr.bf16.gmra.mrb[52].mxu1 %v17470_v30  ;;  %v8304_v30 = vld [vmem:[#allocation2 + $0x68] sm:$0xff] }
 0x967   :  { %13434 = vmatprep.mubr.bf16.mxu1 %v17474_v0  ;;  %v14868_v0 = vld [vmem:[%s19079_s4 + $0x1c8] sm:$0xff]  }
 0x96e   :  { %13435 = vmatmul.mubr.bf16.gmra.mrb[56].mxu1 %v17476_v54  ;;  %v8365_v54 = vpack.c.bf16 %v8304_v30, %v8303_v3  ;;  %v8319_v3 = vld [vmem:[#allocation2 + $0x120] sm:$0xff]  ;;  %v8320_v30 = vld [vmem:[#allocation2 + $0x128] sm:$0xff] }
 0x96f   :  { %13438 = vmatprep.mubr.bf16.mxu1 %v17480_v34  ;;  %v14869_v34 = vld [vmem:[%s19079_s4 + $0x1d0] sm:$0xff]  }
 0x976   :  { %13439 = vmatmul.mubr.bf16.gmra.mrb[60].mxu1 %v17719_v8 }
 0x977   :  { %13458 = vmatprep.mubr.bf16.mxu1 %v8363_v49  ;;  %v17746_v49 = vld [vmem:[%s19079_s4 + $0x200] sm:$0xff]  }
 0x97e   :  { %13459 = vmatmul.mubr.bf16.vlgmr.msra.gmra.mrb[0].mxu1 %v8364_v32  ;;  %v8372_v32 = vpack.c.bf16 %v8318_v7, %v8317_v18  ;;  %v8341_v7 = vld [vmem:[#allocation2 + $0x258] sm:$0xff] }
 0x97f   :  { %13462 = vmatprep.mubr.bf16.mxu1 %v8365_v54  ;;  %13523 = vmatpush3.bf16.msra.mxu1 %v14867_v5  ;;  %v8368_v5 = vpack.c.bf16 %v8310_v23, %v8309_v43  ;;  %v8321_v54 = vld [vmem:[#allocation2 + $0x138] sm:$0xff]  ;;  %v14890_v43 = vld [vmem:[#allocation2 + $0x8] sm:$0xff] }
 0x980   :  { %13524 = vmatprep.subr.bf16.mxu1 %v14868_v0 }
 0x983   :  { %13525 = vmatpush3.bf16.msra.mxu1 %v14868_v0  ;;  %v8373_v0 = vpack.c.bf16 %v8320_v30, %v8319_v3  ;;  %v8342_v3 = vld [vmem:[#allocation2 + $0x260] sm:$0xff]  ;;  %v8343_v30 = vld [vmem:[#allocation2 + $0x270] sm:$0xff] }
 0x984   :  { %13526 = vmatprep.subr.bf16.mxu1 %v14869_v34 }
 0x986   :  { %13463 = vmatmul.mubr.bf16.gmra.mrb[4].mxu1 %v8366_v24  ;;  %v8325_v24 = vld [vmem:[#allocation2 + $0x168] sm:$0xff] }
 0x987   :  { %13466 = vmatprep.mubr.bf16.mxu1 %v8367_v11  ;;  %13527 = vmatpush3.bf16.msra.mxu1 %v14869_v34  ;;  %v8322_v34 = vld [vmem:[#allocation2 + $0x140] sm:$0xff] }
 0x988   :  { %13528 = vmatprep.subr.bf16.mxu1 %v14870_v45  ;;  %v8374_v6 = vpack.c.bf16 %v8322_v34, %v8321_v54  ;;  %v8345_v34 = vld [vmem:[#allocation2 + $0x288] sm:$0xff] }
 0x98b   :  { %13529 = vmatpush3.bf16.msra.mxu1 %v14870_v45  ;;  %v8326_v45 = vld [vmem:[#allocation2 + $0x170] sm:$0xff] }
 0x98c   :  { %13530 = vmatprep.subr.bf16.mxu1 %v14871_v21  ;;  %v8376_v11 = vpack.c.bf16 %v8326_v45, %v8325_v24  ;;  %v8349_v45 = vld [vmem:[#allocation2 + $0x2b8] sm:$0xff] }
 0x98e   :  { %13467 = vmatmul.mubr.bf16.gmra.mrb[8].mxu1 %v8368_v5  ;;  %v8379_v5 = vpack.c.bf16 %v8332_v36, %v8331_v22 }
 0x98f   :  { %13470 = vmatprep.mubr.bf16.mxu1 %v8369_v37  ;;  %13531 = vmatpush3.bf16.msra.mxu1 %v14871_v21  ;;  %v8329_v21 = vld [vmem:[#allocation2 + $0x198] sm:$0xff]  ;;  %v8334_v37 = vld [vmem:[#allocation2 + $0x200] sm:$0xff] }
 0x990   :  { %13532 = vmatprep.subr.bf16.mxu1 %v14872_v4  ;;  %v8378_v23 = vpack.c.bf16 %v14890_v43, %v8329_v21  ;;  %v8351_v21 = vld [vmem:[#allocation2 + $0x2d0] sm:$0xff] }
 0x993   :  { %13533 = vmatpush3.bf16.msra.mxu1 %v14872_v4  ;;  %v8333_v4 = vld [vmem:[#allocation2 + $0x1f8] sm:$0xff] }
 0x994   :  { %13534 = vmatprep.subr.bf16.mxu1 %v14873_v52  ;;  %v8380_v51 = vpack.c.bf16 %v8334_v37, %v8333_v4  ;;  %v8354_v4 = vld [vmem:[#allocation2 + $0x2f0] sm:$0xff]  ;;  %v8355_v37 = vld [vmem:[#allocation2 + $0x300] sm:$0xff] }
 0x996   :  { %13471 = vmatmul.mubr.bf16.gmra.mrb[12].mxu1 %v8370_v28  ;;  %v8338_v28 = vld [vmem:[#allocation2 + $0x230] sm:$0xff] }
 0x997   :  { %13474 = vmatprep.mubr.bf16.mxu1 %v8371_v12  ;;  %13535 = vmatpush3.bf16.msra.mxu1 %v14873_v52  ;;  %v8335_v52 = vld [vmem:[#allocation2 + $0x210] sm:$0xff]  ;;  %v8382_v12 = vpack.c.bf16 %v8338_v28, %v8337_v25  ;;  %v8358_v25 = vld [vmem:[#allocation2 + $0x320] sm:$0xff] }
 0x998   :  { %13536 = vmatprep.subr.bf16.mxu1 %v14874_v56  ;;  %v8381_v63 = vpack.c.bf16 %v8336_v61, %v8335_v52  ;;  %v8356_v52 = vld [vmem:[#allocation2 + $0x308] sm:$0xff] }
 0x99b   :  { %13537 = vmatpush3.bf16.msra.mxu1 %v14874_v56  ;;  %v8339_v56 = vld [vmem:[#allocation2 + $0x240] sm:$0xff] }
 0x99c   :  { %13602 = vmatprep.subr.bf16.mxu1 %v17746_v49 }
 0x99e   :  { %13475 = vmatmul.mubr.bf16.gmra.mrb[16].mxu1 %v8372_v32  ;;  %v8344_v32 = vld [vmem:[#allocation2 + $0x278] sm:$0xff] }
 0x99f   :  { %13478 = vmatprep.mubr.bf16.mxu1 %v8373_v0  ;;  %v8384_v0 = vpack.c.bf16 %v8342_v3, %v8341_v7  ;;  %v8385_v54 = vpack.c.bf16 %v8344_v32, %v8343_v30  ;;  %v9340_v7 = vld [vmem:[#allocation2 + $0xca] sm:$0xff]  ;;  %v9341_v32 = vld [vmem:[#allocation2 + $0xda] sm:$0xff] }
 0x9a6   :  { %13479 = vmatmul.mubr.bf16.gmra.mrb[20].mxu1 %v8374_v6  ;;  %v8348_v6 = vld [vmem:[#allocation2 + $0x2a8] sm:$0xff] }
 0x9a7   :  { %13482 = vmatprep.mubr.bf16.mxu1 %v8375_v19  ;;  %v8386_v19 = vpack.c.bf16 %v8346_v42, %v8345_v34  ;;  %v8387_v24 = vpack.c.bf16 %v8348_v6, %v8347_v38  ;;  %v9344_v34 = vld [vmem:[#allocation2 + $0xfa] sm:$0xff]  ;;  %v9345_v6 = vld [vmem:[#allocation2 + $0x10a] sm:$0xff] }
 0x9ae   :  { %13483 = vmatmul.mubr.bf16.gmra.mrb[24].mxu1 %v8376_v11  ;;  %v8350_v11 = vld [vmem:[#allocation2 + $0x2c0] sm:$0xff] }
 0x9af   :  { %13486 = vmatprep.mubr.bf16.mxu1 %v17523_v16  ;;  %v8340_v16 = vld [vmem:[#allocation2 + $0x248] sm:$0xff]  ;;  %v8388_v22 = vpack.c.bf16 %v8350_v11, %v8349_v45 }
 0x9b0   :  { %v8383_v18 = vpack.c.bf16 %v8340_v16, %v8339_v56  ;;  %v8361_v56 = vld [vmem:[#allocation2 + $0x348] sm:$0xff] }
 0x9b1   :  { %v8394_v16 = vpack.c.bf16 %v14890_v43, %v8361_v56  ;;  %v9338_v43 = vld [vmem:[#allocation2 + $0xb2] sm:$0xff]  ;;  %v9348_v45 = vld [vmem:[#allocation2 + $0x12a] sm:$0xff]  ;;  %v9359_v56 = vld [vmem:[#allocation2 + $0x1e2] sm:$0xff] }
 0x9b6   :  { %13487 = vmatmul.mubr.bf16.gmra.mrb[28].mxu1 %v8378_v23  ;;  %v8352_v23 = vld [vmem:[#allocation2 + $0x2d8] sm:$0xff] }
 0x9b7   :  { %13490 = vmatprep.mubr.bf16.mxu1 %v8379_v5  ;;  %v8389_v36 = vpack.c.bf16 %v8352_v23, %v8351_v21  ;;  %v8353_v5 = vld [vmem:[#allocation2 + $0x2e8] sm:$0xff]  ;;  %v9349_v23 = vld [vmem:[#allocation2 + $0x13a] sm:$0xff] }
 0x9b8   :  { %v8390_v61 = vpack.c.bf16 %v8354_v4, %v8353_v5  ;;  %v9352_v5 = vld [vmem:[#allocation2 + $0x15a] sm:$0xff] }
 0x9be   :  { %13491 = vmatmul.mubr.bf16.gmra.mrb[32].mxu1 %v8380_v51  ;;  %v8391_v51 = vpack.c.bf16 %v8356_v52, %v8355_v37  ;;  %v9353_v52 = vld [vmem:[#allocation2 + $0x16a] sm:$0xff] }
 0x9bf   :  { %13494 = vmatprep.mubr.bf16.mxu1 %v8381_v63  ;;  %v8357_v63 = vld [vmem:[#allocation2 + $0x318] sm:$0xff] }
 0x9c0   :  { %v8392_v28 = vpack.c.bf16 %v8358_v25, %v8357_v63  ;;  %v9357_v63 = vld [vmem:[#allocation2 + $0x19a] sm:$0xff]  ;;  %v9358_v25 = vld [vmem:[#allocation2 + $0x1a2] sm:$0xff] }
 0x9c6   :  { %13495 = vmatmul.mubr.bf16.gmra.mrb[36].mxu1 %v8382_v12  ;;  %v14876_v12 = vld [vmem:[%s19079_s4 + $0x208] sm:$0xff]  }
 0x9c7   :  { %13498 = vmatprep.mubr.bf16.mxu1 %v8383_v18  ;;  %v9339_v18 = vld [vmem:[#allocation2 + $0xc2] sm:$0xff] }
 0x9c8   :  { %v9397_v30 = vpack.c.bf16 %v9340_v7, %v9339_v18  ;;  %v9383_v18 = vld [vmem:[#allocation2 + $0x302] sm:$0xff]  ;;  %v9384_v7 = vld [vmem:[#allocation2 + $0x30a] sm:$0xff] }
 0x9ce   :  { %13499 = vmatmul.mubr.bf16.gmra.mrb[40].mxu1 %v8384_v0  ;;  %v9342_v0 = vld [vmem:[#allocation2 + $0xe2] sm:$0xff] }
 0x9cf   :  { %13502 = vmatprep.mubr.bf16.mxu1 %v8385_v54  ;;  %v9343_v54 = vld [vmem:[#allocation2 + $0xf2] sm:$0xff]  ;;  %v9398_v42 = vpack.c.bf16 %v9342_v0, %v9341_v32  ;;  %v9385_v32 = vld [vmem:[#allocation2 + $0x31a] sm:$0xff]  ;;  %v9386_v0 = vld [vmem:[#allocation2 + $0x322] sm:$0xff] }
 0x9d0   :  { %v9399_v38 = vpack.c.bf16 %v9344_v34, %v9343_v54  ;;  %v9420_v54 = vpack.c.bf16 %v9386_v0, %v9385_v32  ;;  %v9389_v34 = vld [vmem:[#allocation2 + $0x34a] sm:$0xff] }
 0x9d6   :  { %13503 = vmatmul.mubr.bf16.gmra.mrb[44].mxu1 %v8386_v19  ;;  %v9346_v19 = vld [vmem:[#allocation2 + $0x112] sm:$0xff] }
 0x9d7   :  { %13506 = vmatprep.mubr.bf16.mxu1 %v8387_v24  ;;  %v9347_v24 = vld [vmem:[#allocation2 + $0x122] sm:$0xff]  ;;  %v9400_v11 = vpack.c.bf16 %v9346_v19, %v9345_v6 }
 0x9d8   :  { %v9401_v21 = vpack.c.bf16 %v9348_v45, %v9347_v24 }
 0x9de   :  { %13507 = vmatmul.mubr.bf16.gmra.mrb[48].mxu1 %v8388_v22  ;;  %v9350_v22 = vld [vmem:[#allocation2 + $0x142] sm:$0xff] }
 0x9df   :  { %13510 = vmatprep.mubr.bf16.mxu1 %v8389_v36  ;;  %v9351_v36 = vld [vmem:[#allocation2 + $0x152] sm:$0xff]  ;;  %v9402_v4 = vpack.c.bf16 %v9350_v22, %v9349_v23 }
 0x9e0   :  { %v9403_v37 = vpack.c.bf16 %v9352_v5, %v9351_v36 }
 0x9e6   :  { %13511 = vmatmul.mubr.bf16.gmra.mrb[52].mxu1 %v8390_v61  ;;  %v9354_v61 = vld [vmem:[#allocation2 + $0x172] sm:$0xff] }
 0x9e7   :  { %13514 = vmatprep.mubr.bf16.mxu1 %v8391_v51  ;;  %v9404_v51 = vpack.c.bf16 %v9354_v61, %v9353_v52 }
 0x9ee   :  { %13515 = vmatmul.mubr.bf16.gmra.mrb[56].mxu1 %v8392_v28  ;;  %v9406_v28 = vpack.c.bf16 %v9358_v25, %v9357_v63 }
 0x9ef   :  { %13518 = vmatprep.mubr.bf16.mxu1 %v17541_v13  ;;  %v14877_v13 = vld [vmem:[%s19079_s4 + $0x210] sm:$0xff]  }
 0x9f6   :  { %13519 = vmatmul.mubr.bf16.gmra.mrb[60].mxu1 %v8394_v16  ;;  %v9360_v16 = vld [vmem:[#allocation2 + $0x1ea] sm:$0xff] }
 0x9f7   :  { %13538 = vmatprep.mubr.bf16.mxu1 %v17544_v55  ;;  %v14878_v55 = vld [vmem:[%s19079_s4 + $0x218] sm:$0xff]  }
 0x9fe   :  { %13539 = vmatmul.mubr.bf16.vlgmr.msra.gmra.mrb[0].mxu1 %v17549_v41  ;;  %v14879_v41 = vld [vmem:[%s19079_s4 + $0x220] sm:$0xff]  }
 0x9ff   :  { %13542 = vmatprep.mubr.bf16.mxu1 %v17556_v48  ;;  %13603 = vmatpush3.bf16.msra.mxu1 %v17746_v49  ;;  %v14880_v48 = vld [vmem:[%s19079_s4 + $0x228] sm:$0xff]  }
 0xa00   :  { %13604 = vmatprep.subr.bf16.mxu1 %v14876_v12  ;;  %v9337_v49 = vld [vmem:[#allocation2 + $0xaa] sm:$0xff] }
 0xa01   :  { %v9396_v3 = vpack.c.bf16 %v9338_v43, %v9337_v49  ;;  %v9381_v49 = vld [vmem:[#allocation2 + $0x2ea] sm:$0xff]  ;;  %v9382_v43 = vld [vmem:[#allocation2 + $0x2f2] sm:$0xff] }
 0xa03   :  { %13605 = vmatpush3.bf16.msra.mxu1 %v14876_v12  ;;  %v9407_v12 = vpack.c.bf16 %v9360_v16, %v9359_v56 }
 0xa04   :  { %13606 = vmatprep.subr.bf16.mxu1 %v14877_v13 }
 0xa06   :  { %13543 = vmatmul.mubr.bf16.gmra.mrb[4].mxu1 %v17561_v10  ;;  %v14881_v10 = vld [vmem:[%s19079_s4 + $0x230] sm:$0xff]  }
 0xa07   :  { %13546 = vmatprep.mubr.bf16.mxu1 %v17568_v9  ;;  %13607 = vmatpush3.bf16.msra.mxu1 %v14877_v13  ;;  %v14882_v9 = vld [vmem:[%s19079_s4 + $0x238] sm:$0xff]  }
 0xa08   :  { %13608 = vmatprep.subr.bf16.mxu1 %v14878_v55  ;;  %v9361_v13 = vld [vmem:[#allocation2 + $0x1fa] sm:$0xff] }
 0xa0b   :  { %13609 = vmatpush3.bf16.msra.mxu1 %v14878_v55  ;;  %v9362_v55 = vld [vmem:[#allocation2 + $0x202] sm:$0xff] }
 0xa0c   :  { %13610 = vmatprep.subr.bf16.mxu1 %v14879_v41 }
 0xa0e   :  { %13547 = vmatmul.mubr.bf16.gmra.mrb[8].mxu1 %v17573_v20  ;;  %v8843_v20 = vld [vmem:[#allocation2 + $0x199] sm:$0xff] }
 0xa0f   :  { %13550 = vmatprep.mubr.bf16.mxu1 %v17580_v35  ;;  %13611 = vmatpush3.bf16.msra.mxu1 %v14879_v41  ;;  %v8844_v35 = vld [vmem:[#allocation2 + $0x1a1] sm:$0xff]  ;;  %v9363_v41 = vld [vmem:[#allocation2 + $0x212] sm:$0xff] }
 0xa10   :  { %13612 = vmatprep.subr.bf16.mxu1 %v14880_v48 }
 0xa13   :  { %13613 = vmatpush3.bf16.msra.mxu1 %v14880_v48  ;;  %v9364_v48 = vld [vmem:[#allocation2 + $0x21a] sm:$0xff] }
 0xa14   :  { %13614 = vmatprep.subr.bf16.mxu1 %v14881_v10 }
 0xa16   :  { %13551 = vmatmul.mubr.bf16.gmra.mrb[12].mxu1 %v17585_v14  ;;  %v8892_v14 = vpack.c.bf16 %v8844_v35, %v8843_v20  ;;  %v9365_v20 = vld [vmem:[#allocation2 + $0x22a] sm:$0xff]  ;;  %v9366_v35 = vld [vmem:[#allocation2 + $0x232] sm:$0xff] }
 0xa17   :  { %13554 = vmatprep.mubr.bf16.mxu1 %v17594_v40  ;;  %13615 = vmatpush3.bf16.msra.mxu1 %v14881_v10  ;;  %v19411_v40 = vld [vmem:[#allocation19_spill] sm:$0xff]  ;;  %v9408_v10 = vpack.c.bf16 %v9362_v55, %v9361_v13 }
 0xa18   :  { %13616 = vmatprep.subr.bf16.mxu1 %v14882_v9 }
 0xa1b   :  { %13617 = vmatpush3.bf16.msra.mxu1 %v14882_v9  ;;  %v9409_v9 = vpack.c.bf16 %v9364_v48, %v9363_v41 }
 0xa1e   :  { %13555 = vmatmul.mubr.bf16.gmra.mrb[16].mxu1 %v17597_v15  ;;  %v19412_v15 = vld [vmem:[#allocation8_spill] sm:$0xff] }
 0xa1f   :  { %13558 = vmatprep.mubr.bf16.mxu1 %v17601_v17  ;;  %v8875_v17 = vld [vmem:[#allocation2 + $0x349] sm:$0xff] }
 0xa26   :  { %13559 = vmatmul.mubr.bf16.gmra.mrb[20].mxu1 %v17603_v53  ;;  %v8876_v53 = vld [vmem:[#allocation2 + $0x351] sm:$0xff] }
 0xa27   :  { %13562 = vmatprep.mubr.bf16.mxu1 %v17607_v57  ;;  %v8908_v57 = vpack.c.bf16 %v8876_v53, %v8875_v17  ;;  %v9369_v17 = vld [vmem:[#allocation2 + $0x25a] sm:$0xff]  ;;  %v9370_v53 = vld [vmem:[#allocation2 + $0x262] sm:$0xff] }
 0xa2e   :  { %13563 = vmatmul.mubr.bf16.gmra.mrb[24].mxu1 %v17609_v31  ;;  %v9327_v31 = vld [vmem:[#allocation2 + $0x32] sm:$0xff] }
 0xa2f   :  { %13566 = vmatprep.mubr.bf16.mxu1 %v17613_v1  ;;  %v9328_v1 = vld [vmem:[#allocation2 + $0x3a] sm:$0xff] }
 0xa36   :  { %13567 = vmatmul.mubr.bf16.gmra.mrb[28].mxu1 %v8892_v14  ;;  %v9367_v14 = vld [vmem:[#allocation2 + $0x242] sm:$0xff] }
 0xa37   :  { %13570 = vmatprep.mubr.bf16.mxu1 %v17616_v39  ;;  %v9391_v39 = vpack.c.bf16 %v9328_v1, %v9327_v31  ;;  %v9372_v31 = vld [vmem:[#allocation2 + $0x27a] sm:$0xff]  ;;  %v9412_v1 = vpack.c.bf16 %v9370_v53, %v9369_v17 }
 0xa3e   :  { %13571 = vmatmul.mubr.bf16.gmra.mrb[32].mxu1 %v17618_v44  ;;  %v9329_v44 = vld [vmem:[#allocation2 + $0x4a] sm:$0xff] }
 0xa3f   :  { %13574 = vmatprep.mubr.bf16.mxu1 %v17622_v59  ;;  %v9330_v59 = vld [vmem:[#allocation2 + $0x52] sm:$0xff] }
 0xa46   :  { %13575 = vmatmul.mubr.bf16.gmra.mrb[36].mxu1 %v17624_v47  ;;  %v9331_v47 = vld [vmem:[#allocation2 + $0x62] sm:$0xff] }
 0xa47   :  { %13578 = vmatprep.mubr.bf16.mxu1 %v17628_v33  ;;  %v9332_v33 = vld [vmem:[#allocation2 + $0x6a] sm:$0xff] }
 0xa4e   :  { %13579 = vmatmul.mubr.bf16.gmra.mrb[40].mxu1 %v17630_v60  ;;  %v9392_v60 = vpack.c.bf16 %v9330_v59, %v9329_v44  ;;  %v9373_v44 = vld [vmem:[#allocation2 + $0x28a] sm:$0xff]  ;;  %v9374_v59 = vld [vmem:[#allocation2 + $0x292] sm:$0xff] }
 0xa4f   :  { %13582 = vmatprep.mubr.bf16.mxu1 %v17634_v62  ;;  %v9393_v62 = vpack.c.bf16 %v9332_v33, %v9331_v47  ;;  %v9375_v47 = vld [vmem:[#allocation2 + $0x2a2] sm:$0xff]  ;;  %v9376_v33 = vld [vmem:[#allocation2 + $0x2aa] sm:$0xff] }
 0xa56   :  { %13583 = vmatmul.mubr.bf16.gmra.mrb[44].mxu1 %v19411_v40  ;;  %v9410_v40 = vpack.c.bf16 %v9366_v35, %v9365_v20 }
 0xa57   :  { %13586 = vmatprep.mubr.bf16.mxu1 %v19412_v15 }
 0xa5e   :  { %13587 = vmatmul.mubr.bf16.gmra.mrb[48].mxu1 %v17642_v29  ;;  %v9335_v29 = vld [vmem:[#allocation2 + $0x92] sm:$0xff] }
 0xa5f   :  { %13590 = vmatprep.mubr.bf16.mxu1 %v17646_v50  ;;  %v9336_v50 = vld [vmem:[#allocation2 + $0x9a] sm:$0xff] }
 0xa66   :  { %13591 = vmatmul.mubr.bf16.gmra.mrb[52].mxu1 %v17648_v2 }
 0xa67   :  { %13594 = vmatprep.mubr.bf16.mxu1 %v17652_v58  ;;  %v9333_v58 = vld [vmem:[#allocation2 + $0x7a] sm:$0xff] }
 0xa6e   :  { %13595 = vmatmul.mubr.bf16.gmra.mrb[56].mxu1 %v17654_v26  ;;  %v9334_v26 = vld [vmem:[#allocation2 + $0x82] sm:$0xff] }
 0xa6f   :  { %13598 = vmatprep.mubr.bf16.mxu1 %v17658_v46  ;;  %v9394_v2 = vpack.c.bf16 %v9334_v26, %v9333_v58  ;;  %v9395_v46 = vpack.c.bf16 %v9336_v50, %v9335_v29  ;;  %v9377_v58 = vld [vmem:[#allocation2 + $0x2ba] sm:$0xff]  ;;  %v9378_v26 = vld [vmem:[#allocation2 + $0x2c2] sm:$0xff]  ;;  %v9379_v29 = vld [vmem:[#allocation2 + $0x2d2] sm:$0xff] }
 0xa70   :  { %v9380_v50 = vld [vmem:[#allocation2 + $0x2da] sm:$0xff] }
 0xa76   :  { %13599 = vmatmul.mubr.bf16.gmra.mrb[60].mxu1 %v8908_v57  ;;  %v9371_v57 = vld [vmem:[#allocation2 + $0x272] sm:$0xff] }
 0xa77   :  { %13618 = vmatprep.mubr.bf16.mxu1 %v9391_v39  ;;  %v9413_v39 = vpack.c.bf16 %v9372_v31, %v9371_v57 }
 0xa7e   :  { %13619 = vmatmul.mubr.bf16.vlgmr.msra.gmra.mrb[0].mxu1 %v9392_v60  ;;  %v9414_v60 = vpack.c.bf16 %v9374_v59, %v9373_v44 }
 0xa7f   :  { %13622 = vmatprep.mubr.bf16.mxu1 %v9393_v62  ;;  %v9415_v62 = vpack.c.bf16 %v9376_v33, %v9375_v47 }
 0xa86   :  { %13623 = vmatmul.mubr.bf16.gmra.mrb[4].mxu1 %v9394_v2  ;;  %v9416_v2 = vpack.c.bf16 %v9378_v26, %v9377_v58 }
 0xa87   :  { %13626 = vmatprep.mubr.bf16.mxu1 %v9395_v46  ;;  %v9417_v46 = vpack.c.bf16 %v9380_v50, %v9379_v29 }
 0xa8e   :  { %13627 = vmatmul.mubr.bf16.gmra.mrb[8].mxu1 %v9396_v3  ;;  %v9418_v3 = vpack.c.bf16 %v9382_v43, %v9381_v49 }
 0xa8f   :  { %13630 = vmatprep.mubr.bf16.mxu1 %v9397_v30  ;;  %v9419_v30 = vpack.c.bf16 %v9384_v7, %v9383_v18 }
 0xa96   :  { %13631 = vmatmul.mubr.bf16.gmra.mrb[12].mxu1 %v9398_v42  ;;  %v9390_v42 = vld [vmem:[#allocation2 + $0x352] sm:$0xff] }
 0xa97   :  { %13634 = vmatprep.mubr.bf16.mxu1 %v9399_v38  ;;  %v9422_v38 = vpack.c.bf16 %v9390_v42, %v9389_v34 }
 0xa9e   :  { %13635 = vmatmul.mubr.bf16.gmra.mrb[16].mxu1 %v9400_v11 }
 0xa9f   :  { %13638 = vmatprep.mubr.bf16.mxu1 %v9401_v21 }
 0xaa6   :  { %13639 = vmatmul.mubr.bf16.gmra.mrb[20].mxu1 %v9402_v4 }
 0xaa7   :  { %13642 = vmatprep.mubr.bf16.mxu1 %v9403_v37 }
 0xaae   :  { %13643 = vmatmul.mubr.bf16.gmra.mrb[24].mxu1 %v9404_v51 }
 0xaaf   :  { %13646 = vmatprep.mubr.bf16.mxu1 %v17701_v27  ;;  %v9368_v27 = vld [vmem:[#allocation2 + $0x24a] sm:$0xff] }
 0xab0   :  { %v9411_v15 = vpack.c.bf16 %v9368_v27, %v9367_v14 }
 0xab6   :  { %13647 = vmatmul.mubr.bf16.gmra.mrb[28].mxu1 %v9406_v28 }
 0xab7   :  { %13650 = vmatprep.mubr.bf16.mxu1 %v9407_v12 }
 0xabe   :  { %13651 = vmatmul.mubr.bf16.gmra.mrb[32].mxu1 %v9408_v10 }
 0xabf   :  { %13654 = vmatprep.mubr.bf16.mxu1 %v9409_v9 }
 0xac6   :  { %13655 = vmatmul.mubr.bf16.gmra.mrb[36].mxu1 %v9410_v40 }
 0xac7   :  { %13658 = vmatprep.mubr.bf16.mxu1 %v9411_v15 }
 0xace   :  { %13659 = vmatmul.mubr.bf16.gmra.mrb[40].mxu1 %v9412_v1 }
 0xacf   :  { %13662 = vmatprep.mubr.bf16.mxu1 %v9413_v39 }
 0xad6   :  { %13663 = vmatmul.mubr.bf16.gmra.mrb[44].mxu1 %v9414_v60 }
 0xad7   :  { %13666 = vmatprep.mubr.bf16.mxu1 %v9415_v62 }
 0xade   :  { %13667 = vmatmul.mubr.bf16.gmra.mrb[48].mxu1 %v9416_v2 }
 0xadf   :  { %13670 = vmatprep.mubr.bf16.mxu1 %v9417_v46 }
 0xae6   :  { %13671 = vmatmul.mubr.bf16.gmra.mrb[52].mxu1 %v9418_v3 }
 0xae7   :  { %13674 = vmatprep.mubr.bf16.mxu1 %v9419_v30 }
 0xaee   :  { %13675 = vmatmul.mubr.bf16.gmra.mrb[56].mxu1 %v9420_v54 }
 0xaef   :  { %13678 = vmatprep.mubr.bf16.mxu1 %v17719_v8 }
 0xaf6   :  { %13679 = vmatmul.mubr.bf16.gmra.mrb[60].mxu1 %v9422_v38 }
 0xb51   :  { %v17805_v6 = vpop.f32.mrb[0].mxu1 }
 0xb52   :  { %v17807_v19 = vpop.f32.mrb[1].mxu1 }
 0xb53   :  { %v17809_v24 = vpop.f32.mrb[2].mxu1 }
 0xb54   :  { %v17811_v45 = vpop.f32.mrb[3].mxu1 }
 0xb55   :  { %v9841_v11 = vadd.f32 %v17811_v45, %v17807_v19 }
 0xb57   :  { %v9842_v21 = vadd.f32 %v17805_v6, %v9841_v11 }
 0xb59   :  { %v17816_v23 = vpop.f32.mrb[4].mxu1  ;;  %v9843_v8 = vadd.f32 %v17809_v24, %v9842_v21 }
 0xb5a   :  { %v17819_v22 = vpop.f32.mrb[5].mxu1 }
 0xb5b   :  { %v9844_v36 = vadd.f32 %v9843_v8, %v17819_v22  ;;  %v17822_v5 = vpop.f32.mrb[6].mxu1 }
 0xb5c   :  { %v17824_v4 = vpop.f32.mrb[7].mxu1 }
 0xb5d   :  { %v9845_v37 = vadd.f32 %v9844_v36, %v17824_v4 }
 0xb5f   :  { %v9846_v52 = vadd.f32 %v17816_v23, %v9845_v37 }
 0xb61   :  { %v17828_v61 = vpop.f32.mrb[8].mxu1  ;;  %v9847_v51 = vadd.f32 %v17822_v5, %v9846_v52 }
 0xb62   :  { %v17831_v63 = vpop.f32.mrb[9].mxu1 }
 0xb63   :  { %v9848_v25 = vadd.f32 %v9847_v51, %v17831_v63  ;;  %v17834_v28 = vpop.f32.mrb[10].mxu1 }
 0xb64   :  { %v17836_v56 = vpop.f32.mrb[11].mxu1 }
 0xb65   :  { %v9849_v16 = vadd.f32 %v9848_v25, %v17836_v56 }
 0xb67   :  { %v9850_v12 = vadd.f32 %v17828_v61, %v9849_v16 }
 0xb69   :  { %v17840_v13 = vpop.f32.mrb[12].mxu1  ;;  %v9851_v55 = vadd.f32 %v17834_v28, %v9850_v12 }
 0xb6a   :  { %v17843_v41 = vpop.f32.mrb[13].mxu1 }
 0xb6b   :  { %v9852_v48 = vadd.f32 %v9851_v55, %v17843_v41  ;;  %v17846_v10 = vpop.f32.mrb[14].mxu1 }
 0xb6c   :  { %v17848_v9 = vpop.f32.mrb[15].mxu1 }
 0xb6d   :  { %v9853_v20 = vadd.f32 %v9852_v48, %v17848_v9 }
 0xb6f   :  { %v9854_v35 = vadd.f32 %v17840_v13, %v9853_v20 }
 0xb71   :  { %v17852_v14 = vpop.f32.mrb[16].mxu1  ;;  %v9855_v27 = vadd.f32 %v17846_v10, %v9854_v35 }
 0xb72   :  { %v17855_v40 = vpop.f32.mrb[17].mxu1 }
 0xb73   :  { %v9856_v15 = vadd.f32 %v9855_v27, %v17855_v40  ;;  %v17858_v17 = vpop.f32.mrb[18].mxu1 }
 0xb74   :  { %v17860_v53 = vpop.f32.mrb[19].mxu1 }
 0xb75   :  { %v9857_v57 = vadd.f32 %v9856_v15, %v17860_v53 }
 0xb77   :  { %v9858_v31 = vadd.f32 %v17852_v14, %v9857_v57 }
 0xb79   :  { %v17864_v1 = vpop.f32.mrb[20].mxu1  ;;  %v9859_v39 = vadd.f32 %v17858_v17, %v9858_v31 }
 0xb7a   :  { %v17867_v44 = vpop.f32.mrb[21].mxu1 }
 0xb7b   :  { %v9860_v59 = vadd.f32 %v9859_v39, %v17867_v44  ;;  %v17870_v47 = vpop.f32.mrb[22].mxu1 }
 0xb7c   :  { %v17872_v33 = vpop.f32.mrb[23].mxu1 }
 0xb7d   :  { %v9861_v60 = vadd.f32 %v9860_v59, %v17872_v33 }
 0xb7f   :  { %v9862_v62 = vadd.f32 %v17864_v1, %v9861_v60 }
 0xb81   :  { %v17876_v58 = vpop.f32.mrb[24].mxu1  ;;  %v9863_v26 = vadd.f32 %v17870_v47, %v9862_v62 }
 0xb82   :  { %v17879_v29 = vpop.f32.mrb[25].mxu1 }
 0xb83   :  { %v9864_v50 = vadd.f32 %v9863_v26, %v17879_v29  ;;  %v17882_v2 = vpop.f32.mrb[26].mxu1 }
 0xb84   :  { %v17884_v46 = vpop.f32.mrb[27].mxu1 }
 0xb85   :  { %v9865_v49 = vadd.f32 %v9864_v50, %v17884_v46 }
 0xb87   :  { %v9866_v43 = vadd.f32 %v17876_v58, %v9865_v49 }
 0xb89   :  { %v17888_v18 = vpop.f32.mrb[28].mxu1  ;;  %v9867_v7 = vadd.f32 %v17882_v2, %v9866_v43 }
 0xb8a   :  { %v17891_v3 = vpop.f32.mrb[29].mxu1 }
 0xb8b   :  { %v9868_v30 = vadd.f32 %v9867_v7, %v17891_v3  ;;  %v17894_v32 = vpop.f32.mrb[30].mxu1 }
 0xb8c   :  { %v17896_v0 = vpop.f32.mrb[31].mxu1 }
 0xb8d   :  { %v9869_v54 = vadd.f32 %v9868_v30, %v17896_v0 }
 0xb8f   :  { %v9870_v34 = vadd.f32 %v17888_v18, %v9869_v54 }
 0xb91   :  { %v17900_v42 = vpop.f32.mrb[32].mxu1  ;;  %v9871_v38 = vadd.f32 %v17894_v32, %v9870_v34 }
 0xb92   :  { %v17903_v11 = vpop.f32.mrb[33].mxu1 }
 0xb93   :  { %v9872_v21 = vadd.f32 %v9871_v38, %v17903_v11  ;;  %v17906_v8 = vpop.f32.mrb[34].mxu1 }
 0xb94   :  { %v17908_v36 = vpop.f32.mrb[35].mxu1 }
 0xb95   :  { %v9873_v37 = vadd.f32 %v9872_v21, %v17908_v36 }
 0xb97   :  { %v9874_v52 = vadd.f32 %v17900_v42, %v9873_v37 }
 0xb99   :  { %v17912_v51 = vpop.f32.mrb[36].mxu1  ;;  %v9875_v25 = vadd.f32 %v17906_v8, %v9874_v52 }
 0xb9a   :  { %v17915_v16 = vpop.f32.mrb[37].mxu1 }
 0xb9b   :  { %v9876_v12 = vadd.f32 %v9875_v25, %v17915_v16  ;;  %v17918_v55 = vpop.f32.mrb[38].mxu1 }
 0xb9c   :  { %v17920_v48 = vpop.f32.mrb[39].mxu1 }
 0xb9d   :  { %v9877_v20 = vadd.f32 %v9876_v12, %v17920_v48 }
 0xb9f   :  { %v9878_v35 = vadd.f32 %v17912_v51, %v9877_v20 }
 0xba1   :  { %v17924_v27 = vpop.f32.mrb[40].mxu1  ;;  %v9879_v15 = vadd.f32 %v17918_v55, %v9878_v35 }
 0xba2   :  { %v17927_v57 = vpop.f32.mrb[41].mxu1 }
 0xba3   :  { %v9880_v31 = vadd.f32 %v9879_v15, %v17927_v57  ;;  %v17930_v39 = vpop.f32.mrb[42].mxu1 }
 0xba4   :  { %v17932_v59 = vpop.f32.mrb[43].mxu1 }
 0xba5   :  { %v9881_v60 = vadd.f32 %v9880_v31, %v17932_v59 }
 0xba7   :  { %v9882_v62 = vadd.f32 %v17924_v27, %v9881_v60 }
 0xba9   :  { %v17936_v26 = vpop.f32.mrb[44].mxu1  ;;  %v9883_v50 = vadd.f32 %v17930_v39, %v9882_v62 }
 0xbaa   :  { %v17939_v49 = vpop.f32.mrb[45].mxu1 }
 0xbab   :  { %v9884_v43 = vadd.f32 %v9883_v50, %v17939_v49  ;;  %v17942_v7 = vpop.f32.mrb[46].mxu1 }
 0xbac   :  { %v17944_v30 = vpop.f32.mrb[47].mxu1 }
 0xbad   :  { %v9885_v54 = vadd.f32 %v9884_v43, %v17944_v30 }
 0xbaf   :  { %v9886_v34 = vadd.f32 %v17936_v26, %v9885_v54 }
 0xbb1   :  { %v17948_v38 = vpop.f32.mrb[48].mxu1  ;;  %v9887_v21 = vadd.f32 %v17942_v7, %v9886_v34 }
 0xbb2   :  { %19413 = vst [vmem:[#allocation10_spill] sm:$0xff] %v17948_v38  ;;  %v17951_v37 = vpop.f32.mrb[49].mxu1 }
 0xbb3   :  { %19414 = vst [vmem:[#allocation7_spill] sm:$0xff] %v17951_v37  ;;  %v9888_v52 = vadd.f32 %v9887_v21, %v17951_v37  ;;  %v17954_v25 = vpop.f32.mrb[50].mxu1 }
 0xbb4   :  { %19415 = vst [vmem:[#allocation9_spill] sm:$0xff] %v17954_v25  ;;  %v17956_v12 = vpop.f32.mrb[51].mxu1 }
 0xbb5   :  { %19416 = vst [vmem:[#allocation12_spill] sm:$0xff] %v17956_v12  ;;  %v9889_v20 = vadd.f32 %v9888_v52, %v17956_v12 }
 0xbb7   :  { %v9890_v35 = vadd.f32 %v17948_v38, %v9889_v20 }
 0xbb9   :  { %v17960_v15 = vpop.f32.mrb[52].mxu1  ;;  %v9891_v31 = vadd.f32 %v17954_v25, %v9890_v35 }
 0xbba   :  { %19417 = vst [vmem:[#allocation14_spill] sm:$0xff] %v17960_v15  ;;  %v17963_v60 = vpop.f32.mrb[53].mxu1 }
 0xbbb   :  { %19418 = vst [vmem:[#allocation11_spill] sm:$0xff] %v17963_v60  ;;  %v9892_v62 = vadd.f32 %v9891_v31, %v17963_v60  ;;  %v17966_v50 = vpop.f32.mrb[54].mxu1 }
 0xbbc   :  { %19419 = vst [vmem:[#allocation13_spill] sm:$0xff] %v17966_v50  ;;  %v17968_v43 = vpop.f32.mrb[55].mxu1 }
 0xbbd   :  { %19420 = vst [vmem:[#allocation15_spill] sm:$0xff] %v17968_v43  ;;  %v9893_v54 = vadd.f32 %v9892_v62, %v17968_v43 }
 0xbbf   :  { %v9894_v34 = vadd.f32 %v17960_v15, %v9893_v54 }
 0xbc1   :  { %v17972_v21 = vpop.f32.mrb[56].mxu1  ;;  %v9895_v52 = vadd.f32 %v17966_v50, %v9894_v34 }
 0xbc2   :  { %19421 = vst [vmem:[#allocation23_spill] sm:$0xff] %v17972_v21  ;;  %v17975_v20 = vpop.f32.mrb[57].mxu1 }
 0xbc3   :  { %19422 = vst [vmem:[#allocation25_spill] sm:$0xff] %v17975_v20  ;;  %v9896_v35 = vadd.f32 %v9895_v52, %v17975_v20  ;;  %v17978_v25 = vpop.f32.mrb[58].mxu1 }
 0xbc4   :  { %19423 = vst [vmem:[#allocation5_spill] sm:$0xff] %v17978_v25  ;;  %v17980_v38 = vpop.f32.mrb[59].mxu1 }
 0xbc5   :  { %19424 = vst [vmem:[#allocation20_spill] sm:$0xff] %v17980_v38  ;;  %v9897_v31 = vadd.f32 %v9896_v35, %v17980_v38 }
 0xbc7   :  { %v9898_v60 = vadd.f32 %v17972_v21, %v9897_v31 }
 0xbc9   :  { %v17984_v12 = vpop.f32.mrb[60].mxu1  ;;  %v9899_v62 = vadd.f32 %v17978_v25, %v9898_v60 }
 0xbca   :  { %v17987_v54 = vpop.f32.mrb[61].mxu1 }
 0xbcb   :  { %19425 = vst [vmem:[#allocation21_spill] sm:$0xff] %v17987_v54  ;;  %v9900_v34 = vadd.f32 %v9899_v62, %v17987_v54  ;;  %v17990_v50 = vpop.f32.mrb[62].mxu1 }
 0xbcc   :  { %v17992_v15 = vpop.f32.mrb[63].mxu1 }
 0xbcd   :  { %v9901_v52 = vadd.f32 %v9900_v34, %v17992_v15 }
 0xbcf   :  { %v9902_v20 = vadd.f32 %v17984_v12, %v9901_v52  ;;  %v19439_v52 = vld [vmem:[#allocation9_spill] sm:$0xff] }
 0xbd1   :  { %v9903_v35 = vadd.f32 %v17990_v50, %v9902_v20  ;;  %v19437_v20 = vld [vmem:[#allocation10_spill] sm:$0xff] }
 0xbd3   :  { %v9904_v38 = vrot.slane %v9903_v35, 4 }
 0xbd5   :  { %v9905_v31 = vadd.f32 %v9904_v38, %v9903_v35  ;;  %v19441_v35 = vld [vmem:[#allocation11_spill] sm:$0xff] }
 0xbd7   :  { %v9906_v21 = vrot.slane %v9905_v31, 2 }
 0xbd9   :  { %v9907_v43 = vadd.f32 %v9906_v21, %v9905_v31  ;;  %v19435_v21 = vld [vmem:[#allocation12_spill] sm:$0xff]  ;;  %v19443_v31 = vld [vmem:[#allocation15_spill] sm:$0xff] }
 0xbdb   :  { %v9908_v37 = vrot.slane %v9907_v43, 1 }
 0xbdd   :  { %v9909_v60 = vadd.f32 %v9908_v37, %v9907_v43  ;;  %v19433_v43 = vld [vmem:[#allocation7_spill] sm:$0xff] }
 0xbdf   :  { %v17997_v25 = vmul.f32 0.001953125, %v9909_v60 }
 0xbe1   :  { %v18001_v62 = vsub.f32 %v17807_v19, %v17997_v25  ;;  %v18005_v54 = vsub.f32 %v17811_v45, %v17997_v25  ;;  %v18009_v34 = vsub.f32 %v17805_v6, %v17997_v25  ;;  %v18013_v38 = vsub.f32 %v17809_v24, %v17997_v25 }
 0xbe2   :  { %v18017_v37 = vsub.f32 %v17819_v22, %v17997_v25  ;;  %v18021_v19 = vsub.f32 %v17824_v4, %v17997_v25  ;;  %v18025_v45 = vsub.f32 %v17816_v23, %v17997_v25  ;;  %v18029_v6 = vsub.f32 %v17822_v5, %v17997_v25 }
 0xbe3   :  { %19426 = vst [vmem:[#allocation22_spill] sm:$0xff] %v18001_v62  ;;  %19427 = vst [vmem:[#allocation4_spill] sm:$0xff] %v18005_v54  ;;  %v18033_v24 = vsub.f32 %v17831_v63, %v17997_v25  ;;  %v18037_v22 = vsub.f32 %v17836_v56, %v17997_v25  ;;  %v18041_v4 = vsub.f32 %v17828_v61, %v17997_v25 }
 0xbe4   :  { %19428 = vst [vmem:[#allocation6_spill] sm:$0xff] %v18009_v34  ;;  %v18045_v23 = vsub.f32 %v17834_v28, %v17997_v25  ;;  %v18049_v5 = vsub.f32 %v17843_v41, %v17997_v25  ;;  %v18053_v63 = vsub.f32 %v17848_v9, %v17997_v25  ;;  %v18057_v56 = vsub.f32 %v17840_v13, %v17997_v25 }
 0xbe5   :  { %v18061_v61 = vsub.f32 %v17846_v10, %v17997_v25  ;;  %v18065_v28 = vsub.f32 %v17855_v40, %v17997_v25  ;;  %v18069_v41 = vsub.f32 %v17860_v53, %v17997_v25  ;;  %v18073_v9 = vsub.f32 %v17852_v14, %v17997_v25 }
 0xbe6   :  { %v18077_v13 = vsub.f32 %v17858_v17, %v17997_v25  ;;  %v18081_v10 = vsub.f32 %v17867_v44, %v17997_v25  ;;  %v18085_v40 = vsub.f32 %v17872_v33, %v17997_v25  ;;  %v18089_v53 = vsub.f32 %v17864_v1, %v17997_v25 }
 0xbe7   :  { %v18093_v14 = vsub.f32 %v17870_v47, %v17997_v25  ;;  %v18097_v17 = vsub.f32 %v17879_v29, %v17997_v25  ;;  %v18101_v44 = vsub.f32 %v17884_v46, %v17997_v25  ;;  %v18105_v33 = vsub.f32 %v17876_v58, %v17997_v25 }
 0xbe8   :  { %v18109_v1 = vsub.f32 %v17882_v2, %v17997_v25  ;;  %v18113_v47 = vsub.f32 %v17891_v3, %v17997_v25  ;;  %v18117_v29 = vsub.f32 %v17896_v0, %v17997_v25  ;;  %v18121_v46 = vsub.f32 %v17888_v18, %v17997_v25 }
 0xbe9   :  { %v18125_v58 = vsub.f32 %v17894_v32, %v17997_v25  ;;  %v18129_v2 = vsub.f32 %v17903_v11, %v17997_v25  ;;  %v18133_v3 = vsub.f32 %v17908_v36, %v17997_v25  ;;  %v18137_v0 = vsub.f32 %v17900_v42, %v17997_v25 }
 0xbea   :  { %v18141_v18 = vsub.f32 %v17906_v8, %v17997_v25  ;;  %v18145_v32 = vsub.f32 %v17915_v16, %v17997_v25  ;;  %v18149_v11 = vsub.f32 %v17920_v48, %v17997_v25  ;;  %v18153_v36 = vsub.f32 %v17912_v51, %v17997_v25 }
 0xbeb   :  { %v18157_v42 = vsub.f32 %v17918_v55, %v17997_v25  ;;  %v18161_v8 = vsub.f32 %v17927_v57, %v17997_v25  ;;  %v18165_v16 = vsub.f32 %v17932_v59, %v17997_v25  ;;  %v18169_v48 = vsub.f32 %v17924_v27, %v17997_v25 }
 0xbec   :  { %v18173_v51 = vsub.f32 %v17930_v39, %v17997_v25  ;;  %v18177_v55 = vsub.f32 %v17939_v49, %v17997_v25  ;;  %v18181_v57 = vsub.f32 %v17944_v30, %v17997_v25  ;;  %v18185_v59 = vsub.f32 %v17936_v26, %v17997_v25 }
 0xbed   :  { %v18189_v27 = vsub.f32 %v17942_v7, %v17997_v25  ;;  %v18193_v39 = vsub.f32 %v19433_v43, %v17997_v25  ;;  %v18197_v49 = vsub.f32 %v19435_v21, %v17997_v25  ;;  %v18201_v30 = vsub.f32 %v19437_v20, %v17997_v25  ;;  %v19445_v43 = vld [vmem:[#allocation14_spill] sm:$0xff] }
 0xbee   :  { %19429 = vst [vmem:[#allocation24_spill] sm:$0xff] %v18177_v55  ;;  %19430 = vst [vmem:[#allocation16_spill] sm:$0xff] %v18181_v57  ;;  %v18205_v26 = vsub.f32 %v19439_v52, %v17997_v25  ;;  %v18209_v7 = vsub.f32 %v19441_v35, %v17997_v25  ;;  %v18213_v60 = vsub.f32 %v19443_v31, %v17997_v25 }
 0xbef   :  { %19431 = vst [vmem:[#allocation17_spill] sm:$0xff] %v18185_v59  ;;  %19432 = vst [vmem:[#allocation18_spill] sm:$0xff] %v18189_v27  ;;  %v18217_v21 = vsub.f32 %v19445_v43, %v17997_v25 }
 0xbf0   :  { %19434 = vst [vmem:[#allocation19_spill] sm:$0xff] %v18193_v39  ;;  %19436 = vst [vmem:[#allocation8_spill] sm:$0xff] %v18197_v49  ;;  %v19447_v49 = vld [vmem:[#allocation13_spill] sm:$0xff] }
 0xbf1   :  { %19438 = vst [vmem:[#allocation7_spill] sm:$0xff] %v18201_v30  ;;  %19440 = vst [vmem:[#allocation12_spill] sm:$0xff] %v18205_v26  ;;  %v18221_v20 = vsub.f32 %v19447_v49, %v17997_v25  ;;  %v19449_v30 = vld [vmem:[#allocation25_spill] sm:$0xff]  ;;  %v19451_v26 = vld [vmem:[#allocation20_spill] sm:$0xff] }
 0xbf2   :  { %19442 = vst [vmem:[#allocation10_spill] sm:$0xff] %v18209_v7  ;;  %19444 = vst [vmem:[#allocation9_spill] sm:$0xff] %v18213_v60  ;;  %v18225_v52 = vsub.f32 %v19449_v30, %v17997_v25  ;;  %v18229_v35 = vsub.f32 %v19451_v26, %v17997_v25  ;;  %v19453_v7 = vld [vmem:[#allocation23_spill] sm:$0xff]  ;;  %v19455_v60 = vld [vmem:[#allocation5_spill] sm:$0xff]  ;;  %v18245_v30 = vsub.f32 %v17992_v15, %v17997_v25 }
 0xbf3   :  { %19446 = vst [vmem:[#allocation11_spill] sm:$0xff] %v18217_v21  ;;  %19448 = vst [vmem:[#allocation15_spill] sm:$0xff] %v18221_v20  ;;  %v18233_v31 = vsub.f32 %v19453_v7, %v17997_v25  ;;  %v18237_v43 = vsub.f32 %v19455_v60, %v17997_v25  ;;  %v19457_v21 = vld [vmem:[#allocation21_spill] sm:$0xff]  ;;  %v18249_v26 = vsub.f32 %v17984_v12, %v17997_v25 }
 0xbf4   :  { %19450 = vst [vmem:[#allocation14_spill] sm:$0xff] %v18225_v52  ;;  %19452 = vst [vmem:[#allocation13_spill] sm:$0xff] %v18229_v35  ;;  %v18241_v49 = vsub.f32 %v19457_v21, %v17997_v25  ;;  %v18253_v7 = vsub.f32 %v17990_v50, %v17997_v25  ;;  %v9975_v60 = vmul.f32 %v18001_v62, %v18001_v62 }
 0xbf5   :  { %19454 = vst [vmem:[#allocation25_spill] sm:$0xff] %v18233_v31  ;;  %19456 = vst [vmem:[#allocation20_spill] sm:$0xff] %v18237_v43  ;;  %v9976_v43 = vmul.f32 %v18005_v54, %v18005_v54  ;;  %v9977_v21 = vmul.f32 %v18009_v34, %v18009_v34  ;;  %v9978_v15 = vmul.f32 %v18013_v38, %v18013_v38 }
 0xbf6   :  { %19458 = vst [vmem:[#allocation23_spill] sm:$0xff] %v18241_v49  ;;  %19459 = vst [vmem:[#allocation5_spill] sm:$0xff] %v18245_v30  ;;  %v9979_v12 = vmul.f32 %v18017_v37, %v18017_v37  ;;  %v9980_v25 = vmul.f32 %v18021_v19, %v18021_v19  ;;  %v9981_v62 = vmul.f32 %v18025_v45, %v18025_v45 }
 0xbf7   :  { %19460 = vst [vmem:[#allocation21_spill] sm:$0xff] %v18249_v26  ;;  %19461 = vst [vmem:[#allocation26_spill] sm:$0xff] %v18253_v7  ;;  %v10039_v49 = vadd.f32 %v9976_v43, %v9975_v60  ;;  %v9982_v34 = vmul.f32 %v18029_v6, %v18029_v6  ;;  %v9983_v60 = vmul.f32 %v18033_v24, %v18033_v24 }
 0xbf9   :  { %v10040_v30 = vadd.f32 %v10039_v49, %v9977_v21  ;;  %v9984_v21 = vmul.f32 %v18037_v22, %v18037_v22 }
 0xbfb   :  { %v10041_v26 = vadd.f32 %v10040_v30, %v9978_v15  ;;  %v9985_v15 = vmul.f32 %v18041_v4, %v18041_v4 }
 0xbfd   :  { %v10042_v50 = vadd.f32 %v10041_v26, %v9979_v12  ;;  %v9986_v12 = vmul.f32 %v18045_v23, %v18045_v23 }
 0xbff   :  { %v10043_v54 = vadd.f32 %v10042_v50, %v9980_v25  ;;  %v9987_v50 = vmul.f32 %v18049_v5, %v18049_v5 }
 0xc01   :  { %v10044_v43 = vadd.f32 %v10043_v54, %v9981_v62  ;;  %v9988_v62 = vmul.f32 %v18053_v63, %v18053_v63 }
 0xc03   :  { %v10045_v49 = vadd.f32 %v10044_v43, %v9982_v34  ;;  %v9989_v43 = vmul.f32 %v18057_v56, %v18057_v56 }
 0xc05   :  { %v10046_v30 = vadd.f32 %v10045_v49, %v9983_v60  ;;  %v9990_v49 = vmul.f32 %v18061_v61, %v18061_v61 }
 0xc07   :  { %v10047_v26 = vadd.f32 %v10046_v30, %v9984_v21  ;;  %v9991_v30 = vmul.f32 %v18065_v28, %v18065_v28 }
 0xc09   :  { %v10048_v25 = vadd.f32 %v10047_v26, %v9985_v15  ;;  %v9992_v26 = vmul.f32 %v18069_v41, %v18069_v41 }
 0xc0b   :  { %v10049_v54 = vadd.f32 %v10048_v25, %v9986_v12  ;;  %v9993_v25 = vmul.f32 %v18073_v9, %v18073_v9 }
 0xc0d   :  { %v10050_v34 = vadd.f32 %v10049_v54, %v9987_v50  ;;  %v9994_v54 = vmul.f32 %v18077_v13, %v18077_v13 }
 0xc0f   :  { %v10051_v60 = vadd.f32 %v10050_v34, %v9988_v62  ;;  %v9995_v34 = vmul.f32 %v18081_v10, %v18081_v10 }
 0xc11   :  { %v10052_v21 = vadd.f32 %v10051_v60, %v9989_v43  ;;  %v9996_v60 = vmul.f32 %v18085_v40, %v18085_v40 }
 0xc13   :  { %v10053_v15 = vadd.f32 %v10052_v21, %v9990_v49  ;;  %v9997_v21 = vmul.f32 %v18089_v53, %v18089_v53 }
 0xc15   :  { %v10054_v12 = vadd.f32 %v10053_v15, %v9991_v30  ;;  %v9998_v15 = vmul.f32 %v18093_v14, %v18093_v14 }
 0xc17   :  { %v10055_v50 = vadd.f32 %v10054_v12, %v9992_v26  ;;  %v9999_v12 = vmul.f32 %v18097_v17, %v18097_v17 }
 0xc19   :  { %v10056_v62 = vadd.f32 %v10055_v50, %v9993_v25  ;;  %v10000_v50 = vmul.f32 %v18101_v44, %v18101_v44 }
 0xc1b   :  { %v10057_v43 = vadd.f32 %v10056_v62, %v9994_v54  ;;  %v10001_v62 = vmul.f32 %v18105_v33, %v18105_v33 }
 0xc1d   :  { %v10058_v49 = vadd.f32 %v10057_v43, %v9995_v34  ;;  %v10002_v43 = vmul.f32 %v18109_v1, %v18109_v1 }
 0xc1f   :  { %v10059_v30 = vadd.f32 %v10058_v49, %v9996_v60  ;;  %v10003_v49 = vmul.f32 %v18113_v47, %v18113_v47 }
 0xc21   :  { %v10060_v26 = vadd.f32 %v10059_v30, %v9997_v21  ;;  %v10004_v30 = vmul.f32 %v18117_v29, %v18117_v29 }
 0xc23   :  { %v10061_v25 = vadd.f32 %v10060_v26, %v9998_v15  ;;  %v10005_v26 = vmul.f32 %v18121_v46, %v18121_v46 }
 0xc25   :  { %v10062_v54 = vadd.f32 %v10061_v25, %v9999_v12  ;;  %v10006_v25 = vmul.f32 %v18125_v58, %v18125_v58 }
 0xc27   :  { %v10063_v34 = vadd.f32 %v10062_v54, %v10000_v50  ;;  %v10007_v54 = vmul.f32 %v18129_v2, %v18129_v2 }
 0xc29   :  { %v10064_v60 = vadd.f32 %v10063_v34, %v10001_v62  ;;  %v10008_v34 = vmul.f32 %v18133_v3, %v18133_v3 }
 0xc2b   :  { %v10065_v21 = vadd.f32 %v10064_v60, %v10002_v43  ;;  %v10009_v60 = vmul.f32 %v18137_v0, %v18137_v0 }
 0xc2d   :  { %v10066_v15 = vadd.f32 %v10065_v21, %v10003_v49  ;;  %v10010_v21 = vmul.f32 %v18141_v18, %v18141_v18 }
 0xc2f   :  { %v10067_v12 = vadd.f32 %v10066_v15, %v10004_v30  ;;  %v10011_v15 = vmul.f32 %v18145_v32, %v18145_v32 }
 0xc31   :  { %v10068_v50 = vadd.f32 %v10067_v12, %v10005_v26  ;;  %v10012_v12 = vmul.f32 %v18149_v11, %v18149_v11 }
 0xc33   :  { %v10069_v62 = vadd.f32 %v10068_v50, %v10006_v25  ;;  %v10013_v50 = vmul.f32 %v18153_v36, %v18153_v36 }
 0xc35   :  { %v10070_v43 = vadd.f32 %v10069_v62, %v10007_v54  ;;  %v10014_v62 = vmul.f32 %v18157_v42, %v18157_v42 }
 0xc37   :  { %v10071_v49 = vadd.f32 %v10070_v43, %v10008_v34  ;;  %v10015_v43 = vmul.f32 %v18161_v8, %v18161_v8 }
 0xc39   :  { %v10072_v30 = vadd.f32 %v10071_v49, %v10009_v60  ;;  %v10016_v49 = vmul.f32 %v18165_v16, %v18165_v16 }
 0xc3b   :  { %v10073_v26 = vadd.f32 %v10072_v30, %v10010_v21  ;;  %v10017_v30 = vmul.f32 %v18169_v48, %v18169_v48 }
 0xc3d   :  { %v10074_v25 = vadd.f32 %v10073_v26, %v10011_v15  ;;  %v10018_v26 = vmul.f32 %v18173_v51, %v18173_v51 }
 0xc3f   :  { %v10075_v54 = vadd.f32 %v10074_v25, %v10012_v12  ;;  %v10019_v25 = vmul.f32 %v18177_v55, %v18177_v55 }
 0xc41   :  { %v10076_v34 = vadd.f32 %v10075_v54, %v10013_v50  ;;  %v10020_v54 = vmul.f32 %v18181_v57, %v18181_v57 }
 0xc43   :  { %v10077_v60 = vadd.f32 %v10076_v34, %v10014_v62  ;;  %v10021_v34 = vmul.f32 %v18185_v59, %v18185_v59 }
 0xc45   :  { %v10078_v21 = vadd.f32 %v10077_v60, %v10015_v43  ;;  %v10022_v60 = vmul.f32 %v18189_v27, %v18189_v27 }
 0xc47   :  { %v10079_v15 = vadd.f32 %v10078_v21, %v10016_v49  ;;  %v10023_v21 = vmul.f32 %v18193_v39, %v18193_v39 }
 0xc49   :  { %v10080_v12 = vadd.f32 %v10079_v15, %v10017_v30  ;;  %v19462_v15 = vld [vmem:[#allocation8_spill] sm:$0xff] }
 0xc4a   :  { %v10024_v55 = vmul.f32 %v19462_v15, %v19462_v15 }
 0xc4b   :  { %v10081_v50 = vadd.f32 %v10080_v12, %v10018_v26  ;;  %v19463_v12 = vld [vmem:[#allocation7_spill] sm:$0xff] }
 0xc4c   :  { %v10025_v57 = vmul.f32 %v19463_v12, %v19463_v12 }
 0xc4d   :  { %v10082_v62 = vadd.f32 %v10081_v50, %v10019_v25  ;;  %v19464_v50 = vld [vmem:[#allocation12_spill] sm:$0xff] }
 0xc4e   :  { %v10026_v59 = vmul.f32 %v19464_v50, %v19464_v50 }
 0xc4f   :  { %v10083_v43 = vadd.f32 %v10082_v62, %v10020_v54  ;;  %v19465_v62 = vld [vmem:[#allocation10_spill] sm:$0xff] }
 0xc50   :  { %v10027_v27 = vmul.f32 %v19465_v62, %v19465_v62 }
 0xc51   :  { %v10084_v49 = vadd.f32 %v10083_v43, %v10021_v34  ;;  %v19466_v43 = vld [vmem:[#allocation9_spill] sm:$0xff] }
 0xc52   :  { %v10028_v39 = vmul.f32 %v19466_v43, %v19466_v43 }
 0xc53   :  { %v10085_v30 = vadd.f32 %v10084_v49, %v10022_v60  ;;  %v19467_v49 = vld [vmem:[#allocation11_spill] sm:$0xff] }
 0xc54   :  { %v10029_v15 = vmul.f32 %v19467_v49, %v19467_v49 }
 0xc55   :  { %v10086_v26 = vadd.f32 %v10085_v30, %v10023_v21  ;;  %v10030_v30 = vmul.f32 %v18221_v20, %v18221_v20 }
 0xc57   :  { %v10087_v25 = vadd.f32 %v10086_v26, %v10024_v55  ;;  %v10031_v26 = vmul.f32 %v18225_v52, %v18225_v52 }
 0xc59   :  { %v10088_v54 = vadd.f32 %v10087_v25, %v10025_v57  ;;  %v10032_v25 = vmul.f32 %v18229_v35, %v18229_v35 }
 0xc5b   :  { %v10089_v34 = vadd.f32 %v10088_v54, %v10026_v59  ;;  %v10033_v54 = vmul.f32 %v18233_v31, %v18233_v31 }
 0xc5d   :  { %v10090_v60 = vadd.f32 %v10089_v34, %v10027_v27  ;;  %v19468_v34 = vld [vmem:[#allocation20_spill] sm:$0xff] }
 0xc5e   :  { %v10034_v49 = vmul.f32 %v19468_v34, %v19468_v34 }
 0xc5f   :  { %v10091_v21 = vadd.f32 %v10090_v60, %v10028_v39  ;;  %v19469_v60 = vld [vmem:[#allocation23_spill] sm:$0xff] }
 0xc60   :  { %v10035_v20 = vmul.f32 %v19469_v60, %v19469_v60 }
 0xc61   :  { %v10092_v55 = vadd.f32 %v10091_v21, %v10029_v15  ;;  %v19470_v21 = vld [vmem:[#allocation5_spill] sm:$0xff] }
 0xc62   :  { %v10036_v52 = vmul.f32 %v19470_v21, %v19470_v21 }
 0xc63   :  { %v10093_v57 = vadd.f32 %v10092_v55, %v10030_v30  ;;  %v19471_v55 = vld [vmem:[#allocation21_spill] sm:$0xff] }
 0xc64   :  { %v10037_v35 = vmul.f32 %v19471_v55, %v19471_v55 }
 0xc65   :  { %v10094_v59 = vadd.f32 %v10093_v57, %v10031_v26  ;;  %v10038_v57 = vmul.f32 %v18253_v7, %v18253_v7 }
 0xc67   :  { %v10095_v27 = vadd.f32 %v10094_v59, %v10032_v25 }
 0xc69   :  { %v10096_v39 = vadd.f32 %v10095_v27, %v10033_v54 }
 0xc6b   :  { %v10097_v15 = vadd.f32 %v10096_v39, %v10034_v49 }
 0xc6d   :  { %v10098_v30 = vadd.f32 %v10097_v15, %v10035_v20  ;;  %v10109_v20 = vld [vmem:[%s19082_s5] sm:$0x1] }
 0xc6f   :  { %v10099_v26 = vadd.f32 %v10098_v30, %v10036_v52  ;;  %v19472_v30 = vld [vmem:[#allocation3_spill] sm:$0xff] }
 0xc70   :  { %v19473_v55 = vsub.s32 0, %v19472_v30 }
 0xc71   :  { %v10100_v25 = vadd.f32 %v10099_v26, %v10037_v35  ;;  %v19474_v35 = vld [vmem:[#allocation22_spill] sm:$0xff] }
 0xc73   :  { %v10101_v59 = vadd.f32 %v10100_v25, %v10038_v57 }
 0xc75   :  { %v10102_v31 = vrot.slane %v10101_v59, 4 }
 0xc77   :  { %v10103_v34 = vadd.f32 %v10102_v31, %v10101_v59 }
 0xc79   :  { %v10104_v54 = vrot.slane %v10103_v34, 2 }
 0xc7b   :  { %v10105_v27 = vadd.f32 %v10104_v54, %v10103_v34  ;;  %v19475_v34 = vld [vmem:[#allocation4_spill] sm:$0xff] }
 0xc7d   :  { %v10106_v43 = vrot.slane %v10105_v27, 1 }
 0xc7f   :  { %v10107_v60 = vadd.f32 %v10106_v43, %v10105_v27  ;;  %v19477_v27 = vld [vmem:[#allocation24_spill] sm:$0xff] }
 0xc81   :  { %v10108_v49 = vmul.f32 0.001953125, %v10107_v60  ;;  %v19476_v60 = vld [vmem:[#allocation6_spill] sm:$0xff] }
 0xc83   :  { %v10110_v39 = vadd.f32 1e-05, %v10108_v49  ;;  %v19478_v49 = vld [vmem:[#allocation16_spill] sm:$0xff] }
 0xc85   :  { %14885 = vrsqrt.f32 %v10110_v39  ;;  %v19479_v39 = vld [vmem:[#allocation17_spill] sm:$0xff] }
 0xc8f   :  { %v14886_v15 = vpop.eup %14885 }
 0xc90   :  { %v10112_v52 = vmul.f32 %v14886_v15, %v10109_v20  ;;  %v19480_v20 = vld [vmem:[#allocation18_spill] sm:$0xff]  ;;  %v19481_v15 = vld [vmem:[#allocation19_spill] sm:$0xff] }
 0xc92   :  { %v18388_v7 = vrot.slane %v10112_v52, %v19473_v55  ;;  %v19482_v52 = vld [vmem:[#allocation8_spill] sm:$0xff] }
 0xc94   :  { %v18392_v31 = vmul.f32 %v18388_v7, %v19474_v35  ;;  %v18396_v43 = vmul.f32 %v18388_v7, %v19475_v34  ;;  %v18400_v26 = vmul.f32 %v18388_v7, %v19476_v60  ;;  %v18404_v57 = vmul.f32 %v18388_v7, %v18013_v38 }
 0xc95   :  { %v18408_v55 = vmul.f32 %v18388_v7, %v18017_v37  ;;  %v18412_v25 = vmul.f32 %v18388_v7, %v18021_v19  ;;  %v18416_v59 = vmul.f32 %v18388_v7, %v18025_v45  ;;  %v18420_v54 = vmul.f32 %v18388_v7, %v18029_v6 }
 0xc96   :  { %v18424_v38 = vmul.f32 %v18388_v7, %v18033_v24  ;;  %v18428_v37 = vmul.f32 %v18388_v7, %v18037_v22  ;;  %v18432_v19 = vmul.f32 %v18388_v7, %v18041_v4  ;;  %v18436_v45 = vmul.f32 %v18388_v7, %v18045_v23 }
 0xc97   :  { %v18440_v6 = vmul.f32 %v18388_v7, %v18049_v5  ;;  %v18444_v24 = vmul.f32 %v18388_v7, %v18053_v63  ;;  %v18448_v22 = vmul.f32 %v18388_v7, %v18057_v56  ;;  %v18452_v4 = vmul.f32 %v18388_v7, %v18061_v61 }
 0xc98   :  { %v18456_v23 = vmul.f32 %v18388_v7, %v18065_v28  ;;  %v18460_v5 = vmul.f32 %v18388_v7, %v18069_v41  ;;  %v18464_v63 = vmul.f32 %v18388_v7, %v18073_v9  ;;  %v18468_v56 = vmul.f32 %v18388_v7, %v18077_v13 }
 0xc99   :  { %v18472_v61 = vmul.f32 %v18388_v7, %v18081_v10  ;;  %v18476_v28 = vmul.f32 %v18388_v7, %v18085_v40  ;;  %v18480_v41 = vmul.f32 %v18388_v7, %v18089_v53  ;;  %v18484_v9 = vmul.f32 %v18388_v7, %v18093_v14 }
 0xc9a   :  { %v18488_v13 = vmul.f32 %v18388_v7, %v18097_v17  ;;  %v18492_v10 = vmul.f32 %v18388_v7, %v18101_v44  ;;  %v18496_v40 = vmul.f32 %v18388_v7, %v18105_v33  ;;  %v18500_v53 = vmul.f32 %v18388_v7, %v18109_v1 }
 0xc9b   :  { %v18504_v14 = vmul.f32 %v18388_v7, %v18113_v47  ;;  %v18508_v17 = vmul.f32 %v18388_v7, %v18117_v29  ;;  %v18512_v44 = vmul.f32 %v18388_v7, %v18121_v46  ;;  %v18516_v33 = vmul.f32 %v18388_v7, %v18125_v58 }
 0xc9c   :  { %v18520_v1 = vmul.f32 %v18388_v7, %v18129_v2  ;;  %v18524_v47 = vmul.f32 %v18388_v7, %v18133_v3  ;;  %v18528_v29 = vmul.f32 %v18388_v7, %v18137_v0  ;;  %v18532_v46 = vmul.f32 %v18388_v7, %v18141_v18 }
 0xc9d   :  { %v18536_v58 = vmul.f32 %v18388_v7, %v18145_v32  ;;  %v18540_v2 = vmul.f32 %v18388_v7, %v18149_v11  ;;  %v18544_v3 = vmul.f32 %v18388_v7, %v18153_v36  ;;  %v18548_v0 = vmul.f32 %v18388_v7, %v18157_v42 }
 0xc9e   :  { %v18552_v18 = vmul.f32 %v18388_v7, %v18161_v8  ;;  %v18556_v32 = vmul.f32 %v18388_v7, %v18165_v16  ;;  %v18560_v11 = vmul.f32 %v18388_v7, %v18169_v48  ;;  %v18564_v36 = vmul.f32 %v18388_v7, %v18173_v51 }
 0xc9f   :  { %v18568_v42 = vmul.f32 %v18388_v7, %v19477_v27  ;;  %v18572_v8 = vmul.f32 %v18388_v7, %v19478_v49  ;;  %v18576_v16 = vmul.f32 %v18388_v7, %v19479_v39  ;;  %v18580_v48 = vmul.f32 %v18388_v7, %v19480_v20  ;;  %v19485_v27 = vld [vmem:[#allocation9_spill] sm:$0xff]  ;;  %v19487_v39 = vld [vmem:[#allocation11_spill] sm:$0xff] }
 0xca0   :  { %v18584_v51 = vmul.f32 %v18388_v7, %v19481_v15  ;;  %v18588_v30 = vmul.f32 %v18388_v7, %v19482_v52  ;;  %v18592_v35 = vmul.f32 %v18388_v7, %v19463_v12  ;;  %v18596_v34 = vmul.f32 %v18388_v7, %v19464_v50  ;;  %v19489_v15 = vld [vmem:[#allocation15_spill] sm:$0xff]  ;;  %v19491_v52 = vld [vmem:[#allocation14_spill] sm:$0xff] }
 0xca1   :  { %v18600_v60 = vmul.f32 %v18388_v7, %v19465_v62  ;;  %v18604_v49 = vmul.f32 %v18388_v7, %v19485_v27  ;;  %v18608_v20 = vmul.f32 %v18388_v7, %v19487_v39  ;;  %v18612_v12 = vmul.f32 %v18388_v7, %v19489_v15  ;;  %v18617_v50 = vld [vmem:[%s19083_s6] ss:$0 sm:$0xff] }
 0xca2   :  { %19483 = vst [vmem:[#allocation7_spill] sm:$0xff] %v18596_v34  ;;  %v18621_v62 = vmul.f32 %v18388_v7, %v19491_v52  ;;  %v18641_v52 = vmul.f32 %v18388_v7, %v19470_v21  ;;  %v18661_v21 = vadd.f32 %v18617_v50, %v18400_v26  ;;  %v18681_v26 = vadd.f32 %v18617_v50, %v18420_v54 }
 0xca3   :  { %19484 = vst [vmem:[#allocation12_spill] sm:$0xff] %v18600_v60  ;;  %19486 = vst [vmem:[#allocation10_spill] sm:$0xff] %v18604_v49  ;;  %v19493_v60 = vld [vmem:[#allocation13_spill] sm:$0xff]  ;;  %v18701_v54 = vadd.f32 %v18617_v50, %v18440_v6  ;;  %v18721_v6 = vadd.f32 %v18617_v50, %v18460_v5  ;;  %v18741_v5 = vadd.f32 %v18617_v50, %v18480_v41 }
 0xca4   :  { %19488 = vst [vmem:[#allocation5_spill] sm:$0xff] %v18608_v20  ;;  %19490 = vst [vmem:[#allocation3_spill] sm:$0xff] %v18612_v12  ;;  %v18625_v27 = vmul.f32 %v18388_v7, %v19493_v60  ;;  %v19495_v49 = vld [vmem:[#allocation25_spill] sm:$0xff]  ;;  %v19496_v20 = vld [vmem:[#allocation20_spill] sm:$0xff]  ;;  %v18761_v41 = vadd.f32 %v18617_v50, %v18500_v53  ;;  %v18781_v53 = vadd.f32 %v18617_v50, %v18520_v1 }
 0xca5   :  { %19492 = vst [vmem:[#allocation22_spill] sm:$0xff] %v18621_v62  ;;  %v18629_v39 = vmul.f32 %v18388_v7, %v19495_v49  ;;  %v18633_v15 = vmul.f32 %v18388_v7, %v19496_v20  ;;  %v19497_v12 = vld [vmem:[#allocation23_spill] sm:$0xff]  ;;  %v19498_v62 = vld [vmem:[#allocation21_spill] sm:$0xff]  ;;  %v18653_v20 = vadd.f32 %v18617_v50, %v18392_v31  ;;  %19502 = vst [vmem:[#allocation16_spill] sm:$0xff] %v18661_v21 }
 0xca6   :  { %19494 = vst [vmem:[#allocation4_spill] sm:$0xff] %v18625_v27  ;;  %v18637_v34 = vmul.f32 %v18388_v7, %v19497_v12  ;;  %v18645_v60 = vmul.f32 %v18388_v7, %v19498_v62  ;;  %v19499_v27 = vld [vmem:[#allocation26_spill] sm:$0xff]  ;;  %v18657_v12 = vadd.f32 %v18617_v50, %v18396_v43  ;;  %v18665_v62 = vadd.f32 %v18617_v50, %v18404_v57 }
 0xca7   :  { %v18649_v49 = vmul.f32 %v18388_v7, %v19499_v27  ;;  %19500 = vst [vmem:[#allocation6_spill] sm:$0xff] %v18653_v20  ;;  %v18669_v7 = vadd.f32 %v18617_v50, %v18408_v55  ;;  %v18673_v31 = vadd.f32 %v18617_v50, %v18412_v25  ;;  %v18677_v43 = vadd.f32 %v18617_v50, %v18416_v59 }
 0xca8   :  { %19501 = vst [vmem:[#allocation24_spill] sm:$0xff] %v18657_v12  ;;  %19503 = vst [vmem:[#allocation17_spill] sm:$0xff] %v18665_v62  ;;  %v18685_v57 = vadd.f32 %v18617_v50, %v18424_v38  ;;  %v18689_v55 = vadd.f32 %v18617_v50, %v18428_v37  ;;  %v18693_v25 = vadd.f32 %v18617_v50, %v18432_v19 }
 0xca9   :  { %19504 = vst [vmem:[#allocation18_spill] sm:$0xff] %v18669_v7  ;;  %v18697_v59 = vadd.f32 %v18617_v50, %v18436_v45  ;;  %v18705_v38 = vadd.f32 %v18617_v50, %v18444_v24  ;;  %v18709_v37 = vadd.f32 %v18617_v50, %v18448_v22  ;;  %v18713_v19 = vadd.f32 %v18617_v50, %v18452_v4  ;;  %v19510_v27 = vld [vmem:[#allocation7_spill] sm:$0xff] }
 0xcaa   :  { %v18717_v45 = vadd.f32 %v18617_v50, %v18456_v23  ;;  %v18725_v24 = vadd.f32 %v18617_v50, %v18464_v63  ;;  %v18729_v22 = vadd.f32 %v18617_v50, %v18468_v56  ;;  %v18733_v4 = vadd.f32 %v18617_v50, %v18472_v61 }
 0xcab   :  { %v18737_v23 = vadd.f32 %v18617_v50, %v18476_v28  ;;  %v18745_v63 = vadd.f32 %v18617_v50, %v18484_v9  ;;  %v18749_v56 = vadd.f32 %v18617_v50, %v18488_v13  ;;  %v18753_v61 = vadd.f32 %v18617_v50, %v18492_v10 }
 0xcac   :  { %v18757_v28 = vadd.f32 %v18617_v50, %v18496_v40  ;;  %v18765_v9 = vadd.f32 %v18617_v50, %v18504_v14  ;;  %v18769_v13 = vadd.f32 %v18617_v50, %v18508_v17  ;;  %v18773_v10 = vadd.f32 %v18617_v50, %v18512_v44 }
 0xcad   :  { %v18777_v40 = vadd.f32 %v18617_v50, %v18516_v33  ;;  %v18785_v14 = vadd.f32 %v18617_v50, %v18524_v47  ;;  %v18789_v17 = vadd.f32 %v18617_v50, %v18528_v29  ;;  %v18793_v44 = vadd.f32 %v18617_v50, %v18532_v46 }
 0xcae   :  { %v18797_v33 = vadd.f32 %v18617_v50, %v18536_v58  ;;  %v18801_v1 = vadd.f32 %v18617_v50, %v18540_v2  ;;  %v18805_v47 = vadd.f32 %v18617_v50, %v18544_v3  ;;  %v18809_v29 = vadd.f32 %v18617_v50, %v18548_v0 }
 0xcaf   :  { %v18813_v46 = vadd.f32 %v18617_v50, %v18552_v18  ;;  %v18817_v58 = vadd.f32 %v18617_v50, %v18556_v32  ;;  %v18821_v2 = vadd.f32 %v18617_v50, %v18560_v11  ;;  %v18825_v3 = vadd.f32 %v18617_v50, %v18564_v36 }
 0xcb0   :  { %v18829_v0 = vadd.f32 %v18617_v50, %v18568_v42  ;;  %v18833_v18 = vadd.f32 %v18617_v50, %v18572_v8  ;;  %v18837_v32 = vadd.f32 %v18617_v50, %v18576_v16  ;;  %v18841_v11 = vadd.f32 %v18617_v50, %v18580_v48 }
 0xcb1   :  { %v18845_v36 = vadd.f32 %v18617_v50, %v18584_v51  ;;  %v18849_v42 = vadd.f32 %v18617_v50, %v18588_v30  ;;  %v18853_v8 = vadd.f32 %v18617_v50, %v18592_v35  ;;  %v18857_v16 = vadd.f32 %v18617_v50, %v19510_v27 }
 0xcb2   :  { %19505 = vst [vmem:[#allocation19_spill] sm:$0xff] %v18837_v32  ;;  %19506 = vst [vmem:[#allocation8_spill] sm:$0xff] %v18841_v11  ;;  %v19512_v32 = vld [vmem:[#allocation12_spill] sm:$0xff]  ;;  %v19513_v11 = vld [vmem:[#allocation10_spill] sm:$0xff] }
 0xcb3   :  { %19507 = vst [vmem:[#allocation9_spill] sm:$0xff] %v18845_v36  ;;  %19508 = vst [vmem:[#allocation11_spill] sm:$0xff] %v18849_v42  ;;  %v18861_v48 = vadd.f32 %v18617_v50, %v19512_v32  ;;  %v18865_v51 = vadd.f32 %v18617_v50, %v19513_v11  ;;  %v19514_v36 = vld [vmem:[#allocation5_spill] sm:$0xff]  ;;  %v19515_v42 = vld [vmem:[#allocation3_spill] sm:$0xff]  ;;  %v18885_v11 = vadd.f32 %v18617_v50, %v18629_v39 }
 0xcb4   :  { %19509 = vst [vmem:[#allocation15_spill] sm:$0xff] %v18853_v8  ;;  %19511 = vst [vmem:[#allocation14_spill] sm:$0xff] %v18857_v16  ;;  %v18869_v30 = vadd.f32 %v18617_v50, %v19514_v36  ;;  %v18873_v35 = vadd.f32 %v18617_v50, %v19515_v42  ;;  %v19516_v8 = vld [vmem:[#allocation22_spill] sm:$0xff]  ;;  %v19517_v16 = vld [vmem:[#allocation4_spill] sm:$0xff]  ;;  %v18889_v36 = vadd.f32 %v18617_v50, %v18633_v15  ;;  %v10265_v15 = vmax.f32 %v18697_v59, 0.0 }
 0xcb5   :  { %v18877_v27 = vadd.f32 %v18617_v50, %v19516_v8  ;;  %v18881_v32 = vadd.f32 %v18617_v50, %v19517_v16  ;;  %19518 = vst [vmem:[#allocation13_spill] sm:$0xff] %v18885_v11  ;;  %v18893_v42 = vadd.f32 %v18617_v50, %v18637_v34  ;;  %v18897_v8 = vadd.f32 %v18617_v50, %v18641_v52 }
 0xcb6   :  { %19519 = vst [vmem:[#allocation25_spill] sm:$0xff] %v18889_v36  ;;  %v18901_v16 = vadd.f32 %v18617_v50, %v18645_v60  ;;  %v18905_v39 = vadd.f32 %v18617_v50, %v18649_v49  ;;  %v10259_v52 = vmax.f32 %v18673_v31, 0.0  ;;  %v10261_v60 = vmax.f32 %v18681_v26, 0.0 }
 0xcb7   :  { %19520 = vst [vmem:[#allocation20_spill] sm:$0xff] %v18893_v42  ;;  %19521 = vst [vmem:[#allocation23_spill] sm:$0xff] %v18897_v8  ;;  %v10260_v8 = vmax.f32 %v18677_v43, 0.0  ;;  %v10263_v50 = vmax.f32 %v18689_v55, 0.0  ;;  %v10264_v49 = vmax.f32 %v18693_v25, 0.0  ;;  %v10266_v36 = vmax.f32 %v18701_v54, 0.0 }
 0xcb8   :  { %19522 = vst [vmem:[#allocation21_spill] sm:$0xff] %v18901_v16  ;;  %19523 = vst [vmem:[#allocation26_spill] sm:$0xff] %v18905_v39  ;;  %v10262_v16 = vmax.f32 %v18685_v57, 0.0  ;;  %v10267_v34 = vmax.f32 %v18705_v38, 0.0  ;;  %v10268_v42 = vmax.f32 %v18709_v37, 0.0  ;;  %v10269_v31 = vmax.f32 %v18713_v19, 0.0 }
 0xcb9   :  { %v10270_v43 = vmax.f32 %v18717_v45, 0.0  ;;  %v10271_v26 = vmax.f32 %v18721_v6, 0.0  ;;  %v10272_v57 = vmax.f32 %v18725_v24, 0.0  ;;  %v10273_v55 = vmax.f32 %v18729_v22, 0.0  ;;  %v19524_v11 = vld [vmem:[#allocation19_spill] sm:$0xff]  ;;  %v19525_v7 = vld [vmem:[#allocation8_spill] sm:$0xff] }
 0xcba   :  { %v10274_v25 = vmax.f32 %v18733_v4, 0.0  ;;  %v10275_v59 = vmax.f32 %v18737_v23, 0.0  ;;  %v10276_v54 = vmax.f32 %v18741_v5, 0.0  ;;  %v10277_v38 = vmax.f32 %v18745_v63, 0.0  ;;  %v19526_v62 = vld [vmem:[#allocation9_spill] sm:$0xff]  ;;  %v19527_v21 = vld [vmem:[#allocation11_spill] sm:$0xff] }
 0xcbb   :  { %v10278_v37 = vmax.f32 %v18749_v56, 0.0  ;;  %v10279_v19 = vmax.f32 %v18753_v61, 0.0  ;;  %v10280_v45 = vmax.f32 %v18757_v28, 0.0  ;;  %v10281_v6 = vmax.f32 %v18761_v41, 0.0  ;;  %v19528_v12 = vld [vmem:[#allocation15_spill] sm:$0xff]  ;;  %v19529_v20 = vld [vmem:[#allocation14_spill] sm:$0xff] }
 0xcbc   :  { %v10282_v24 = vmax.f32 %v18765_v9, 0.0  ;;  %v10283_v22 = vmax.f32 %v18769_v13, 0.0  ;;  %v10284_v4 = vmax.f32 %v18773_v10, 0.0  ;;  %v10285_v23 = vmax.f32 %v18777_v40, 0.0  ;;  %v19530_v39 = vld [vmem:[#allocation13_spill] sm:$0xff] }
 0xcbd   :  { %v10286_v5 = vmax.f32 %v18781_v53, 0.0  ;;  %v10287_v63 = vmax.f32 %v18785_v14, 0.0  ;;  %v10288_v56 = vmax.f32 %v18789_v17, 0.0  ;;  %v10289_v61 = vmax.f32 %v18793_v44, 0.0 }
 0xcbe   :  { %v10290_v28 = vmax.f32 %v18797_v33, 0.0  ;;  %v10291_v41 = vmax.f32 %v18801_v1, 0.0  ;;  %v10292_v9 = vmax.f32 %v18805_v47, 0.0  ;;  %v10293_v13 = vmax.f32 %v18809_v29, 0.0 }
 0xcbf   :  { %v10294_v10 = vmax.f32 %v18813_v46, 0.0  ;;  %v10295_v40 = vmax.f32 %v18817_v58, 0.0  ;;  %v10296_v53 = vmax.f32 %v18821_v2, 0.0  ;;  %v10297_v14 = vmax.f32 %v18825_v3, 0.0 }
 0xcc0   :  { %v10298_v17 = vmax.f32 %v18829_v0, 0.0  ;;  %v10299_v44 = vmax.f32 %v18833_v18, 0.0  ;;  %v10300_v33 = vmax.f32 %v19524_v11, 0.0  ;;  %v10301_v1 = vmax.f32 %v19525_v7, 0.0 }
 0xcc1   :  { %v10302_v47 = vmax.f32 %v19526_v62, 0.0  ;;  %v10303_v29 = vmax.f32 %v19527_v21, 0.0  ;;  %v10304_v46 = vmax.f32 %v19528_v12, 0.0  ;;  %v10305_v58 = vmax.f32 %v19529_v20, 0.0  ;;  %v19531_v21 = vld [vmem:[#allocation25_spill] sm:$0xff]  ;;  %v19532_v20 = vld [vmem:[#allocation20_spill] sm:$0xff] }
 0xcc2   :  { %v10306_v2 = vmax.f32 %v18861_v48, 0.0  ;;  %v10307_v3 = vmax.f32 %v18865_v51, 0.0  ;;  %v10308_v0 = vmax.f32 %v18869_v30, 0.0  ;;  %v10309_v18 = vmax.f32 %v18873_v35, 0.0  ;;  %v19533_v51 = vld [vmem:[#allocation23_spill] sm:$0xff]  ;;  %v19534_v35 = vld [vmem:[#allocation21_spill] sm:$0xff] }
 0xcc3   :  { %v10310_v11 = vmax.f32 %v18877_v27, 0.0  ;;  %v10311_v7 = vmax.f32 %v18881_v32, 0.0  ;;  %v10312_v62 = vmax.f32 %v19530_v39, 0.0  ;;  %v10313_v12 = vmax.f32 %v19531_v21, 0.0  ;;  %v19535_v32 = vld [vmem:[#allocation26_spill] sm:$0xff] }
 0xcc4   :  { %v10314_v48 = vmax.f32 %v19532_v20, 0.0  ;;  %v10315_v30 = vmax.f32 %v19533_v51, 0.0  ;;  %v10316_v27 = vmax.f32 %v19534_v35, 0.0  ;;  %v10317_v39 = vmax.f32 %v19535_v32, 0.0  ;;  %v19536_v21 = vld [vmem:[#allocation6_spill] sm:$0xff]  ;;  %v19538_v51 = vld [vmem:[#allocation24_spill] sm:$0xff] }
 0xcc5   :  { %v19537_v20 = vmax.f32 %v19536_v21, 0.0  ;;  %v19539_v35 = vmax.f32 %v19538_v51, 0.0  ;;  %v19540_v21 = vld [vmem:[#allocation16_spill] sm:$0xff] }
 0xcc6   :  { %v19541_v51 = vmax.f32 %v19540_v21, 0.0 }
 0xcc7   :  { %v11303_v32 = vpack.c.bf16 %v19539_v35, %v19537_v20  ;;  %v19542_v20 = vld [vmem:[#allocation17_spill] sm:$0xff] }
 0xcc8   :  { %v19543_v35 = vmax.f32 %v19542_v20, 0.0  ;;  %v19544_v20 = vld [vmem:[#allocation18_spill] sm:$0xff] }
 0xcc9   :  { %11304 = vst [vmem:[%s19084_s7] sm:$0xff] %v11303_v32  }
 0xcca   :  { %v11308_v21 = vpack.c.bf16 %v19543_v35, %v19541_v51  ;;  %v19545_v35 = vmax.f32 %v19544_v20, 0.0  ;;  %v11318_v20 = vpack.c.bf16 %v10261_v60, %v10260_v8  ;;  %v11333_v8 = vpack.c.bf16 %v10267_v34, %v10266_v36 }
 0xccb   :  { %v11338_v60 = vpack.c.bf16 %v10269_v31, %v10268_v42  ;;  %v11353_v36 = vpack.c.bf16 %v10275_v59, %v10274_v25  ;;  %v11358_v42 = vpack.c.bf16 %v10277_v38, %v10276_v54  ;;  %v11363_v34 = vpack.c.bf16 %v10279_v19, %v10278_v37 }
 0xccc   :  { %v11313_v51 = vpack.c.bf16 %v10259_v52, %v19545_v35  ;;  %v11323_v35 = vpack.c.bf16 %v10263_v50, %v10262_v16  ;;  %v11328_v52 = vpack.c.bf16 %v10265_v15, %v10264_v49  ;;  %11491 = vst [vmem:[%s19084_s7 + $0x8] sm:$0xff] %v11308_v21   ;;  %11493 = vst [vmem:[%s19084_s7 + $0x18] sm:$0xff] %v11318_v20  }
 0xccd   :  { %v11343_v16 = vpack.c.bf16 %v10271_v26, %v10270_v43  ;;  %v11348_v15 = vpack.c.bf16 %v10273_v55, %v10272_v57  ;;  %11496 = vst [vmem:[%s19084_s7 + $0x30] sm:$0xff] %v11333_v8   ;;  %11497 = vst [vmem:[%s19084_s7 + $0x38] sm:$0xff] %v11338_v60   ;;  %v11368_v50 = vpack.c.bf16 %v10281_v6, %v10280_v45 }
 0xcce   :  { %11492 = vst [vmem:[%s19084_s7 + $0x10] sm:$0xff] %v11313_v51   ;;  %11494 = vst [vmem:[%s19084_s7 + $0x20] sm:$0xff] %v11323_v35   ;;  %v11373_v49 = vpack.c.bf16 %v10283_v22, %v10282_v24  ;;  %v11378_v31 = vpack.c.bf16 %v10285_v23, %v10284_v4  ;;  %v11383_v43 = vpack.c.bf16 %v10287_v63, %v10286_v5 }
 0xccf   :  { %11495 = vst [vmem:[%s19084_s7 + $0x28] sm:$0xff] %v11328_v52   ;;  %11498 = vst [vmem:[%s19084_s7 + $0x40] sm:$0xff] %v11343_v16   ;;  %v11388_v26 = vpack.c.bf16 %v10289_v61, %v10288_v56  ;;  %v11393_v57 = vpack.c.bf16 %v10291_v41, %v10290_v28  ;;  %v11398_v55 = vpack.c.bf16 %v10293_v13, %v10292_v9 }
 0xcd0   :  { %11499 = vst [vmem:[%s19084_s7 + $0x48] sm:$0xff] %v11348_v15   ;;  %11500 = vst [vmem:[%s19084_s7 + $0x50] sm:$0xff] %v11353_v36   ;;  %v11403_v25 = vpack.c.bf16 %v10295_v40, %v10294_v10  ;;  %v11408_v59 = vpack.c.bf16 %v10297_v14, %v10296_v53  ;;  %v11413_v54 = vpack.c.bf16 %v10299_v44, %v10298_v17 }
 0xcd1   :  { %11501 = vst [vmem:[%s19084_s7 + $0x58] sm:$0xff] %v11358_v42   ;;  %11502 = vst [vmem:[%s19084_s7 + $0x60] sm:$0xff] %v11363_v34   ;;  %v11418_v38 = vpack.c.bf16 %v10301_v1, %v10300_v33  ;;  %v11423_v37 = vpack.c.bf16 %v10303_v29, %v10302_v47  ;;  %v11428_v19 = vpack.c.bf16 %v10305_v58, %v10304_v46 }
 0xcd2   :  { %11503 = vst [vmem:[%s19084_s7 + $0x68] sm:$0xff] %v11368_v50   ;;  %11504 = vst [vmem:[%s19084_s7 + $0x70] sm:$0xff] %v11373_v49   ;;  %v11433_v45 = vpack.c.bf16 %v10307_v3, %v10306_v2  ;;  %v11438_v6 = vpack.c.bf16 %v10309_v18, %v10308_v0  ;;  %v11443_v24 = vpack.c.bf16 %v10311_v7, %v10310_v11 }
 0xcd3   :  { %11505 = vst [vmem:[%s19084_s7 + $0x78] sm:$0xff] %v11378_v31   ;;  %11506 = vst [vmem:[%s19084_s7 + $0x80] sm:$0xff] %v11383_v43   ;;  %v11448_v22 = vpack.c.bf16 %v10313_v12, %v10312_v62  ;;  %v11453_v4 = vpack.c.bf16 %v10315_v30, %v10314_v48  ;;  %v11458_v23 = vpack.c.bf16 %v10317_v39, %v10316_v27 }
 0xcd4   :  { %11507 = vst [vmem:[%s19084_s7 + $0x88] sm:$0xff] %v11388_v26   ;;  %11508 = vst [vmem:[%s19084_s7 + $0x90] sm:$0xff] %v11393_v57  }
 0xcd5   :  { %11509 = vst [vmem:[%s19084_s7 + $0x98] sm:$0xff] %v11398_v55   ;;  %11510 = vst [vmem:[%s19084_s7 + $0xa0] sm:$0xff] %v11403_v25  }
 0xcd6   :  { %11511 = vst [vmem:[%s19084_s7 + $0xa8] sm:$0xff] %v11408_v59   ;;  %11512 = vst [vmem:[%s19084_s7 + $0xb0] sm:$0xff] %v11413_v54  }
 0xcd7   :  { %11513 = vst [vmem:[%s19084_s7 + $0xb8] sm:$0xff] %v11418_v38   ;;  %11514 = vst [vmem:[%s19084_s7 + $0xc0] sm:$0xff] %v11423_v37  }
 0xcd8   :  { %11515 = vst [vmem:[%s19084_s7 + $0xc8] sm:$0xff] %v11428_v19   ;;  %11516 = vst [vmem:[%s19084_s7 + $0xd0] sm:$0xff] %v11433_v45  }
 0xcd9   :  { %11517 = vst [vmem:[%s19084_s7 + $0xd8] sm:$0xff] %v11438_v6   ;;  %11518 = vst [vmem:[%s19084_s7 + $0xe0] sm:$0xff] %v11443_v24  }
 0xcda   :  { %11519 = vst [vmem:[%s19084_s7 + $0xe8] sm:$0xff] %v11448_v22   ;;  %11520 = vst [vmem:[%s19084_s7 + $0xf0] sm:$0xff] %v11453_v4  }
 0xcdb   :  { %11521 = vst [vmem:[%s19084_s7 + $0xf8] sm:$0xff] %v11458_v23  }

</bundles_post_ra>
